<compile_context>
chip_gen: v7x
topology: tpu7x:2x2x1
jax: 0.10.0
libtpu: 0.0.40
codegen_flags: <defaults>
</compile_context>

<pallas_src>
import numpy as np
import jax
import jax.numpy as jnp
from jax.experimental import pallas as pl
from jax.experimental.pallas import tpu as pltpu


# ----------------------------- VMEM budgeting -------------------------------

def _vmem_budget_bytes():
    """Generation-aware scoped-VMEM budget (v5e/v6e: 128 MiB phys, v7x: 64 MiB)."""
    try:
        phys = int(pltpu.get_tpu_info().vmem_capacity_bytes)
    except Exception:                      # older jax / interpret fallback
        phys = 64 << 20                    # conservative: v7x-sized physical VMEM
    return int(min((phys * 3) // 4, 96 << 20))


def _resident(shape):
    """VMEM-resident operand: constant index_map, single pipeline buffer
    (constant-index operands never need the default double buffer)."""
    idx = lambda *args: (0,) * len(shape)
    try:
        return pl.BlockSpec(shape, idx, pipeline_mode=pl.Buffered(1))
    except Exception:                      # older jax without pipeline_mode/Buffered
        return pl.BlockSpec(shape, idx)


def _pick_row_tile(n, cap, avail_bytes, bytes_per_row, multiple=128):
    """Largest row tile that divides n, is a multiple of `multiple`, fits the
    remaining VMEM budget, and (when possible) leaves >= 2 grid steps so v7x's
    second TensorCore gets work."""
    cands = [t for t in range(multiple, min(n, cap) + 1, multiple)
             if n % t == 0 and t * bytes_per_row <= avail_bytes]
    two_step = [t for t in cands if n // t >= 2]
    if two_step:
        return max(two_step)
    if cands:
        return max(cands)
    # NOTE: for very large N where even the resident operands exceed the budget,
    # passes 1-3 should switch to a K-tiled ("arbitrary") accumulator grid.
    return n


# --------------------------------- kernels ----------------------------------

def _fused_kernel(x_ref, adj_ref, w0_ref, wms_ref, noise_ref,
                  z_ref, mls_ref, a_ref, zt_s):
    """Whole VGAE forward in one kernel (small/medium N).

    Grid iterates over row tiles of A_pred ("arbitrary" axis).  Step 0 runs the
    full encode into the VMEM-resident z / m_ls output blocks and a (D, N) bf16
    z-transpose scratch; every step then does a pure-MXU decode tile."""
    i = pl.program_id(0)
    d = noise_ref.shape[-1]
    tm = a_ref.shape[0]

    @pl.when(i == 0)
    def _encode():
        xw = jnp.dot(x_ref[...], w0_ref[...],
                     preferred_element_type=jnp.float32).astype(jnp.bfloat16)
        h = jnp.maximum(
            jnp.dot(adj_ref[...], xw, preferred_element_type=jnp.float32),
            0.0).astype(jnp.bfloat16)
        hw = jnp.dot(h, wms_ref[...],
                     preferred_element_type=jnp.float32).astype(jnp.bfloat16)
        m_ls = jnp.dot(adj_ref[...], hw, preferred_element_type=jnp.float32)
        mean = m_ls[:, :d]
        logstd = m_ls[:, d:]
        z = noise_ref[...] * jnp.exp(logstd) + mean      # EUP exp, f32
        mls_ref[...] = m_ls
        z_ref[...] = z
        zt_s[...] = z.T.astype(jnp.bfloat16)             # one-time transpose (XLU)

    # Decode row tile: sigmoid(z_rows @ z.T)  -- no per-step transpose.
    start = pl.multiple_of(i * tm, tm)
    z_rows = z_ref[pl.ds(start, tm), :].astype(jnp.bfloat16)
    logits = jnp.dot(z_rows, zt_s[...], preferred_element_type=jnp.float32)
    # (bf16 sigmoid would double EUP throughput on v6e/v7x; kept f32 for v5e safety)
    a_ref[...] = jax.nn.sigmoid(logits).astype(a_ref.dtype)


def xw_kernel(x_ref, w0_ref, xw_ref):
    # xw_tile = X_tile @ W0      (bf16 in, f32 acc, bf16 out: feeds the next matmul)
    xw_ref[...] = jnp.dot(x_ref[...], w0_ref[...],
                          preferred_element_type=jnp.float32).astype(xw_ref.dtype)


def hw_kernel(adj_ref, xw_ref, wms_ref, hw_ref):
    # hw_tile = relu(adj_tile @ xw_full) @ [Wm | Ws]
    h = jnp.maximum(
        jnp.dot(adj_ref[...], xw_ref[...], preferred_element_type=jnp.float32),
        0.0).astype(jnp.bfloat16)
    hw_ref[...] = jnp.dot(h, wms_ref[...],
                          preferred_element_type=jnp.float32).astype(hw_ref.dtype)


def encode_kernel(adj_ref, hw_ref, noise_ref, mls_ref, z_ref, zt_ref):
    # m_ls = adj_tile @ hw_full ; z = noise * exp(logstd) + mean ; zT column block
    d = z_ref.shape[-1]
    m_ls = jnp.dot(adj_ref[...], hw_ref[...], preferred_element_type=jnp.float32)
    mean = m_ls[:, :d]
    logstd = m_ls[:, d:]
    z = noise_ref[...] * jnp.exp(logstd) + mean
    mls_ref[...] = m_ls                      # single fused (tm, 2D) store
    z_ref[...] = z
    zt_ref[...] = z.T.astype(jnp.bfloat16)   # emit transposed bf16 z for decode


def decode_kernel(z_ref, zt_ref, a_ref):
    # A_pred_tile = sigmoid(z_tile @ z.T)  with z.T pre-transposed (pure MXU + store)
    logits = jnp.dot(z_ref[...].astype(jnp.bfloat16), zt_ref[...],
                     preferred_element_type=jnp.float32)
    a_ref[...] = jax.nn.sigmoid(logits).astype(a_ref.dtype)


# --------------------------------- wrappers ----------------------------------

def _vgae_fused(x_bf, adj_bf, w0_bf, wms_bf, noise_f, a_pred_dtype, budget, base_bytes):
    N, F = x_bf.shape
    H = w0_bf.shape[1]
    D = noise_f.shape[1]
    a_bytes = jnp.dtype(a_pred_dtype).itemsize

    # per-row cost of the only row-tiled array: A_pred tile (x2 bufs) + f32 logits temp
    bpr = (2 * a_bytes + 4) * N
    tm = _pick_row_tile(N, cap=256, avail_bytes=budget - base_bytes - (4 << 20),
                        bytes_per_row=bpr)
    grid = (N // tm,)

    z, m_ls, a_pred = pl.pallas_call(
        _fused_kernel,
        grid=grid,
        in_specs=[_resident((N, F)), _resident((N, N)), _resident((F, H)),
                  _resident((H, 2 * D)), _resident((N, D))],
        out_specs=(pl.BlockSpec((N, D), lambda i: (0, 0)),       # resident z
                   pl.BlockSpec((N, 2 * D), lambda i: (0, 0)),   # resident [mean|logstd]
                   pl.BlockSpec((tm, N), lambda i: (i, 0))),     # row-tiled A_pred
        out_shape=(jax.ShapeDtypeStruct((N, D), jnp.float32),
                   jax.ShapeDtypeStruct((N, 2 * D), jnp.float32),
                   jax.ShapeDtypeStruct((N, N), a_pred_dtype)),
        scratch_shapes=[pltpu.VMEM((D, N), jnp.bfloat16)],        # zT
        compiler_params=pltpu.CompilerParams(
            dimension_semantics=("arbitrary",),                   # step-0 -> later deps
            vmem_limit_bytes=budget),
    )(x_bf, adj_bf, w0_bf, wms_bf, noise_f)

    return z, a_pred, m_ls[:, :D], m_ls[:, D:]


def _vgae_multipass(x_bf, adj_bf, w0_bf, wms_bf, noise_f, a_pred_dtype, budget):
    N, F = x_bf.shape
    H = w0_bf.shape[1]
    D = noise_f.shape[1]
    bf16, f32 = jnp.bfloat16, jnp.float32
    a_bytes = jnp.dtype(a_pred_dtype).itemsize
    head = 4 << 20     # Mosaic internal / temporaries headroom
    CAP = 512          # v5e/v6e can afford big tiles; the budget clamps v7x

    def params():
        return pltpu.CompilerParams(dimension_semantics=("parallel",),
                                    vmem_limit_bytes=budget)

    def row(tm, c):
        return pl.BlockSpec((tm, c), lambda i: (i, 0))

    # ---- pass 1: xw = X @ W0 -------------------------------------------------
    tm1 = _pick_row_tile(N, CAP, budget - 2 * F * H - head, 4 * F + 8 * H)
    xw = pl.pallas_call(
        xw_kernel, grid=(N // tm1,),
        in_specs=[row(tm1, F), _resident((F, H))],
        out_specs=row(tm1, H),
        out_shape=jax.ShapeDtypeStruct((N, H), bf16),
        compiler_params=params(),
    )(x_bf, w0_bf)

    # ---- pass 2: hw = relu(adj @ xw) @ [Wm | Ws] -------------------------------
    tm2 = _pick_row_tile(N, CAP, budget - (2 * N * H + 4 * H * D) - head,
                         4 * N + 6 * H + 16 * D)
    hw = pl.pallas_call(
        hw_kernel, grid=(N // tm2,),
        in_specs=[row(tm2, N), _resident((N, H)), _resident((H, 2 * D))],
        out_specs=row(tm2, 2 * D),
        out_shape=jax.ShapeDtypeStruct((N, 2 * D), bf16),
        compiler_params=params(),
    )(adj_bf, xw, wms_bf)

    # ---- pass 3: [mean|logstd] = adj @ hw ; z ; zT (bf16, pre-transposed) ------
    tm3 = _pick_row_tile(N, CAP, budget - 4 * N * D - head, 4 * N + 48 * D)
    m_ls, z, z_t = pl.pallas_call(
        encode_kernel, grid=(N // tm3,),
        in_specs=[row(tm3, N), _resident((N, 2 * D)), row(tm3, D)],
        out_specs=(row(tm3, 2 * D), row(tm3, D),
                   pl.BlockSpec((D, tm3), lambda i: (0, i))),
        out_shape=(jax.ShapeDtypeStruct((N, 2 * D), f32),
                   jax.ShapeDtypeStruct((N, D), f32),
                   jax.ShapeDtypeStruct((D, N), bf16)),
        compiler_params=params(),
    )(adj_bf, hw, noise_f)

    # ---- pass 4: A_pred = sigmoid(z @ z.T) -------------------------------------
    tm4 = _pick_row_tile(N, CAP, budget - 2 * N * D - head,
                         10 * D + (2 * a_bytes + 4) * N)
    a_pred = pl.pallas_call(
        decode_kernel, grid=(N // tm4,),
        in_specs=[row(tm4, D), _resident((D, N))],
        out_specs=row(tm4, N),
        out_shape=jax.ShapeDtypeStruct((N, N), a_pred_dtype),
        compiler_params=params(),
    )(z, z_t)

    return z, a_pred, m_ls[:, :D], m_ls[:, D:]


def vgae_forward(X, adj, w0, wm, ws, noise, *, a_pred_dtype=jnp.bfloat16, mode="auto"):
    """Returns (z, A_pred, mean, logstd). mode in {"auto", "fused", "multipass"}."""
    N, F = X.shape
    H = w0.shape[1]
    D = wm.shape[1]
    assert adj.shape == (N, N) and w0.shape == (F, H) and noise.shape == (N, D)
    assert N % 8 == 0 and H % 128 == 0 and D % 128 == 0, \
        "pad num_nodes/hidden_dim/dim to TPU-friendly sizes in the caller"

    bf16, f32 = jnp.bfloat16, jnp.float32
    x_bf = X.astype(bf16)
    adj_bf = adj.astype(bf16)
    w0_bf = w0.astype(bf16)
    wms_bf = jnp.concatenate([wm, ws], axis=1).astype(bf16)   # fused (H, 2D) weights
    noise_f = noise.astype(f32)

    budget = _vmem_budget_bytes()

    # Footprint if everything (inputs, resident outputs, scratch, step-0 temps) is
    # VMEM-resident -> single fused kernel is worthwhile & safe.
    fused_base = (2 * N * F + 2 * N * N + 2 * F * H + 4 * H * D + 4 * N * D   # inputs
                  + 4 * N * D + 8 * N * D                                     # z, m_ls
                  + 2 * N * D                                                 # zT scratch
                  + 6 * N * H + 8 * N * D)                                    # step-0 temps
    use_fused = (mode == "fused") or (mode == "auto" and 2 * fused_base <= budget)

    if use_fused:
        return _vgae_fused(x_bf, adj_bf, w0_bf, wms_bf, noise_f,
                           a_pred_dtype, budget, fused_base)
    return _vgae_multipass(x_bf, adj_bf, w0_bf, wms_bf, noise_f, a_pred_dtype, budget)


def glorot_init(key, input_dim, output_dim):
    init_range = np.sqrt(6.0 / (input_dim + output_dim))
    return jax.random.uniform(key, (input_dim, output_dim), jnp.float32,
                              minval=-init_range, maxval=init_range)


if __name__ == "__main__":
    # Small, TPU-friendly shapes consistent with VGAE defaults (dim=128).
    num_nodes = 512      # N
    hidden_dim = 256     # H (lane/MXU-friendly stand-in for the default 200)
    dim = 128            # D (module default)

    key = jax.random.PRNGKey(0)
    k_x, k_adj, k_w0, k_wm, k_ws, k_noise = jax.random.split(key, 6)

    X = jax.random.normal(k_x, (num_nodes, num_nodes), jnp.float32)

    # Row-normalized dense adjacency (keeps GCN magnitudes well-scaled).
    a_raw = (jax.random.uniform(k_adj, (num_nodes, num_nodes)) < 0.1).astype(jnp.float32)
    a_raw = a_raw + jnp.eye(num_nodes, dtype=jnp.float32)
    adj = a_raw / a_raw.sum(axis=1, keepdims=True)

    w0 = glorot_init(k_w0, num_nodes, hidden_dim)     # base_gcn.weight
    wm = glorot_init(k_wm, hidden_dim, dim)           # gcn_mean.weight
    ws = glorot_init(k_ws, hidden_dim, dim)           # gcn_logstddev.weight
    noise = jax.random.normal(k_noise, (num_nodes, dim), jnp.float32)

    # Pure-JAX reference with the same bf16-matmul / f32-accumulate recipe.
    bf, f32 = jnp.bfloat16, jnp.float32
    xw_r = jnp.dot(X.astype(bf), w0.astype(bf), preferred_element_type=f32).astype(bf)
    h_r = jnp.maximum(jnp.dot(adj.astype(bf), xw_r, preferred_element_type=f32),
                      0.0).astype(bf)
    wms_r = jnp.concatenate([wm, ws], axis=1).astype(bf)
    hw_r = jnp.dot(h_r, wms_r, preferred_element_type=f32).astype(bf)
    m_ls_r = jnp.dot(adj.astype(bf), hw_r, preferred_element_type=f32)
    mean_r, logstd_r = m_ls_r[:, :dim], m_ls_r[:, dim:]
    z_r = noise * jnp.exp(logstd_r) + mean_r
    zb_r = z_r.astype(bf)
    a_r = jax.nn.sigmoid(jnp.dot(zb_r, zb_r.T, preferred_element_type=f32))

    for mode in ("fused", "multipass"):
        z, a_pred, mean, logstd = jax.block_until_ready(
            vgae_forward(X, adj, w0, wm, ws, noise, mode=mode))
        assert np.allclose(np.asarray(mean), np.asarray(mean_r), atol=2e-2, rtol=2e-2)
        assert np.allclose(np.asarray(logstd), np.asarray(logstd_r), atol=2e-2, rtol=2e-2)
        assert np.allclose(np.asarray(z), np.asarray(z_r), atol=2e-2, rtol=2e-2)
        a_pred_f32 = np.asarray(a_pred.astype(jnp.float32))
        assert np.allclose(a_pred_f32, np.asarray(a_r), atol=2e-2, rtol=2e-2)

    print("KERNEL_OK")
</pallas_src>

<mosaic_0001>
module attributes {stable_mosaic.version = 11 : i64} {
  func.func @_fused_kernel(%arg0: i32, %arg1: memref<512x512xbf16, #tpu.memory_space<vmem>>, %arg2: memref<512x512xbf16, #tpu.memory_space<vmem>>, %arg3: memref<512x256xbf16, #tpu.memory_space<vmem>>, %arg4: memref<256x256xbf16, #tpu.memory_space<vmem>>, %arg5: memref<512x128xf32, #tpu.memory_space<vmem>>, %arg6: memref<512x128xf32, #tpu.memory_space<vmem>>, %arg7: memref<512x256xf32, #tpu.memory_space<vmem>>, %arg8: memref<256x512xbf16, #tpu.memory_space<vmem>>, %arg9: memref<128x512xbf16, #tpu.memory_space<vmem>>) attributes {dimension_semantics = [#tpu.dimension_semantics<arbitrary>], iteration_bounds = array<i64: 2>, scalar_prefetch = 0 : i64, scratch_operands = 1 : i64, tpu.core_type = #tpu.core_type<tc>, window_params = [{pipeline_mode = #tpu.pipeline_mode<synchronous>, transform_indices = @transform_0, window_bounds = array<i64: 512, 512>}, {pipeline_mode = #tpu.pipeline_mode<synchronous>, transform_indices = @transform_1, window_bounds = array<i64: 512, 512>}, {pipeline_mode = #tpu.pipeline_mode<synchronous>, transform_indices = @transform_2, window_bounds = array<i64: 512, 256>}, {pipeline_mode = #tpu.pipeline_mode<synchronous>, transform_indices = @transform_3, window_bounds = array<i64: 256, 256>}, {pipeline_mode = #tpu.pipeline_mode<synchronous>, transform_indices = @transform_4, window_bounds = array<i64: 512, 128>}, {pipeline_mode = #tpu.pipeline_mode<synchronous>, transform_indices = @transform_5, window_bounds = array<i64: 512, 128>}, {pipeline_mode = #tpu.pipeline_mode<synchronous>, transform_indices = @transform_6, window_bounds = array<i64: 512, 256>}, {transform_indices = @transform_7, window_bounds = array<i64: 256, 512>}]} {
    %c0_i32 = arith.constant 0 : i32
    %0 = arith.cmpi eq, %arg0, %c0_i32 : i32
    %1 = arith.extui %0 : i1 to i32
    %c0_i32_0 = arith.constant 0 : i32
    %2 = arith.cmpi ne, %1, %c0_i32_0 : i32
    scf.if %2 {
      %c0_6 = arith.constant 0 : index
      %c0_7 = arith.constant 0 : index
      %17 = vector.load %arg1[%c0_6, %c0_7] : memref<512x512xbf16, #tpu.memory_space<vmem>>, vector<512x512xbf16>
      %c0_8 = arith.constant 0 : index
      %c0_9 = arith.constant 0 : index
      %18 = vector.load %arg3[%c0_8, %c0_9] : memref<512x256xbf16, #tpu.memory_space<vmem>>, vector<512x256xbf16>
      %cst_10 = arith.constant dense<0.000000e+00> : vector<512x256xf32>
      %19 = tpu.matmul %17, %18, %cst_10 {dimension_numbers = #tpu.dot_dimension_numbers<[1], [0], [0], [1], [0, 0, 1, 1], [], []>} : vector<512x512xbf16>, vector<512x256xbf16>, vector<512x256xf32> -> vector<512x256xf32>
      %20 = arith.truncf %19 : vector<512x256xf32> to vector<512x256xbf16>
      %c0_11 = arith.constant 0 : index
      %c0_12 = arith.constant 0 : index
      %21 = vector.load %arg2[%c0_11, %c0_12] : memref<512x512xbf16, #tpu.memory_space<vmem>>, vector<512x512xbf16>
      %cst_13 = arith.constant dense<0.000000e+00> : vector<512x256xf32>
      %22 = tpu.matmul %21, %20, %cst_13 {dimension_numbers = #tpu.dot_dimension_numbers<[1], [0], [0], [1], [0, 0, 1, 1], [], []>} : vector<512x512xbf16>, vector<512x256xbf16>, vector<512x256xf32> -> vector<512x256xf32>
      %cst_14 = arith.constant 0.000000e+00 : f32
      %23 = vector.broadcast %cst_14 : f32 to vector<512x256xf32>
      %24 = arith.maximumf %22, %23 : vector<512x256xf32>
      %25 = arith.truncf %24 : vector<512x256xf32> to vector<512x256xbf16>
      %c0_15 = arith.constant 0 : index
      %c0_16 = arith.constant 0 : index
      %26 = vector.load %arg4[%c0_15, %c0_16] : memref<256x256xbf16, #tpu.memory_space<vmem>>, vector<256x256xbf16>
      %cst_17 = arith.constant dense<0.000000e+00> : vector<512x256xf32>
      %27 = tpu.matmul %25, %26, %cst_17 {dimension_numbers = #tpu.dot_dimension_numbers<[1], [0], [0], [1], [0, 0, 1, 1], [], []>} : vector<512x256xbf16>, vector<256x256xbf16>, vector<512x256xf32> -> vector<512x256xf32>
      %28 = arith.truncf %27 : vector<512x256xf32> to vector<512x256xbf16>
      %c0_18 = arith.constant 0 : index
      %c0_19 = arith.constant 0 : index
      %29 = vector.load %arg2[%c0_18, %c0_19] : memref<512x512xbf16, #tpu.memory_space<vmem>>, vector<512x512xbf16>
      %cst_20 = arith.constant dense<0.000000e+00> : vector<512x256xf32>
      %30 = tpu.matmul %29, %28, %cst_20 {dimension_numbers = #tpu.dot_dimension_numbers<[1], [0], [0], [1], [0, 0, 1, 1], [], []>} : vector<512x512xbf16>, vector<512x256xbf16>, vector<512x256xf32> -> vector<512x256xf32>
      %31 = vector.extract_strided_slice %30 {offsets = [0, 0], sizes = [512, 128], strides = [1, 1]} : vector<512x256xf32> to vector<512x128xf32>
      %32 = vector.extract_strided_slice %30 {offsets = [0, 128], sizes = [512, 128], strides = [1, 1]} : vector<512x256xf32> to vector<512x128xf32>
      %c0_21 = arith.constant 0 : index
      %c0_22 = arith.constant 0 : index
      %33 = vector.load %arg5[%c0_21, %c0_22] : memref<512x128xf32, #tpu.memory_space<vmem>>, vector<512x128xf32>
      %34 = math.exp %32 : vector<512x128xf32>
      %35 = arith.mulf %33, %34 : vector<512x128xf32>
      %36 = arith.addf %35, %31 : vector<512x128xf32>
      %c0_23 = arith.constant 0 : index
      %c0_24 = arith.constant 0 : index
      %37 = vector.load %arg7[%c0_23, %c0_24] : memref<512x256xf32, #tpu.memory_space<vmem>>, vector<512x256xf32>
      tpu.vector_store %arg7[%c0_23, %c0_24], %30 {strides = array<i32>} : memref<512x256xf32, #tpu.memory_space<vmem>>, vector<512x256xf32>,
      %c0_25 = arith.constant 0 : index
      %c0_26 = arith.constant 0 : index
      %38 = vector.load %arg6[%c0_25, %c0_26] : memref<512x128xf32, #tpu.memory_space<vmem>>, vector<512x128xf32>
      tpu.vector_store %arg6[%c0_25, %c0_26], %36 {strides = array<i32>} : memref<512x128xf32, #tpu.memory_space<vmem>>, vector<512x128xf32>,
      %39 = tpu.transpose %36, [1, 0] : vector<512x128xf32> -> vector<128x512xf32>
      %40 = arith.truncf %39 : vector<128x512xf32> to vector<128x512xbf16>
      %c0_27 = arith.constant 0 : index
      %c0_28 = arith.constant 0 : index
      %41 = vector.load %arg9[%c0_27, %c0_28] : memref<128x512xbf16, #tpu.memory_space<vmem>>, vector<128x512xbf16>
      tpu.vector_store %arg9[%c0_27, %c0_28], %40 {strides = array<i32>} : memref<128x512xbf16, #tpu.memory_space<vmem>>, vector<128x512xbf16>,
    } else {
    }
    %c256_i32 = arith.constant 256 : i32
    %3 = arith.muli %arg0, %c256_i32 : i32
    %4 = tpu.assume_multiple %3, 256 : i32
    %5 = arith.index_cast %4 : i32 to index
    %c0 = arith.constant 0 : index
    %6 = vector.load %arg6[%5, %c0] : memref<512x128xf32, #tpu.memory_space<vmem>>, vector<256x128xf32>
    %7 = arith.truncf %6 : vector<256x128xf32> to vector<256x128xbf16>
    %c0_1 = arith.constant 0 : index
    %c0_2 = arith.constant 0 : index
    %8 = vector.load %arg9[%c0_1, %c0_2] : memref<128x512xbf16, #tpu.memory_space<vmem>>, vector<128x512xbf16>
    %cst = arith.constant dense<0.000000e+00> : vector<256x512xf32>
    %9 = tpu.matmul %7, %8, %cst {dimension_numbers = #tpu.dot_dimension_numbers<[1], [0], [0], [1], [0, 0, 1, 1], [], []>} : vector<256x128xbf16>, vector<128x512xbf16>, vector<256x512xf32> -> vector<256x512xf32>
    %10 = arith.negf %9 : vector<256x512xf32>
    %11 = math.exp %10 : vector<256x512xf32>
    %cst_3 = arith.constant 1.000000e+00 : f32
    %12 = vector.broadcast %cst_3 : f32 to vector<256x512xf32>
    %13 = arith.addf %12, %11 : vector<256x512xf32>
    %14 = arith.divf %12, %13 : vector<256x512xf32>
    %15 = arith.truncf %14 : vector<256x512xf32> to vector<256x512xbf16>
    %c0_4 = arith.constant 0 : index
    %c0_5 = arith.constant 0 : index
    %16 = vector.load %arg8[%c0_4, %c0_5] : memref<256x512xbf16, #tpu.memory_space<vmem>>, vector<256x512xbf16>
    tpu.vector_store %arg8[%c0_4, %c0_5], %15 {strides = array<i32>} : memref<256x512xbf16, #tpu.memory_space<vmem>>, vector<256x512xbf16>,
    return
  }
  func.func @transform_0(%arg0: i32) -> (i32, i32) {
    %c0_i32 = arith.constant 0 : i32
    %c0_i32_0 = arith.constant 0 : i32
    %c0_i32_1 = arith.constant 0 : i32
    return %c0_i32, %c0_i32_0 : i32, i32
  }
  func.func @transform_1(%arg0: i32) -> (i32, i32) {
    %c0_i32 = arith.constant 0 : i32
    %c0_i32_0 = arith.constant 0 : i32
    %c0_i32_1 = arith.constant 0 : i32
    return %c0_i32, %c0_i32_0 : i32, i32
  }
  func.func @transform_2(%arg0: i32) -> (i32, i32) {
    %c0_i32 = arith.constant 0 : i32
    %c0_i32_0 = arith.constant 0 : i32
    %c0_i32_1 = arith.constant 0 : i32
    return %c0_i32, %c0_i32_0 : i32, i32
  }
  func.func @transform_3(%arg0: i32) -> (i32, i32) {
    %c0_i32 = arith.constant 0 : i32
    %c0_i32_0 = arith.constant 0 : i32
    %c0_i32_1 = arith.constant 0 : i32
    return %c0_i32, %c0_i32_0 : i32, i32
  }
  func.func @transform_4(%arg0: i32) -> (i32, i32) {
    %c0_i32 = arith.constant 0 : i32
    %c0_i32_0 = arith.constant 0 : i32
    %c0_i32_1 = arith.constant 0 : i32
    return %c0_i32, %c0_i32_0 : i32, i32
  }
  func.func @transform_5(%arg0: i32) -> (i32, i32) {
    %c0_i32 = arith.constant 0 : i32
    %c0_i32_0 = arith.constant 0 : i32
    %c0_i32_1 = arith.constant 0 : i32
    return %c0_i32, %c0_i32_0 : i32, i32
  }
  func.func @transform_6(%arg0: i32) -> (i32, i32) {
    %c0_i32 = arith.constant 0 : i32
    %c0_i32_0 = arith.constant 0 : i32
    %c0_i32_1 = arith.constant 0 : i32
    return %c0_i32, %c0_i32_0 : i32, i32
  }
  func.func @transform_7(%arg0: i32) -> (i32, i32) {
    %c0_i32 = arith.constant 0 : i32
    %c0_i32_0 = arith.constant 0 : i32
    return %arg0, %c0_i32 : i32, i32
  }
}

</mosaic_0001>

<bundles_post_ra>
// kernel: tpu_custom_call.1
= control target key start
LH: loop header
LB: loop body
LE: loop exit
PB: predicated region body
PF: predicated region fallthrough
CT: control target
= control target key end

     0   :  { %13 = vsyncpa [#allocation4], 0  ;;  %s11927_s0 = inlined_call_operand.hbm [shape: bf16[512,512], index: 0, kind: input, shape index: {}]   ;;  %s11928_s1 = inlined_call_operand.hbm [shape: bf16[512,512], index: 1, kind: input, shape index: {}]   ;;  %s11929_s2 = inlined_call_operand.hbm [shape: bf16[512,256], index: 2, kind: input, shape index: {}]   ;;  %s11930_s3 = inlined_call_operand.hbm [shape: bf16[256,256], index: 3, kind: input, shape index: {}]   ;;  %s11931_s4 = inlined_call_operand.hbm [shape: f32[512,128], index: 4, kind: input, shape index: {}]   ;;  %s11932_s5 = inlined_call_operand.hbm [shape: f32[512,128], index: 5, kind: output, shape index: {0}]   ;;  %s11933_s6 = inlined_call_operand.hbm [shape: f32[512,256], index: 6, kind: output, shape index: {1}]   ;;  %s11934_s7 = inlined_call_operand.hbm [shape: bf16[512,512], index: 7, kind: output, shape index: {2}]  }
   0x1   :  { %14 = vsyncpa [#allocation7], 0 }
   0x2   :  { %15 = vsyncpa [#allocation10], 0 }
   0x3   :  { %16 = vsyncpa [#allocation5], 0 }
   0x4   :  { %17 = vsyncpa [#allocation14], 0  ;;  %s10803_s24 = smov 0   ;;  %s10805_s25 = smov 0  }
   0x5   :  { %s10807_s26 = smov 0   ;;  %s10809_s27 = smov 0  }
   0x6 LB: > { %11947 = sst [smem:[#allocation22_spill]] %s10740_s26  ;;  %s10822_s28 = sadd.s32 4294967295, %s10744_s27   ;;  %s10744_s27 = sphi %s10809_s27, %s12044_s27   ;;  %s10740_s26 = sphi %s10807_s26, %s12049_s26   ;;  %s10736_s25 = sphi %s10805_s25, %s12048_s25   ;;  %s10732_s24 = sphi %s10803_s24, %s12047_s24  }
   0x7   : > { %s11939_s29 = sadd.s32 4294967294, %s10744_s27   ;;  %s10826_s30 = sadd.s32 1, %s10744_s27  }
   0x8   : > { %11948 = sst [smem:[#allocation23_spill]] %s10826_s30  ;;  %s177_s8 = sadd.s32 1, %s10740_s26 }
   0x9   : > { %s174_s9 = ssub.s32 %s10744_s27, %s10826_s30  ;;  %p187_p0 = scmp.ne.s32.totalorder %s10740_s26, %s10736_s25 }
   0xa   : > { %p175_p1 = scmp.eq.s32.totalorder %s174_s9, 0  ;;  %p11935_p2 = scmp.eq.s32.totalorder %s10822_s28, 1 }
   0xb   : > { %p193_p3 = scmp.ne.s32.totalorder %s10736_s25, %s10732_s24  ;;  %p194_p4 = scmp.eq.s32.totalorder %s11939_s29, 1 }
   0xc   : > { %s10838_s10 = scalar_select %p175_p1, %s10740_s26, %s177_s8  }
   0xd   : > { %p10842_p5 = por %p11935_p2, %p187_p0  ;;  %p10846_p6 = por %p194_p4, %p193_p3 }
   0xe   : > { %11949 = sst [smem:[#allocation24_spill]] %s10838_s10  ;;  %p7786_p7 = scmp.ge.s32.totalorder %s10744_s27, 1 }
   0xf   : > { %s11950_s11 = scalar_select %p10842_p5, 1, 0 }
  0x10   : > { %s11951_s12 = scalar_select %p10846_p6, 1, 0 }
  0x11   : > { %p201_p8 = scmp.lt.s32.totalorder %s10744_s27, 3  ;;  %p11936_p10 = scmp.eq.s32.totalorder %s10822_s28, 0 }
  0x12   : > { %s10746_s14 = smov [#allocation6]   ;;  %s10747_s17 = smov [#allocation9]  }
  0x13   : > { %p10854_p11 = pnand %p7786_p7, %p201_p8  ;;  %s226_s15 = sshll.u32 %s10746_s14, 4  ;;  %s227_s15 = int_to_ptr.vmem [resolvable:$true] %s226_s15 }
  0x14   : > { %s252_s18 = sshll.u32 %s10747_s17, 4  ;;  %s10470_s21 = scalar_lea.hbm %s11928_s1, 16384  ;;  %s253_s18 = int_to_ptr.vmem [resolvable:$true] %s252_s18 }
  0x15   : > { %s11952_s13 = scalar_select %p10854_p11, 1, 0 }
  0x16   : > { %p8867_p12 = pneg %p10854_p11  ;;  %p10471_p0 = scmp.ne.s32.totalorder %s11928_s1, %s10470_s21 }
  0x17   : > { %p10477_p7 = scmp.lt.u32.totalorder %s10470_s21, %s11928_s1 }
  0x18   : > { %p10862_p13 = pnand %p11936_p10, %p8867_p12 }
  0x1a   : > { %p10874_p1 = pneg %p10862_p13 }
  0x1c   : > { %p10473_p3 = pnand %p10874_p1, %p10471_p0 }
  0x1e   : > { %p10474_p4 = pneg %p10473_p3 }
  0x20   : > { %p10479_p8 = pnand %p10477_p7, %p10474_p4 }
  0x22   : > { %10482 = shalt.err (!%p10479_p8)
}
  0x23   : > { %s10483_s14 = scalar_lea.vmem %s227_s15, 16384  ;;  %p10491_p10 = scmp.lt.s32.totalorder %s227_s15, %s227_s15 }
  0x24   : > { %p10484_p12 = scmp.ne.s32.totalorder %s227_s15, %s10483_s14  ;;  %p10492_p6 = scmp.lt.s32.totalorder %s10483_s14, %s10483_s14 }
  0x26   : > { %p10486_p2 = pnand %p10484_p12, %p10874_p1  ;;  %p10493_p5 = por %p10492_p6, %p10491_p10 }
  0x28   : > { %p10487_p9 = pneg %p10486_p2 }
  0x2a   : > { %p10494_p11 = pnand %p10493_p5, %p10487_p9 }
  0x2c   : > { %10497 = shalt.err (!%p10494_p11)
}
  0x2d   : > { %s10748_s17 = smov 256   ;;  %s10749_s19 = smov 16  }
  0x2e   : > { %8873 = dma.hbm_to_vmem [thread:$0]  (!%p10862_p13), %s11928_s1, 16384, %s227_s15, [#allocation7], %s10748_s17, %s10748_s17, %s10749_s19  }
  0x2f   : > { %s10750_s22 = smov [#allocation3]   ;;  %s10498_s14 = scalar_lea.hbm %s11930_s3, 4096 }
  0x30   : > { %s213_s23 = sshll.u32 %s10750_s22, 4  ;;  %p10499_p2 = scmp.ne.s32.totalorder %s11930_s3, %s10498_s14  ;;  %s214_s23 = int_to_ptr.vmem [resolvable:$true] %s213_s23 }
  0x31   : > { %p10505_p9 = scmp.lt.u32.totalorder %s10498_s14, %s11930_s3 }
  0x32   : > { %p10501_p5 = pnand %p10499_p2, %p10874_p1 }
  0x34   : > { %p10502_p6 = pneg %p10501_p5 }
  0x36   : > { %p10507_p10 = pnand %p10505_p9, %p10502_p6 }
  0x38   : > { %10510 = shalt.err (!%p10507_p10)
}
  0x39   : > { %s10511_s15 = scalar_lea.vmem %s253_s18, 4096  ;;  %p10519_p4 = scmp.lt.s32.totalorder %s253_s18, %s253_s18 }
  0x3a   : > { %p10512_p11 = scmp.ne.s32.totalorder %s253_s18, %s10511_s15  ;;  %p10520_p7 = scmp.lt.s32.totalorder %s10511_s15, %s10511_s15 }
  0x3c   : > { %p10514_p0 = pnand %p10512_p11, %p10874_p1  ;;  %p10521_p8 = por %p10520_p7, %p10519_p4 }
  0x3e   : > { %p10515_p3 = pneg %p10514_p0 }
  0x40   : > { %p10522_p12 = pnand %p10521_p8, %p10515_p3 }
  0x42   : > { %10525 = shalt.err (!%p10522_p12)
}
  0x43   : > { %s11943_s29 = smov 128   ;;  %s11945_s10 = smov 8  }
  0x44   : > { %8879 = dma.hbm_to_vmem [thread:$0]  (!%p10862_p13), %s11930_s3, 4096, %s253_s18, [#allocation10], %s11943_s29, %s11943_s29, %s11945_s10  }
  0x45   : > { %s10526_s22 = scalar_lea.hbm %s11927_s0, 16384 }
  0x46   : > { %p10527_p2 = scmp.ne.s32.totalorder %s11927_s0, %s10526_s22  ;;  %p10533_p9 = scmp.lt.u32.totalorder %s10526_s22, %s11927_s0 }
  0x48   : > { %p10529_p5 = pnand %p10527_p2, %p10874_p1 }
  0x4a   : > { %p10530_p6 = pneg %p10529_p5 }
  0x4c   : > { %p10535_p10 = pnand %p10533_p9, %p10530_p6 }
  0x4e   : > { %10538 = shalt.err (!%p10535_p10)
}
  0x4f   : > { %s10539_s26 = scalar_lea.vmem %s214_s23, 16384  ;;  %p10547_p4 = scmp.lt.s32.totalorder %s214_s23, %s214_s23 }
  0x50   : > { %p10540_p11 = scmp.ne.s32.totalorder %s214_s23, %s10539_s26  ;;  %p10548_p7 = scmp.lt.s32.totalorder %s10539_s26, %s10539_s26 }
  0x52   : > { %p10542_p0 = pnand %p10540_p11, %p10874_p1  ;;  %p10549_p8 = por %p10548_p7, %p10547_p4 }
  0x54   : > { %p10543_p3 = pneg %p10542_p0 }
  0x56   : > { %p10550_p12 = pnand %p10549_p8, %p10543_p3 }
  0x58   : > { %10553 = shalt.err (!%p10550_p12)
}
  0x59   : > { %8870 = dma.hbm_to_vmem [thread:$0]  (!%p10862_p13), %s11927_s0, 16384, %s214_s23, [#allocation4], %s10748_s17, %s10748_s17, %s10749_s19  }
  0x5a   : > { %s10753_s20 = smov [#allocation8]   ;;  %s10754_s22 = smov [#allocation11]  }
  0x5b   : > { %s239_s21 = sshll.u32 %s10753_s20, 4  ;;  %s265_s8 = sshll.u32 %s10754_s22, 4  ;;  %s240_s21 = int_to_ptr.vmem [resolvable:$true] %s239_s21  ;;  %s266_s8 = int_to_ptr.vmem [resolvable:$true] %s265_s8 }
  0x5c   : > { %s10554_s15 = scalar_lea.hbm %s11929_s2, 8192 }
  0x5d   : > { %p10555_p2 = scmp.ne.s32.totalorder %s11929_s2, %s10554_s15  ;;  %p10561_p9 = scmp.lt.u32.totalorder %s10554_s15, %s11929_s2 }
  0x5f   : > { %p10557_p5 = pnand %p10555_p2, %p10874_p1 }
  0x61   : > { %p10558_p6 = pneg %p10557_p5 }
  0x63   : > { %p10563_p10 = pnand %p10561_p9, %p10558_p6 }
  0x65   : > { %10566 = shalt.err (!%p10563_p10)
}
  0x66   : > { %s10567_s17 = scalar_lea.vmem %s240_s21, 8192  ;;  %p10575_p4 = scmp.lt.s32.totalorder %s240_s21, %s240_s21 }
  0x67   : > { %p10568_p11 = scmp.ne.s32.totalorder %s240_s21, %s10567_s17  ;;  %p10576_p7 = scmp.lt.s32.totalorder %s10567_s17, %s10567_s17 }
  0x69   : > { %p10570_p0 = pnand %p10568_p11, %p10874_p1  ;;  %p10577_p8 = por %p10576_p7, %p10575_p4 }
  0x6b   : > { %p10571_p3 = pneg %p10570_p0 }
  0x6d   : > { %p10578_p12 = pnand %p10577_p8, %p10571_p3 }
  0x6f   : > { %10581 = shalt.err (!%p10578_p12)
}
  0x70   : > { %s11955_s19 = smov 8   ;;  %s11956_s23 = smov 128  }
  0x71   : > { %8876 = dma.hbm_to_vmem [thread:$0]  (!%p10862_p13), %s11929_s2, 8192, %s240_s21, [#allocation7], %s11956_s23, %s11956_s23, %s11955_s19  }
  0x72   : > { %s10582_s22 = scalar_lea.hbm %s11931_s4, 8192 }
  0x73   : > { %p10583_p2 = scmp.ne.s32.totalorder %s11931_s4, %s10582_s22  ;;  %p10589_p9 = scmp.lt.u32.totalorder %s10582_s22, %s11931_s4 }
  0x75   : > { %p10585_p5 = pnand %p10583_p2, %p10874_p1 }
  0x77   : > { %p10586_p6 = pneg %p10585_p5 }
  0x79   : > { %p10591_p10 = pnand %p10589_p9, %p10586_p6 }
  0x7b   : > { %10594 = shalt.err (!%p10591_p10)
}
  0x7c   : > { %s10595_s18 = scalar_lea.vmem %s266_s8, 8192  ;;  %p10603_p4 = scmp.lt.s32.totalorder %s266_s8, %s266_s8 }
  0x7d   : > { %p10596_p11 = scmp.ne.s32.totalorder %s266_s8, %s10595_s18  ;;  %p10604_p7 = scmp.lt.s32.totalorder %s10595_s18, %s10595_s18 }
  0x7f   : > { %p10598_p0 = pnand %p10596_p11, %p10874_p1  ;;  %p10605_p8 = por %p10604_p7, %p10603_p4 }
  0x81   : > { %p10599_p3 = pneg %p10598_p0 }
  0x83   : > { %p10606_p12 = pnand %p10605_p8, %p10599_p3 }
  0x85   : > { %10609 = shalt.err (!%p10606_p12)
}
  0x86   : > { %8882 = dma.hbm_to_vmem [thread:$0]  (!%p10862_p13), %s11931_s4, 8192, %s266_s8, [#allocation10], %s11956_s23, %s11956_s23, %s11955_s19  }
  0x87   : > { %p11957_p2 = scmp.ne.s32.totalorder %s11952_s13, 0 }
  0x89   : > { %281 = sbr.rel (%p11957_p2) target bundleno = 2961 (0xb91), region = 40 }
  0x90   : > { %p11958_p1 = scmp.eq.s32.totalorder %s10822_s28, 0 }
  0x92   : > { %10707 = dma.done.wait (%p11958_p1), [#allocation4], 16384   ;;  %p11959_p5 = pmov %p11958_p1 }
  0x93   : > { %p11960_p6 = pmov %p11958_p1 }
  0x94   : > { %10709 = vsyncadd (%p11959_p5), [#allocation4], 4294950912 }
  0x95   : > { %10711 = dma.done.wait (%p11960_p6), [#allocation7], 24576   ;;  %p11961_p9 = pmov %p11958_p1 }
  0x96   : > { %p11962_p10 = pmov %p11958_p1 }
  0x97   : > { %10713 = vsyncadd (%p11961_p9), [#allocation7], 4294942720 }
  0x98   : > { %10715 = dma.done.wait (%p11962_p10), [#allocation10], 12288   ;;  %p11963_p13 = pmov %p11958_p1 }
  0x99   : > { %s321_s13 = sand.u32 1, %s10736_s25   ;;  %p11964_p11 = scmp.ne.s32.totalorder %s10822_s28, 0 }
  0x9a   : > { %10717 = vsyncadd (%p11963_p13), [#allocation10], 4294955008  ;;  %s7798_s16 = sshll.u32 %s321_s13, 9 }
  0x9b   : > { %s10992_s24 = scalar_lea.vmem [#allocation15], %s7798_s16  ;;  %329 = sbr.rel (%p11964_p11) target bundleno = 2389 (0x955), region = 64 }
  0xa2   : > { %v9174_v0 = vld [vmem:[#allocation8 + $0x4] ss:$8 sps:$4 sm:$0xff]   ;;  %v9176_v1 = vld [vmem:[#allocation8] ss:$8 sps:$4 sm:$0xff]   ;;  %v9177_v2 = vld [vmem:[#allocation8 + $0x14] ss:$8 sps:$4 sm:$0xff]  }
  0xa3   : > { %1482 = vmatprep.subr.bf16.mxu0 %v9174_v0  ;;  %v9179_v3 = vld [vmem:[#allocation8 + $0x10] ss:$8 sps:$4 sm:$0xff]   ;;  %v9180_v4 = vld [vmem:[#allocation8 + $0x24] ss:$8 sps:$4 sm:$0xff]   ;;  %v9182_v5 = vld [vmem:[#allocation8 + $0x20] ss:$8 sps:$4 sm:$0xff]  }
  0xa4   : > { %1483 = vmatpush1.bf16.msra.mxu0 %v9176_v1  ;;  %v9183_v6 = vld [vmem:[#allocation8 + $0x34] ss:$8 sps:$4 sm:$0xff]   ;;  %v9185_v7 = vld [vmem:[#allocation8 + $0x30] ss:$8 sps:$4 sm:$0xff]   ;;  %v9186_v8 = vld [vmem:[#allocation8 + $0x44] ss:$8 sps:$4 sm:$0xff]  }
  0xa5   : > { %1484 = vmatprep.subr.bf16.mxu0 %v9177_v2  ;;  %v9188_v9 = vld [vmem:[#allocation8 + $0x40] ss:$8 sps:$4 sm:$0xff]   ;;  %v9189_v10 = vld [vmem:[#allocation8 + $0x54] ss:$8 sps:$4 sm:$0xff]   ;;  %v9191_v11 = vld [vmem:[#allocation8 + $0x50] ss:$8 sps:$4 sm:$0xff]  }
  0xa6   : > { %v9192_v12 = vld [vmem:[#allocation8 + $0x64] ss:$8 sps:$4 sm:$0xff]   ;;  %v9194_v14 = vld [vmem:[#allocation8 + $0x60] ss:$8 sps:$4 sm:$0xff]   ;;  %v9195_v15 = vld [vmem:[#allocation8 + $0x74] ss:$8 sps:$4 sm:$0xff]  }
  0xa7   : > { %v9224_v13 = vld [vmem:[#allocation3 + $0x4] ss:$16 sps:$4 sm:$0xff]   ;;  %v9197_v16 = vld [vmem:[#allocation8 + $0x70] ss:$8 sps:$4 sm:$0xff]   ;;  %v9200_v18 = vld [vmem:[#allocation8 + $0x80] ss:$8 sps:$4 sm:$0xff]  }
  0xa8   : > { %1485 = vmatpush1.bf16.msra.mxu0 %v9179_v3  ;;  %1514 = vmatprep.mubr.bf16.mxu0 %v9224_v13  ;;  %v9198_v17 = vld [vmem:[#allocation8 + $0x84] ss:$8 sps:$4 sm:$0xff]   ;;  %v9201_v19 = vld [vmem:[#allocation8 + $0x94] ss:$8 sps:$4 sm:$0xff]   ;;  %v9203_v20 = vld [vmem:[#allocation8 + $0x90] ss:$8 sps:$4 sm:$0xff]  }
  0xa9   : > { %1486 = vmatprep.subr.bf16.mxu0 %v9180_v4  ;;  %v9204_v21 = vld [vmem:[#allocation8 + $0xa4] ss:$8 sps:$4 sm:$0xff]   ;;  %v9206_v22 = vld [vmem:[#allocation8 + $0xa0] ss:$8 sps:$4 sm:$0xff]   ;;  %v9207_v23 = vld [vmem:[#allocation8 + $0xb4] ss:$8 sps:$4 sm:$0xff]  }
  0xaa   : > { %v9209_v24 = vld [vmem:[#allocation8 + $0xb0] ss:$8 sps:$4 sm:$0xff]   ;;  %v9210_v25 = vld [vmem:[#allocation8 + $0xc4] ss:$8 sps:$4 sm:$0xff]   ;;  %v9212_v26 = vld [vmem:[#allocation8 + $0xc0] ss:$8 sps:$4 sm:$0xff]  }
  0xab   : > { %v9213_v27 = vld [vmem:[#allocation8 + $0xd4] ss:$8 sps:$4 sm:$0xff]   ;;  %v9215_v28 = vld [vmem:[#allocation8 + $0xd0] ss:$8 sps:$4 sm:$0xff]   ;;  %v9216_v29 = vld [vmem:[#allocation8 + $0xe4] ss:$8 sps:$4 sm:$0xff]  }
  0xac   : > { %1487 = vmatpush1.bf16.msra.mxu0 %v9182_v5  ;;  %v9218_v30 = vld [vmem:[#allocation8 + $0xe0] ss:$8 sps:$4 sm:$0xff]   ;;  %v9219_v31 = vld [vmem:[#allocation8 + $0xf4] ss:$8 sps:$4 sm:$0xff]   ;;  %v9221_v32 = vld [vmem:[#allocation8 + $0xf0] ss:$8 sps:$4 sm:$0xff]  }
  0xad   : > { %1488 = vmatprep.subr.bf16.mxu0 %v9183_v6  ;;  %v9222_v33 = vld [vmem:[#allocation3] ss:$16 sps:$4 sm:$0xff]   ;;  %v9225_v34 = vld [vmem:[#allocation3 + $0x24] ss:$16 sps:$4 sm:$0xff]  }
  0xae   : > { %v9273_v35 = vld [vmem:[#allocation8 + $0x100] ss:$8 sps:$4 sm:$0xff]   ;;  %v9275_v36 = vld [vmem:[#allocation8 + $0x104] ss:$8 sps:$4 sm:$0xff]   ;;  %v9282_v41 = vld [vmem:[#allocation8 + $0x110] ss:$8 sps:$4 sm:$0xff]  }
  0xaf   : > { %v9227_v37 = vld [vmem:[#allocation3 + $0x20] ss:$16 sps:$4 sm:$0xff]   ;;  %v9228_v38 = vld [vmem:[#allocation3 + $0x44] ss:$16 sps:$4 sm:$0xff]  }
  0xb0   : > { %1489 = vmatpush1.bf16.msra.mxu0 %v9185_v7  ;;  %v9230_v39 = vld [vmem:[#allocation3 + $0x40] ss:$16 sps:$4 sm:$0xff]   ;;  %v9231_v40 = vld [vmem:[#allocation3 + $0x64] ss:$16 sps:$4 sm:$0xff]  }
  0xb1   : > { %1490 = vmatprep.subr.bf16.mxu0 %v9186_v8  ;;  %v9284_v42 = vld [vmem:[#allocation8 + $0x114] ss:$8 sps:$4 sm:$0xff]   ;;  %v9233_v43 = vld [vmem:[#allocation3 + $0x60] ss:$16 sps:$4 sm:$0xff]   ;;  %v9293_v48 = vld [vmem:[#allocation8 + $0x124] ss:$8 sps:$4 sm:$0xff]  }
  0xb2   : > { %v9234_v44 = vld [vmem:[#allocation3 + $0x84] ss:$16 sps:$4 sm:$0xff]   ;;  %v9236_v45 = vld [vmem:[#allocation3 + $0x80] ss:$16 sps:$4 sm:$0xff]  }
  0xb3   : > { %v9237_v46 = vld [vmem:[#allocation3 + $0xa4] ss:$16 sps:$4 sm:$0xff]   ;;  %v9291_v47 = vld [vmem:[#allocation8 + $0x120] ss:$8 sps:$4 sm:$0xff]   ;;  %v9300_v53 = vld [vmem:[#allocation8 + $0x130] ss:$8 sps:$4 sm:$0xff]  }
  0xb4   : > { %1491 = vmatpush1.bf16.msra.mxu0 %v9188_v9  ;;  %v9239_v49 = vld [vmem:[#allocation3 + $0xa0] ss:$16 sps:$4 sm:$0xff]   ;;  %v9240_v50 = vld [vmem:[#allocation3 + $0xc4] ss:$16 sps:$4 sm:$0xff]  }
  0xb5   : > { %1492 = vmatprep.subr.bf16.mxu0 %v9189_v10  ;;  %v9242_v51 = vld [vmem:[#allocation3 + $0xc0] ss:$16 sps:$4 sm:$0xff]   ;;  %v9243_v52 = vld [vmem:[#allocation3 + $0xe4] ss:$16 sps:$4 sm:$0xff]  }
  0xb6   : > { %v9302_v54 = vld [vmem:[#allocation8 + $0x134] ss:$8 sps:$4 sm:$0xff]   ;;  %v9245_v55 = vld [vmem:[#allocation3 + $0xe0] ss:$16 sps:$4 sm:$0xff]   ;;  %v9311_v60 = vld [vmem:[#allocation8 + $0x144] ss:$8 sps:$4 sm:$0xff]  }
  0xb7   : > { %v9246_v56 = vld [vmem:[#allocation3 + $0x104] ss:$16 sps:$4 sm:$0xff]   ;;  %v9248_v57 = vld [vmem:[#allocation3 + $0x100] ss:$16 sps:$4 sm:$0xff]  }
  0xb8   : > { %1493 = vmatpush1.bf16.msra.mxu0 %v9191_v11  ;;  %v9249_v58 = vld [vmem:[#allocation3 + $0x124] ss:$16 sps:$4 sm:$0xff]   ;;  %v9309_v59 = vld [vmem:[#allocation8 + $0x140] ss:$8 sps:$4 sm:$0xff]   ;;  %v9318_v1 = vld [vmem:[#allocation8 + $0x150] ss:$8 sps:$4 sm:$0xff]  }
  0xb9   : > { %1494 = vmatprep.subr.bf16.mxu0 %v9192_v12  ;;  %v9251_v61 = vld [vmem:[#allocation3 + $0x120] ss:$16 sps:$4 sm:$0xff]   ;;  %v9252_v62 = vld [vmem:[#allocation3 + $0x144] ss:$16 sps:$4 sm:$0xff]  }
  0xba   : > { %v9254_v63 = vld [vmem:[#allocation3 + $0x140] ss:$16 sps:$4 sm:$0xff]   ;;  %v9255_v0 = vld [vmem:[#allocation3 + $0x164] ss:$16 sps:$4 sm:$0xff]  }
  0xbb   : > { %v9320_v2 = vld [vmem:[#allocation8 + $0x154] ss:$8 sps:$4 sm:$0xff]   ;;  %v9257_v3 = vld [vmem:[#allocation3 + $0x160] ss:$16 sps:$4 sm:$0xff]   ;;  %v9326_v5 = vld [vmem:[#allocation8 + $0x164] ss:$8 sps:$4 sm:$0xff]  }
  0xbc   : > { %1495 = vmatpush1.bf16.msra.mxu0 %v9194_v14  ;;  %v9258_v4 = vld [vmem:[#allocation3 + $0x184] ss:$16 sps:$4 sm:$0xff]   ;;  %v9324_v6 = vld [vmem:[#allocation8 + $0x160] ss:$8 sps:$4 sm:$0xff]   ;;  %v9327_v8 = vld [vmem:[#allocation8 + $0x170] ss:$8 sps:$4 sm:$0xff]  }
  0xbd   : > { %1496 = vmatprep.subr.bf16.mxu0 %v9195_v15  ;;  %v9329_v7 = vld [vmem:[#allocation8 + $0x174] ss:$8 sps:$4 sm:$0xff]   ;;  %v9260_v9 = vld [vmem:[#allocation3 + $0x180] ss:$16 sps:$4 sm:$0xff]   ;;  %v9335_v11 = vld [vmem:[#allocation8 + $0x184] ss:$8 sps:$4 sm:$0xff]  }
  0xbe   : > { %v9261_v10 = vld [vmem:[#allocation3 + $0x1a4] ss:$16 sps:$4 sm:$0xff]   ;;  %v9333_v12 = vld [vmem:[#allocation8 + $0x180] ss:$8 sps:$4 sm:$0xff]   ;;  %v9336_v14 = vld [vmem:[#allocation8 + $0x190] ss:$8 sps:$4 sm:$0xff]  }
  0xbf   : > { %v9338_v13 = vld [vmem:[#allocation8 + $0x194] ss:$8 sps:$4 sm:$0xff]   ;;  %v9263_v15 = vld [vmem:[#allocation3 + $0x1a0] ss:$16 sps:$4 sm:$0xff]  }
  0xc0   : > { %1497 = vmatpush1.bf16.msra.mxu0 %v9197_v16  ;;  %v9264_v16 = vld [vmem:[#allocation3 + $0x1c4] ss:$16 sps:$4 sm:$0xff]  }
  0xc1   : > { %1498 = vmatprep.subr.bf16.mxu0 %v9198_v17  ;;  %v9344_v17 = vld [vmem:[#allocation8 + $0x1a4] ss:$8 sps:$4 sm:$0xff]  }
  0xc4   : > { %1499 = vmatpush1.bf16.msra.mxu0 %v9200_v18  ;;  %v9342_v18 = vld [vmem:[#allocation8 + $0x1a0] ss:$8 sps:$4 sm:$0xff]  }
  0xc5   : > { %1500 = vmatprep.subr.bf16.mxu0 %v9201_v19  ;;  %v9347_v19 = vld [vmem:[#allocation8 + $0x1b4] ss:$8 sps:$4 sm:$0xff]  }
  0xc8   : > { %1501 = vmatpush1.bf16.msra.mxu0 %v9203_v20  ;;  %v9345_v20 = vld [vmem:[#allocation8 + $0x1b0] ss:$8 sps:$4 sm:$0xff]  }
  0xc9   : > { %1502 = vmatprep.subr.bf16.mxu0 %v9204_v21  ;;  %v9266_v21 = vld [vmem:[#allocation3 + $0x1c0] ss:$16 sps:$4 sm:$0xff]  }
  0xcc   : > { %1503 = vmatpush1.bf16.msra.mxu0 %v9206_v22  ;;  %v9267_v22 = vld [vmem:[#allocation3 + $0x1e4] ss:$16 sps:$4 sm:$0xff]  }
  0xcd   : > { %1504 = vmatprep.subr.bf16.mxu0 %v9207_v23  ;;  %v9353_v23 = vld [vmem:[#allocation8 + $0x1c4] ss:$8 sps:$4 sm:$0xff]  }
  0xd0   : > { %1505 = vmatpush1.bf16.msra.mxu0 %v9209_v24  ;;  %v9351_v24 = vld [vmem:[#allocation8 + $0x1c0] ss:$8 sps:$4 sm:$0xff]  }
  0xd1   : > { %1506 = vmatprep.subr.bf16.mxu0 %v9210_v25  ;;  %v9356_v25 = vld [vmem:[#allocation8 + $0x1d4] ss:$8 sps:$4 sm:$0xff]  }
  0xd4   : > { %1507 = vmatpush1.bf16.msra.mxu0 %v9212_v26  ;;  %v9354_v26 = vld [vmem:[#allocation8 + $0x1d0] ss:$8 sps:$4 sm:$0xff]  }
  0xd5   : > { %1508 = vmatprep.subr.bf16.mxu0 %v9213_v27  ;;  %v9269_v27 = vld [vmem:[#allocation3 + $0x1e0] ss:$16 sps:$4 sm:$0xff]  }
  0xd8   : > { %1509 = vmatpush1.bf16.msra.mxu0 %v9215_v28  ;;  %v9270_v28 = vld [vmem:[#allocation3 + $0x204] ss:$16 sps:$4 sm:$0xff]  }
  0xd9   : > { %1510 = vmatprep.subr.bf16.mxu0 %v9216_v29  ;;  %v9362_v29 = vld [vmem:[#allocation8 + $0x1e4] ss:$8 sps:$4 sm:$0xff]  }
  0xdc   : > { %1511 = vmatpush1.bf16.msra.mxu0 %v9218_v30  ;;  %v9360_v30 = vld [vmem:[#allocation8 + $0x1e0] ss:$8 sps:$4 sm:$0xff]  }
  0xdd   : > { %1512 = vmatprep.subr.bf16.mxu0 %v9219_v31  ;;  %v9365_v31 = vld [vmem:[#allocation8 + $0x1f4] ss:$8 sps:$4 sm:$0xff]  }
  0xe0   : > { %1513 = vmatpush1.bf16.msra.mxu0 %v9221_v32  ;;  %v9363_v32 = vld [vmem:[#allocation8 + $0x1f0] ss:$8 sps:$4 sm:$0xff]  }
  0xe1   : > { %1835 = vmatprep.subr.bf16.mxu0 %v9275_v36  ;;  %v9279_v36 = vld [vmem:[#allocation3 + $0x244] ss:$16 sps:$4 sm:$0xff]  }
  0xe3   : > { %1515 = vmatmul.mubr.bf16.vlgmr.msra.gmra.mrb[0].mxu0 %v9222_v33  ;;  %v9272_v33 = vld [vmem:[#allocation3 + $0x200] ss:$16 sps:$4 sm:$0xff]  }
  0xe4   : > { %1524 = vmatprep.mubr.bf16.mxu0 %v9225_v34  ;;  %1836 = vmatpush1.bf16.msra.mxu0 %v9273_v35  ;;  %v9276_v34 = vld [vmem:[#allocation3 + $0x224] ss:$16 sps:$4 sm:$0xff]   ;;  %v9278_v35 = vld [vmem:[#allocation3 + $0x220] ss:$16 sps:$4 sm:$0xff]  }
  0xe5   : > { %1837 = vmatprep.subr.bf16.mxu0 %v9284_v42  ;;  %v9294_v42 = vld [vmem:[#allocation3 + $0x2a4] ss:$16 sps:$4 sm:$0xff]  }
  0xe8   : > { %1838 = vmatpush1.bf16.msra.mxu0 %v9282_v41  ;;  %v9290_v41 = vld [vmem:[#allocation3 + $0x280] ss:$16 sps:$4 sm:$0xff]  }
  0xe9   : > { %1839 = vmatprep.subr.bf16.mxu0 %v9293_v48  ;;  %v9306_v48 = vld [vmem:[#allocation3 + $0x304] ss:$16 sps:$4 sm:$0xff]  }
  0xeb   : > { %1525 = vmatmul.mubr.bf16.gmra.mrb[4].mxu0 %v9227_v37  ;;  %v9281_v37 = vld [vmem:[#allocation3 + $0x240] ss:$16 sps:$4 sm:$0xff]  }
  0xec   : > { %1534 = vmatprep.mubr.bf16.mxu0 %v9228_v38  ;;  %1840 = vmatpush1.bf16.msra.mxu0 %v9291_v47  ;;  %v9285_v38 = vld [vmem:[#allocation3 + $0x264] ss:$16 sps:$4 sm:$0xff]   ;;  %v9305_v47 = vld [vmem:[#allocation3 + $0x2e0] ss:$16 sps:$4 sm:$0xff]  }
  0xed   : > { %1841 = vmatprep.subr.bf16.mxu0 %v9302_v54  ;;  %v9321_v54 = vld [vmem:[#allocation3 + $0x364] ss:$16 sps:$4 sm:$0xff]  }
  0xf0   : > { %1842 = vmatpush1.bf16.msra.mxu0 %v9300_v53  ;;  %v9317_v53 = vld [vmem:[#allocation3 + $0x340] ss:$16 sps:$4 sm:$0xff]  }
  0xf1   : > { %1843 = vmatprep.subr.bf16.mxu0 %v9311_v60  ;;  %v9348_v60 = vld [vmem:[#allocation3 + $0x3c4] ss:$16 sps:$4 sm:$0xff]  }
  0xf3   : > { %1535 = vmatmul.mubr.bf16.gmra.mrb[8].mxu0 %v9230_v39  ;;  %v9287_v39 = vld [vmem:[#allocation3 + $0x260] ss:$16 sps:$4 sm:$0xff]  }
  0xf4   : > { %1544 = vmatprep.mubr.bf16.mxu0 %v9231_v40  ;;  %1844 = vmatpush1.bf16.msra.mxu0 %v9309_v59  ;;  %v9288_v40 = vld [vmem:[#allocation3 + $0x284] ss:$16 sps:$4 sm:$0xff]   ;;  %v9341_v59 = vld [vmem:[#allocation3 + $0x3a0] ss:$16 sps:$4 sm:$0xff]  }
  0xf5   : > { %1845 = vmatprep.subr.bf16.mxu0 %v9320_v2  ;;  %v9369_v2 = vld [vmem:[#allocation3 + $0x2c] ss:$16 sps:$4 sm:$0xff]  }
  0xf8   : > { %1846 = vmatpush1.bf16.msra.mxu0 %v9318_v1  ;;  %v9366_v1 = vld [vmem:[#allocation3 + $0x8] ss:$16 sps:$4 sm:$0xff]  }
  0xf9   : > { %1847 = vmatprep.subr.bf16.mxu0 %v9326_v5  ;;  %v9374_v5 = vld [vmem:[#allocation3 + $0x48] ss:$16 sps:$4 sm:$0xff]  }
  0xfb   : > { %1545 = vmatmul.mubr.bf16.gmra.mrb[12].mxu0 %v9233_v43  ;;  %v9296_v43 = vld [vmem:[#allocation3 + $0x2a0] ss:$16 sps:$4 sm:$0xff]  }
  0xfc   : > { %1554 = vmatprep.mubr.bf16.mxu0 %v9234_v44  ;;  %1848 = vmatpush1.bf16.msra.mxu0 %v9324_v6  ;;  %v9297_v44 = vld [vmem:[#allocation3 + $0x2c4] ss:$16 sps:$4 sm:$0xff]   ;;  %v9375_v6 = vld [vmem:[#allocation3 + $0x6c] ss:$16 sps:$4 sm:$0xff]  }
  0xfd   : > { %1849 = vmatprep.subr.bf16.mxu0 %v9329_v7  ;;  %v9377_v7 = vld [vmem:[#allocation3 + $0x68] ss:$16 sps:$4 sm:$0xff]  }
 0x100   : > { %1850 = vmatpush1.bf16.msra.mxu0 %v9327_v8  ;;  %v9378_v8 = vld [vmem:[#allocation3 + $0x8c] ss:$16 sps:$4 sm:$0xff]  }
 0x101   : > { %1851 = vmatprep.subr.bf16.mxu0 %v9335_v11  ;;  %v9383_v11 = vld [vmem:[#allocation3 + $0xa8] ss:$16 sps:$4 sm:$0xff]  }
 0x103   : > { %1555 = vmatmul.mubr.bf16.gmra.mrb[16].mxu0 %v9236_v45  ;;  %v9299_v45 = vld [vmem:[#allocation3 + $0x2c0] ss:$16 sps:$4 sm:$0xff]  }
 0x104   : > { %1564 = vmatprep.mubr.bf16.mxu0 %v9237_v46  ;;  %1852 = vmatpush1.bf16.msra.mxu0 %v9333_v12  ;;  %v9303_v46 = vld [vmem:[#allocation3 + $0x2e4] ss:$16 sps:$4 sm:$0xff]   ;;  %v9384_v12 = vld [vmem:[#allocation3 + $0xcc] ss:$16 sps:$4 sm:$0xff]  }
 0x105   : > { %1853 = vmatprep.subr.bf16.mxu0 %v9338_v13  ;;  %v9386_v13 = vld [vmem:[#allocation3 + $0xc8] ss:$16 sps:$4 sm:$0xff]  }
 0x108   : > { %1854 = vmatpush1.bf16.msra.mxu0 %v9336_v14  ;;  %v9387_v14 = vld [vmem:[#allocation3 + $0xec] ss:$16 sps:$4 sm:$0xff]  }
 0x109   : > { %1855 = vmatprep.subr.bf16.mxu0 %v9344_v17  ;;  %v9392_v17 = vld [vmem:[#allocation3 + $0x108] ss:$16 sps:$4 sm:$0xff]  }
 0x10b   : > { %1565 = vmatmul.mubr.bf16.gmra.mrb[20].mxu0 %v9239_v49  ;;  %v9308_v49 = vld [vmem:[#allocation3 + $0x300] ss:$16 sps:$4 sm:$0xff]  }
 0x10c   : > { %1574 = vmatprep.mubr.bf16.mxu0 %v9240_v50  ;;  %1856 = vmatpush1.bf16.msra.mxu0 %v9342_v18  ;;  %v9312_v50 = vld [vmem:[#allocation3 + $0x324] ss:$16 sps:$4 sm:$0xff]   ;;  %v9393_v18 = vld [vmem:[#allocation3 + $0x12c] ss:$16 sps:$4 sm:$0xff]  }
 0x10d   : > { %1857 = vmatprep.subr.bf16.mxu0 %v9347_v19  ;;  %v9395_v19 = vld [vmem:[#allocation3 + $0x128] ss:$16 sps:$4 sm:$0xff]  }
 0x110   : > { %1858 = vmatpush1.bf16.msra.mxu0 %v9345_v20  ;;  %v9396_v20 = vld [vmem:[#allocation3 + $0x14c] ss:$16 sps:$4 sm:$0xff]  }
 0x111   : > { %1859 = vmatprep.subr.bf16.mxu0 %v9353_v23  ;;  %v9401_v23 = vld [vmem:[#allocation3 + $0x168] ss:$16 sps:$4 sm:$0xff]  }
 0x113   : > { %1575 = vmatmul.mubr.bf16.gmra.mrb[24].mxu0 %v9242_v51  ;;  %v9314_v51 = vld [vmem:[#allocation3 + $0x320] ss:$16 sps:$4 sm:$0xff]  }
 0x114   : > { %1584 = vmatprep.mubr.bf16.mxu0 %v9243_v52  ;;  %1860 = vmatpush1.bf16.msra.mxu0 %v9351_v24  ;;  %v9315_v52 = vld [vmem:[#allocation3 + $0x344] ss:$16 sps:$4 sm:$0xff]   ;;  %v9402_v24 = vld [vmem:[#allocation3 + $0x18c] ss:$16 sps:$4 sm:$0xff]  }
 0x115   : > { %1861 = vmatprep.subr.bf16.mxu0 %v9356_v25  ;;  %v9404_v25 = vld [vmem:[#allocation3 + $0x188] ss:$16 sps:$4 sm:$0xff]  }
 0x118   : > { %1862 = vmatpush1.bf16.msra.mxu0 %v9354_v26  ;;  %v9405_v26 = vld [vmem:[#allocation3 + $0x1ac] ss:$16 sps:$4 sm:$0xff]  }
 0x119   : > { %1863 = vmatprep.subr.bf16.mxu0 %v9362_v29  ;;  %v9410_v29 = vld [vmem:[#allocation3 + $0x1c8] ss:$16 sps:$4 sm:$0xff]  }
 0x11b   : > { %1585 = vmatmul.mubr.bf16.gmra.mrb[28].mxu0 %v9245_v55  ;;  %v9323_v55 = vld [vmem:[#allocation3 + $0x360] ss:$16 sps:$4 sm:$0xff]  }
 0x11c   : > { %1594 = vmatprep.mubr.bf16.mxu0 %v9246_v56  ;;  %1864 = vmatpush1.bf16.msra.mxu0 %v9360_v30  ;;  %v9330_v56 = vld [vmem:[#allocation3 + $0x384] ss:$16 sps:$4 sm:$0xff]   ;;  %v9411_v30 = vld [vmem:[#allocation3 + $0x1ec] ss:$16 sps:$4 sm:$0xff]  }
 0x11d   : > { %1865 = vmatprep.subr.bf16.mxu0 %v9365_v31  ;;  %v9413_v31 = vld [vmem:[#allocation3 + $0x1e8] ss:$16 sps:$4 sm:$0xff]  }
 0x120   : > { %1866 = vmatpush1.bf16.msra.mxu0 %v9363_v32  ;;  %v9414_v32 = vld [vmem:[#allocation3 + $0x20c] ss:$16 sps:$4 sm:$0xff]  }
 0x123   : > { %1595 = vmatmul.mubr.bf16.gmra.mrb[32].mxu0 %v9248_v57  ;;  %v9332_v57 = vld [vmem:[#allocation3 + $0x380] ss:$16 sps:$4 sm:$0xff]  }
 0x124   : > { %1604 = vmatprep.mubr.bf16.mxu0 %v9249_v58  ;;  %v9339_v58 = vld [vmem:[#allocation3 + $0x3a4] ss:$16 sps:$4 sm:$0xff]  }
 0x12b   : > { %1605 = vmatmul.mubr.bf16.gmra.mrb[36].mxu0 %v9251_v61  ;;  %v9350_v61 = vld [vmem:[#allocation3 + $0x3c0] ss:$16 sps:$4 sm:$0xff]  }
 0x12c   : > { %1614 = vmatprep.mubr.bf16.mxu0 %v9252_v62  ;;  %v9357_v62 = vld [vmem:[#allocation3 + $0x3e4] ss:$16 sps:$4 sm:$0xff]  }
 0x133   : > { %1615 = vmatmul.mubr.bf16.gmra.mrb[40].mxu0 %v9254_v63  ;;  %v9359_v63 = vld [vmem:[#allocation3 + $0x3e0] ss:$16 sps:$4 sm:$0xff]  }
 0x134   : > { %1624 = vmatprep.mubr.bf16.mxu0 %v9255_v0  ;;  %v9368_v0 = vld [vmem:[#allocation3 + $0xc] ss:$16 sps:$4 sm:$0xff]  }
 0x13b   : > { %1625 = vmatmul.mubr.bf16.gmra.mrb[44].mxu0 %v9257_v3  ;;  %v9371_v3 = vld [vmem:[#allocation3 + $0x28] ss:$16 sps:$4 sm:$0xff]  }
 0x13c   : > { %1634 = vmatprep.mubr.bf16.mxu0 %v9258_v4  ;;  %v9372_v4 = vld [vmem:[#allocation3 + $0x4c] ss:$16 sps:$4 sm:$0xff]  }
 0x143   : > { %1635 = vmatmul.mubr.bf16.gmra.mrb[48].mxu0 %v9260_v9  ;;  %v9380_v9 = vld [vmem:[#allocation3 + $0x88] ss:$16 sps:$4 sm:$0xff]  }
 0x144   : > { %1644 = vmatprep.mubr.bf16.mxu0 %v9261_v10  ;;  %v9381_v10 = vld [vmem:[#allocation3 + $0xac] ss:$16 sps:$4 sm:$0xff]  }
 0x14b   : > { %1645 = vmatmul.mubr.bf16.gmra.mrb[52].mxu0 %v9263_v15  ;;  %v9389_v15 = vld [vmem:[#allocation3 + $0xe8] ss:$16 sps:$4 sm:$0xff]  }
 0x14c   : > { %1654 = vmatprep.mubr.bf16.mxu0 %v9264_v16  ;;  %v9390_v16 = vld [vmem:[#allocation3 + $0x10c] ss:$16 sps:$4 sm:$0xff]  }
 0x153   : > { %1655 = vmatmul.mubr.bf16.gmra.mrb[56].mxu0 %v9266_v21  ;;  %v9398_v21 = vld [vmem:[#allocation3 + $0x148] ss:$16 sps:$4 sm:$0xff]  }
 0x154   : > { %1664 = vmatprep.mubr.bf16.mxu0 %v9267_v22  ;;  %v9399_v22 = vld [vmem:[#allocation3 + $0x16c] ss:$16 sps:$4 sm:$0xff]  }
 0x15b   : > { %1665 = vmatmul.mubr.bf16.gmra.mrb[60].mxu0 %v9269_v27  ;;  %v9407_v27 = vld [vmem:[#allocation3 + $0x1a8] ss:$16 sps:$4 sm:$0xff]  }
 0x15c   : > { %1674 = vmatprep.mubr.bf16.mxu0 %v9270_v28  ;;  %v9408_v28 = vld [vmem:[#allocation3 + $0x1cc] ss:$16 sps:$4 sm:$0xff]  }
 0x163   : > { %1675 = vmatmul.mubr.bf16.gmra.mrb[64].mxu0 %v9272_v33  ;;  %v9416_v33 = vld [vmem:[#allocation3 + $0x208] ss:$16 sps:$4 sm:$0xff]  }
 0x164   : > { %1684 = vmatprep.mubr.bf16.mxu0 %v9276_v34  ;;  %v9417_v34 = vld [vmem:[#allocation3 + $0x22c] ss:$16 sps:$4 sm:$0xff]  }
 0x16b   : > { %1685 = vmatmul.mubr.bf16.gmra.mrb[68].mxu0 %v9278_v35  ;;  %v9419_v35 = vld [vmem:[#allocation3 + $0x228] ss:$16 sps:$4 sm:$0xff]  }
 0x16c   : > { %1694 = vmatprep.mubr.bf16.mxu0 %v9279_v36  ;;  %v9420_v36 = vld [vmem:[#allocation3 + $0x24c] ss:$16 sps:$4 sm:$0xff]  }
 0x173   : > { %1695 = vmatmul.mubr.bf16.gmra.mrb[72].mxu0 %v9281_v37  ;;  %v9422_v37 = vld [vmem:[#allocation3 + $0x248] ss:$16 sps:$4 sm:$0xff]  }
 0x174   : > { %1704 = vmatprep.mubr.bf16.mxu0 %v9285_v38  ;;  %v9423_v38 = vld [vmem:[#allocation3 + $0x26c] ss:$16 sps:$4 sm:$0xff]  }
 0x17b   : > { %1705 = vmatmul.mubr.bf16.gmra.mrb[76].mxu0 %v9287_v39  ;;  %v9425_v39 = vld [vmem:[#allocation3 + $0x268] ss:$16 sps:$4 sm:$0xff]  }
 0x17c   : > { %1714 = vmatprep.mubr.bf16.mxu0 %v9288_v40  ;;  %v9426_v40 = vld [vmem:[#allocation3 + $0x28c] ss:$16 sps:$4 sm:$0xff]  }
 0x183   : > { %1715 = vmatmul.mubr.bf16.gmra.mrb[80].mxu0 %v9290_v41  ;;  %v9428_v41 = vld [vmem:[#allocation3 + $0x288] ss:$16 sps:$4 sm:$0xff]  }
 0x184   : > { %1724 = vmatprep.mubr.bf16.mxu0 %v9294_v42  ;;  %v9429_v42 = vld [vmem:[#allocation3 + $0x2ac] ss:$16 sps:$4 sm:$0xff]  }
 0x18b   : > { %1725 = vmatmul.mubr.bf16.gmra.mrb[84].mxu0 %v9296_v43  ;;  %v9431_v43 = vld [vmem:[#allocation3 + $0x2a8] ss:$16 sps:$4 sm:$0xff]  }
 0x18c   : > { %1734 = vmatprep.mubr.bf16.mxu0 %v9297_v44  ;;  %v9432_v44 = vld [vmem:[#allocation3 + $0x2cc] ss:$16 sps:$4 sm:$0xff]  }
 0x193   : > { %1735 = vmatmul.mubr.bf16.gmra.mrb[88].mxu0 %v9299_v45  ;;  %v9434_v45 = vld [vmem:[#allocation3 + $0x2c8] ss:$16 sps:$4 sm:$0xff]  }
 0x194   : > { %1744 = vmatprep.mubr.bf16.mxu0 %v9303_v46  ;;  %v9435_v46 = vld [vmem:[#allocation3 + $0x2ec] ss:$16 sps:$4 sm:$0xff]  }
 0x19b   : > { %1745 = vmatmul.mubr.bf16.gmra.mrb[92].mxu0 %v9305_v47  ;;  %v9437_v47 = vld [vmem:[#allocation3 + $0x2e8] ss:$16 sps:$4 sm:$0xff]  }
 0x19c   : > { %1754 = vmatprep.mubr.bf16.mxu0 %v9306_v48  ;;  %v9438_v48 = vld [vmem:[#allocation3 + $0x30c] ss:$16 sps:$4 sm:$0xff]  }
 0x1a3   : > { %1755 = vmatmul.mubr.bf16.gmra.mrb[96].mxu0 %v9308_v49  ;;  %v9440_v49 = vld [vmem:[#allocation3 + $0x308] ss:$16 sps:$4 sm:$0xff]  }
 0x1a4   : > { %1764 = vmatprep.mubr.bf16.mxu0 %v9312_v50  ;;  %v9441_v50 = vld [vmem:[#allocation3 + $0x32c] ss:$16 sps:$4 sm:$0xff]  }
 0x1ab   : > { %1765 = vmatmul.mubr.bf16.gmra.mrb[100].mxu0 %v9314_v51  ;;  %v9443_v51 = vld [vmem:[#allocation3 + $0x328] ss:$16 sps:$4 sm:$0xff]  }
 0x1ac   : > { %1774 = vmatprep.mubr.bf16.mxu0 %v9315_v52  ;;  %v9444_v52 = vld [vmem:[#allocation3 + $0x34c] ss:$16 sps:$4 sm:$0xff]  }
 0x1b3   : > { %1775 = vmatmul.mubr.bf16.gmra.mrb[104].mxu0 %v9317_v53  ;;  %v9446_v53 = vld [vmem:[#allocation3 + $0x348] ss:$16 sps:$4 sm:$0xff]  }
 0x1b4   : > { %1784 = vmatprep.mubr.bf16.mxu0 %v9321_v54  ;;  %v9447_v54 = vld [vmem:[#allocation3 + $0x36c] ss:$16 sps:$4 sm:$0xff]  }
 0x1bb   : > { %1785 = vmatmul.mubr.bf16.gmra.mrb[108].mxu0 %v9323_v55  ;;  %v9464_v55 = vld [vmem:[#allocation6 + $0x204] ss:$16 sps:$4 sm:$0xff]  }
 0x1bc   : > { %1794 = vmatprep.mubr.bf16.mxu0 %v9330_v56  ;;  %3212 = vmatprep.mubr.bf16.mxu1 %v9464_v55 }
 0x1c3   : > { %1795 = vmatmul.mubr.bf16.gmra.mrb[112].mxu0 %v9332_v57 }
 0x1c4   : > { %1804 = vmatprep.mubr.bf16.mxu0 %v9339_v58  ;;  %v9449_v58 = vld [vmem:[#allocation3 + $0x368] ss:$16 sps:$4 sm:$0xff]  }
 0x1cb   : > { %1805 = vmatmul.mubr.bf16.gmra.mrb[116].mxu0 %v9341_v59 }
 0x1cc   : > { %1814 = vmatprep.mubr.bf16.mxu0 %v9348_v60 }
 0x1d3   : > { %1815 = vmatmul.mubr.bf16.gmra.mrb[120].mxu0 %v9350_v61 }
 0x1d4   : > { %1824 = vmatprep.mubr.bf16.mxu0 %v9357_v62 }
 0x1db   : > { %1825 = vmatmul.mubr.bf16.gmra.mrb[124].mxu0 %v9359_v63  ;;  %v9450_v63 = vld [vmem:[#allocation3 + $0x38c] ss:$16 sps:$4 sm:$0xff]  }
 0x1dc   : > { %1867 = vmatprep.mubr.bf16.mxu0 %v9368_v0 }
 0x1e3   : > { %1868 = vmatmul.mubr.bf16.vlgmr.msra.gmra.mrb[0].mxu0 %v9366_v1 }
 0x1e4   : > { %1877 = vmatprep.mubr.bf16.mxu0 %v9369_v2  ;;  %v9452_v2 = vld [vmem:[#allocation3 + $0x388] ss:$16 sps:$4 sm:$0xff]  }
 0x1eb   : > { %1878 = vmatmul.mubr.bf16.gmra.mrb[4].mxu0 %v9371_v3 }
 0x1ec   : > { %1887 = vmatprep.mubr.bf16.mxu0 %v9372_v4 }
 0x1f3   : > { %1888 = vmatmul.mubr.bf16.gmra.mrb[8].mxu0 %v9374_v5 }
 0x1f4   : > { %1897 = vmatprep.mubr.bf16.mxu0 %v9375_v6 }
 0x1fb   : > { %1898 = vmatmul.mubr.bf16.gmra.mrb[12].mxu0 %v9377_v7  ;;  %v9453_v7 = vld [vmem:[#allocation3 + $0x3ac] ss:$16 sps:$4 sm:$0xff]  }
 0x1fc   : > { %1907 = vmatprep.mubr.bf16.mxu0 %v9378_v8 }
 0x203   : > { %1908 = vmatmul.mubr.bf16.gmra.mrb[16].mxu0 %v9380_v9 }
 0x204   : > { %1917 = vmatprep.mubr.bf16.mxu0 %v9381_v10  ;;  %v9455_v10 = vld [vmem:[#allocation3 + $0x3a8] ss:$16 sps:$4 sm:$0xff]  }
 0x20b   : > { %1918 = vmatmul.mubr.bf16.gmra.mrb[20].mxu0 %v9383_v11 }
 0x20c   : > { %1927 = vmatprep.mubr.bf16.mxu0 %v9384_v12 }
 0x213   : > { %1928 = vmatmul.mubr.bf16.gmra.mrb[24].mxu0 %v9386_v13 }
 0x214   : > { %1937 = vmatprep.mubr.bf16.mxu0 %v9387_v14 }
 0x21b   : > { %1938 = vmatmul.mubr.bf16.gmra.mrb[28].mxu0 %v9389_v15  ;;  %v9456_v15 = vld [vmem:[#allocation3 + $0x3cc] ss:$16 sps:$4 sm:$0xff]  }
 0x21c   : > { %1947 = vmatprep.mubr.bf16.mxu0 %v9390_v16 }
 0x223   : > { %1948 = vmatmul.mubr.bf16.gmra.mrb[32].mxu0 %v9392_v17 }
 0x224   : > { %1957 = vmatprep.mubr.bf16.mxu0 %v9393_v18  ;;  %v9458_v18 = vld [vmem:[#allocation3 + $0x3c8] ss:$16 sps:$4 sm:$0xff]  }
 0x22b   : > { %1958 = vmatmul.mubr.bf16.gmra.mrb[36].mxu0 %v9395_v19 }
 0x22c   : > { %1967 = vmatprep.mubr.bf16.mxu0 %v9396_v20 }
 0x233   : > { %1968 = vmatmul.mubr.bf16.gmra.mrb[40].mxu0 %v9398_v21 }
 0x234   : > { %1977 = vmatprep.mubr.bf16.mxu0 %v9399_v22 }
 0x23b   : > { %1978 = vmatmul.mubr.bf16.gmra.mrb[44].mxu0 %v9401_v23  ;;  %v9459_v23 = vld [vmem:[#allocation3 + $0x3ec] ss:$16 sps:$4 sm:$0xff]  }
 0x23c   : > { %1987 = vmatprep.mubr.bf16.mxu0 %v9402_v24 }
 0x243   : > { %1988 = vmatmul.mubr.bf16.gmra.mrb[48].mxu0 %v9404_v25 }
 0x244   : > { %1997 = vmatprep.mubr.bf16.mxu0 %v9405_v26  ;;  %v9461_v26 = vld [vmem:[#allocation3 + $0x3e8] ss:$16 sps:$4 sm:$0xff]  }
 0x24b   : > { %1998 = vmatmul.mubr.bf16.gmra.mrb[52].mxu0 %v9407_v27 }
 0x24c   : > { %2007 = vmatprep.mubr.bf16.mxu0 %v9408_v28 }
 0x253   : > { %2008 = vmatmul.mubr.bf16.gmra.mrb[56].mxu0 %v9410_v29 }
 0x254   : > { %2017 = vmatprep.mubr.bf16.mxu0 %v9411_v30 }
 0x25b   : > { %2018 = vmatmul.mubr.bf16.gmra.mrb[60].mxu0 %v9413_v31 }
 0x25c   : > { %2027 = vmatprep.mubr.bf16.mxu0 %v9414_v32 }
 0x263   : > { %2028 = vmatmul.mubr.bf16.gmra.mrb[64].mxu0 %v9416_v33 }
 0x264   : > { %2037 = vmatprep.mubr.bf16.mxu0 %v9417_v34 }
 0x26b   : > { %2038 = vmatmul.mubr.bf16.gmra.mrb[68].mxu0 %v9419_v35 }
 0x26c   : > { %2047 = vmatprep.mubr.bf16.mxu0 %v9420_v36 }
 0x273   : > { %2048 = vmatmul.mubr.bf16.gmra.mrb[72].mxu0 %v9422_v37 }
 0x274   : > { %2057 = vmatprep.mubr.bf16.mxu0 %v9423_v38 }
 0x27b   : > { %2058 = vmatmul.mubr.bf16.gmra.mrb[76].mxu0 %v9425_v39 }
 0x27c   : > { %2067 = vmatprep.mubr.bf16.mxu0 %v9426_v40 }
 0x283   : > { %2068 = vmatmul.mubr.bf16.gmra.mrb[80].mxu0 %v9428_v41 }
 0x284   : > { %2077 = vmatprep.mubr.bf16.mxu0 %v9429_v42 }
 0x28b   : > { %2078 = vmatmul.mubr.bf16.gmra.mrb[84].mxu0 %v9431_v43 }
 0x28c   : > { %2087 = vmatprep.mubr.bf16.mxu0 %v9432_v44 }
 0x293   : > { %2088 = vmatmul.mubr.bf16.gmra.mrb[88].mxu0 %v9434_v45 }
 0x294   : > { %2097 = vmatprep.mubr.bf16.mxu0 %v9435_v46 }
 0x29b   : > { %2098 = vmatmul.mubr.bf16.gmra.mrb[92].mxu0 %v9437_v47 }
 0x29c   : > { %2107 = vmatprep.mubr.bf16.mxu0 %v9438_v48 }
 0x2a3   : > { %2108 = vmatmul.mubr.bf16.gmra.mrb[96].mxu0 %v9440_v49 }
 0x2a4   : > { %2117 = vmatprep.mubr.bf16.mxu0 %v9441_v50 }
 0x2ab   : > { %2118 = vmatmul.mubr.bf16.gmra.mrb[100].mxu0 %v9443_v51 }
 0x2ac   : > { %2127 = vmatprep.mubr.bf16.mxu0 %v9444_v52 }
 0x2b3   : > { %2128 = vmatmul.mubr.bf16.gmra.mrb[104].mxu0 %v9446_v53 }
 0x2b4   : > { %2137 = vmatprep.mubr.bf16.mxu0 %v9447_v54 }
 0x2b6   : > { %v1869_v56 = vpop.f32.mrb[0].mxu0 }
 0x2b7   : > { %v1871_v57 = vpop.f32.mrb[1].mxu0 }
 0x2b8   : > { %v1873_v59 = vpop.f32.mrb[2].mxu0 }
 0x2b9   : > { %v2188_v60 = vpack.c.bf16 %v1873_v59, %v1869_v56  ;;  %v1875_v61 = vpop.f32.mrb[3].mxu0 }
 0x2ba   : > { %v2189_v62 = vpack.c.bf16 %v1875_v61, %v1871_v57 }
 0x2bb   : > { %2138 = vmatmul.mubr.bf16.gmra.mrb[108].mxu0 %v9449_v58 }
 0x2bc   : > { %3020 = vmatprep.subr.bf16.mxu0 %v2189_v62  ;;  %8421 = vmatprep.subr.bf16.mxu1 %v2189_v62 }
 0x2bd   : > { %3021 = vmatpush1.bf16.msra.mxu0 %v2188_v60  ;;  %8437 = vmatpush1.bf16.msra.mxu1 %v2188_v60 }
 0x2be   : > { %v1879_v0 = vpop.f32.mrb[4].mxu0  ;;  %2147 = vmatprep.mubr.bf16.mxu0 %v9450_v63 }
 0x2bf   : > { %v1881_v1 = vpop.f32.mrb[5].mxu0 }
 0x2c0   : > { %v1883_v3 = vpop.f32.mrb[6].mxu0 }
 0x2c1   : > { %v2190_v4 = vpack.c.bf16 %v1883_v3, %v1879_v0  ;;  %v1885_v5 = vpop.f32.mrb[7].mxu0 }
 0x2c2   : > { %v2191_v6 = vpack.c.bf16 %v1885_v5, %v1881_v1 }
 0x2c3   : > { %2148 = vmatmul.mubr.bf16.gmra.mrb[112].mxu0 %v9452_v2 }
 0x2c4   : > { %3022 = vmatprep.subr.bf16.mxu0 %v2191_v6  ;;  %8422 = vmatprep.subr.bf16.mxu1 %v2191_v6 }
 0x2c5   : > { %3023 = vmatpush1.bf16.msra.mxu0 %v2190_v4  ;;  %8438 = vmatpush1.bf16.msra.mxu1 %v2190_v4 }
 0x2c6   : > { %v1889_v8 = vpop.f32.mrb[8].mxu0  ;;  %2157 = vmatprep.mubr.bf16.mxu0 %v9453_v7 }
 0x2c7   : > { %v1891_v9 = vpop.f32.mrb[9].mxu0 }
 0x2c8   : > { %v1893_v11 = vpop.f32.mrb[10].mxu0 }
 0x2c9   : > { %v2192_v12 = vpack.c.bf16 %v1893_v11, %v1889_v8  ;;  %v1895_v13 = vpop.f32.mrb[11].mxu0 }
 0x2ca   : > { %v2193_v14 = vpack.c.bf16 %v1895_v13, %v1891_v9 }
 0x2cb   : > { %2158 = vmatmul.mubr.bf16.gmra.mrb[116].mxu0 %v9455_v10 }
 0x2cc   : > { %3024 = vmatprep.subr.bf16.mxu0 %v2193_v14  ;;  %8423 = vmatprep.subr.bf16.mxu1 %v2193_v14 }
 0x2cd   : > { %3025 = vmatpush1.bf16.msra.mxu0 %v2192_v12  ;;  %8439 = vmatpush1.bf16.msra.mxu1 %v2192_v12 }
 0x2ce   : > { %v1899_v16 = vpop.f32.mrb[12].mxu0  ;;  %2167 = vmatprep.mubr.bf16.mxu0 %v9456_v15 }
 0x2cf   : > { %v1901_v17 = vpop.f32.mrb[13].mxu0 }
 0x2d0   : > { %v1903_v19 = vpop.f32.mrb[14].mxu0 }
 0x2d1   : > { %v2194_v20 = vpack.c.bf16 %v1903_v19, %v1899_v16  ;;  %v1905_v21 = vpop.f32.mrb[15].mxu0 }
 0x2d2   : > { %v2195_v22 = vpack.c.bf16 %v1905_v21, %v1901_v17 }
 0x2d3   : > { %2168 = vmatmul.mubr.bf16.gmra.mrb[120].mxu0 %v9458_v18 }
 0x2d4   : > { %3026 = vmatprep.subr.bf16.mxu0 %v2195_v22  ;;  %8424 = vmatprep.subr.bf16.mxu1 %v2195_v22 }
 0x2d5   : > { %3027 = vmatpush1.bf16.msra.mxu0 %v2194_v20  ;;  %8440 = vmatpush1.bf16.msra.mxu1 %v2194_v20 }
 0x2d6   : > { %v1909_v24 = vpop.f32.mrb[16].mxu0  ;;  %2177 = vmatprep.mubr.bf16.mxu0 %v9459_v23 }
 0x2d7   : > { %v1911_v25 = vpop.f32.mrb[17].mxu0 }
 0x2d8   : > { %v1913_v27 = vpop.f32.mrb[18].mxu0 }
 0x2d9   : > { %v2196_v28 = vpack.c.bf16 %v1913_v27, %v1909_v24  ;;  %v1915_v29 = vpop.f32.mrb[19].mxu0 }
 0x2da   : > { %v2197_v30 = vpack.c.bf16 %v1915_v29, %v1911_v25 }
 0x2db   : > { %2178 = vmatmul.mubr.bf16.gmra.mrb[124].mxu0 %v9461_v26 }
 0x2dc   : > { %3028 = vmatprep.subr.bf16.mxu0 %v2197_v30  ;;  %8425 = vmatprep.subr.bf16.mxu1 %v2197_v30 }
 0x2dd   : > { %3029 = vmatpush1.bf16.msra.mxu0 %v2196_v28  ;;  %8441 = vmatpush1.bf16.msra.mxu1 %v2196_v28 }
 0x2de   : > { %v1919_v31 = vpop.f32.mrb[20].mxu0 }
 0x2df   : > { %v1921_v32 = vpop.f32.mrb[21].mxu0 }
 0x2e0   : > { %v1923_v33 = vpop.f32.mrb[22].mxu0 }
 0x2e1   : > { %v2198_v34 = vpack.c.bf16 %v1923_v33, %v1919_v31  ;;  %v1925_v35 = vpop.f32.mrb[23].mxu0  ;;  %v9512_v33 = vld [vmem:[#allocation6 + $0x4] ss:$16 sps:$4 sm:$0xff]  }
 0x2e2   : > { %v2199_v36 = vpack.c.bf16 %v1925_v35, %v1921_v32  ;;  %v9510_v35 = vld [vmem:[#allocation6] ss:$16 sps:$4 sm:$0xff]   ;;  %3052 = vmatprep.mubr.bf16.mxu0 %v9512_v33 }
 0x2e4   : > { %3030 = vmatprep.subr.bf16.mxu0 %v2199_v36  ;;  %8426 = vmatprep.subr.bf16.mxu1 %v2199_v36  ;;  %v9465_v36 = vld [vmem:[#allocation6 + $0x224] ss:$16 sps:$4 sm:$0xff]  }
 0x2e5   : > { %3031 = vmatpush1.bf16.msra.mxu0 %v2198_v34  ;;  %8442 = vmatpush1.bf16.msra.mxu1 %v2198_v34  ;;  %v9462_v34 = vld [vmem:[#allocation6 + $0x200] ss:$16 sps:$4 sm:$0xff]  }
 0x2e6   : > { %v1929_v37 = vpop.f32.mrb[24].mxu0 }
 0x2e7   : > { %v1931_v38 = vpop.f32.mrb[25].mxu0 }
 0x2e8   : > { %v1933_v39 = vpop.f32.mrb[26].mxu0 }
 0x2e9   : > { %v2200_v40 = vpack.c.bf16 %v1933_v39, %v1929_v37  ;;  %v1935_v41 = vpop.f32.mrb[27].mxu0 }
 0x2ea   : > { %v2201_v42 = vpack.c.bf16 %v1935_v41, %v1931_v38 }
 0x2ec   : > { %3032 = vmatprep.subr.bf16.mxu0 %v2201_v42  ;;  %8427 = vmatprep.subr.bf16.mxu1 %v2201_v42 }
 0x2ed   : > { %3033 = vmatpush1.bf16.msra.mxu0 %v2200_v40  ;;  %8443 = vmatpush1.bf16.msra.mxu1 %v2200_v40  ;;  %v9516_v40 = vld [vmem:[#allocation6 + $0x24] ss:$16 sps:$4 sm:$0xff]  }
 0x2ee   : > { %v1939_v43 = vpop.f32.mrb[28].mxu0 }
 0x2ef   : > { %v1941_v44 = vpop.f32.mrb[29].mxu0 }
 0x2f0   : > { %v1943_v45 = vpop.f32.mrb[30].mxu0 }
 0x2f1   : > { %v2202_v46 = vpack.c.bf16 %v1943_v45, %v1939_v43  ;;  %v1945_v47 = vpop.f32.mrb[31].mxu0  ;;  %v9520_v45 = vld [vmem:[#allocation6 + $0x20] ss:$16 sps:$4 sm:$0xff]  }
 0x2f2   : > { %v2203_v48 = vpack.c.bf16 %v1945_v47, %v1941_v44  ;;  %v9467_v44 = vld [vmem:[#allocation6 + $0x220] ss:$16 sps:$4 sm:$0xff]  }
 0x2f4   : > { %3034 = vmatprep.subr.bf16.mxu0 %v2203_v48  ;;  %8428 = vmatprep.subr.bf16.mxu1 %v2203_v48 }
 0x2f5   : > { %3035 = vmatpush1.bf16.msra.mxu0 %v2202_v46  ;;  %8444 = vmatpush1.bf16.msra.mxu1 %v2202_v46  ;;  %v9468_v46 = vld [vmem:[#allocation6 + $0x244] ss:$16 sps:$4 sm:$0xff]  }
 0x2f6   : > { %v1949_v49 = vpop.f32.mrb[32].mxu0 }
 0x2f7   : > { %v1951_v50 = vpop.f32.mrb[33].mxu0 }
 0x2f8   : > { %v1953_v51 = vpop.f32.mrb[34].mxu0 }
 0x2f9   : > { %v2204_v52 = vpack.c.bf16 %v1953_v51, %v1949_v49  ;;  %v1955_v53 = vpop.f32.mrb[35].mxu0 }
 0x2fa   : > { %v2205_v54 = vpack.c.bf16 %v1955_v53, %v1951_v50  ;;  %v9522_v50 = vld [vmem:[#allocation6 + $0x44] ss:$16 sps:$4 sm:$0xff]  }
 0x2fc   : > { %3036 = vmatprep.subr.bf16.mxu0 %v2205_v54  ;;  %8429 = vmatprep.subr.bf16.mxu1 %v2205_v54  ;;  %v9470_v54 = vld [vmem:[#allocation6 + $0x240] ss:$16 sps:$4 sm:$0xff]  }
 0x2fd   : > { %3037 = vmatpush1.bf16.msra.mxu0 %v2204_v52  ;;  %8445 = vmatpush1.bf16.msra.mxu1 %v2204_v52 }
 0x2fe   : > { %v1959_v55 = vpop.f32.mrb[36].mxu0 }
 0x2ff   : > { %v1961_v56 = vpop.f32.mrb[37].mxu0 }
 0x300   : > { %v1963_v57 = vpop.f32.mrb[38].mxu0 }
 0x301   : > { %v2206_v58 = vpack.c.bf16 %v1963_v57, %v1959_v55  ;;  %v1965_v59 = vpop.f32.mrb[39].mxu0  ;;  %v9526_v55 = vld [vmem:[#allocation6 + $0x40] ss:$16 sps:$4 sm:$0xff]  }
 0x302   : > { %v2207_v60 = vpack.c.bf16 %v1965_v59, %v1961_v56  ;;  %v9471_v56 = vld [vmem:[#allocation6 + $0x264] ss:$16 sps:$4 sm:$0xff]  }
 0x304   : > { %3038 = vmatprep.subr.bf16.mxu0 %v2207_v60  ;;  %8430 = vmatprep.subr.bf16.mxu1 %v2207_v60  ;;  %v9528_v60 = vld [vmem:[#allocation6 + $0x64] ss:$16 sps:$4 sm:$0xff]  }
 0x305   : > { %3039 = vmatpush1.bf16.msra.mxu0 %v2206_v58  ;;  %8446 = vmatpush1.bf16.msra.mxu1 %v2206_v58 }
 0x306   : > { %v1969_v61 = vpop.f32.mrb[40].mxu0 }
 0x307   : > { %v1971_v62 = vpop.f32.mrb[41].mxu0 }
 0x308   : > { %v1973_v63 = vpop.f32.mrb[42].mxu0 }
 0x309   : > { %v2208_v0 = vpack.c.bf16 %v1973_v63, %v1969_v61  ;;  %v1975_v1 = vpop.f32.mrb[43].mxu0 }
 0x30a   : > { %v2209_v2 = vpack.c.bf16 %v1975_v1, %v1971_v62  ;;  %v9532_v1 = vld [vmem:[#allocation6 + $0x60] ss:$16 sps:$4 sm:$0xff]  }
 0x30c   : > { %3040 = vmatprep.subr.bf16.mxu0 %v2209_v2  ;;  %8431 = vmatprep.subr.bf16.mxu1 %v2209_v2  ;;  %v9474_v2 = vld [vmem:[#allocation6 + $0x284] ss:$16 sps:$4 sm:$0xff]  }
 0x30d   : > { %3041 = vmatpush1.bf16.msra.mxu0 %v2208_v0  ;;  %8447 = vmatpush1.bf16.msra.mxu1 %v2208_v0  ;;  %v9473_v0 = vld [vmem:[#allocation6 + $0x260] ss:$16 sps:$4 sm:$0xff]  }
 0x30e   : > { %v1979_v3 = vpop.f32.mrb[44].mxu0 }
 0x30f   : > { %v1981_v4 = vpop.f32.mrb[45].mxu0 }
 0x310   : > { %v1983_v5 = vpop.f32.mrb[46].mxu0 }
 0x311   : > { %v2210_v6 = vpack.c.bf16 %v1983_v5, %v1979_v3  ;;  %v1985_v7 = vpop.f32.mrb[47].mxu0 }
 0x312   : > { %v2211_v8 = vpack.c.bf16 %v1985_v7, %v1981_v4 }
 0x314   : > { %3042 = vmatprep.subr.bf16.mxu0 %v2211_v8  ;;  %8432 = vmatprep.subr.bf16.mxu1 %v2211_v8 }
 0x315   : > { %3043 = vmatpush1.bf16.msra.mxu0 %v2210_v6  ;;  %8448 = vmatpush1.bf16.msra.mxu1 %v2210_v6  ;;  %v9534_v6 = vld [vmem:[#allocation6 + $0x84] ss:$16 sps:$4 sm:$0xff]  }
 0x316   : > { %v1989_v9 = vpop.f32.mrb[48].mxu0 }
 0x317   : > { %v1991_v10 = vpop.f32.mrb[49].mxu0 }
 0x318   : > { %v1993_v11 = vpop.f32.mrb[50].mxu0 }
 0x319   : > { %v2212_v12 = vpack.c.bf16 %v1993_v11, %v1989_v9  ;;  %v1995_v13 = vpop.f32.mrb[51].mxu0  ;;  %v9538_v11 = vld [vmem:[#allocation6 + $0x80] ss:$16 sps:$4 sm:$0xff]  }
 0x31a   : > { %v2213_v14 = vpack.c.bf16 %v1995_v13, %v1991_v10  ;;  %v9476_v10 = vld [vmem:[#allocation6 + $0x280] ss:$16 sps:$4 sm:$0xff]  }
 0x31c   : > { %3044 = vmatprep.subr.bf16.mxu0 %v2213_v14  ;;  %8433 = vmatprep.subr.bf16.mxu1 %v2213_v14 }
 0x31d   : > { %3045 = vmatpush1.bf16.msra.mxu0 %v2212_v12  ;;  %8449 = vmatpush1.bf16.msra.mxu1 %v2212_v12  ;;  %v9477_v12 = vld [vmem:[#allocation6 + $0x2a4] ss:$16 sps:$4 sm:$0xff]  }
 0x31e   : > { %v1999_v15 = vpop.f32.mrb[52].mxu0 }
 0x31f   : > { %v2001_v16 = vpop.f32.mrb[53].mxu0 }
 0x320   : > { %v2003_v17 = vpop.f32.mrb[54].mxu0 }
 0x321   : > { %v2214_v18 = vpack.c.bf16 %v2003_v17, %v1999_v15  ;;  %v2005_v19 = vpop.f32.mrb[55].mxu0 }
 0x322   : > { %v2215_v20 = vpack.c.bf16 %v2005_v19, %v2001_v16  ;;  %v9540_v16 = vld [vmem:[#allocation6 + $0xa4] ss:$16 sps:$4 sm:$0xff]  }
 0x324   : > { %3046 = vmatprep.subr.bf16.mxu0 %v2215_v20  ;;  %8434 = vmatprep.subr.bf16.mxu1 %v2215_v20  ;;  %v9479_v20 = vld [vmem:[#allocation6 + $0x2a0] ss:$16 sps:$4 sm:$0xff]  }
 0x325   : > { %3047 = vmatpush1.bf16.msra.mxu0 %v2214_v18  ;;  %8450 = vmatpush1.bf16.msra.mxu1 %v2214_v18 }
 0x326   : > { %v2009_v21 = vpop.f32.mrb[56].mxu0 }
 0x327   : > { %v2011_v22 = vpop.f32.mrb[57].mxu0 }
 0x328   : > { %v2013_v23 = vpop.f32.mrb[58].mxu0 }
 0x329   : > { %v2216_v24 = vpack.c.bf16 %v2013_v23, %v2009_v21  ;;  %v2015_v25 = vpop.f32.mrb[59].mxu0  ;;  %v9544_v21 = vld [vmem:[#allocation6 + $0xa0] ss:$16 sps:$4 sm:$0xff]  }
 0x32a   : > { %v2217_v26 = vpack.c.bf16 %v2015_v25, %v2011_v22  ;;  %v9480_v22 = vld [vmem:[#allocation6 + $0x2c4] ss:$16 sps:$4 sm:$0xff]  }
 0x32c   : > { %3048 = vmatprep.subr.bf16.mxu0 %v2217_v26  ;;  %8435 = vmatprep.subr.bf16.mxu1 %v2217_v26  ;;  %v9546_v26 = vld [vmem:[#allocation6 + $0xc4] ss:$16 sps:$4 sm:$0xff]  }
 0x32d   : > { %3049 = vmatpush1.bf16.msra.mxu0 %v2216_v24  ;;  %8451 = vmatpush1.bf16.msra.mxu1 %v2216_v24 }
 0x32e   : > { %v2019_v27 = vpop.f32.mrb[60].mxu0 }
 0x32f   : > { %v2021_v28 = vpop.f32.mrb[61].mxu0 }
 0x330   : > { %v2023_v29 = vpop.f32.mrb[62].mxu0 }
 0x331   : > { %v2218_v30 = vpack.c.bf16 %v2023_v29, %v2019_v27  ;;  %v2025_v31 = vpop.f32.mrb[63].mxu0 }
 0x332   : > { %v2219_v32 = vpack.c.bf16 %v2025_v31, %v2021_v28  ;;  %v9550_v31 = vld [vmem:[#allocation6 + $0xc0] ss:$16 sps:$4 sm:$0xff]  }
 0x334   : > { %3050 = vmatprep.subr.bf16.mxu0 %v2219_v32  ;;  %8436 = vmatprep.subr.bf16.mxu1 %v2219_v32  ;;  %v9483_v32 = vld [vmem:[#allocation6 + $0x2e4] ss:$16 sps:$4 sm:$0xff]  }
 0x335   : > { %3051 = vmatpush1.bf16.msra.mxu0 %v2218_v30  ;;  %8452 = vmatpush1.bf16.msra.mxu1 %v2218_v30  ;;  %v9482_v30 = vld [vmem:[#allocation6 + $0x2c0] ss:$16 sps:$4 sm:$0xff]  }
 0x336   : > { %v2029_v37 = vpop.f32.mrb[64].mxu0 }
 0x337   : > { %v2031_v38 = vpop.f32.mrb[65].mxu0 }
 0x338   : > { %v2033_v39 = vpop.f32.mrb[66].mxu0  ;;  %3213 = vmatmul.mubr.bf16.vlgmr.msra.gmra.mrb[0].mxu1 %v9462_v34  ;;  %3053 = vmatmul.mubr.bf16.vlgmr.msra.gmra.mrb[128].mxu0 %v9510_v35 }
 0x339   : > { %v2220_v41 = vpack.c.bf16 %v2033_v39, %v2029_v37  ;;  %v2035_v42 = vpop.f32.mrb[67].mxu0  ;;  %3222 = vmatprep.mubr.bf16.mxu1 %v9465_v36  ;;  %3062 = vmatprep.mubr.bf16.mxu0 %v9516_v40  ;;  %v9552_v36 = vld [vmem:[#allocation6 + $0xe4] ss:$16 sps:$4 sm:$0xff]   ;;  %v9485_v40 = vld [vmem:[#allocation6 + $0x2e0] ss:$16 sps:$4 sm:$0xff]  }
 0x33a   : > { %v2221_v43 = vpack.c.bf16 %v2035_v42, %v2031_v38  ;;  %v9486_v42 = vld [vmem:[#allocation6 + $0x304] ss:$16 sps:$4 sm:$0xff]  }
 0x33c   : > { %3373 = vmatprep.subr.bf16.mxu1 %v2221_v43 }
 0x33d   : > { %3374 = vmatpush1.bf16.msra.mxu1 %v2220_v41  ;;  %v9556_v41 = vld [vmem:[#allocation6 + $0xe0] ss:$16 sps:$4 sm:$0xff]  }
 0x33e   : > { %v2039_v47 = vpop.f32.mrb[68].mxu0 }
 0x33f   : > { %v2041_v48 = vpop.f32.mrb[69].mxu0 }
 0x340   : > { %v2043_v49 = vpop.f32.mrb[70].mxu0  ;;  %3223 = vmatmul.mubr.bf16.gmra.mrb[4].mxu1 %v9467_v44  ;;  %3063 = vmatmul.mubr.bf16.gmra.mrb[132].mxu0 %v9520_v45 }
 0x341   : > { %v2222_v51 = vpack.c.bf16 %v2043_v49, %v2039_v47  ;;  %v2045_v52 = vpop.f32.mrb[71].mxu0  ;;  %3232 = vmatprep.mubr.bf16.mxu1 %v9468_v46  ;;  %3072 = vmatprep.mubr.bf16.mxu0 %v9522_v50  ;;  %v9558_v46 = vld [vmem:[#allocation6 + $0x104] ss:$16 sps:$4 sm:$0xff]   ;;  %v9488_v50 = vld [vmem:[#allocation6 + $0x300] ss:$16 sps:$4 sm:$0xff]  }
 0x342   : > { %v2223_v53 = vpack.c.bf16 %v2045_v52, %v2041_v48  ;;  %v9489_v52 = vld [vmem:[#allocation6 + $0x324] ss:$16 sps:$4 sm:$0xff]  }
 0x344   : > { %3375 = vmatprep.subr.bf16.mxu1 %v2223_v53 }
 0x345   : > { %3376 = vmatpush1.bf16.msra.mxu1 %v2222_v51  ;;  %v9562_v51 = vld [vmem:[#allocation6 + $0x100] ss:$16 sps:$4 sm:$0xff]  }
 0x346   : > { %v2049_v57 = vpop.f32.mrb[72].mxu0 }
 0x347   : > { %v2051_v58 = vpop.f32.mrb[73].mxu0 }
 0x348   : > { %v2053_v59 = vpop.f32.mrb[74].mxu0  ;;  %3233 = vmatmul.mubr.bf16.gmra.mrb[8].mxu1 %v9470_v54  ;;  %3073 = vmatmul.mubr.bf16.gmra.mrb[136].mxu0 %v9526_v55 }
 0x349   : > { %v2224_v61 = vpack.c.bf16 %v2053_v59, %v2049_v57  ;;  %v2055_v62 = vpop.f32.mrb[75].mxu0  ;;  %3242 = vmatprep.mubr.bf16.mxu1 %v9471_v56  ;;  %3082 = vmatprep.mubr.bf16.mxu0 %v9528_v60  ;;  %v9564_v56 = vld [vmem:[#allocation6 + $0x124] ss:$16 sps:$4 sm:$0xff]   ;;  %v9491_v60 = vld [vmem:[#allocation6 + $0x320] ss:$16 sps:$4 sm:$0xff]  }
 0x34a   : > { %v2225_v63 = vpack.c.bf16 %v2055_v62, %v2051_v58  ;;  %v9492_v62 = vld [vmem:[#allocation6 + $0x344] ss:$16 sps:$4 sm:$0xff]  }
 0x34c   : > { %3377 = vmatprep.subr.bf16.mxu1 %v2225_v63 }
 0x34d   : > { %3378 = vmatpush1.bf16.msra.mxu1 %v2224_v61  ;;  %v9568_v61 = vld [vmem:[#allocation6 + $0x120] ss:$16 sps:$4 sm:$0xff]  }
 0x34e   : > { %v2059_v3 = vpop.f32.mrb[76].mxu0 }
 0x34f   : > { %v2061_v4 = vpop.f32.mrb[77].mxu0 }
 0x350   : > { %v2063_v5 = vpop.f32.mrb[78].mxu0  ;;  %3243 = vmatmul.mubr.bf16.gmra.mrb[12].mxu1 %v9473_v0  ;;  %3083 = vmatmul.mubr.bf16.gmra.mrb[140].mxu0 %v9532_v1 }
 0x351   : > { %v2226_v7 = vpack.c.bf16 %v2063_v5, %v2059_v3  ;;  %v2065_v8 = vpop.f32.mrb[79].mxu0  ;;  %3252 = vmatprep.mubr.bf16.mxu1 %v9474_v2  ;;  %3092 = vmatprep.mubr.bf16.mxu0 %v9534_v6  ;;  %v9570_v2 = vld [vmem:[#allocation6 + $0x144] ss:$16 sps:$4 sm:$0xff]   ;;  %v9494_v6 = vld [vmem:[#allocation6 + $0x340] ss:$16 sps:$4 sm:$0xff]  }
 0x352   : > { %v2227_v9 = vpack.c.bf16 %v2065_v8, %v2061_v4  ;;  %v9495_v8 = vld [vmem:[#allocation6 + $0x364] ss:$16 sps:$4 sm:$0xff]  }
 0x354   : > { %3379 = vmatprep.subr.bf16.mxu1 %v2227_v9 }
 0x355   : > { %3380 = vmatpush1.bf16.msra.mxu1 %v2226_v7  ;;  %v9574_v7 = vld [vmem:[#allocation6 + $0x140] ss:$16 sps:$4 sm:$0xff]  }
 0x356   : > { %v2069_v13 = vpop.f32.mrb[80].mxu0 }
 0x357   : > { %v2071_v14 = vpop.f32.mrb[81].mxu0 }
 0x358   : > { %v2073_v15 = vpop.f32.mrb[82].mxu0  ;;  %3253 = vmatmul.mubr.bf16.gmra.mrb[16].mxu1 %v9476_v10  ;;  %3093 = vmatmul.mubr.bf16.gmra.mrb[144].mxu0 %v9538_v11 }
 0x359   : > { %v2228_v17 = vpack.c.bf16 %v2073_v15, %v2069_v13  ;;  %v2075_v18 = vpop.f32.mrb[83].mxu0  ;;  %3262 = vmatprep.mubr.bf16.mxu1 %v9477_v12  ;;  %3102 = vmatprep.mubr.bf16.mxu0 %v9540_v16  ;;  %v9576_v12 = vld [vmem:[#allocation6 + $0x164] ss:$16 sps:$4 sm:$0xff]   ;;  %v9497_v16 = vld [vmem:[#allocation6 + $0x360] ss:$16 sps:$4 sm:$0xff]  }
 0x35a   : > { %v2229_v19 = vpack.c.bf16 %v2075_v18, %v2071_v14  ;;  %v9498_v18 = vld [vmem:[#allocation6 + $0x384] ss:$16 sps:$4 sm:$0xff]  }
 0x35c   : > { %3381 = vmatprep.subr.bf16.mxu1 %v2229_v19 }
 0x35d   : > { %3382 = vmatpush1.bf16.msra.mxu1 %v2228_v17  ;;  %v9580_v17 = vld [vmem:[#allocation6 + $0x160] ss:$16 sps:$4 sm:$0xff]  }
 0x35e   : > { %v2079_v23 = vpop.f32.mrb[84].mxu0 }
 0x35f   : > { %v2081_v24 = vpop.f32.mrb[85].mxu0 }
 0x360   : > { %v2083_v25 = vpop.f32.mrb[86].mxu0  ;;  %3263 = vmatmul.mubr.bf16.gmra.mrb[20].mxu1 %v9479_v20  ;;  %3103 = vmatmul.mubr.bf16.gmra.mrb[148].mxu0 %v9544_v21 }
 0x361   : > { %v2230_v27 = vpack.c.bf16 %v2083_v25, %v2079_v23  ;;  %v2085_v28 = vpop.f32.mrb[87].mxu0  ;;  %3272 = vmatprep.mubr.bf16.mxu1 %v9480_v22  ;;  %3112 = vmatprep.mubr.bf16.mxu0 %v9546_v26  ;;  %v9582_v22 = vld [vmem:[#allocation6 + $0x184] ss:$16 sps:$4 sm:$0xff]   ;;  %v9500_v26 = vld [vmem:[#allocation6 + $0x380] ss:$16 sps:$4 sm:$0xff]  }
 0x362   : > { %v2231_v29 = vpack.c.bf16 %v2085_v28, %v2081_v24  ;;  %v9501_v28 = vld [vmem:[#allocation6 + $0x3a4] ss:$16 sps:$4 sm:$0xff]  }
 0x364   : > { %3383 = vmatprep.subr.bf16.mxu1 %v2231_v29 }
 0x365   : > { %3384 = vmatpush1.bf16.msra.mxu1 %v2230_v27  ;;  %v9586_v27 = vld [vmem:[#allocation6 + $0x180] ss:$16 sps:$4 sm:$0xff]  }
 0x366   : > { %v2089_v33 = vpop.f32.mrb[88].mxu0 }
 0x367   : > { %v2091_v34 = vpop.f32.mrb[89].mxu0 }
 0x368   : > { %v2093_v35 = vpop.f32.mrb[90].mxu0  ;;  %3273 = vmatmul.mubr.bf16.gmra.mrb[24].mxu1 %v9482_v30  ;;  %3113 = vmatmul.mubr.bf16.gmra.mrb[152].mxu0 %v9550_v31 }
 0x369   : > { %v2232_v37 = vpack.c.bf16 %v2093_v35, %v2089_v33  ;;  %v2095_v38 = vpop.f32.mrb[91].mxu0  ;;  %3282 = vmatprep.mubr.bf16.mxu1 %v9483_v32  ;;  %3122 = vmatprep.mubr.bf16.mxu0 %v9552_v36  ;;  %v9588_v32 = vld [vmem:[#allocation6 + $0x1a4] ss:$16 sps:$4 sm:$0xff]   ;;  %v9503_v36 = vld [vmem:[#allocation6 + $0x3a0] ss:$16 sps:$4 sm:$0xff]  }
 0x36a   : > { %v2233_v39 = vpack.c.bf16 %v2095_v38, %v2091_v34  ;;  %v9504_v38 = vld [vmem:[#allocation6 + $0x3c4] ss:$16 sps:$4 sm:$0xff]  }
 0x36c   : > { %3385 = vmatprep.subr.bf16.mxu1 %v2233_v39 }
 0x36d   : > { %3386 = vmatpush1.bf16.msra.mxu1 %v2232_v37  ;;  %v9592_v37 = vld [vmem:[#allocation6 + $0x1a0] ss:$16 sps:$4 sm:$0xff]  }
 0x36e   : > { %v2099_v43 = vpop.f32.mrb[92].mxu0 }
 0x36f   : > { %v2101_v44 = vpop.f32.mrb[93].mxu0 }
 0x370   : > { %v2103_v45 = vpop.f32.mrb[94].mxu0  ;;  %3283 = vmatmul.mubr.bf16.gmra.mrb[28].mxu1 %v9485_v40  ;;  %3123 = vmatmul.mubr.bf16.gmra.mrb[156].mxu0 %v9556_v41 }
 0x371   : > { %v2234_v47 = vpack.c.bf16 %v2103_v45, %v2099_v43  ;;  %v2105_v48 = vpop.f32.mrb[95].mxu0  ;;  %3292 = vmatprep.mubr.bf16.mxu1 %v9486_v42  ;;  %3132 = vmatprep.mubr.bf16.mxu0 %v9558_v46  ;;  %v9594_v42 = vld [vmem:[#allocation6 + $0x1c4] ss:$16 sps:$4 sm:$0xff]   ;;  %v9506_v46 = vld [vmem:[#allocation6 + $0x3c0] ss:$16 sps:$4 sm:$0xff]  }
 0x372   : > { %v2235_v49 = vpack.c.bf16 %v2105_v48, %v2101_v44  ;;  %v9507_v48 = vld [vmem:[#allocation6 + $0x3e4] ss:$16 sps:$4 sm:$0xff]  }
 0x374   : > { %3387 = vmatprep.subr.bf16.mxu1 %v2235_v49 }
 0x375   : > { %3388 = vmatpush1.bf16.msra.mxu1 %v2234_v47  ;;  %v9598_v47 = vld [vmem:[#allocation6 + $0x1c0] ss:$16 sps:$4 sm:$0xff]  }
 0x376   : > { %v2109_v53 = vpop.f32.mrb[96].mxu0 }
 0x377   : > { %v2111_v54 = vpop.f32.mrb[97].mxu0 }
 0x378   : > { %v2113_v55 = vpop.f32.mrb[98].mxu0  ;;  %3293 = vmatmul.mubr.bf16.gmra.mrb[32].mxu1 %v9488_v50  ;;  %3133 = vmatmul.mubr.bf16.gmra.mrb[160].mxu0 %v9562_v51 }
 0x379   : > { %v2236_v57 = vpack.c.bf16 %v2113_v55, %v2109_v53  ;;  %v2115_v58 = vpop.f32.mrb[99].mxu0  ;;  %3302 = vmatprep.mubr.bf16.mxu1 %v9489_v52  ;;  %3142 = vmatprep.mubr.bf16.mxu0 %v9564_v56  ;;  %v9600_v52 = vld [vmem:[#allocation6 + $0x1e4] ss:$16 sps:$4 sm:$0xff]   ;;  %v9509_v56 = vld [vmem:[#allocation6 + $0x3e0] ss:$16 sps:$4 sm:$0xff]  }
 0x37a   : > { %v2237_v59 = vpack.c.bf16 %v2115_v58, %v2111_v54  ;;  %v9515_v58 = vld [vmem:[#allocation6 + $0xc] ss:$16 sps:$4 sm:$0xff]  }
 0x37c   : > { %3389 = vmatprep.subr.bf16.mxu1 %v2237_v59 }
 0x37d   : > { %3390 = vmatpush1.bf16.msra.mxu1 %v2236_v57  ;;  %v9604_v57 = vld [vmem:[#allocation6 + $0x1e0] ss:$16 sps:$4 sm:$0xff]  }
 0x37e   : > { %v2119_v63 = vpop.f32.mrb[100].mxu0 }
 0x37f   : > { %v2121_v0 = vpop.f32.mrb[101].mxu0 }
 0x380   : > { %v2123_v1 = vpop.f32.mrb[102].mxu0  ;;  %3303 = vmatmul.mubr.bf16.gmra.mrb[36].mxu1 %v9491_v60  ;;  %3143 = vmatmul.mubr.bf16.gmra.mrb[164].mxu0 %v9568_v61 }
 0x381   : > { %v2238_v3 = vpack.c.bf16 %v2123_v1, %v2119_v63  ;;  %v2125_v4 = vpop.f32.mrb[103].mxu0  ;;  %3312 = vmatprep.mubr.bf16.mxu1 %v9492_v62  ;;  %3152 = vmatprep.mubr.bf16.mxu0 %v9570_v2  ;;  %v9513_v1 = vld [vmem:[#allocation6 + $0x8] ss:$16 sps:$4 sm:$0xff]   ;;  %v9518_v2 = vld [vmem:[#allocation6 + $0x2c] ss:$16 sps:$4 sm:$0xff]  }
 0x382   : > { %v2239_v5 = vpack.c.bf16 %v2125_v4, %v2121_v0  ;;  %v9524_v4 = vld [vmem:[#allocation6 + $0x4c] ss:$16 sps:$4 sm:$0xff]  }
 0x384   : > { %3391 = vmatprep.subr.bf16.mxu1 %v2239_v5  ;;  %v9527_v5 = vld [vmem:[#allocation6 + $0x48] ss:$16 sps:$4 sm:$0xff]  }
 0x385   : > { %3392 = vmatpush1.bf16.msra.mxu1 %v2238_v3  ;;  %v9521_v3 = vld [vmem:[#allocation6 + $0x28] ss:$16 sps:$4 sm:$0xff]  }
 0x386   : > { %v2129_v9 = vpop.f32.mrb[104].mxu0 }
 0x387   : > { %v2131_v10 = vpop.f32.mrb[105].mxu0 }
 0x388   : > { %v2133_v11 = vpop.f32.mrb[106].mxu0  ;;  %3313 = vmatmul.mubr.bf16.gmra.mrb[40].mxu1 %v9494_v6  ;;  %3153 = vmatmul.mubr.bf16.gmra.mrb[168].mxu0 %v9574_v7  ;;  %v9530_v6 = vld [vmem:[#allocation6 + $0x6c] ss:$16 sps:$4 sm:$0xff]   ;;  %v9533_v7 = vld [vmem:[#allocation6 + $0x68] ss:$16 sps:$4 sm:$0xff]  }
 0x389   : > { %v2240_v13 = vpack.c.bf16 %v2133_v11, %v2129_v9  ;;  %v2135_v14 = vpop.f32.mrb[107].mxu0  ;;  %3322 = vmatprep.mubr.bf16.mxu1 %v9495_v8  ;;  %3162 = vmatprep.mubr.bf16.mxu0 %v9576_v12  ;;  %v9536_v8 = vld [vmem:[#allocation6 + $0x8c] ss:$16 sps:$4 sm:$0xff]   ;;  %v9618_v9 = vld [vmem:[#allocation9] ss:$8 sps:$4 sm:$0xff]  }
 0x38a   : > { %v2241_v15 = vpack.c.bf16 %v2135_v14, %v2131_v10  ;;  %v9620_v10 = vld [vmem:[#allocation9 + $0x4] ss:$8 sps:$4 sm:$0xff]   ;;  %v9539_v11 = vld [vmem:[#allocation6 + $0x88] ss:$16 sps:$4 sm:$0xff]   ;;  %v9626_v14 = vld [vmem:[#allocation9 + $0x14] ss:$8 sps:$4 sm:$0xff]  }
 0x38b   : > { %4110 = vmatprep.subr.bf16.mxu0 %v9620_v10  ;;  %v9542_v12 = vld [vmem:[#allocation6 + $0xac] ss:$16 sps:$4 sm:$0xff]   ;;  %v9599_v10 = vld [vmem:[#allocation6 + $0x1c8] ss:$16 sps:$4 sm:$0xff]  }
 0x38c   : > { %3393 = vmatprep.subr.bf16.mxu1 %v2241_v15  ;;  %4111 = vmatpush1.bf16.msra.mxu0 %v9618_v9  ;;  %v9629_v15 = vld [vmem:[#allocation9 + $0x24] ss:$8 sps:$4 sm:$0xff]  }
 0x38d   : > { %3394 = vmatpush1.bf16.msra.mxu1 %v2240_v13  ;;  %v9624_v13 = vld [vmem:[#allocation9 + $0x10] ss:$8 sps:$4 sm:$0xff]   ;;  %4112 = vmatprep.subr.bf16.mxu0 %v9626_v14 }
 0x38e   : > { %v2139_v19 = vpop.f32.mrb[108].mxu0 }
 0x38f   : > { %v2141_v20 = vpop.f32.mrb[109].mxu0 }
 0x390   : > { %v2143_v21 = vpop.f32.mrb[110].mxu0  ;;  %3323 = vmatmul.mubr.bf16.gmra.mrb[44].mxu1 %v9497_v16  ;;  %3163 = vmatmul.mubr.bf16.gmra.mrb[172].mxu0 %v9580_v17  ;;  %v9627_v16 = vld [vmem:[#allocation9 + $0x20] ss:$8 sps:$4 sm:$0xff]  }
 0x391   : > { %v2242_v23 = vpack.c.bf16 %v2143_v21, %v2139_v19  ;;  %v2145_v24 = vpop.f32.mrb[111].mxu0  ;;  %3332 = vmatprep.mubr.bf16.mxu1 %v9498_v18  ;;  %3172 = vmatprep.mubr.bf16.mxu0 %v9582_v22  ;;  %v9545_v17 = vld [vmem:[#allocation6 + $0xa8] ss:$16 sps:$4 sm:$0xff]   ;;  %v9548_v18 = vld [vmem:[#allocation6 + $0xcc] ss:$16 sps:$4 sm:$0xff]  }
 0x392   : > { %v2243_v25 = vpack.c.bf16 %v2145_v24, %v2141_v20  ;;  %4113 = vmatpush1.bf16.msra.mxu0 %v9624_v13  ;;  %v9633_v19 = vld [vmem:[#allocation9 + $0x30] ss:$8 sps:$4 sm:$0xff]   ;;  %v9635_v20 = vld [vmem:[#allocation9 + $0x34] ss:$8 sps:$4 sm:$0xff]   ;;  %v9638_v21 = vld [vmem:[#allocation9 + $0x44] ss:$8 sps:$4 sm:$0xff]  }
 0x393   : > { %4114 = vmatprep.subr.bf16.mxu0 %v9629_v15  ;;  %v9636_v22 = vld [vmem:[#allocation9 + $0x40] ss:$8 sps:$4 sm:$0xff]   ;;  %v9554_v24 = vld [vmem:[#allocation6 + $0xec] ss:$16 sps:$4 sm:$0xff]  }
 0x394   : > { %3395 = vmatprep.subr.bf16.mxu1 %v2243_v25  ;;  %v9642_v25 = vld [vmem:[#allocation9 + $0x50] ss:$8 sps:$4 sm:$0xff]  }
 0x395   : > { %3396 = vmatpush1.bf16.msra.mxu1 %v2242_v23  ;;  %v9551_v23 = vld [vmem:[#allocation6 + $0xc8] ss:$16 sps:$4 sm:$0xff]  }
 0x396   : > { %v2149_v29 = vpop.f32.mrb[112].mxu0  ;;  %4115 = vmatpush1.bf16.msra.mxu0 %v9627_v16  ;;  %v9605_v16 = vld [vmem:[#allocation6 + $0x1e8] ss:$16 sps:$4 sm:$0xff]  }
 0x397   : > { %v2151_v30 = vpop.f32.mrb[113].mxu0  ;;  %4116 = vmatprep.subr.bf16.mxu0 %v9635_v20 }
 0x398   : > { %v2153_v31 = vpop.f32.mrb[114].mxu0  ;;  %3333 = vmatmul.mubr.bf16.gmra.mrb[48].mxu1 %v9500_v26  ;;  %3173 = vmatmul.mubr.bf16.gmra.mrb[176].mxu0 %v9586_v27  ;;  %v9644_v26 = vld [vmem:[#allocation9 + $0x54] ss:$8 sps:$4 sm:$0xff]   ;;  %v9647_v27 = vld [vmem:[#allocation9 + $0x64] ss:$8 sps:$4 sm:$0xff]  }
 0x399   : > { %v2244_v33 = vpack.c.bf16 %v2153_v31, %v2149_v29  ;;  %v2155_v34 = vpop.f32.mrb[115].mxu0  ;;  %3342 = vmatprep.mubr.bf16.mxu1 %v9501_v28  ;;  %3182 = vmatprep.mubr.bf16.mxu0 %v9588_v32  ;;  %v9645_v28 = vld [vmem:[#allocation9 + $0x60] ss:$8 sps:$4 sm:$0xff]   ;;  %v9651_v31 = vld [vmem:[#allocation9 + $0x70] ss:$8 sps:$4 sm:$0xff]  }
 0x39a   : > { %v2245_v35 = vpack.c.bf16 %v2155_v34, %v2151_v30  ;;  %4117 = vmatpush1.bf16.msra.mxu0 %v9633_v19  ;;  %v9557_v29 = vld [vmem:[#allocation6 + $0xe8] ss:$16 sps:$4 sm:$0xff]   ;;  %v9560_v30 = vld [vmem:[#allocation6 + $0x10c] ss:$16 sps:$4 sm:$0xff]  }
 0x39b   : > { %4118 = vmatprep.subr.bf16.mxu0 %v9638_v21  ;;  %v9653_v32 = vld [vmem:[#allocation9 + $0x74] ss:$8 sps:$4 sm:$0xff]   ;;  %v9654_v34 = vld [vmem:[#allocation9 + $0x80] ss:$8 sps:$4 sm:$0xff]  }
 0x39c   : > { %3397 = vmatprep.subr.bf16.mxu1 %v2245_v35  ;;  %v9563_v35 = vld [vmem:[#allocation6 + $0x108] ss:$16 sps:$4 sm:$0xff]  }
 0x39d   : > { %3398 = vmatpush1.bf16.msra.mxu1 %v2244_v33  ;;  %v9656_v33 = vld [vmem:[#allocation9 + $0x84] ss:$8 sps:$4 sm:$0xff]  }
 0x39e   : > { %v2159_v39 = vpop.f32.mrb[116].mxu0  ;;  %4119 = vmatpush1.bf16.msra.mxu0 %v9636_v22  ;;  %v9608_v22 = vld [vmem:[#allocation6 + $0x208] ss:$16 sps:$4 sm:$0xff]  }
 0x39f   : > { %v2161_v40 = vpop.f32.mrb[117].mxu0  ;;  %4120 = vmatprep.subr.bf16.mxu0 %v9644_v26 }
 0x3a0   : > { %v2163_v41 = vpop.f32.mrb[118].mxu0  ;;  %3343 = vmatmul.mubr.bf16.gmra.mrb[52].mxu1 %v9503_v36  ;;  %3183 = vmatmul.mubr.bf16.gmra.mrb[180].mxu0 %v9592_v37  ;;  %v9566_v36 = vld [vmem:[#allocation6 + $0x12c] ss:$16 sps:$4 sm:$0xff]   ;;  %v9660_v37 = vld [vmem:[#allocation9 + $0x90] ss:$8 sps:$4 sm:$0xff]  }
 0x3a1   : > { %v2246_v43 = vpack.c.bf16 %v2163_v41, %v2159_v39  ;;  %v2165_v44 = vpop.f32.mrb[119].mxu0  ;;  %3352 = vmatprep.mubr.bf16.mxu1 %v9504_v38  ;;  %3192 = vmatprep.mubr.bf16.mxu0 %v9594_v42  ;;  %v9662_v38 = vld [vmem:[#allocation9 + $0x94] ss:$8 sps:$4 sm:$0xff]   ;;  %v9665_v39 = vld [vmem:[#allocation9 + $0xa4] ss:$8 sps:$4 sm:$0xff]  }
 0x3a2   : > { %v2247_v45 = vpack.c.bf16 %v2165_v44, %v2161_v40  ;;  %4121 = vmatpush1.bf16.msra.mxu0 %v9642_v25  ;;  %v9663_v40 = vld [vmem:[#allocation9 + $0xa0] ss:$8 sps:$4 sm:$0xff]   ;;  %v9572_v42 = vld [vmem:[#allocation6 + $0x14c] ss:$16 sps:$4 sm:$0xff]  }
 0x3a3   : > { %4122 = vmatprep.subr.bf16.mxu0 %v9647_v27  ;;  %v9569_v41 = vld [vmem:[#allocation6 + $0x128] ss:$16 sps:$4 sm:$0xff]   ;;  %v9671_v44 = vld [vmem:[#allocation9 + $0xb4] ss:$8 sps:$4 sm:$0xff]  }
 0x3a4   : > { %3399 = vmatprep.subr.bf16.mxu1 %v2247_v45  ;;  %v9674_v45 = vld [vmem:[#allocation9 + $0xc4] ss:$8 sps:$4 sm:$0xff]  }
 0x3a5   : > { %3400 = vmatpush1.bf16.msra.mxu1 %v2246_v43  ;;  %v9669_v43 = vld [vmem:[#allocation9 + $0xb0] ss:$8 sps:$4 sm:$0xff]  }
 0x3a6   : > { %v2169_v49 = vpop.f32.mrb[120].mxu0  ;;  %4123 = vmatpush1.bf16.msra.mxu0 %v9645_v28  ;;  %v9611_v28 = vld [vmem:[#allocation6 + $0x228] ss:$16 sps:$4 sm:$0xff]  }
 0x3a7   : > { %v2171_v50 = vpop.f32.mrb[121].mxu0  ;;  %4124 = vmatprep.subr.bf16.mxu0 %v9653_v32 }
 0x3a8   : > { %v2173_v51 = vpop.f32.mrb[122].mxu0  ;;  %3353 = vmatmul.mubr.bf16.gmra.mrb[56].mxu1 %v9506_v46  ;;  %3193 = vmatmul.mubr.bf16.gmra.mrb[184].mxu0 %v9598_v47  ;;  %v9672_v46 = vld [vmem:[#allocation9 + $0xc0] ss:$8 sps:$4 sm:$0xff]  }
 0x3a9   : > { %v2248_v53 = vpack.c.bf16 %v2173_v51, %v2169_v49  ;;  %v2175_v54 = vpop.f32.mrb[123].mxu0  ;;  %3362 = vmatprep.mubr.bf16.mxu1 %v9507_v48  ;;  %3202 = vmatprep.mubr.bf16.mxu0 %v9600_v52  ;;  %v9575_v47 = vld [vmem:[#allocation6 + $0x148] ss:$16 sps:$4 sm:$0xff]   ;;  %v9578_v48 = vld [vmem:[#allocation6 + $0x16c] ss:$16 sps:$4 sm:$0xff]  }
 0x3aa   : > { %v2249_v55 = vpack.c.bf16 %v2175_v54, %v2171_v50  ;;  %4125 = vmatpush1.bf16.msra.mxu0 %v9651_v31  ;;  %v9678_v49 = vld [vmem:[#allocation9 + $0xd0] ss:$8 sps:$4 sm:$0xff]   ;;  %v9680_v50 = vld [vmem:[#allocation9 + $0xd4] ss:$8 sps:$4 sm:$0xff]   ;;  %v9683_v54 = vld [vmem:[#allocation9 + $0xe4] ss:$8 sps:$4 sm:$0xff]  }
 0x3ab   : > { %4126 = vmatprep.subr.bf16.mxu0 %v9656_v33  ;;  %v9581_v52 = vld [vmem:[#allocation6 + $0x168] ss:$16 sps:$4 sm:$0xff]  }
 0x3ac   : > { %3401 = vmatprep.subr.bf16.mxu1 %v2249_v55  ;;  %v9584_v55 = vld [vmem:[#allocation6 + $0x18c] ss:$16 sps:$4 sm:$0xff]  }
 0x3ad   : > { %3402 = vmatpush1.bf16.msra.mxu1 %v2248_v53 }
 0x3ae   : > { %v2179_v59 = vpop.f32.mrb[124].mxu0  ;;  %4127 = vmatpush1.bf16.msra.mxu0 %v9654_v34  ;;  %v9614_v34 = vld [vmem:[#allocation6 + $0x248] ss:$16 sps:$4 sm:$0xff]  }
 0x3af   : > { %v2181_v60 = vpop.f32.mrb[125].mxu0  ;;  %4128 = vmatprep.subr.bf16.mxu0 %v9662_v38 }
 0x3b0   : > { %v2183_v61 = vpop.f32.mrb[126].mxu0  ;;  %3363 = vmatmul.mubr.bf16.gmra.mrb[60].mxu1 %v9509_v56  ;;  %3203 = vmatmul.mubr.bf16.gmra.mrb[188].mxu0 %v9604_v57  ;;  %v9681_v57 = vld [vmem:[#allocation9 + $0xe0] ss:$8 sps:$4 sm:$0xff]  }
 0x3b1   : > { %v2250_v62 = vpack.c.bf16 %v2183_v61, %v2179_v59  ;;  %v2185_v63 = vpop.f32.mrb[127].mxu0  ;;  %3405 = vmatprep.mubr.bf16.mxu1 %v9515_v58  ;;  %v9689_v59 = vld [vmem:[#allocation9 + $0xf4] ss:$8 sps:$4 sm:$0xff]  }
 0x3b2   : > { %v2251_v0 = vpack.c.bf16 %v2185_v63, %v2181_v60  ;;  %4129 = vmatpush1.bf16.msra.mxu0 %v9660_v37  ;;  %v9687_v60 = vld [vmem:[#allocation9 + $0xf0] ss:$8 sps:$4 sm:$0xff]  }
 0x3b3   : > { %4130 = vmatprep.subr.bf16.mxu0 %v9665_v39 }
 0x3b4   : > { %3403 = vmatprep.subr.bf16.mxu1 %v2251_v0  ;;  %v9590_v0 = vld [vmem:[#allocation6 + $0x1ac] ss:$16 sps:$4 sm:$0xff]  }
 0x3b5   : > { %3404 = vmatpush1.bf16.msra.mxu1 %v2250_v62  ;;  %v9587_v62 = vld [vmem:[#allocation6 + $0x188] ss:$16 sps:$4 sm:$0xff]  }
 0x3b6   : > { %4131 = vmatpush1.bf16.msra.mxu0 %v9663_v40  ;;  %v9617_v40 = vld [vmem:[#allocation6 + $0x268] ss:$16 sps:$4 sm:$0xff]  }
 0x3b7   : > { %4132 = vmatprep.subr.bf16.mxu0 %v9671_v44 }
 0x3b8   : > { %3406 = vmatmul.mubr.bf16.vlgmr.msra.gmra.mrb[64].mxu1 %v9513_v1 }
 0x3b9   : > { %3415 = vmatprep.mubr.bf16.mxu1 %v9518_v2 }
 0x3ba   : > { %4133 = vmatpush1.bf16.msra.mxu0 %v9669_v43 }
 0x3bb   : > { %4134 = vmatprep.subr.bf16.mxu0 %v9674_v45 }
 0x3be   : > { %4135 = vmatpush1.bf16.msra.mxu0 %v9672_v46  ;;  %v9623_v46 = vld [vmem:[#allocation6 + $0x288] ss:$16 sps:$4 sm:$0xff]  }
 0x3bf   : > { %4136 = vmatprep.subr.bf16.mxu0 %v9680_v50 }
 0x3c0   : > { %3416 = vmatmul.mubr.bf16.gmra.mrb[68].mxu1 %v9521_v3 }
 0x3c1   : > { %3425 = vmatprep.mubr.bf16.mxu1 %v9524_v4  ;;  %v9593_v4 = vld [vmem:[#allocation6 + $0x1a8] ss:$16 sps:$4 sm:$0xff]  }
 0x3c2   : > { %4137 = vmatpush1.bf16.msra.mxu0 %v9678_v49 }
 0x3c3   : > { %4138 = vmatprep.subr.bf16.mxu0 %v9683_v54  ;;  %v9632_v54 = vld [vmem:[#allocation6 + $0x2a8] ss:$16 sps:$4 sm:$0xff]  }
 0x3c6   : > { %4139 = vmatpush1.bf16.msra.mxu0 %v9681_v57  ;;  %v9639_v57 = vld [vmem:[#allocation6 + $0x2cc] ss:$16 sps:$4 sm:$0xff]  }
 0x3c7   : > { %4140 = vmatprep.subr.bf16.mxu0 %v9689_v59 }
 0x3c8   : > { %3426 = vmatmul.mubr.bf16.gmra.mrb[72].mxu1 %v9527_v5 }
 0x3c9   : > { %3435 = vmatprep.mubr.bf16.mxu1 %v9530_v6  ;;  %v9596_v6 = vld [vmem:[#allocation6 + $0x1cc] ss:$16 sps:$4 sm:$0xff]  }
 0x3ca   : > { %4141 = vmatpush1.bf16.msra.mxu0 %v9687_v60 }
 0x3d0   : > { %3436 = vmatmul.mubr.bf16.gmra.mrb[76].mxu1 %v9533_v7 }
 0x3d1   : > { %3445 = vmatprep.mubr.bf16.mxu1 %v9536_v8 }
 0x3d8   : > { %3446 = vmatmul.mubr.bf16.gmra.mrb[80].mxu1 %v9539_v11 }
 0x3d9   : > { %3455 = vmatprep.mubr.bf16.mxu1 %v9542_v12  ;;  %v9602_v12 = vld [vmem:[#allocation6 + $0x1ec] ss:$16 sps:$4 sm:$0xff]  }
 0x3e0   : > { %3456 = vmatmul.mubr.bf16.gmra.mrb[84].mxu1 %v9545_v17 }
 0x3e1   : > { %3465 = vmatprep.mubr.bf16.mxu1 %v9548_v18  ;;  %v9606_v18 = vld [vmem:[#allocation6 + $0x20c] ss:$16 sps:$4 sm:$0xff]  }
 0x3e8   : > { %3466 = vmatmul.mubr.bf16.gmra.mrb[88].mxu1 %v9551_v23 }
 0x3e9   : > { %3475 = vmatprep.mubr.bf16.mxu1 %v9554_v24  ;;  %v9609_v24 = vld [vmem:[#allocation6 + $0x22c] ss:$16 sps:$4 sm:$0xff]  }
 0x3f0   : > { %3476 = vmatmul.mubr.bf16.gmra.mrb[92].mxu1 %v9557_v29 }
 0x3f1   : > { %3485 = vmatprep.mubr.bf16.mxu1 %v9560_v30  ;;  %v9612_v30 = vld [vmem:[#allocation6 + $0x24c] ss:$16 sps:$4 sm:$0xff]  }
 0x3f8   : > { %3486 = vmatmul.mubr.bf16.gmra.mrb[96].mxu1 %v9563_v35 }
 0x3f9   : > { %3495 = vmatprep.mubr.bf16.mxu1 %v9566_v36  ;;  %v9615_v36 = vld [vmem:[#allocation6 + $0x26c] ss:$16 sps:$4 sm:$0xff]  }
 0x400   : > { %3496 = vmatmul.mubr.bf16.gmra.mrb[100].mxu1 %v9569_v41 }
 0x401   : > { %3505 = vmatprep.mubr.bf16.mxu1 %v9572_v42  ;;  %v9621_v42 = vld [vmem:[#allocation6 + $0x28c] ss:$16 sps:$4 sm:$0xff]  }
 0x408   : > { %3506 = vmatmul.mubr.bf16.gmra.mrb[104].mxu1 %v9575_v47 }
 0x409   : > { %3515 = vmatprep.mubr.bf16.mxu1 %v9578_v48  ;;  %v9630_v48 = vld [vmem:[#allocation6 + $0x2ac] ss:$16 sps:$4 sm:$0xff]  }
 0x40b   : > { %v10996_v51 = vpop.f32.mrb[128].mxu0 }
 0x40c   : > { %v10998_v53 = vpop.f32.mrb[129].mxu0 }
 0x40d   : > { %v11000_v56 = vpop.f32.mrb[130].mxu0 }
 0x40e   : > { %v11002_v58 = vpop.f32.mrb[131].mxu0 }
 0x410   : > { %3516 = vmatmul.mubr.bf16.gmra.mrb[108].mxu1 %v9581_v52 }
 0x411   : > { %3525 = vmatprep.mubr.bf16.mxu1 %v9584_v55 }
 0x413   : > { %v11004_v61 = vpop.f32.mrb[132].mxu0 }
 0x414   : > { %v11006_v63 = vpop.f32.mrb[133].mxu0 }
 0x415   : > { %v11008_v1 = vpop.f32.mrb[134].mxu0 }
 0x416   : > { %v11010_v2 = vpop.f32.mrb[135].mxu0 }
 0x418   : > { %3526 = vmatmul.mubr.bf16.gmra.mrb[112].mxu1 %v9587_v62 }
 0x419   : > { %3535 = vmatprep.mubr.bf16.mxu1 %v9590_v0  ;;  %v9641_v0 = vld [vmem:[#allocation6 + $0x2c8] ss:$16 sps:$4 sm:$0xff]  }
 0x41b   : > { %v11012_v3 = vpop.f32.mrb[136].mxu0 }
 0x41c   : > { %v11014_v5 = vpop.f32.mrb[137].mxu0 }
 0x41d   : > { %v11016_v7 = vpop.f32.mrb[138].mxu0 }
 0x41e   : > { %v11018_v8 = vpop.f32.mrb[139].mxu0 }
 0x420   : > { %3536 = vmatmul.mubr.bf16.gmra.mrb[116].mxu1 %v9593_v4 }
 0x421   : > { %3545 = vmatprep.mubr.bf16.mxu1 %v9596_v6  ;;  %v9648_v6 = vld [vmem:[#allocation6 + $0x2ec] ss:$16 sps:$4 sm:$0xff]  }
 0x423   : > { %v11020_v9 = vpop.f32.mrb[140].mxu0 }
 0x424   : > { %v11022_v11 = vpop.f32.mrb[141].mxu0 }
 0x425   : > { %v11024_v13 = vpop.f32.mrb[142].mxu0 }
 0x426   : > { %v11026_v14 = vpop.f32.mrb[143].mxu0 }
 0x428   : > { %3546 = vmatmul.mubr.bf16.gmra.mrb[120].mxu1 %v9599_v10 }
 0x429   : > { %3555 = vmatprep.mubr.bf16.mxu1 %v9602_v12 }
 0x42b   : > { %v11028_v15 = vpop.f32.mrb[144].mxu0 }
 0x42c   : > { %v11030_v17 = vpop.f32.mrb[145].mxu0 }
 0x42d   : > { %v11032_v19 = vpop.f32.mrb[146].mxu0 }
 0x42e   : > { %v11034_v20 = vpop.f32.mrb[147].mxu0 }
 0x430   : > { %3556 = vmatmul.mubr.bf16.gmra.mrb[124].mxu1 %v9605_v16 }
 0x431   : > { %3565 = vmatprep.mubr.bf16.mxu1 %v9606_v18  ;;  %v9650_v18 = vld [vmem:[#allocation6 + $0x2e8] ss:$16 sps:$4 sm:$0xff]  }
 0x433   : > { %v11036_v21 = vpop.f32.mrb[148].mxu0 }
 0x434   : > { %v11038_v23 = vpop.f32.mrb[149].mxu0 }
 0x435   : > { %v11040_v25 = vpop.f32.mrb[150].mxu0 }
 0x436   : > { %v11042_v26 = vpop.f32.mrb[151].mxu0 }
 0x438   : > { %3566 = vmatmul.mubr.bf16.gmra.mrb[0].mxu1 %v9608_v22 }
 0x439   : > { %3575 = vmatprep.mubr.bf16.mxu1 %v9609_v24  ;;  %v9657_v24 = vld [vmem:[#allocation6 + $0x30c] ss:$16 sps:$4 sm:$0xff]  }
 0x43b   : > { %v11044_v27 = vpop.f32.mrb[152].mxu0 }
 0x43c   : > { %v11046_v29 = vpop.f32.mrb[153].mxu0 }
 0x43d   : > { %v11048_v31 = vpop.f32.mrb[154].mxu0 }
 0x43e   : > { %v11050_v32 = vpop.f32.mrb[155].mxu0 }
 0x440   : > { %3576 = vmatmul.mubr.bf16.gmra.mrb[4].mxu1 %v9611_v28 }
 0x441   : > { %3585 = vmatprep.mubr.bf16.mxu1 %v9612_v30 }
 0x443   : > { %v11052_v33 = vpop.f32.mrb[156].mxu0 }
 0x444   : > { %v11054_v35 = vpop.f32.mrb[157].mxu0 }
 0x445   : > { %v11056_v37 = vpop.f32.mrb[158].mxu0 }
 0x446   : > { %v11058_v38 = vpop.f32.mrb[159].mxu0 }
 0x448   : > { %3586 = vmatmul.mubr.bf16.gmra.mrb[8].mxu1 %v9614_v34 }
 0x449   : > { %3595 = vmatprep.mubr.bf16.mxu1 %v9615_v36  ;;  %v9659_v36 = vld [vmem:[#allocation6 + $0x308] ss:$16 sps:$4 sm:$0xff]  }
 0x44b   : > { %v11060_v39 = vpop.f32.mrb[160].mxu0 }
 0x44c   : > { %v11062_v41 = vpop.f32.mrb[161].mxu0 }
 0x44d   : > { %v11064_v43 = vpop.f32.mrb[162].mxu0 }
 0x44e   : > { %v11066_v44 = vpop.f32.mrb[163].mxu0 }
 0x450   : > { %3596 = vmatmul.mubr.bf16.gmra.mrb[12].mxu1 %v9617_v40 }
 0x451   : > { %3605 = vmatprep.mubr.bf16.mxu1 %v9621_v42  ;;  %v9666_v42 = vld [vmem:[#allocation6 + $0x32c] ss:$16 sps:$4 sm:$0xff]  }
 0x453   : > { %v11068_v45 = vpop.f32.mrb[164].mxu0 }
 0x454   : > { %v11070_v47 = vpop.f32.mrb[165].mxu0 }
 0x455   : > { %v11072_v49 = vpop.f32.mrb[166].mxu0 }
 0x456   : > { %v11074_v50 = vpop.f32.mrb[167].mxu0 }
 0x458   : > { %3606 = vmatmul.mubr.bf16.gmra.mrb[16].mxu1 %v9623_v46 }
 0x459   : > { %3615 = vmatprep.mubr.bf16.mxu1 %v9630_v48 }
 0x45b   : > { %v11076_v52 = vpop.f32.mrb[168].mxu0 }
 0x45c   : > { %v11078_v55 = vpop.f32.mrb[169].mxu0 }
 0x45d   : > { %v11080_v59 = vpop.f32.mrb[170].mxu0 }
 0x45e   : > { %v11082_v60 = vpop.f32.mrb[171].mxu0 }
 0x460   : > { %3616 = vmatmul.mubr.bf16.gmra.mrb[20].mxu1 %v9632_v54 }
 0x461   : > { %3625 = vmatprep.mubr.bf16.mxu1 %v9639_v57  ;;  %v9668_v57 = vld [vmem:[#allocation6 + $0x328] ss:$16 sps:$4 sm:$0xff]  }
 0x463   : > { %v11084_v62 = vpop.f32.mrb[172].mxu0 }
 0x464   : > { %v11086_v4 = vpop.f32.mrb[173].mxu0 }
 0x465   : > { %v11088_v10 = vpop.f32.mrb[174].mxu0 }
 0x466   : > { %11965 = vst [vmem:[#allocation25_spill] sm:$0xff] %v11088_v10  ;;  %v11090_v12 = vpop.f32.mrb[175].mxu0 }
 0x467   : > { %11966 = vst [vmem:[#allocation26_spill] sm:$0xff] %v11090_v12 }
 0x468   : > { %3626 = vmatmul.mubr.bf16.gmra.mrb[24].mxu1 %v9641_v0 }
 0x469   : > { %3635 = vmatprep.mubr.bf16.mxu1 %v9648_v6  ;;  %v9675_v6 = vld [vmem:[#allocation6 + $0x34c] ss:$16 sps:$4 sm:$0xff]  }
 0x46b   : > { %v11092_v16 = vpop.f32.mrb[176].mxu0 }
 0x46c   : > { %11967 = vst [vmem:[#allocation27_spill] sm:$0xff] %v11092_v16  ;;  %v11094_v22 = vpop.f32.mrb[177].mxu0 }
 0x46d   : > { %11968 = vst [vmem:[#allocation28_spill] sm:$0xff] %v11094_v22  ;;  %v11096_v28 = vpop.f32.mrb[178].mxu0 }
 0x46e   : > { %11969 = vst [vmem:[#allocation29_spill] sm:$0xff] %v11096_v28  ;;  %v11098_v30 = vpop.f32.mrb[179].mxu0 }
 0x46f   : > { %11970 = vst [vmem:[#allocation30_spill] sm:$0xff] %v11098_v30  ;;  %v9686_v30 = vld [vmem:[#allocation6 + $0x368] ss:$16 sps:$4 sm:$0xff]  }
 0x470   : > { %3636 = vmatmul.mubr.bf16.gmra.mrb[28].mxu1 %v9650_v18 }
 0x471   : > { %3645 = vmatprep.mubr.bf16.mxu1 %v9657_v24 }
 0x473   : > { %v11100_v34 = vpop.f32.mrb[180].mxu0 }
 0x474   : > { %11971 = vst [vmem:[#allocation31_spill] sm:$0xff] %v11100_v34  ;;  %v11102_v40 = vpop.f32.mrb[181].mxu0  ;;  %v9677_v34 = vld [vmem:[#allocation6 + $0x348] ss:$16 sps:$4 sm:$0xff]  }
 0x475   : > { %11972 = vst [vmem:[#allocation32_spill] sm:$0xff] %v11102_v40  ;;  %v11104_v46 = vpop.f32.mrb[182].mxu0 }
 0x476   : > { %11973 = vst [vmem:[#allocation33_spill] sm:$0xff] %v11104_v46  ;;  %v11106_v48 = vpop.f32.mrb[183].mxu0 }
 0x477   : > { %11974 = vst [vmem:[#allocation34_spill] sm:$0xff] %v11106_v48  ;;  %v9684_v48 = vld [vmem:[#allocation6 + $0x36c] ss:$16 sps:$4 sm:$0xff]  }
 0x478   : > { %3646 = vmatmul.mubr.bf16.gmra.mrb[32].mxu1 %v9659_v36 }
 0x479   : > { %3655 = vmatprep.mubr.bf16.mxu1 %v9666_v42 }
 0x47b   : > { %v11108_v54 = vpop.f32.mrb[184].mxu0 }
 0x47c   : > { %11975 = vst [vmem:[#allocation35_spill] sm:$0xff] %v11108_v54  ;;  %v11110_v0 = vpop.f32.mrb[185].mxu0 }
 0x47d   : > { %11976 = vst [vmem:[#allocation36_spill] sm:$0xff] %v11110_v0  ;;  %v11112_v18 = vpop.f32.mrb[186].mxu0 }
 0x47e   : > { %11977 = vst [vmem:[#allocation37_spill] sm:$0xff] %v11112_v18  ;;  %v11114_v24 = vpop.f32.mrb[187].mxu0 }
 0x47f   : > { %11978 = vst [vmem:[#allocation38_spill] sm:$0xff] %v11114_v24  ;;  %v9690_v24 = vld [vmem:[#allocation6 + $0x38c] ss:$16 sps:$4 sm:$0xff]  }
 0x480   : > { %3656 = vmatmul.mubr.bf16.gmra.mrb[36].mxu1 %v9668_v57 }
 0x481   : > { %3665 = vmatprep.mubr.bf16.mxu1 %v9675_v6 }
 0x483   : > { %v11116_v40 = vpop.f32.mrb[188].mxu0 }
 0x484   : > { %11979 = vst [vmem:[#allocation39_spill] sm:$0xff] %v11116_v40  ;;  %v11118_v46 = vpop.f32.mrb[189].mxu0 }
 0x485   : > { %11980 = vst [vmem:[#allocation40_spill] sm:$0xff] %v11118_v46  ;;  %v11120_v36 = vpop.f32.mrb[190].mxu0 }
 0x486   : > { %11981 = vst [vmem:[#allocation41_spill] sm:$0xff] %v11120_v36  ;;  %v11122_v42 = vpop.f32.mrb[191].mxu0 }
 0x487   : > { %11982 = vst [vmem:[#allocation42_spill] sm:$0xff] %v11122_v42 }
 0x488   : > { %3666 = vmatmul.mubr.bf16.gmra.mrb[40].mxu1 %v9677_v34 }
 0x489   : > { %3675 = vmatprep.mubr.bf16.mxu1 %v9684_v48 }
 0x48b   : > { %v3407_v0 = vpop.f32.mrb[64].mxu1 }
 0x48c   : > { %v3408_v54 = vadd.f32 %v3407_v0, %v10996_v51  ;;  %v3409_v18 = vpop.f32.mrb[65].mxu1 }
 0x48d   : > { %v3410_v57 = vadd.f32 %v3409_v18, %v10998_v53  ;;  %v3411_v6 = vpop.f32.mrb[66].mxu1  ;;  %v9692_v53 = vld [vmem:[#allocation6 + $0x388] ss:$16 sps:$4 sm:$0xff]  }
 0x48e   : > { %v3412_v40 = vadd.f32 %v3411_v6, %v11000_v56  ;;  %v3413_v28 = vpop.f32.mrb[67].mxu1  ;;  %v3726_v22 = vmax.f32 %v3408_v54, 0.0  ;;  %v9693_v56 = vld [vmem:[#allocation6 + $0x3ac] ss:$16 sps:$4 sm:$0xff]  }
 0x48f   : > { %v3414_v46 = vadd.f32 %v3413_v28, %v11002_v58  ;;  %v3727_v42 = vmax.f32 %v3410_v57, 0.0 }
 0x490   : > { %v3728_v36 = vmax.f32 %v3412_v40, 0.0  ;;  %3676 = vmatmul.mubr.bf16.gmra.mrb[44].mxu1 %v9686_v30 }
 0x491   : > { %v3729_v34 = vmax.f32 %v3414_v46, 0.0  ;;  %3685 = vmatprep.mubr.bf16.mxu1 %v9690_v24 }
 0x492   : > { %v3854_v48 = vpack.c.bf16 %v3728_v36, %v3726_v22 }
 0x493   : > { %v3855_v16 = vpack.c.bf16 %v3729_v34, %v3727_v42  ;;  %v3417_v51 = vpop.f32.mrb[68].mxu1 }
 0x494   : > { %v3418_v0 = vadd.f32 %v3417_v51, %v11004_v61  ;;  %v3419_v12 = vpop.f32.mrb[69].mxu1 }
 0x495   : > { %v3420_v18 = vadd.f32 %v3419_v12, %v11006_v63  ;;  %v3421_v10 = vpop.f32.mrb[70].mxu1  ;;  %4142 = vmatprep.mubr.bf16.mxu0 %v3855_v16  ;;  %v9695_v16 = vld [vmem:[#allocation6 + $0x3a8] ss:$16 sps:$4 sm:$0xff]  }
 0x496   : > { %v3422_v58 = vadd.f32 %v3421_v10, %v11008_v1  ;;  %v3423_v28 = vpop.f32.mrb[71].mxu1  ;;  %4143 = vmatmul.mubr.bf16.vlgmr.msra.gmra.mrb[192].mxu0 %v3854_v48  ;;  %v3730_v40 = vmax.f32 %v3418_v0, 0.0  ;;  %v9696_v10 = vld [vmem:[#allocation6 + $0x3cc] ss:$16 sps:$4 sm:$0xff]  }
 0x497   : > { %v3424_v30 = vadd.f32 %v3423_v28, %v11010_v2  ;;  %v3731_v22 = vmax.f32 %v3420_v18, 0.0 }
 0x498   : > { %v3732_v46 = vmax.f32 %v3422_v58, 0.0  ;;  %3686 = vmatmul.mubr.bf16.gmra.mrb[48].mxu1 %v9692_v53  ;;  %v9698_v58 = vld [vmem:[#allocation6 + $0x3c8] ss:$16 sps:$4 sm:$0xff]  }
 0x499   : > { %v3733_v54 = vmax.f32 %v3424_v30, 0.0  ;;  %3695 = vmatprep.mubr.bf16.mxu1 %v9693_v56  ;;  %v9699_v30 = vld [vmem:[#allocation6 + $0x3ec] ss:$16 sps:$4 sm:$0xff]  }
 0x49a   : > { %v3856_v61 = vpack.c.bf16 %v3732_v46, %v3730_v40 }
 0x49b   : > { %v3857_v24 = vpack.c.bf16 %v3733_v54, %v3731_v22  ;;  %v3427_v36 = vpop.f32.mrb[72].mxu1 }
 0x49c   : > { %v3428_v63 = vadd.f32 %v3427_v36, %v11012_v3  ;;  %v3429_v12 = vpop.f32.mrb[73].mxu1 }
 0x49d   : > { %v3430_v42 = vadd.f32 %v3429_v12, %v11014_v5  ;;  %v3431_v1 = vpop.f32.mrb[74].mxu1  ;;  %4152 = vmatprep.mubr.bf16.mxu0 %v3857_v24 }
 0x49e   : > { %v3432_v2 = vadd.f32 %v3431_v1, %v11016_v7  ;;  %v3433_v57 = vpop.f32.mrb[75].mxu1  ;;  %4153 = vmatmul.mubr.bf16.gmra.mrb[196].mxu0 %v3856_v61  ;;  %v3734_v34 = vmax.f32 %v3428_v63, 0.0 }
 0x49f   : > { %v3434_v6 = vadd.f32 %v3433_v57, %v11018_v8  ;;  %v3735_v51 = vmax.f32 %v3430_v42, 0.0 }
 0x4a0   : > { %v3736_v48 = vmax.f32 %v3432_v2, 0.0  ;;  %3696 = vmatmul.mubr.bf16.gmra.mrb[52].mxu1 %v9695_v16  ;;  %v9701_v16 = vld [vmem:[#allocation6 + $0x3e8] ss:$16 sps:$4 sm:$0xff]  }
 0x4a1   : > { %v3737_v0 = vmax.f32 %v3434_v6, 0.0  ;;  %3705 = vmatprep.mubr.bf16.mxu1 %v9696_v10 }
 0x4a2   : > { %v3858_v3 = vpack.c.bf16 %v3736_v48, %v3734_v34  ;;  %v9830_v48 = vld [vmem:[#allocation6 + $0x4] ss:$16 sps:$4 sm:$0xff]  }
 0x4a3   : > { %v3859_v53 = vpack.c.bf16 %v3737_v0, %v3735_v51  ;;  %v3437_v18 = vpop.f32.mrb[76].mxu1 }
 0x4a4   : > { %v3438_v5 = vadd.f32 %v3437_v18, %v11020_v9  ;;  %v3439_v56 = vpop.f32.mrb[77].mxu1 }
 0x4a5   : > { %v3440_v28 = vadd.f32 %v3439_v56, %v11022_v11  ;;  %v3441_v7 = vpop.f32.mrb[78].mxu1  ;;  %4162 = vmatprep.mubr.bf16.mxu0 %v3859_v53 }
 0x4a6   : > { %v3442_v8 = vadd.f32 %v3441_v7, %v11024_v13  ;;  %v3443_v40 = vpop.f32.mrb[79].mxu1  ;;  %4163 = vmatmul.mubr.bf16.gmra.mrb[200].mxu0 %v3858_v3  ;;  %v3738_v22 = vmax.f32 %v3438_v5, 0.0 }
 0x4a7   : > { %v3444_v46 = vadd.f32 %v3443_v40, %v11026_v14  ;;  %v3739_v61 = vmax.f32 %v3440_v28, 0.0 }
 0x4a8   : > { %v3740_v54 = vmax.f32 %v3442_v8, 0.0  ;;  %3706 = vmatmul.mubr.bf16.gmra.mrb[56].mxu1 %v9698_v58 }
 0x4a9   : > { %v3741_v24 = vmax.f32 %v3444_v46, 0.0  ;;  %3715 = vmatprep.mubr.bf16.mxu1 %v9699_v30 }
 0x4aa   : > { %v3860_v9 = vpack.c.bf16 %v3740_v54, %v3738_v22 }
 0x4ab   : > { %v3861_v36 = vpack.c.bf16 %v3741_v24, %v3739_v61  ;;  %v3447_v63 = vpop.f32.mrb[80].mxu1 }
 0x4ac   : > { %v3448_v11 = vadd.f32 %v3447_v63, %v11028_v15  ;;  %v3449_v12 = vpop.f32.mrb[81].mxu1 }
 0x4ad   : > { %v3450_v42 = vadd.f32 %v3449_v12, %v11030_v17  ;;  %v3451_v13 = vpop.f32.mrb[82].mxu1  ;;  %4172 = vmatprep.mubr.bf16.mxu0 %v3861_v36 }
 0x4ae   : > { %v3452_v1 = vadd.f32 %v3451_v13, %v11032_v19  ;;  %v3453_v14 = vpop.f32.mrb[83].mxu1  ;;  %4173 = vmatmul.mubr.bf16.gmra.mrb[204].mxu0 %v3860_v9  ;;  %v3742_v2 = vmax.f32 %v3448_v11, 0.0 }
 0x4af   : > { %v3454_v10 = vadd.f32 %v3453_v14, %v11034_v20  ;;  %v3743_v6 = vmax.f32 %v3450_v42, 0.0 }
 0x4b0   : > { %v3744_v57 = vmax.f32 %v3452_v1, 0.0  ;;  %3716 = vmatmul.mubr.bf16.gmra.mrb[60].mxu1 %v9701_v16 }
 0x4b1   : > { %v3745_v34 = vmax.f32 %v3454_v10, 0.0  ;;  %4559 = vmatprep.mubr.bf16.mxu1 %v9830_v48 }
 0x4b2   : > { %v3862_v15 = vpack.c.bf16 %v3744_v57, %v3742_v2 }
 0x4b3   : > { %v3863_v51 = vpack.c.bf16 %v3745_v34, %v3743_v6  ;;  %v3457_v0 = vpop.f32.mrb[84].mxu1 }
 0x4b4   : > { %v3458_v17 = vadd.f32 %v3457_v0, %v11036_v21  ;;  %v3459_v3 = vpop.f32.mrb[85].mxu1 }
 0x4b5   : > { %v3460_v53 = vadd.f32 %v3459_v3, %v11038_v23  ;;  %v3461_v19 = vpop.f32.mrb[86].mxu1  ;;  %4182 = vmatprep.mubr.bf16.mxu0 %v3863_v51 }
 0x4b6   : > { %v3462_v18 = vadd.f32 %v3461_v19, %v11040_v25  ;;  %v3463_v20 = vpop.f32.mrb[87].mxu1  ;;  %4183 = vmatmul.mubr.bf16.gmra.mrb[208].mxu0 %v3862_v15  ;;  %v3746_v56 = vmax.f32 %v3458_v17, 0.0 }
 0x4b7   : > { %v3464_v5 = vadd.f32 %v3463_v20, %v11042_v26  ;;  %v3747_v28 = vmax.f32 %v3460_v53, 0.0 }
 0x4b8   : > { %v3748_v58 = vmax.f32 %v3462_v18, 0.0 }
 0x4b9   : > { %v3749_v7 = vmax.f32 %v3464_v5, 0.0 }
 0x4ba   : > { %v3864_v30 = vpack.c.bf16 %v3748_v58, %v3746_v56 }
 0x4bb   : > { %v3865_v8 = vpack.c.bf16 %v3749_v7, %v3747_v28  ;;  %v3467_v40 = vpop.f32.mrb[88].mxu1 }
 0x4bc   : > { %v3468_v21 = vadd.f32 %v3467_v40, %v11044_v27  ;;  %v3469_v46 = vpop.f32.mrb[89].mxu1 }
 0x4bd   : > { %v3470_v23 = vadd.f32 %v3469_v46, %v11046_v29  ;;  %v3471_v22 = vpop.f32.mrb[90].mxu1  ;;  %4192 = vmatprep.mubr.bf16.mxu0 %v3865_v8 }
 0x4be   : > { %v3472_v25 = vadd.f32 %v3471_v22, %v11048_v31  ;;  %v3473_v54 = vpop.f32.mrb[91].mxu1  ;;  %4193 = vmatmul.mubr.bf16.gmra.mrb[212].mxu0 %v3864_v30  ;;  %v3750_v61 = vmax.f32 %v3468_v21, 0.0 }
 0x4bf   : > { %v3474_v26 = vadd.f32 %v3473_v54, %v11050_v32  ;;  %v3751_v9 = vmax.f32 %v3470_v23, 0.0 }
 0x4c0   : > { %v3752_v24 = vmax.f32 %v3472_v25, 0.0 }
 0x4c1   : > { %v3753_v36 = vmax.f32 %v3474_v26, 0.0 }
 0x4c2   : > { %v3866_v63 = vpack.c.bf16 %v3752_v24, %v3750_v61 }
 0x4c3   : > { %v3867_v11 = vpack.c.bf16 %v3753_v36, %v3751_v9  ;;  %v3477_v12 = vpop.f32.mrb[92].mxu1 }
 0x4c4   : > { %v3478_v27 = vadd.f32 %v3477_v12, %v11052_v33  ;;  %v3479_v16 = vpop.f32.mrb[93].mxu1 }
 0x4c5   : > { %v3480_v29 = vadd.f32 %v3479_v16, %v11054_v35  ;;  %v3481_v42 = vpop.f32.mrb[94].mxu1  ;;  %4202 = vmatprep.mubr.bf16.mxu0 %v3867_v11 }
 0x4c6   : > { %v3482_v31 = vadd.f32 %v3481_v42, %v11056_v37  ;;  %v3483_v13 = vpop.f32.mrb[95].mxu1  ;;  %4203 = vmatmul.mubr.bf16.gmra.mrb[216].mxu0 %v3866_v63  ;;  %v3754_v1 = vmax.f32 %v3478_v27, 0.0  ;;  %v11983_v27 = vld [vmem:[#allocation25_spill] sm:$0xff] }
 0x4c7   : > { %v3484_v32 = vadd.f32 %v3483_v13, %v11058_v38  ;;  %v3755_v10 = vmax.f32 %v3480_v29, 0.0  ;;  %v11984_v29 = vld [vmem:[#allocation26_spill] sm:$0xff] }
 0x4c8   : > { %v3756_v14 = vmax.f32 %v3482_v31, 0.0 }
 0x4c9   : > { %v3757_v2 = vmax.f32 %v3484_v32, 0.0 }
 0x4ca   : > { %v3868_v57 = vpack.c.bf16 %v3756_v14, %v3754_v1 }
 0x4cb   : > { %v3869_v6 = vpack.c.bf16 %v3757_v2, %v3755_v10  ;;  %v3487_v34 = vpop.f32.mrb[96].mxu1  ;;  %v11985_v2 = vld [vmem:[#allocation27_spill] sm:$0xff] }
 0x4cc   : > { %v3488_v33 = vadd.f32 %v3487_v34, %v11060_v39  ;;  %v3489_v48 = vpop.f32.mrb[97].mxu1 }
 0x4cd   : > { %v3490_v35 = vadd.f32 %v3489_v48, %v11062_v41  ;;  %v3491_v15 = vpop.f32.mrb[98].mxu1  ;;  %4212 = vmatprep.mubr.bf16.mxu0 %v3869_v6  ;;  %v11986_v6 = vld [vmem:[#allocation28_spill] sm:$0xff] }
 0x4ce   : > { %v3492_v37 = vadd.f32 %v3491_v15, %v11064_v43  ;;  %v3493_v51 = vpop.f32.mrb[99].mxu1  ;;  %4213 = vmatmul.mubr.bf16.gmra.mrb[220].mxu0 %v3868_v57  ;;  %v3758_v0 = vmax.f32 %v3488_v33, 0.0  ;;  %v11987_v33 = vld [vmem:[#allocation29_spill] sm:$0xff]  ;;  %v11988_v15 = vld [vmem:[#allocation30_spill] sm:$0xff] }
 0x4cf   : > { %v3494_v38 = vadd.f32 %v3493_v51, %v11066_v44  ;;  %v3759_v3 = vmax.f32 %v3490_v35, 0.0 }
 0x4d0   : > { %v3760_v17 = vmax.f32 %v3492_v37, 0.0 }
 0x4d1   : > { %v3761_v53 = vmax.f32 %v3494_v38, 0.0 }
 0x4d2   : > { %v3870_v19 = vpack.c.bf16 %v3760_v17, %v3758_v0 }
 0x4d3   : > { %v3871_v18 = vpack.c.bf16 %v3761_v53, %v3759_v3  ;;  %v3497_v20 = vpop.f32.mrb[100].mxu1 }
 0x4d4   : > { %v3498_v39 = vadd.f32 %v3497_v20, %v11068_v45  ;;  %v3499_v5 = vpop.f32.mrb[101].mxu1 }
 0x4d5   : > { %v3500_v41 = vadd.f32 %v3499_v5, %v11070_v47  ;;  %v3501_v56 = vpop.f32.mrb[102].mxu1  ;;  %4222 = vmatprep.mubr.bf16.mxu0 %v3871_v18  ;;  %v11989_v18 = vld [vmem:[#allocation31_spill] sm:$0xff]  ;;  %v11990_v5 = vld [vmem:[#allocation32_spill] sm:$0xff] }
 0x4d6   : > { %v3502_v43 = vadd.f32 %v3501_v56, %v11072_v49  ;;  %v3503_v58 = vpop.f32.mrb[103].mxu1  ;;  %4223 = vmatmul.mubr.bf16.gmra.mrb[224].mxu0 %v3870_v19  ;;  %v3762_v28 = vmax.f32 %v3498_v39, 0.0 }
 0x4d7   : > { %v3504_v44 = vadd.f32 %v3503_v58, %v11074_v50  ;;  %v3763_v30 = vmax.f32 %v3500_v41, 0.0 }
 0x4d8   : > { %v3764_v7 = vmax.f32 %v3502_v43, 0.0  ;;  %v11991_v43 = vld [vmem:[#allocation33_spill] sm:$0xff] }
 0x4d9   : > { %v3765_v8 = vmax.f32 %v3504_v44, 0.0 }
 0x4da   : > { %v3872_v40 = vpack.c.bf16 %v3764_v7, %v3762_v28  ;;  %v11992_v28 = vld [vmem:[#allocation34_spill] sm:$0xff] }
 0x4db   : > { %v3873_v21 = vpack.c.bf16 %v3765_v8, %v3763_v30  ;;  %v3507_v46 = vpop.f32.mrb[104].mxu1 }
 0x4dc   : > { %v3508_v45 = vadd.f32 %v3507_v46, %v11076_v52  ;;  %v3509_v23 = vpop.f32.mrb[105].mxu1 }
 0x4dd   : > { %v3510_v47 = vadd.f32 %v3509_v23, %v11078_v55  ;;  %v3511_v22 = vpop.f32.mrb[106].mxu1  ;;  %4232 = vmatprep.mubr.bf16.mxu0 %v3873_v21 }
 0x4de   : > { %v3512_v49 = vadd.f32 %v3511_v22, %v11080_v59  ;;  %v3513_v25 = vpop.f32.mrb[107].mxu1  ;;  %4233 = vmatmul.mubr.bf16.gmra.mrb[228].mxu0 %v3872_v40  ;;  %v3766_v54 = vmax.f32 %v3508_v45, 0.0 }
 0x4df   : > { %v3514_v50 = vadd.f32 %v3513_v25, %v11082_v60  ;;  %v3767_v61 = vmax.f32 %v3510_v47, 0.0  ;;  %v11993_v47 = vld [vmem:[#allocation35_spill] sm:$0xff]  ;;  %v11994_v25 = vld [vmem:[#allocation36_spill] sm:$0xff] }
 0x4e0   : > { %v3768_v26 = vmax.f32 %v3512_v49, 0.0 }
 0x4e1   : > { %v3769_v24 = vmax.f32 %v3514_v50, 0.0 }
 0x4e2   : > { %v3874_v9 = vpack.c.bf16 %v3768_v26, %v3766_v54  ;;  %v11995_v26 = vld [vmem:[#allocation37_spill] sm:$0xff] }
 0x4e3   : > { %v3875_v36 = vpack.c.bf16 %v3769_v24, %v3767_v61  ;;  %v3517_v63 = vpop.f32.mrb[108].mxu1 }
 0x4e4   : > { %v3518_v52 = vadd.f32 %v3517_v63, %v11084_v62  ;;  %v3519_v11 = vpop.f32.mrb[109].mxu1 }
 0x4e5   : > { %v3520_v55 = vadd.f32 %v3519_v11, %v11086_v4  ;;  %v3521_v12 = vpop.f32.mrb[110].mxu1  ;;  %4242 = vmatprep.mubr.bf16.mxu0 %v3875_v36 }
 0x4e6   : > { %v3522_v59 = vadd.f32 %v3521_v12, %v11983_v27  ;;  %v3523_v16 = vpop.f32.mrb[111].mxu1  ;;  %4243 = vmatmul.mubr.bf16.gmra.mrb[232].mxu0 %v3874_v9  ;;  %v3770_v42 = vmax.f32 %v3518_v52, 0.0  ;;  %v11996_v9 = vld [vmem:[#allocation38_spill] sm:$0xff] }
 0x4e7   : > { %v3524_v60 = vadd.f32 %v3523_v16, %v11984_v29  ;;  %v3771_v13 = vmax.f32 %v3520_v55, 0.0  ;;  %v11997_v16 = vld [vmem:[#allocation39_spill] sm:$0xff] }
 0x4e8   : > { %v3772_v31 = vmax.f32 %v3522_v59, 0.0 }
 0x4e9   : > { %v3773_v32 = vmax.f32 %v3524_v60, 0.0 }
 0x4ea   : > { %v3876_v1 = vpack.c.bf16 %v3772_v31, %v3770_v42  ;;  %v11998_v42 = vld [vmem:[#allocation40_spill] sm:$0xff] }
 0x4eb   : > { %v3877_v14 = vpack.c.bf16 %v3773_v32, %v3771_v13  ;;  %v3527_v10 = vpop.f32.mrb[112].mxu1  ;;  %v11999_v32 = vld [vmem:[#allocation41_spill] sm:$0xff] }
 0x4ec   : > { %v3528_v62 = vadd.f32 %v3527_v10, %v11985_v2  ;;  %v3529_v57 = vpop.f32.mrb[113].mxu1  ;;  %v12000_v10 = vld [vmem:[#allocation42_spill] sm:$0xff] }
 0x4ed   : > { %v3530_v4 = vadd.f32 %v3529_v57, %v11986_v6  ;;  %v3531_v34 = vpop.f32.mrb[114].mxu1  ;;  %4252 = vmatprep.mubr.bf16.mxu0 %v3877_v14 }
 0x4ee   : > { %v3532_v48 = vadd.f32 %v3531_v34, %v11987_v33  ;;  %v3533_v35 = vpop.f32.mrb[115].mxu1  ;;  %4253 = vmatmul.mubr.bf16.gmra.mrb[236].mxu0 %v3876_v1  ;;  %v3774_v51 = vmax.f32 %v3528_v62, 0.0 }
 0x4ef   : > { %v3534_v37 = vadd.f32 %v3533_v35, %v11988_v15  ;;  %v3775_v0 = vmax.f32 %v3530_v4, 0.0 }
 0x4f0   : > { %v3776_v38 = vmax.f32 %v3532_v48, 0.0 }
 0x4f1   : > { %v3777_v17 = vmax.f32 %v3534_v37, 0.0 }
 0x4f2   : > { %v3878_v3 = vpack.c.bf16 %v3776_v38, %v3774_v51 }
 0x4f3   : > { %v3879_v53 = vpack.c.bf16 %v3777_v17, %v3775_v0  ;;  %v3537_v19 = vpop.f32.mrb[116].mxu1 }
 0x4f4   : > { %v3538_v20 = vadd.f32 %v3537_v19, %v11989_v18  ;;  %v3539_v39 = vpop.f32.mrb[117].mxu1 }
 0x4f5   : > { %v3540_v41 = vadd.f32 %v3539_v39, %v11990_v5  ;;  %v3541_v56 = vpop.f32.mrb[118].mxu1  ;;  %4262 = vmatprep.mubr.bf16.mxu0 %v3879_v53 }
 0x4f6   : > { %v3542_v58 = vadd.f32 %v3541_v56, %v11991_v43  ;;  %v3543_v44 = vpop.f32.mrb[119].mxu1  ;;  %4263 = vmatmul.mubr.bf16.gmra.mrb[240].mxu0 %v3878_v3  ;;  %v3778_v30 = vmax.f32 %v3538_v20, 0.0 }
 0x4f7   : > { %v3544_v7 = vadd.f32 %v3543_v44, %v11992_v28  ;;  %v3779_v40 = vmax.f32 %v3540_v41, 0.0 }
 0x4f8   : > { %v3780_v8 = vmax.f32 %v3542_v58, 0.0 }
 0x4f9   : > { %v3781_v21 = vmax.f32 %v3544_v7, 0.0 }
 0x4fa   : > { %v3880_v46 = vpack.c.bf16 %v3780_v8, %v3778_v30 }
 0x4fb   : > { %v3881_v45 = vpack.c.bf16 %v3781_v21, %v3779_v40  ;;  %v3547_v23 = vpop.f32.mrb[120].mxu1 }
 0x4fc   : > { %v3548_v22 = vadd.f32 %v3547_v23, %v11993_v47  ;;  %v3549_v49 = vpop.f32.mrb[121].mxu1 }
 0x4fd   : > { %v3550_v50 = vadd.f32 %v3549_v49, %v11994_v25  ;;  %v3551_v54 = vpop.f32.mrb[122].mxu1  ;;  %4272 = vmatprep.mubr.bf16.mxu0 %v3881_v45 }
 0x4fe   : > { %v3552_v61 = vadd.f32 %v3551_v54, %v11995_v26  ;;  %v3553_v24 = vpop.f32.mrb[123].mxu1  ;;  %4273 = vmatmul.mubr.bf16.gmra.mrb[244].mxu0 %v3880_v46  ;;  %v3782_v63 = vmax.f32 %v3548_v22, 0.0 }
 0x4ff   : > { %v3554_v36 = vadd.f32 %v3553_v24, %v11996_v9  ;;  %v3783_v11 = vmax.f32 %v3550_v50, 0.0 }
 0x500   : > { %v3784_v52 = vmax.f32 %v3552_v61, 0.0 }
 0x501   : > { %v3785_v55 = vmax.f32 %v3554_v36, 0.0 }
 0x502   : > { %v3882_v12 = vpack.c.bf16 %v3784_v52, %v3782_v63 }
 0x503   : > { %v3883_v27 = vpack.c.bf16 %v3785_v55, %v3783_v11  ;;  %v3557_v59 = vpop.f32.mrb[124].mxu1 }
 0x504   : > { %v3558_v29 = vadd.f32 %v3557_v59, %v11997_v16  ;;  %v3559_v60 = vpop.f32.mrb[125].mxu1 }
 0x505   : > { %v3560_v31 = vadd.f32 %v3559_v60, %v11998_v42  ;;  %v3561_v13 = vpop.f32.mrb[126].mxu1  ;;  %4282 = vmatprep.mubr.bf16.mxu0 %v3883_v27 }
 0x506   : > { %v3562_v1 = vadd.f32 %v3561_v13, %v11999_v32  ;;  %v3563_v14 = vpop.f32.mrb[127].mxu1  ;;  %4283 = vmatmul.mubr.bf16.gmra.mrb[248].mxu0 %v3882_v12  ;;  %v3786_v62 = vmax.f32 %v3558_v29, 0.0 }
 0x507   : > { %v3564_v2 = vadd.f32 %v3563_v14, %v12000_v10  ;;  %v3787_v6 = vmax.f32 %v3560_v31, 0.0 }
 0x508   : > { %v3788_v57 = vmax.f32 %v3562_v1, 0.0 }
 0x509   : > { %v3789_v4 = vmax.f32 %v3564_v2, 0.0 }
 0x50a   : > { %v3884_v34 = vpack.c.bf16 %v3788_v57, %v3786_v62 }
 0x50b   : > { %v3885_v33 = vpack.c.bf16 %v3789_v4, %v3787_v6  ;;  %v3567_v48 = vpop.f32.mrb[0].mxu1 }
 0x50c   : > { %v3569_v35 = vpop.f32.mrb[1].mxu1  ;;  %v3790_v37 = vmax.f32 %v3567_v48, 0.0 }
 0x50d   : > { %v3571_v15 = vpop.f32.mrb[2].mxu1  ;;  %4292 = vmatprep.mubr.bf16.mxu0 %v3885_v33  ;;  %v3791_v0 = vmax.f32 %v3569_v35, 0.0 }
 0x50e   : > { %v3792_v51 = vmax.f32 %v3571_v15, 0.0  ;;  %v3573_v38 = vpop.f32.mrb[3].mxu1  ;;  %4293 = vmatmul.mubr.bf16.gmra.mrb[252].mxu0 %v3884_v34 }
 0x50f   : > { %v3793_v17 = vmax.f32 %v3573_v38, 0.0 }
 0x510   : > { %v3886_v3 = vpack.c.bf16 %v3792_v51, %v3790_v37 }
 0x511   : > { %v3887_v53 = vpack.c.bf16 %v3793_v17, %v3791_v0 }
 0x513   : > { %v3577_v19 = vpop.f32.mrb[4].mxu1  ;;  %4302 = vmatprep.mubr.bf16.mxu0 %v3887_v53 }
 0x514   : > { %v3579_v18 = vpop.f32.mrb[5].mxu1  ;;  %v3794_v39 = vmax.f32 %v3577_v19, 0.0 }
 0x515   : > { %v3581_v20 = vpop.f32.mrb[6].mxu1  ;;  %v3795_v56 = vmax.f32 %v3579_v18, 0.0 }
 0x516   : > { %v3796_v5 = vmax.f32 %v3581_v20, 0.0  ;;  %v3583_v41 = vpop.f32.mrb[7].mxu1  ;;  %4303 = vmatmul.mubr.bf16.gmra.mrb[0].mxu0 %v3886_v3 }
 0x517   : > { %v3797_v43 = vmax.f32 %v3583_v41, 0.0 }
 0x518   : > { %v3888_v58 = vpack.c.bf16 %v3796_v5, %v3794_v39 }
 0x519   : > { %v3889_v44 = vpack.c.bf16 %v3797_v43, %v3795_v56 }
 0x51b   : > { %v3587_v28 = vpop.f32.mrb[8].mxu1  ;;  %4312 = vmatprep.mubr.bf16.mxu0 %v3889_v44 }
 0x51c   : > { %v3589_v7 = vpop.f32.mrb[9].mxu1  ;;  %v3798_v8 = vmax.f32 %v3587_v28, 0.0 }
 0x51d   : > { %v3591_v30 = vpop.f32.mrb[10].mxu1  ;;  %v3799_v46 = vmax.f32 %v3589_v7, 0.0 }
 0x51e   : > { %v3800_v40 = vmax.f32 %v3591_v30, 0.0  ;;  %v3593_v21 = vpop.f32.mrb[11].mxu1  ;;  %4313 = vmatmul.mubr.bf16.gmra.mrb[4].mxu0 %v3888_v58 }
 0x51f   : > { %v3801_v45 = vmax.f32 %v3593_v21, 0.0 }
 0x520   : > { %v3890_v23 = vpack.c.bf16 %v3800_v40, %v3798_v8 }
 0x521   : > { %v3891_v47 = vpack.c.bf16 %v3801_v45, %v3799_v46 }
 0x523   : > { %v3597_v22 = vpop.f32.mrb[12].mxu1  ;;  %4322 = vmatprep.mubr.bf16.mxu0 %v3891_v47 }
 0x524   : > { %v3599_v49 = vpop.f32.mrb[13].mxu1  ;;  %v3802_v50 = vmax.f32 %v3597_v22, 0.0 }
 0x525   : > { %v3601_v25 = vpop.f32.mrb[14].mxu1  ;;  %v3803_v61 = vmax.f32 %v3599_v49, 0.0 }
 0x526   : > { %v3804_v54 = vmax.f32 %v3601_v25, 0.0  ;;  %v3603_v26 = vpop.f32.mrb[15].mxu1  ;;  %4323 = vmatmul.mubr.bf16.gmra.mrb[8].mxu0 %v3890_v23 }
 0x527   : > { %v3805_v24 = vmax.f32 %v3603_v26, 0.0 }
 0x528   : > { %v3892_v9 = vpack.c.bf16 %v3804_v54, %v3802_v50 }
 0x529   : > { %v3893_v36 = vpack.c.bf16 %v3805_v24, %v3803_v61 }
 0x52b   : > { %v3607_v63 = vpop.f32.mrb[16].mxu1  ;;  %4332 = vmatprep.mubr.bf16.mxu0 %v3893_v36 }
 0x52c   : > { %v3609_v52 = vpop.f32.mrb[17].mxu1  ;;  %v3806_v55 = vmax.f32 %v3607_v63, 0.0 }
 0x52d   : > { %v3611_v11 = vpop.f32.mrb[18].mxu1  ;;  %v3807_v59 = vmax.f32 %v3609_v52, 0.0 }
 0x52e   : > { %v3808_v12 = vmax.f32 %v3611_v11, 0.0  ;;  %v3613_v27 = vpop.f32.mrb[19].mxu1  ;;  %4333 = vmatmul.mubr.bf16.gmra.mrb[12].mxu0 %v3892_v9 }
 0x52f   : > { %v3809_v16 = vmax.f32 %v3613_v27, 0.0 }
 0x530   : > { %v3894_v29 = vpack.c.bf16 %v3808_v12, %v3806_v55 }
 0x531   : > { %v3895_v60 = vpack.c.bf16 %v3809_v16, %v3807_v59 }
 0x533   : > { %v3617_v42 = vpop.f32.mrb[20].mxu1  ;;  %4342 = vmatprep.mubr.bf16.mxu0 %v3895_v60 }
 0x534   : > { %v3619_v31 = vpop.f32.mrb[21].mxu1  ;;  %v3810_v32 = vmax.f32 %v3617_v42, 0.0 }
 0x535   : > { %v3621_v13 = vpop.f32.mrb[22].mxu1  ;;  %v3811_v10 = vmax.f32 %v3619_v31, 0.0 }
 0x536   : > { %v3812_v1 = vmax.f32 %v3621_v13, 0.0  ;;  %v3623_v14 = vpop.f32.mrb[23].mxu1  ;;  %4343 = vmatmul.mubr.bf16.gmra.mrb[16].mxu0 %v3894_v29 }
 0x537   : > { %v3813_v2 = vmax.f32 %v3623_v14, 0.0 }
 0x538   : > { %v3896_v62 = vpack.c.bf16 %v3812_v1, %v3810_v32 }
 0x539   : > { %v3897_v57 = vpack.c.bf16 %v3813_v2, %v3811_v10 }
 0x53b   : > { %v3627_v6 = vpop.f32.mrb[24].mxu1  ;;  %4352 = vmatprep.mubr.bf16.mxu0 %v3897_v57 }
 0x53c   : > { %v3629_v4 = vpop.f32.mrb[25].mxu1  ;;  %v3814_v33 = vmax.f32 %v3627_v6, 0.0 }
 0x53d   : > { %v3631_v34 = vpop.f32.mrb[26].mxu1  ;;  %v3815_v15 = vmax.f32 %v3629_v4, 0.0 }
 0x53e   : > { %v3816_v48 = vmax.f32 %v3631_v34, 0.0  ;;  %v3633_v35 = vpop.f32.mrb[27].mxu1  ;;  %4353 = vmatmul.mubr.bf16.gmra.mrb[20].mxu0 %v3896_v62 }
 0x53f   : > { %v3817_v37 = vmax.f32 %v3633_v35, 0.0 }
 0x540   : > { %v3898_v51 = vpack.c.bf16 %v3816_v48, %v3814_v33 }
 0x541   : > { %v3899_v38 = vpack.c.bf16 %v3817_v37, %v3815_v15 }
 0x543   : > { %v3637_v0 = vpop.f32.mrb[28].mxu1  ;;  %4362 = vmatprep.mubr.bf16.mxu0 %v3899_v38 }
 0x544   : > { %v3639_v17 = vpop.f32.mrb[29].mxu1  ;;  %v3818_v53 = vmax.f32 %v3637_v0, 0.0 }
 0x545   : > { %v3641_v3 = vpop.f32.mrb[30].mxu1  ;;  %v3819_v20 = vmax.f32 %v3639_v17, 0.0 }
 0x546   : > { %v3820_v19 = vmax.f32 %v3641_v3, 0.0  ;;  %v3643_v18 = vpop.f32.mrb[31].mxu1  ;;  %4363 = vmatmul.mubr.bf16.gmra.mrb[24].mxu0 %v3898_v51 }
 0x547   : > { %v3821_v39 = vmax.f32 %v3643_v18, 0.0 }
 0x548   : > { %v3900_v5 = vpack.c.bf16 %v3820_v19, %v3818_v53 }
 0x549   : > { %v3901_v41 = vpack.c.bf16 %v3821_v39, %v3819_v20 }
 0x54b   : > { %v3647_v56 = vpop.f32.mrb[32].mxu1  ;;  %4372 = vmatprep.mubr.bf16.mxu0 %v3901_v41 }
 0x54c   : > { %v3649_v43 = vpop.f32.mrb[33].mxu1  ;;  %v3822_v44 = vmax.f32 %v3647_v56, 0.0 }
 0x54d   : > { %v3651_v58 = vpop.f32.mrb[34].mxu1  ;;  %v3823_v30 = vmax.f32 %v3649_v43, 0.0 }
 0x54e   : > { %v3824_v28 = vmax.f32 %v3651_v58, 0.0  ;;  %v3653_v7 = vpop.f32.mrb[35].mxu1  ;;  %4373 = vmatmul.mubr.bf16.gmra.mrb[28].mxu0 %v3900_v5 }
 0x54f   : > { %v3825_v8 = vmax.f32 %v3653_v7, 0.0 }
 0x550   : > { %v3902_v40 = vpack.c.bf16 %v3824_v28, %v3822_v44 }
 0x551   : > { %v3903_v21 = vpack.c.bf16 %v3825_v8, %v3823_v30 }
 0x553   : > { %v3657_v46 = vpop.f32.mrb[36].mxu1  ;;  %4382 = vmatprep.mubr.bf16.mxu0 %v3903_v21 }
 0x554   : > { %v3659_v45 = vpop.f32.mrb[37].mxu1  ;;  %v3826_v47 = vmax.f32 %v3657_v46, 0.0 }
 0x555   : > { %v3661_v23 = vpop.f32.mrb[38].mxu1  ;;  %v3827_v25 = vmax.f32 %v3659_v45, 0.0 }
 0x556   : > { %v3828_v22 = vmax.f32 %v3661_v23, 0.0  ;;  %v3663_v49 = vpop.f32.mrb[39].mxu1  ;;  %4383 = vmatmul.mubr.bf16.gmra.mrb[32].mxu0 %v3902_v40 }
 0x557   : > { %v3829_v50 = vmax.f32 %v3663_v49, 0.0 }
 0x558   : > { %v3904_v54 = vpack.c.bf16 %v3828_v22, %v3826_v47 }
 0x559   : > { %v3905_v26 = vpack.c.bf16 %v3829_v50, %v3827_v25 }
 0x55b   : > { %v3667_v61 = vpop.f32.mrb[40].mxu1  ;;  %4392 = vmatprep.mubr.bf16.mxu0 %v3905_v26 }
 0x55c   : > { %v3669_v24 = vpop.f32.mrb[41].mxu1  ;;  %v3830_v36 = vmax.f32 %v3667_v61, 0.0 }
 0x55d   : > { %v3671_v9 = vpop.f32.mrb[42].mxu1  ;;  %v3831_v11 = vmax.f32 %v3669_v24, 0.0 }
 0x55e   : > { %v3832_v63 = vmax.f32 %v3671_v9, 0.0  ;;  %v3673_v52 = vpop.f32.mrb[43].mxu1  ;;  %4393 = vmatmul.mubr.bf16.gmra.mrb[36].mxu0 %v3904_v54 }
 0x55f   : > { %v3833_v55 = vmax.f32 %v3673_v52, 0.0 }
 0x560   : > { %v3906_v12 = vpack.c.bf16 %v3832_v63, %v3830_v36 }
 0x561   : > { %v3907_v27 = vpack.c.bf16 %v3833_v55, %v3831_v11 }
 0x563   : > { %v3677_v59 = vpop.f32.mrb[44].mxu1  ;;  %4402 = vmatprep.mubr.bf16.mxu0 %v3907_v27 }
 0x564   : > { %v3679_v16 = vpop.f32.mrb[45].mxu1  ;;  %v3834_v60 = vmax.f32 %v3677_v59, 0.0 }
 0x565   : > { %v3681_v29 = vpop.f32.mrb[46].mxu1  ;;  %v3835_v13 = vmax.f32 %v3679_v16, 0.0 }
 0x566   : > { %v3836_v42 = vmax.f32 %v3681_v29, 0.0  ;;  %v3683_v31 = vpop.f32.mrb[47].mxu1  ;;  %4403 = vmatmul.mubr.bf16.gmra.mrb[40].mxu0 %v3906_v12 }
 0x567   : > { %v3837_v32 = vmax.f32 %v3683_v31, 0.0 }
 0x568   : > { %v3908_v1 = vpack.c.bf16 %v3836_v42, %v3834_v60 }
 0x569   : > { %v3909_v14 = vpack.c.bf16 %v3837_v32, %v3835_v13  ;;  %v4144_v10 = vpop.f32.mrb[192].mxu0 }
 0x56a   : > { %v4146_v2 = vpop.f32.mrb[193].mxu0 }
 0x56b   : > { %v3687_v62 = vpop.f32.mrb[48].mxu1  ;;  %v4148_v57 = vpop.f32.mrb[194].mxu0  ;;  %4412 = vmatprep.mubr.bf16.mxu0 %v3909_v14 }
 0x56c   : > { %v4463_v6 = vpack.c.bf16 %v4148_v57, %v4144_v10  ;;  %v3689_v4 = vpop.f32.mrb[49].mxu1  ;;  %v4150_v34 = vpop.f32.mrb[195].mxu0  ;;  %v3838_v35 = vmax.f32 %v3687_v62, 0.0 }
 0x56d   : > { %v4464_v33 = vpack.c.bf16 %v4150_v34, %v4146_v2  ;;  %v3691_v48 = vpop.f32.mrb[50].mxu1  ;;  %v3839_v51 = vmax.f32 %v3689_v4, 0.0 }
 0x56e   : > { %v3840_v15 = vmax.f32 %v3691_v48, 0.0  ;;  %v3693_v37 = vpop.f32.mrb[51].mxu1  ;;  %4413 = vmatmul.mubr.bf16.gmra.mrb[44].mxu0 %v3908_v1 }
 0x56f   : > { %v3841_v38 = vmax.f32 %v3693_v37, 0.0  ;;  %4527 = vmatprep.subr.bf16.mxu1 %v4464_v33 }
 0x570   : > { %v3910_v0 = vpack.c.bf16 %v3840_v15, %v3838_v35  ;;  %4528 = vmatpush1.bf16.msra.mxu1 %v4463_v6 }
 0x571   : > { %v3911_v17 = vpack.c.bf16 %v3841_v38, %v3839_v51  ;;  %v4154_v3 = vpop.f32.mrb[196].mxu0 }
 0x572   : > { %v4156_v53 = vpop.f32.mrb[197].mxu0 }
 0x573   : > { %v3697_v19 = vpop.f32.mrb[52].mxu1  ;;  %v4158_v18 = vpop.f32.mrb[198].mxu0  ;;  %4422 = vmatprep.mubr.bf16.mxu0 %v3911_v17 }
 0x574   : > { %v4465_v20 = vpack.c.bf16 %v4158_v18, %v4154_v3  ;;  %v3699_v39 = vpop.f32.mrb[53].mxu1  ;;  %v4160_v5 = vpop.f32.mrb[199].mxu0  ;;  %v3842_v43 = vmax.f32 %v3697_v19, 0.0 }
 0x575   : > { %v4466_v41 = vpack.c.bf16 %v4160_v5, %v4156_v53  ;;  %v3701_v56 = vpop.f32.mrb[54].mxu1  ;;  %v3843_v28 = vmax.f32 %v3699_v39, 0.0 }
 0x576   : > { %v3844_v58 = vmax.f32 %v3701_v56, 0.0  ;;  %v3703_v44 = vpop.f32.mrb[55].mxu1  ;;  %4423 = vmatmul.mubr.bf16.gmra.mrb[48].mxu0 %v3910_v0 }
 0x577   : > { %v3845_v7 = vmax.f32 %v3703_v44, 0.0  ;;  %4529 = vmatprep.subr.bf16.mxu1 %v4466_v41 }
 0x578   : > { %v3912_v30 = vpack.c.bf16 %v3844_v58, %v3842_v43  ;;  %4530 = vmatpush1.bf16.msra.mxu1 %v4465_v20 }
 0x579   : > { %v3913_v8 = vpack.c.bf16 %v3845_v7, %v3843_v28  ;;  %v4164_v40 = vpop.f32.mrb[200].mxu0 }
 0x57a   : > { %v4166_v21 = vpop.f32.mrb[201].mxu0 }
 0x57b   : > { %v3707_v46 = vpop.f32.mrb[56].mxu1  ;;  %4432 = vmatprep.mubr.bf16.mxu0 %v3913_v8  ;;  %v4168_v45 = vpop.f32.mrb[202].mxu0 }
 0x57c   : > { %v3709_v23 = vpop.f32.mrb[57].mxu1  ;;  %v4467_v47 = vpack.c.bf16 %v4168_v45, %v4164_v40  ;;  %v4170_v22 = vpop.f32.mrb[203].mxu0  ;;  %v3846_v50 = vmax.f32 %v3707_v46, 0.0 }
 0x57d   : > { %v3711_v49 = vpop.f32.mrb[58].mxu1  ;;  %v4468_v25 = vpack.c.bf16 %v4170_v22, %v4166_v21  ;;  %v3847_v61 = vmax.f32 %v3709_v23, 0.0 }
 0x57e   : > { %v3848_v54 = vmax.f32 %v3711_v49, 0.0  ;;  %v3713_v26 = vpop.f32.mrb[59].mxu1  ;;  %4433 = vmatmul.mubr.bf16.gmra.mrb[52].mxu0 %v3912_v30 }
 0x57f   : > { %v3849_v24 = vmax.f32 %v3713_v26, 0.0  ;;  %4531 = vmatprep.subr.bf16.mxu1 %v4468_v25 }
 0x580   : > { %v3914_v9 = vpack.c.bf16 %v3848_v54, %v3846_v50  ;;  %4532 = vmatpush1.bf16.msra.mxu1 %v4467_v47 }
 0x581   : > { %v3915_v36 = vpack.c.bf16 %v3849_v24, %v3847_v61  ;;  %v4174_v63 = vpop.f32.mrb[204].mxu0 }
 0x582   : > { %v4176_v52 = vpop.f32.mrb[205].mxu0 }
 0x583   : > { %v3717_v11 = vpop.f32.mrb[60].mxu1  ;;  %4442 = vmatprep.mubr.bf16.mxu0 %v3915_v36  ;;  %v4178_v55 = vpop.f32.mrb[206].mxu0 }
 0x584   : > { %v3719_v12 = vpop.f32.mrb[61].mxu1  ;;  %v4469_v27 = vpack.c.bf16 %v4178_v55, %v4174_v63  ;;  %v4180_v59 = vpop.f32.mrb[207].mxu0  ;;  %v3850_v60 = vmax.f32 %v3717_v11, 0.0 }
 0x585   : > { %v3721_v16 = vpop.f32.mrb[62].mxu1  ;;  %v4470_v29 = vpack.c.bf16 %v4180_v59, %v4176_v52  ;;  %v3851_v13 = vmax.f32 %v3719_v12, 0.0 }
 0x586   : > { %v3852_v42 = vmax.f32 %v3721_v16, 0.0  ;;  %v3723_v31 = vpop.f32.mrb[63].mxu1  ;;  %4443 = vmatmul.mubr.bf16.gmra.mrb[56].mxu0 %v3914_v9 }
 0x587   : > { %v3853_v32 = vmax.f32 %v3723_v31, 0.0  ;;  %4533 = vmatprep.subr.bf16.mxu1 %v4470_v29 }
 0x588   : > { %v3916_v1 = vpack.c.bf16 %v3852_v42, %v3850_v60  ;;  %4534 = vmatpush1.bf16.msra.mxu1 %v4469_v27 }
 0x589   : > { %v3917_v14 = vpack.c.bf16 %v3853_v32, %v3851_v13  ;;  %v4184_v10 = vpop.f32.mrb[208].mxu0 }
 0x58a   : > { %v4186_v2 = vpop.f32.mrb[209].mxu0 }
 0x58b   : > { %4452 = vmatprep.mubr.bf16.mxu0 %v3917_v14  ;;  %v4188_v62 = vpop.f32.mrb[210].mxu0 }
 0x58c   : > { %v4471_v57 = vpack.c.bf16 %v4188_v62, %v4184_v10  ;;  %v4190_v6 = vpop.f32.mrb[211].mxu0 }
 0x58d   : > { %v4472_v4 = vpack.c.bf16 %v4190_v6, %v4186_v2 }
 0x58e   : > { %4453 = vmatmul.mubr.bf16.gmra.mrb[60].mxu0 %v3916_v1 }
 0x58f   : > { %4535 = vmatprep.subr.bf16.mxu1 %v4472_v4 }
 0x590   : > { %4536 = vmatpush1.bf16.msra.mxu1 %v4471_v57 }
 0x591   : > { %v4194_v34 = vpop.f32.mrb[212].mxu0 }
 0x592   : > { %v4196_v33 = vpop.f32.mrb[213].mxu0 }
 0x593   : > { %v4198_v48 = vpop.f32.mrb[214].mxu0 }
 0x594   : > { %v4473_v35 = vpack.c.bf16 %v4198_v48, %v4194_v34  ;;  %v4200_v15 = vpop.f32.mrb[215].mxu0 }
 0x595   : > { %v4474_v37 = vpack.c.bf16 %v4200_v15, %v4196_v33 }
 0x597   : > { %4537 = vmatprep.subr.bf16.mxu1 %v4474_v37  ;;  %v9831_v37 = vld [vmem:[#allocation6] ss:$16 sps:$4 sm:$0xff]  }
 0x598   : > { %4538 = vmatpush1.bf16.msra.mxu1 %v4473_v35 }
 0x599   : > { %v4204_v51 = vpop.f32.mrb[216].mxu0 }
 0x59a   : > { %v4206_v38 = vpop.f32.mrb[217].mxu0 }
 0x59b   : > { %v4208_v0 = vpop.f32.mrb[218].mxu0 }
 0x59c   : > { %v4475_v17 = vpack.c.bf16 %v4208_v0, %v4204_v51  ;;  %v4210_v3 = vpop.f32.mrb[219].mxu0  ;;  %v9832_v0 = vld [vmem:[#allocation6 + $0x24] ss:$16 sps:$4 sm:$0xff]  }
 0x59d   : > { %v4476_v53 = vpack.c.bf16 %v4210_v3, %v4206_v38 }
 0x59f   : > { %4539 = vmatprep.subr.bf16.mxu1 %v4476_v53 }
 0x5a0   : > { %4540 = vmatpush1.bf16.msra.mxu1 %v4475_v17 }
 0x5a1   : > { %v4214_v19 = vpop.f32.mrb[220].mxu0 }
 0x5a2   : > { %v4216_v18 = vpop.f32.mrb[221].mxu0 }
 0x5a3   : > { %v4218_v20 = vpop.f32.mrb[222].mxu0 }
 0x5a4   : > { %v4477_v39 = vpack.c.bf16 %v4218_v20, %v4214_v19  ;;  %v4220_v5 = vpop.f32.mrb[223].mxu0 }
 0x5a5   : > { %v4478_v41 = vpack.c.bf16 %v4220_v5, %v4216_v18  ;;  %v9833_v18 = vld [vmem:[#allocation6 + $0x20] ss:$16 sps:$4 sm:$0xff]   ;;  %v9834_v5 = vld [vmem:[#allocation6 + $0x44] ss:$16 sps:$4 sm:$0xff]  }
 0x5a7   : > { %4541 = vmatprep.subr.bf16.mxu1 %v4478_v41 }
 0x5a8   : > { %4542 = vmatpush1.bf16.msra.mxu1 %v4477_v39 }
 0x5a9   : > { %v4224_v56 = vpop.f32.mrb[224].mxu0 }
 0x5aa   : > { %v4226_v43 = vpop.f32.mrb[225].mxu0 }
 0x5ab   : > { %v4228_v58 = vpop.f32.mrb[226].mxu0 }
 0x5ac   : > { %v4479_v44 = vpack.c.bf16 %v4228_v58, %v4224_v56  ;;  %v4230_v28 = vpop.f32.mrb[227].mxu0 }
 0x5ad   : > { %v4480_v7 = vpack.c.bf16 %v4230_v28, %v4226_v43 }
 0x5af   : > { %4543 = vmatprep.subr.bf16.mxu1 %v4480_v7 }
 0x5b0   : > { %4544 = vmatpush1.bf16.msra.mxu1 %v4479_v44  ;;  %v9835_v44 = vld [vmem:[#allocation6 + $0x40] ss:$16 sps:$4 sm:$0xff]  }
 0x5b1   : > { %v4234_v30 = vpop.f32.mrb[228].mxu0 }
 0x5b2   : > { %v4236_v8 = vpop.f32.mrb[229].mxu0 }
 0x5b3   : > { %v4238_v40 = vpop.f32.mrb[230].mxu0 }
 0x5b4   : > { %v4481_v21 = vpack.c.bf16 %v4238_v40, %v4234_v30  ;;  %v4240_v46 = vpop.f32.mrb[231].mxu0  ;;  %v9836_v30 = vld [vmem:[#allocation6 + $0x64] ss:$16 sps:$4 sm:$0xff]  }
 0x5b5   : > { %v4482_v45 = vpack.c.bf16 %v4240_v46, %v4236_v8 }
 0x5b7   : > { %4545 = vmatprep.subr.bf16.mxu1 %v4482_v45  ;;  %v9837_v45 = vld [vmem:[#allocation6 + $0x60] ss:$16 sps:$4 sm:$0xff]  }
 0x5b8   : > { %4546 = vmatpush1.bf16.msra.mxu1 %v4481_v21 }
 0x5b9   : > { %v4244_v23 = vpop.f32.mrb[232].mxu0 }
 0x5ba   : > { %v4246_v47 = vpop.f32.mrb[233].mxu0 }
 0x5bb   : > { %v4248_v22 = vpop.f32.mrb[234].mxu0 }
 0x5bc   : > { %v4483_v49 = vpack.c.bf16 %v4248_v22, %v4244_v23  ;;  %v4250_v25 = vpop.f32.mrb[235].mxu0  ;;  %v9838_v22 = vld [vmem:[#allocation6 + $0x84] ss:$16 sps:$4 sm:$0xff]  }
 0x5bd   : > { %v4484_v50 = vpack.c.bf16 %v4250_v25, %v4246_v47 }
 0x5bf   : > { %4547 = vmatprep.subr.bf16.mxu1 %v4484_v50 }
 0x5c0   : > { %4548 = vmatpush1.bf16.msra.mxu1 %v4483_v49 }
 0x5c1   : > { %v4254_v54 = vpop.f32.mrb[236].mxu0 }
 0x5c2   : > { %v4256_v26 = vpop.f32.mrb[237].mxu0 }
 0x5c3   : > { %v4258_v61 = vpop.f32.mrb[238].mxu0 }
 0x5c4   : > { %v4485_v24 = vpack.c.bf16 %v4258_v61, %v4254_v54  ;;  %v4260_v9 = vpop.f32.mrb[239].mxu0 }
 0x5c5   : > { %v4486_v36 = vpack.c.bf16 %v4260_v9, %v4256_v26  ;;  %v9839_v26 = vld [vmem:[#allocation6 + $0x80] ss:$16 sps:$4 sm:$0xff]   ;;  %v9840_v9 = vld [vmem:[#allocation6 + $0xa4] ss:$16 sps:$4 sm:$0xff]  }
 0x5c7   : > { %4549 = vmatprep.subr.bf16.mxu1 %v4486_v36 }
 0x5c8   : > { %4550 = vmatpush1.bf16.msra.mxu1 %v4485_v24 }
 0x5c9   : > { %v4264_v63 = vpop.f32.mrb[240].mxu0 }
 0x5ca   : > { %v4266_v52 = vpop.f32.mrb[241].mxu0 }
 0x5cb   : > { %v4268_v11 = vpop.f32.mrb[242].mxu0 }
 0x5cc   : > { %v4487_v55 = vpack.c.bf16 %v4268_v11, %v4264_v63  ;;  %v4270_v12 = vpop.f32.mrb[243].mxu0 }
 0x5cd   : > { %v4488_v27 = vpack.c.bf16 %v4270_v12, %v4266_v52 }
 0x5cf   : > { %4551 = vmatprep.subr.bf16.mxu1 %v4488_v27 }
 0x5d0   : > { %4552 = vmatpush1.bf16.msra.mxu1 %v4487_v55  ;;  %v9841_v55 = vld [vmem:[#allocation6 + $0xa0] ss:$16 sps:$4 sm:$0xff]  }
 0x5d1   : > { %v4274_v59 = vpop.f32.mrb[244].mxu0 }
 0x5d2   : > { %v4276_v16 = vpop.f32.mrb[245].mxu0 }
 0x5d3   : > { %v4278_v29 = vpop.f32.mrb[246].mxu0 }
 0x5d4   : > { %v4489_v60 = vpack.c.bf16 %v4278_v29, %v4274_v59  ;;  %v4280_v42 = vpop.f32.mrb[247].mxu0  ;;  %v9842_v59 = vld [vmem:[#allocation6 + $0xc4] ss:$16 sps:$4 sm:$0xff]  }
 0x5d5   : > { %v4490_v31 = vpack.c.bf16 %v4280_v42, %v4276_v16 }
 0x5d7   : > { %4553 = vmatprep.subr.bf16.mxu1 %v4490_v31  ;;  %v9843_v31 = vld [vmem:[#allocation6 + $0xc0] ss:$16 sps:$4 sm:$0xff]  }
 0x5d8   : > { %4554 = vmatpush1.bf16.msra.mxu1 %v4489_v60 }
 0x5d9   : > { %v4284_v13 = vpop.f32.mrb[248].mxu0 }
 0x5da   : > { %v4286_v32 = vpop.f32.mrb[249].mxu0 }
 0x5db   : > { %v4288_v1 = vpop.f32.mrb[250].mxu0 }
 0x5dc   : > { %v4491_v14 = vpack.c.bf16 %v4288_v1, %v4284_v13  ;;  %v4290_v10 = vpop.f32.mrb[251].mxu0  ;;  %v9844_v1 = vld [vmem:[#allocation6 + $0xe4] ss:$16 sps:$4 sm:$0xff]  }
 0x5dd   : > { %v4492_v2 = vpack.c.bf16 %v4290_v10, %v4286_v32 }
 0x5df   : > { %4555 = vmatprep.subr.bf16.mxu1 %v4492_v2 }
 0x5e0   : > { %4556 = vmatpush1.bf16.msra.mxu1 %v4491_v14 }
 0x5e1   : > { %v4294_v62 = vpop.f32.mrb[252].mxu0 }
 0x5e2   : > { %v4296_v57 = vpop.f32.mrb[253].mxu0 }
 0x5e3   : > { %v4298_v6 = vpop.f32.mrb[254].mxu0 }
 0x5e4   : > { %v4493_v4 = vpack.c.bf16 %v4298_v6, %v4294_v62  ;;  %v4300_v34 = vpop.f32.mrb[255].mxu0 }
 0x5e5   : > { %v4494_v33 = vpack.c.bf16 %v4300_v34, %v4296_v57  ;;  %v9845_v57 = vld [vmem:[#allocation6 + $0xe0] ss:$16 sps:$4 sm:$0xff]   ;;  %v9846_v34 = vld [vmem:[#allocation6 + $0x104] ss:$16 sps:$4 sm:$0xff]  }
 0x5e7   : > { %4557 = vmatprep.subr.bf16.mxu1 %v4494_v33 }
 0x5e8   : > { %4558 = vmatpush1.bf16.msra.mxu1 %v4493_v4 }
 0x5e9   : > { %v4304_v48 = vpop.f32.mrb[0].mxu0 }
 0x5ea   : > { %v4306_v35 = vpop.f32.mrb[1].mxu0 }
 0x5eb   : > { %v4308_v15 = vpop.f32.mrb[2].mxu0  ;;  %4560 = vmatmul.mubr.bf16.vlgmr.msra.gmra.mrb[128].mxu1 %v9831_v37  ;;  %v9847_v37 = vld [vmem:[#allocation6 + $0x100] ss:$16 sps:$4 sm:$0xff]  }
 0x5ec   : > { %v4495_v51 = vpack.c.bf16 %v4308_v15, %v4304_v48  ;;  %v4310_v38 = vpop.f32.mrb[3].mxu0  ;;  %4569 = vmatprep.mubr.bf16.mxu1 %v9832_v0  ;;  %v9848_v0 = vld [vmem:[#allocation6 + $0x124] ss:$16 sps:$4 sm:$0xff]  }
 0x5ed   : > { %v4496_v17 = vpack.c.bf16 %v4310_v38, %v4306_v35 }
 0x5ef   : > { %4880 = vmatprep.subr.bf16.mxu1 %v4496_v17 }
 0x5f0   : > { %4881 = vmatpush1.bf16.msra.mxu1 %v4495_v51 }
 0x5f1   : > { %v4314_v3 = vpop.f32.mrb[4].mxu0 }
 0x5f2   : > { %v4316_v53 = vpop.f32.mrb[5].mxu0 }
 0x5f3   : > { %v4318_v19 = vpop.f32.mrb[6].mxu0  ;;  %4570 = vmatmul.mubr.bf16.gmra.mrb[132].mxu1 %v9833_v18  ;;  %v9849_v18 = vld [vmem:[#allocation6 + $0x120] ss:$16 sps:$4 sm:$0xff]  }
 0x5f4   : > { %v4497_v20 = vpack.c.bf16 %v4318_v19, %v4314_v3  ;;  %v4320_v39 = vpop.f32.mrb[7].mxu0  ;;  %4579 = vmatprep.mubr.bf16.mxu1 %v9834_v5  ;;  %v9850_v5 = vld [vmem:[#allocation6 + $0x144] ss:$16 sps:$4 sm:$0xff]  }
 0x5f5   : > { %v4498_v41 = vpack.c.bf16 %v4320_v39, %v4316_v53 }
 0x5f7   : > { %4882 = vmatprep.subr.bf16.mxu1 %v4498_v41 }
 0x5f8   : > { %4883 = vmatpush1.bf16.msra.mxu1 %v4497_v20 }
 0x5f9   : > { %v4324_v56 = vpop.f32.mrb[8].mxu0 }
 0x5fa   : > { %v4326_v43 = vpop.f32.mrb[9].mxu0 }
 0x5fb   : > { %v4328_v58 = vpop.f32.mrb[10].mxu0  ;;  %4580 = vmatmul.mubr.bf16.gmra.mrb[136].mxu1 %v9835_v44  ;;  %v9851_v44 = vld [vmem:[#allocation6 + $0x140] ss:$16 sps:$4 sm:$0xff]  }
 0x5fc   : > { %v4499_v28 = vpack.c.bf16 %v4328_v58, %v4324_v56  ;;  %v4330_v7 = vpop.f32.mrb[11].mxu0  ;;  %4589 = vmatprep.mubr.bf16.mxu1 %v9836_v30  ;;  %v9852_v30 = vld [vmem:[#allocation6 + $0x164] ss:$16 sps:$4 sm:$0xff]  }
 0x5fd   : > { %v4500_v8 = vpack.c.bf16 %v4330_v7, %v4326_v43 }
 0x5ff   : > { %4884 = vmatprep.subr.bf16.mxu1 %v4500_v8 }
 0x600   : > { %4885 = vmatpush1.bf16.msra.mxu1 %v4499_v28 }
 0x601   : > { %v4334_v40 = vpop.f32.mrb[12].mxu0 }
 0x602   : > { %v4336_v21 = vpop.f32.mrb[13].mxu0 }
 0x603   : > { %v4338_v46 = vpop.f32.mrb[14].mxu0  ;;  %4590 = vmatmul.mubr.bf16.gmra.mrb[140].mxu1 %v9837_v45  ;;  %v9853_v45 = vld [vmem:[#allocation6 + $0x160] ss:$16 sps:$4 sm:$0xff]  }
 0x604   : > { %v4501_v23 = vpack.c.bf16 %v4338_v46, %v4334_v40  ;;  %v4340_v47 = vpop.f32.mrb[15].mxu0  ;;  %4599 = vmatprep.mubr.bf16.mxu1 %v9838_v22  ;;  %v9854_v22 = vld [vmem:[#allocation6 + $0x184] ss:$16 sps:$4 sm:$0xff]  }
 0x605   : > { %v4502_v49 = vpack.c.bf16 %v4340_v47, %v4336_v21 }
 0x607   : > { %4886 = vmatprep.subr.bf16.mxu1 %v4502_v49 }
 0x608   : > { %4887 = vmatpush1.bf16.msra.mxu1 %v4501_v23 }
 0x609   : > { %v4344_v25 = vpop.f32.mrb[16].mxu0 }
 0x60a   : > { %v4346_v50 = vpop.f32.mrb[17].mxu0 }
 0x60b   : > { %v4348_v54 = vpop.f32.mrb[18].mxu0  ;;  %4600 = vmatmul.mubr.bf16.gmra.mrb[144].mxu1 %v9839_v26  ;;  %v9855_v26 = vld [vmem:[#allocation6 + $0x180] ss:$16 sps:$4 sm:$0xff]  }
 0x60c   : > { %v4503_v61 = vpack.c.bf16 %v4348_v54, %v4344_v25  ;;  %v4350_v24 = vpop.f32.mrb[19].mxu0  ;;  %4609 = vmatprep.mubr.bf16.mxu1 %v9840_v9  ;;  %v9856_v9 = vld [vmem:[#allocation6 + $0x1a4] ss:$16 sps:$4 sm:$0xff]  }
 0x60d   : > { %v4504_v36 = vpack.c.bf16 %v4350_v24, %v4346_v50 }
 0x60f   : > { %4888 = vmatprep.subr.bf16.mxu1 %v4504_v36 }
 0x610   : > { %4889 = vmatpush1.bf16.msra.mxu1 %v4503_v61 }
 0x611   : > { %v4354_v63 = vpop.f32.mrb[20].mxu0 }
 0x612   : > { %v4356_v52 = vpop.f32.mrb[21].mxu0 }
 0x613   : > { %v4358_v11 = vpop.f32.mrb[22].mxu0  ;;  %4610 = vmatmul.mubr.bf16.gmra.mrb[148].mxu1 %v9841_v55  ;;  %v9857_v55 = vld [vmem:[#allocation6 + $0x1a0] ss:$16 sps:$4 sm:$0xff]  }
 0x614   : > { %v4505_v12 = vpack.c.bf16 %v4358_v11, %v4354_v63  ;;  %v4360_v27 = vpop.f32.mrb[23].mxu0  ;;  %4619 = vmatprep.mubr.bf16.mxu1 %v9842_v59  ;;  %v9858_v59 = vld [vmem:[#allocation6 + $0x1c4] ss:$16 sps:$4 sm:$0xff]  }
 0x615   : > { %v4506_v16 = vpack.c.bf16 %v4360_v27, %v4356_v52 }
 0x617   : > { %4890 = vmatprep.subr.bf16.mxu1 %v4506_v16 }
 0x618   : > { %4891 = vmatpush1.bf16.msra.mxu1 %v4505_v12 }
 0x619   : > { %v4364_v29 = vpop.f32.mrb[24].mxu0 }
 0x61a   : > { %v4366_v60 = vpop.f32.mrb[25].mxu0 }
 0x61b   : > { %v4368_v42 = vpop.f32.mrb[26].mxu0  ;;  %4620 = vmatmul.mubr.bf16.gmra.mrb[152].mxu1 %v9843_v31  ;;  %v9859_v31 = vld [vmem:[#allocation6 + $0x1c0] ss:$16 sps:$4 sm:$0xff]  }
 0x61c   : > { %v4507_v13 = vpack.c.bf16 %v4368_v42, %v4364_v29  ;;  %v4370_v32 = vpop.f32.mrb[27].mxu0  ;;  %4629 = vmatprep.mubr.bf16.mxu1 %v9844_v1  ;;  %v9860_v1 = vld [vmem:[#allocation6 + $0x1e4] ss:$16 sps:$4 sm:$0xff]  }
 0x61d   : > { %v4508_v14 = vpack.c.bf16 %v4370_v32, %v4366_v60 }
 0x61f   : > { %4892 = vmatprep.subr.bf16.mxu1 %v4508_v14 }
 0x620   : > { %4893 = vmatpush1.bf16.msra.mxu1 %v4507_v13 }
 0x621   : > { %v4374_v10 = vpop.f32.mrb[28].mxu0 }
 0x622   : > { %v4376_v2 = vpop.f32.mrb[29].mxu0 }
 0x623   : > { %v4378_v62 = vpop.f32.mrb[30].mxu0  ;;  %4630 = vmatmul.mubr.bf16.gmra.mrb[156].mxu1 %v9845_v57  ;;  %v9861_v57 = vld [vmem:[#allocation6 + $0x1e0] ss:$16 sps:$4 sm:$0xff]  }
 0x624   : > { %v4509_v6 = vpack.c.bf16 %v4378_v62, %v4374_v10  ;;  %v4380_v4 = vpop.f32.mrb[31].mxu0  ;;  %4639 = vmatprep.mubr.bf16.mxu1 %v9846_v34  ;;  %v9862_v34 = vld [vmem:[#allocation6 + $0x204] ss:$16 sps:$4 sm:$0xff]  }
 0x625   : > { %v4510_v33 = vpack.c.bf16 %v4380_v4, %v4376_v2 }
 0x627   : > { %4894 = vmatprep.subr.bf16.mxu1 %v4510_v33 }
 0x628   : > { %4895 = vmatpush1.bf16.msra.mxu1 %v4509_v6 }
 0x629   : > { %v4384_v48 = vpop.f32.mrb[32].mxu0 }
 0x62a   : > { %v4386_v35 = vpop.f32.mrb[33].mxu0 }
 0x62b   : > { %v4388_v15 = vpop.f32.mrb[34].mxu0  ;;  %4640 = vmatmul.mubr.bf16.gmra.mrb[160].mxu1 %v9847_v37  ;;  %v9866_v37 = vld [vmem:[#allocation6 + $0x244] ss:$16 sps:$4 sm:$0xff]  }
 0x62c   : > { %v4511_v51 = vpack.c.bf16 %v4388_v15, %v4384_v48  ;;  %v4390_v38 = vpop.f32.mrb[35].mxu0  ;;  %4649 = vmatprep.mubr.bf16.mxu1 %v9848_v0  ;;  %v9863_v48 = vld [vmem:[#allocation6 + $0x200] ss:$16 sps:$4 sm:$0xff]  }
 0x62d   : > { %v4512_v17 = vpack.c.bf16 %v4390_v38, %v4386_v35  ;;  %v9864_v35 = vld [vmem:[#allocation6 + $0x224] ss:$16 sps:$4 sm:$0xff]   ;;  %v9865_v15 = vld [vmem:[#allocation6 + $0x220] ss:$16 sps:$4 sm:$0xff]  }
 0x62e   : > { %v9868_v38 = vld [vmem:[#allocation6 + $0x264] ss:$16 sps:$4 sm:$0xff]   ;;  %v9869_v0 = vld [vmem:[#allocation6 + $0x260] ss:$16 sps:$4 sm:$0xff]  }
 0x62f   : > { %4896 = vmatprep.subr.bf16.mxu1 %v4512_v17  ;;  %v9870_v17 = vld [vmem:[#allocation6 + $0x284] ss:$16 sps:$4 sm:$0xff]  }
 0x630   : > { %4897 = vmatpush1.bf16.msra.mxu1 %v4511_v51  ;;  %v9867_v51 = vld [vmem:[#allocation6 + $0x240] ss:$16 sps:$4 sm:$0xff]  }
 0x631   : > { %v4394_v3 = vpop.f32.mrb[36].mxu0 }
 0x632   : > { %v4396_v53 = vpop.f32.mrb[37].mxu0 }
 0x633   : > { %v4398_v19 = vpop.f32.mrb[38].mxu0  ;;  %4650 = vmatmul.mubr.bf16.gmra.mrb[164].mxu1 %v9849_v18  ;;  %v9874_v18 = vld [vmem:[#allocation6 + $0x2c4] ss:$16 sps:$4 sm:$0xff]  }
 0x634   : > { %v4513_v20 = vpack.c.bf16 %v4398_v19, %v4394_v3  ;;  %v4400_v39 = vpop.f32.mrb[39].mxu0  ;;  %4659 = vmatprep.mubr.bf16.mxu1 %v9850_v5  ;;  %v9871_v3 = vld [vmem:[#allocation6 + $0x280] ss:$16 sps:$4 sm:$0xff]  }
 0x635   : > { %v4514_v41 = vpack.c.bf16 %v4400_v39, %v4396_v53  ;;  %v9872_v53 = vld [vmem:[#allocation6 + $0x2a4] ss:$16 sps:$4 sm:$0xff]   ;;  %v9873_v19 = vld [vmem:[#allocation6 + $0x2a0] ss:$16 sps:$4 sm:$0xff]  }
 0x636   : > { %v9876_v39 = vld [vmem:[#allocation6 + $0x2e4] ss:$16 sps:$4 sm:$0xff]   ;;  %v9877_v5 = vld [vmem:[#allocation6 + $0x2e0] ss:$16 sps:$4 sm:$0xff]  }
 0x637   : > { %4898 = vmatprep.subr.bf16.mxu1 %v4514_v41  ;;  %v9878_v41 = vld [vmem:[#allocation6 + $0x304] ss:$16 sps:$4 sm:$0xff]  }
 0x638   : > { %4899 = vmatpush1.bf16.msra.mxu1 %v4513_v20  ;;  %v9875_v20 = vld [vmem:[#allocation6 + $0x2c0] ss:$16 sps:$4 sm:$0xff]  }
 0x639   : > { %v4404_v56 = vpop.f32.mrb[40].mxu0 }
 0x63a   : > { %v4406_v43 = vpop.f32.mrb[41].mxu0 }
 0x63b   : > { %v4408_v58 = vpop.f32.mrb[42].mxu0  ;;  %4660 = vmatmul.mubr.bf16.gmra.mrb[168].mxu1 %v9851_v44  ;;  %v9882_v44 = vld [vmem:[#allocation6 + $0x344] ss:$16 sps:$4 sm:$0xff]  }
 0x63c   : > { %v4515_v28 = vpack.c.bf16 %v4408_v58, %v4404_v56  ;;  %v4410_v7 = vpop.f32.mrb[43].mxu0  ;;  %4669 = vmatprep.mubr.bf16.mxu1 %v9852_v30  ;;  %v9879_v56 = vld [vmem:[#allocation6 + $0x300] ss:$16 sps:$4 sm:$0xff]  }
 0x63d   : > { %v4516_v8 = vpack.c.bf16 %v4410_v7, %v4406_v43  ;;  %v9880_v43 = vld [vmem:[#allocation6 + $0x324] ss:$16 sps:$4 sm:$0xff]   ;;  %v9881_v58 = vld [vmem:[#allocation6 + $0x320] ss:$16 sps:$4 sm:$0xff]  }
 0x63e   : > { %v9884_v7 = vld [vmem:[#allocation6 + $0x364] ss:$16 sps:$4 sm:$0xff]   ;;  %v9885_v30 = vld [vmem:[#allocation6 + $0x360] ss:$16 sps:$4 sm:$0xff]  }
 0x63f   : > { %4900 = vmatprep.subr.bf16.mxu1 %v4516_v8  ;;  %v9886_v8 = vld [vmem:[#allocation6 + $0x384] ss:$16 sps:$4 sm:$0xff]  }
 0x640   : > { %4901 = vmatpush1.bf16.msra.mxu1 %v4515_v28  ;;  %v9883_v28 = vld [vmem:[#allocation6 + $0x340] ss:$16 sps:$4 sm:$0xff]  }
 0x641   : > { %v4414_v40 = vpop.f32.mrb[44].mxu0 }
 0x642   : > { %v4416_v21 = vpop.f32.mrb[45].mxu0 }
 0x643   : > { %v4418_v46 = vpop.f32.mrb[46].mxu0  ;;  %4670 = vmatmul.mubr.bf16.gmra.mrb[172].mxu1 %v9853_v45  ;;  %v9890_v45 = vld [vmem:[#allocation6 + $0x3c4] ss:$16 sps:$4 sm:$0xff]  }
 0x644   : > { %v4517_v23 = vpack.c.bf16 %v4418_v46, %v4414_v40  ;;  %v4420_v47 = vpop.f32.mrb[47].mxu0  ;;  %4679 = vmatprep.mubr.bf16.mxu1 %v9854_v22  ;;  %v9887_v40 = vld [vmem:[#allocation6 + $0x380] ss:$16 sps:$4 sm:$0xff]  }
 0x645   : > { %v4518_v49 = vpack.c.bf16 %v4420_v47, %v4416_v21  ;;  %v9888_v21 = vld [vmem:[#allocation6 + $0x3a4] ss:$16 sps:$4 sm:$0xff]   ;;  %v9889_v46 = vld [vmem:[#allocation6 + $0x3a0] ss:$16 sps:$4 sm:$0xff]  }
 0x646   : > { %v9892_v47 = vld [vmem:[#allocation6 + $0x3e4] ss:$16 sps:$4 sm:$0xff]   ;;  %v9893_v22 = vld [vmem:[#allocation6 + $0x3e0] ss:$16 sps:$4 sm:$0xff]  }
 0x647   : > { %4902 = vmatprep.subr.bf16.mxu1 %v4518_v49  ;;  %v9894_v49 = vld [vmem:[#allocation6 + $0xc] ss:$16 sps:$4 sm:$0xff]  }
 0x648   : > { %4903 = vmatpush1.bf16.msra.mxu1 %v4517_v23  ;;  %v9891_v23 = vld [vmem:[#allocation6 + $0x3c0] ss:$16 sps:$4 sm:$0xff]  }
 0x649   : > { %v4424_v25 = vpop.f32.mrb[48].mxu0 }
 0x64a   : > { %v4426_v50 = vpop.f32.mrb[49].mxu0 }
 0x64b   : > { %v4428_v54 = vpop.f32.mrb[50].mxu0  ;;  %4680 = vmatmul.mubr.bf16.gmra.mrb[176].mxu1 %v9855_v26  ;;  %v9898_v26 = vld [vmem:[#allocation6 + $0x4c] ss:$16 sps:$4 sm:$0xff]  }
 0x64c   : > { %v4519_v61 = vpack.c.bf16 %v4428_v54, %v4424_v25  ;;  %v4430_v24 = vpop.f32.mrb[51].mxu0  ;;  %4689 = vmatprep.mubr.bf16.mxu1 %v9856_v9  ;;  %v9895_v25 = vld [vmem:[#allocation6 + $0x8] ss:$16 sps:$4 sm:$0xff]  }
 0x64d   : > { %v4520_v36 = vpack.c.bf16 %v4430_v24, %v4426_v50  ;;  %v9896_v50 = vld [vmem:[#allocation6 + $0x2c] ss:$16 sps:$4 sm:$0xff]   ;;  %v9897_v54 = vld [vmem:[#allocation6 + $0x28] ss:$16 sps:$4 sm:$0xff]  }
 0x64e   : > { %v9900_v24 = vld [vmem:[#allocation6 + $0x6c] ss:$16 sps:$4 sm:$0xff]   ;;  %v9901_v9 = vld [vmem:[#allocation6 + $0x68] ss:$16 sps:$4 sm:$0xff]  }
 0x64f   : > { %4904 = vmatprep.subr.bf16.mxu1 %v4520_v36  ;;  %v9902_v36 = vld [vmem:[#allocation6 + $0x8c] ss:$16 sps:$4 sm:$0xff]  }
 0x650   : > { %4905 = vmatpush1.bf16.msra.mxu1 %v4519_v61  ;;  %v9899_v61 = vld [vmem:[#allocation6 + $0x48] ss:$16 sps:$4 sm:$0xff]  }
 0x651   : > { %v4434_v63 = vpop.f32.mrb[52].mxu0 }
 0x652   : > { %v4436_v52 = vpop.f32.mrb[53].mxu0 }
 0x653   : > { %v4438_v11 = vpop.f32.mrb[54].mxu0  ;;  %4690 = vmatmul.mubr.bf16.gmra.mrb[180].mxu1 %v9857_v55  ;;  %v9906_v55 = vld [vmem:[#allocation6 + $0xcc] ss:$16 sps:$4 sm:$0xff]  }
 0x654   : > { %v4521_v12 = vpack.c.bf16 %v4438_v11, %v4434_v63  ;;  %v4440_v27 = vpop.f32.mrb[55].mxu0  ;;  %4699 = vmatprep.mubr.bf16.mxu1 %v9858_v59  ;;  %v9903_v63 = vld [vmem:[#allocation6 + $0x88] ss:$16 sps:$4 sm:$0xff]  }
 0x655   : > { %v4522_v16 = vpack.c.bf16 %v4440_v27, %v4436_v52  ;;  %v9904_v52 = vld [vmem:[#allocation6 + $0xac] ss:$16 sps:$4 sm:$0xff]   ;;  %v9905_v11 = vld [vmem:[#allocation6 + $0xa8] ss:$16 sps:$4 sm:$0xff]  }
 0x656   : > { %v9908_v27 = vld [vmem:[#allocation6 + $0xec] ss:$16 sps:$4 sm:$0xff]   ;;  %v9909_v59 = vld [vmem:[#allocation6 + $0xe8] ss:$16 sps:$4 sm:$0xff]  }
 0x657   : > { %4906 = vmatprep.subr.bf16.mxu1 %v4522_v16  ;;  %v9910_v16 = vld [vmem:[#allocation6 + $0x10c] ss:$16 sps:$4 sm:$0xff]  }
 0x658   : > { %4907 = vmatpush1.bf16.msra.mxu1 %v4521_v12  ;;  %v9907_v12 = vld [vmem:[#allocation6 + $0xc8] ss:$16 sps:$4 sm:$0xff]  }
 0x659   : > { %v4444_v29 = vpop.f32.mrb[56].mxu0 }
 0x65a   : > { %v4446_v60 = vpop.f32.mrb[57].mxu0 }
 0x65b   : > { %v4448_v42 = vpop.f32.mrb[58].mxu0  ;;  %4700 = vmatmul.mubr.bf16.gmra.mrb[184].mxu1 %v9859_v31  ;;  %v9914_v31 = vld [vmem:[#allocation6 + $0x14c] ss:$16 sps:$4 sm:$0xff]  }
 0x65c   : > { %v4523_v13 = vpack.c.bf16 %v4448_v42, %v4444_v29  ;;  %v4450_v32 = vpop.f32.mrb[59].mxu0  ;;  %4709 = vmatprep.mubr.bf16.mxu1 %v9860_v1  ;;  %v9911_v29 = vld [vmem:[#allocation6 + $0x108] ss:$16 sps:$4 sm:$0xff]  }
 0x65d   : > { %v4524_v14 = vpack.c.bf16 %v4450_v32, %v4446_v60  ;;  %v9912_v60 = vld [vmem:[#allocation6 + $0x12c] ss:$16 sps:$4 sm:$0xff]   ;;  %v9913_v42 = vld [vmem:[#allocation6 + $0x128] ss:$16 sps:$4 sm:$0xff]  }
 0x65e   : > { %v9916_v32 = vld [vmem:[#allocation6 + $0x16c] ss:$16 sps:$4 sm:$0xff]   ;;  %v9917_v1 = vld [vmem:[#allocation6 + $0x168] ss:$16 sps:$4 sm:$0xff]  }
 0x65f   : > { %4908 = vmatprep.subr.bf16.mxu1 %v4524_v14  ;;  %v9918_v14 = vld [vmem:[#allocation6 + $0x18c] ss:$16 sps:$4 sm:$0xff]  }
 0x660   : > { %4909 = vmatpush1.bf16.msra.mxu1 %v4523_v13  ;;  %v9915_v13 = vld [vmem:[#allocation6 + $0x148] ss:$16 sps:$4 sm:$0xff]  }
 0x661   : > { %v4454_v10 = vpop.f32.mrb[60].mxu0 }
 0x662   : > { %v4456_v2 = vpop.f32.mrb[61].mxu0 }
 0x663   : > { %v4458_v62 = vpop.f32.mrb[62].mxu0  ;;  %4710 = vmatmul.mubr.bf16.gmra.mrb[188].mxu1 %v9861_v57  ;;  %v9922_v57 = vld [vmem:[#allocation6 + $0x1cc] ss:$16 sps:$4 sm:$0xff]  }
 0x664   : > { %v4525_v6 = vpack.c.bf16 %v4458_v62, %v4454_v10  ;;  %v4460_v4 = vpop.f32.mrb[63].mxu0  ;;  %4719 = vmatprep.mubr.bf16.mxu1 %v9862_v34  ;;  %v9919_v10 = vld [vmem:[#allocation6 + $0x188] ss:$16 sps:$4 sm:$0xff]  }
 0x665   : > { %v4526_v33 = vpack.c.bf16 %v4460_v4, %v4456_v2  ;;  %v9920_v2 = vld [vmem:[#allocation6 + $0x1ac] ss:$16 sps:$4 sm:$0xff]   ;;  %v9921_v62 = vld [vmem:[#allocation6 + $0x1a8] ss:$16 sps:$4 sm:$0xff]  }
 0x666   : > { %v9924_v4 = vld [vmem:[#allocation6 + $0x1ec] ss:$16 sps:$4 sm:$0xff]   ;;  %v9925_v34 = vld [vmem:[#allocation6 + $0x1e8] ss:$16 sps:$4 sm:$0xff]  }
 0x667   : > { %4910 = vmatprep.subr.bf16.mxu1 %v4526_v33  ;;  %v9926_v33 = vld [vmem:[#allocation6 + $0x20c] ss:$16 sps:$4 sm:$0xff]  }
 0x668   : > { %4911 = vmatpush1.bf16.msra.mxu1 %v4525_v6  ;;  %v9923_v6 = vld [vmem:[#allocation6 + $0x1c8] ss:$16 sps:$4 sm:$0xff]  }
 0x66b   : > { %4720 = vmatmul.mubr.bf16.gmra.mrb[192].mxu1 %v9863_v48  ;;  %v9927_v48 = vld [vmem:[#allocation6 + $0x208] ss:$16 sps:$4 sm:$0xff]  }
 0x66c   : > { %4729 = vmatprep.mubr.bf16.mxu1 %v9864_v35  ;;  %v9928_v35 = vld [vmem:[#allocation6 + $0x22c] ss:$16 sps:$4 sm:$0xff]  }
 0x673   : > { %4730 = vmatmul.mubr.bf16.gmra.mrb[196].mxu1 %v9865_v15  ;;  %v9929_v15 = vld [vmem:[#allocation6 + $0x228] ss:$16 sps:$4 sm:$0xff]  }
 0x674   : > { %4739 = vmatprep.mubr.bf16.mxu1 %v9866_v37  ;;  %v9930_v37 = vld [vmem:[#allocation6 + $0x24c] ss:$16 sps:$4 sm:$0xff]  }
 0x67b   : > { %4740 = vmatmul.mubr.bf16.gmra.mrb[200].mxu1 %v9867_v51  ;;  %v9931_v51 = vld [vmem:[#allocation6 + $0x248] ss:$16 sps:$4 sm:$0xff]  }
 0x67c   : > { %4749 = vmatprep.mubr.bf16.mxu1 %v9868_v38  ;;  %v9932_v38 = vld [vmem:[#allocation6 + $0x26c] ss:$16 sps:$4 sm:$0xff]  }
 0x683   : > { %4750 = vmatmul.mubr.bf16.gmra.mrb[204].mxu1 %v9869_v0  ;;  %v9933_v0 = vld [vmem:[#allocation6 + $0x268] ss:$16 sps:$4 sm:$0xff]  }
 0x684   : > { %4759 = vmatprep.mubr.bf16.mxu1 %v9870_v17  ;;  %v9934_v17 = vld [vmem:[#allocation6 + $0x28c] ss:$16 sps:$4 sm:$0xff]  }
 0x68b   : > { %4760 = vmatmul.mubr.bf16.gmra.mrb[208].mxu1 %v9871_v3  ;;  %v9935_v3 = vld [vmem:[#allocation6 + $0x288] ss:$16 sps:$4 sm:$0xff]  }
 0x68c   : > { %4769 = vmatprep.mubr.bf16.mxu1 %v9872_v53  ;;  %v9936_v53 = vld [vmem:[#allocation6 + $0x2ac] ss:$16 sps:$4 sm:$0xff]  }
 0x693   : > { %4770 = vmatmul.mubr.bf16.gmra.mrb[212].mxu1 %v9873_v19  ;;  %v9937_v19 = vld [vmem:[#allocation6 + $0x2a8] ss:$16 sps:$4 sm:$0xff]  }
 0x694   : > { %4779 = vmatprep.mubr.bf16.mxu1 %v9874_v18  ;;  %v9938_v18 = vld [vmem:[#allocation6 + $0x2cc] ss:$16 sps:$4 sm:$0xff]  }
 0x69b   : > { %4780 = vmatmul.mubr.bf16.gmra.mrb[216].mxu1 %v9875_v20  ;;  %v9939_v20 = vld [vmem:[#allocation6 + $0x2c8] ss:$16 sps:$4 sm:$0xff]  }
 0x69c   : > { %4789 = vmatprep.mubr.bf16.mxu1 %v9876_v39  ;;  %v9940_v39 = vld [vmem:[#allocation6 + $0x2ec] ss:$16 sps:$4 sm:$0xff]  }
 0x6a3   : > { %4790 = vmatmul.mubr.bf16.gmra.mrb[220].mxu1 %v9877_v5  ;;  %v9941_v5 = vld [vmem:[#allocation6 + $0x2e8] ss:$16 sps:$4 sm:$0xff]  }
 0x6a4   : > { %4799 = vmatprep.mubr.bf16.mxu1 %v9878_v41  ;;  %v9942_v41 = vld [vmem:[#allocation6 + $0x30c] ss:$16 sps:$4 sm:$0xff]  }
 0x6ab   : > { %4800 = vmatmul.mubr.bf16.gmra.mrb[224].mxu1 %v9879_v56  ;;  %v9943_v56 = vld [vmem:[#allocation6 + $0x308] ss:$16 sps:$4 sm:$0xff]  }
 0x6ac   : > { %4809 = vmatprep.mubr.bf16.mxu1 %v9880_v43  ;;  %v9944_v43 = vld [vmem:[#allocation6 + $0x32c] ss:$16 sps:$4 sm:$0xff]  }
 0x6b3   : > { %4810 = vmatmul.mubr.bf16.gmra.mrb[228].mxu1 %v9881_v58  ;;  %v9945_v58 = vld [vmem:[#allocation6 + $0x328] ss:$16 sps:$4 sm:$0xff]  }
 0x6b4   : > { %4819 = vmatprep.mubr.bf16.mxu1 %v9882_v44  ;;  %v9946_v44 = vld [vmem:[#allocation6 + $0x34c] ss:$16 sps:$4 sm:$0xff]  }
 0x6bb   : > { %4820 = vmatmul.mubr.bf16.gmra.mrb[232].mxu1 %v9883_v28  ;;  %v9947_v28 = vld [vmem:[#allocation6 + $0x348] ss:$16 sps:$4 sm:$0xff]  }
 0x6bc   : > { %4829 = vmatprep.mubr.bf16.mxu1 %v9884_v7  ;;  %v9948_v7 = vld [vmem:[#allocation6 + $0x36c] ss:$16 sps:$4 sm:$0xff]  }
 0x6c3   : > { %4830 = vmatmul.mubr.bf16.gmra.mrb[236].mxu1 %v9885_v30 }
 0x6c4   : > { %4839 = vmatprep.mubr.bf16.mxu1 %v9886_v8 }
 0x6cb   : > { %4840 = vmatmul.mubr.bf16.gmra.mrb[240].mxu1 %v9887_v40 }
 0x6cc   : > { %4849 = vmatprep.mubr.bf16.mxu1 %v9888_v21 }
 0x6d3   : > { %4850 = vmatmul.mubr.bf16.gmra.mrb[244].mxu1 %v9889_v46 }
 0x6d4   : > { %4859 = vmatprep.mubr.bf16.mxu1 %v9890_v45 }
 0x6db   : > { %4860 = vmatmul.mubr.bf16.gmra.mrb[248].mxu1 %v9891_v23  ;;  %v9949_v23 = vld [vmem:[#allocation6 + $0x368] ss:$16 sps:$4 sm:$0xff]  }
 0x6dc   : > { %4869 = vmatprep.mubr.bf16.mxu1 %v9892_v47  ;;  %v9950_v47 = vld [vmem:[#allocation6 + $0x38c] ss:$16 sps:$4 sm:$0xff]  }
 0x6e3   : > { %4870 = vmatmul.mubr.bf16.gmra.mrb[252].mxu1 %v9893_v22 }
 0x6e4   : > { %4912 = vmatprep.mubr.bf16.mxu1 %v9894_v49 }
 0x6eb   : > { %4913 = vmatmul.mubr.bf16.vlgmr.msra.gmra.mrb[128].mxu1 %v9895_v25 }
 0x6ec   : > { %4922 = vmatprep.mubr.bf16.mxu1 %v9896_v50 }
 0x6f3   : > { %4923 = vmatmul.mubr.bf16.gmra.mrb[132].mxu1 %v9897_v54 }
 0x6f4   : > { %4932 = vmatprep.mubr.bf16.mxu1 %v9898_v26 }
 0x6fb   : > { %4933 = vmatmul.mubr.bf16.gmra.mrb[136].mxu1 %v9899_v61  ;;  %v5233_v61 = vld [vmem:[#allocation11] sm:$0xff] }
 0x6fc   : > { %4942 = vmatprep.mubr.bf16.mxu1 %v9900_v24  ;;  %v9951_v24 = vld [vmem:[#allocation6 + $0x388] ss:$16 sps:$4 sm:$0xff]  }
 0x703   : > { %4943 = vmatmul.mubr.bf16.gmra.mrb[140].mxu1 %v9901_v9 }
 0x704   : > { %4952 = vmatprep.mubr.bf16.mxu1 %v9902_v36  ;;  %v9952_v36 = vld [vmem:[#allocation6 + $0x3ac] ss:$16 sps:$4 sm:$0xff]  }
 0x70b   : > { %4953 = vmatmul.mubr.bf16.gmra.mrb[144].mxu1 %v9903_v63  ;;  %v5234_v63 = vld [vmem:[#allocation11 + $0x8] sm:$0xff] }
 0x70c   : > { %4962 = vmatprep.mubr.bf16.mxu1 %v9904_v52 }
 0x713   : > { %4963 = vmatmul.mubr.bf16.gmra.mrb[148].mxu1 %v9905_v11 }
 0x714   : > { %4972 = vmatprep.mubr.bf16.mxu1 %v9906_v55 }
 0x71b   : > { %4973 = vmatmul.mubr.bf16.gmra.mrb[152].mxu1 %v9907_v12 }
 0x71c   : > { %4982 = vmatprep.mubr.bf16.mxu1 %v9908_v27 }
 0x723   : > { %4983 = vmatmul.mubr.bf16.gmra.mrb[156].mxu1 %v9909_v59 }
 0x724   : > { %4992 = vmatprep.mubr.bf16.mxu1 %v9910_v16 }
 0x72b   : > { %4993 = vmatmul.mubr.bf16.gmra.mrb[160].mxu1 %v9911_v29 }
 0x72c   : > { %5002 = vmatprep.mubr.bf16.mxu1 %v9912_v60 }
 0x733   : > { %5003 = vmatmul.mubr.bf16.gmra.mrb[164].mxu1 %v9913_v42 }
 0x734   : > { %5012 = vmatprep.mubr.bf16.mxu1 %v9914_v31 }
 0x73b   : > { %5013 = vmatmul.mubr.bf16.gmra.mrb[168].mxu1 %v9915_v13  ;;  %v5235_v13 = vld [vmem:[#allocation11 + $0x10] sm:$0xff] }
 0x73c   : > { %5022 = vmatprep.mubr.bf16.mxu1 %v9916_v32  ;;  %v9953_v32 = vld [vmem:[#allocation6 + $0x3a8] ss:$16 sps:$4 sm:$0xff]  }
 0x743   : > { %5023 = vmatmul.mubr.bf16.gmra.mrb[172].mxu1 %v9917_v1 }
 0x744   : > { %5032 = vmatprep.mubr.bf16.mxu1 %v9918_v14  ;;  %v9954_v14 = vld [vmem:[#allocation6 + $0x3cc] ss:$16 sps:$4 sm:$0xff]  }
 0x74b   : > { %5033 = vmatmul.mubr.bf16.gmra.mrb[176].mxu1 %v9919_v10  ;;  %v5236_v10 = vld [vmem:[#allocation11 + $0x18] sm:$0xff] }
 0x74c   : > { %5042 = vmatprep.mubr.bf16.mxu1 %v9920_v2 }
 0x753   : > { %5043 = vmatmul.mubr.bf16.gmra.mrb[180].mxu1 %v9921_v62 }
 0x754   : > { %5052 = vmatprep.mubr.bf16.mxu1 %v9922_v57 }
 0x75b   : > { %5053 = vmatmul.mubr.bf16.gmra.mrb[184].mxu1 %v9923_v6 }
 0x75c   : > { %5062 = vmatprep.mubr.bf16.mxu1 %v9924_v4 }
 0x763   : > { %5063 = vmatmul.mubr.bf16.gmra.mrb[188].mxu1 %v9925_v34 }
 0x764   : > { %5072 = vmatprep.mubr.bf16.mxu1 %v9926_v33 }
 0x76b   : > { %5073 = vmatmul.mubr.bf16.gmra.mrb[192].mxu1 %v9927_v48 }
 0x76c   : > { %5082 = vmatprep.mubr.bf16.mxu1 %v9928_v35 }
 0x773   : > { %5083 = vmatmul.mubr.bf16.gmra.mrb[196].mxu1 %v9929_v15 }
 0x774   : > { %5092 = vmatprep.mubr.bf16.mxu1 %v9930_v37 }
 0x77b   : > { %5093 = vmatmul.mubr.bf16.gmra.mrb[200].mxu1 %v9931_v51  ;;  %v5237_v51 = vld [vmem:[#allocation11 + $0x20] sm:$0xff] }
 0x77c   : > { %5102 = vmatprep.mubr.bf16.mxu1 %v9932_v38  ;;  %v9955_v38 = vld [vmem:[#allocation6 + $0x3c8] ss:$16 sps:$4 sm:$0xff]  }
 0x783   : > { %5103 = vmatmul.mubr.bf16.gmra.mrb[204].mxu1 %v9933_v0 }
 0x784   : > { %5112 = vmatprep.mubr.bf16.mxu1 %v9934_v17  ;;  %v9956_v17 = vld [vmem:[#allocation6 + $0x3ec] ss:$16 sps:$4 sm:$0xff]  }
 0x78b   : > { %5113 = vmatmul.mubr.bf16.gmra.mrb[208].mxu1 %v9935_v3  ;;  %v5238_v3 = vld [vmem:[#allocation11 + $0x28] sm:$0xff] }
 0x78c   : > { %5122 = vmatprep.mubr.bf16.mxu1 %v9936_v53 }
 0x793   : > { %5123 = vmatmul.mubr.bf16.gmra.mrb[212].mxu1 %v9937_v19 }
 0x794   : > { %5132 = vmatprep.mubr.bf16.mxu1 %v9938_v18 }
 0x79b   : > { %5133 = vmatmul.mubr.bf16.gmra.mrb[216].mxu1 %v9939_v20 }
 0x79c   : > { %5142 = vmatprep.mubr.bf16.mxu1 %v9940_v39 }
 0x7a3   : > { %5143 = vmatmul.mubr.bf16.gmra.mrb[220].mxu1 %v9941_v5 }
 0x7a4   : > { %5152 = vmatprep.mubr.bf16.mxu1 %v9942_v41 }
 0x7ab   : > { %5153 = vmatmul.mubr.bf16.gmra.mrb[224].mxu1 %v9943_v56 }
 0x7ac   : > { %5162 = vmatprep.mubr.bf16.mxu1 %v9944_v43 }
 0x7b3   : > { %5163 = vmatmul.mubr.bf16.gmra.mrb[228].mxu1 %v9945_v58 }
 0x7b4   : > { %5172 = vmatprep.mubr.bf16.mxu1 %v9946_v44 }
 0x7bb   : > { %5173 = vmatmul.mubr.bf16.gmra.mrb[232].mxu1 %v9947_v28  ;;  %v5239_v28 = vld [vmem:[#allocation11 + $0x30] sm:$0xff] }
 0x7bc   : > { %5182 = vmatprep.mubr.bf16.mxu1 %v9948_v7  ;;  %v9957_v7 = vld [vmem:[#allocation6 + $0x3e8] ss:$16 sps:$4 sm:$0xff]  }
 0x7be   : > { %v4914_v30 = vpop.f32.mrb[128].mxu1 }
 0x7bf   : > { %5553 = vst [vmem:[#allocation13] sm:$0xff] %v4914_v30  ;;  %v4916_v8 = vpop.f32.mrb[129].mxu1 }
 0x7c0   : > { %v5297_v40 = vmul.f32 1.442695, %v4916_v8  ;;  %5554 = vst [vmem:[#allocation13 + $0x8] sm:$0xff] %v4916_v8  ;;  %v4918_v21 = vpop.f32.mrb[130].mxu1  ;;  %v5240_v8 = vld [vmem:[#allocation11 + $0x38] sm:$0xff] }
 0x7c1   : > { %5555 = vst [vmem:[#allocation13 + $0x10] sm:$0xff] %v4918_v21  ;;  %v4920_v46 = vpop.f32.mrb[131].mxu1 }
 0x7c2   : > { %9702 = vpow2.f32 %v5297_v40  ;;  %v5299_v45 = vmul.f32 1.442695, %v4920_v46  ;;  %5556 = vst [vmem:[#allocation13 + $0x18] sm:$0xff] %v4920_v46 }
 0x7c3   : > { %5183 = vmatmul.mubr.bf16.gmra.mrb[236].mxu1 %v9949_v23 }
 0x7c4   : > { %9704 = vpow2.f32 %v5299_v45  ;;  %5192 = vmatprep.mubr.bf16.mxu1 %v9950_v47 }
 0x7c6   : > { %v4924_v22 = vpop.f32.mrb[132].mxu1 }
 0x7c7   : > { %5557 = vst [vmem:[#allocation13 + $0x20] sm:$0xff] %v4924_v22  ;;  %v4926_v49 = vpop.f32.mrb[133].mxu1 }
 0x7c8   : > { %v5301_v25 = vmul.f32 1.442695, %v4926_v49  ;;  %5558 = vst [vmem:[#allocation13 + $0x28] sm:$0xff] %v4926_v49  ;;  %v4928_v50 = vpop.f32.mrb[134].mxu1 }
 0x7c9   : > { %5559 = vst [vmem:[#allocation13 + $0x30] sm:$0xff] %v4928_v50  ;;  %v4930_v54 = vpop.f32.mrb[135].mxu1 }
 0x7ca   : > { %9706 = vpow2.f32 %v5301_v25  ;;  %v5303_v26 = vmul.f32 1.442695, %v4930_v54  ;;  %5560 = vst [vmem:[#allocation13 + $0x38] sm:$0xff] %v4930_v54 }
 0x7cb   : > { %5193 = vmatmul.mubr.bf16.gmra.mrb[240].mxu1 %v9951_v24  ;;  %v5242_v24 = vld [vmem:[#allocation11 + $0x48] sm:$0xff] }
 0x7cc   : > { %v9703_v9 = vpop.eup %9702  ;;  %9708 = vpow2.f32 %v5303_v26  ;;  %5202 = vmatprep.mubr.bf16.mxu1 %v9952_v36  ;;  %v5241_v26 = vld [vmem:[#allocation11 + $0x40] sm:$0xff] }
 0x7cd   : > { %v5425_v52 = vmul.f32 %v9703_v9, %v5233_v61 }
 0x7ce   : > { %v9705_v11 = vpop.eup %9704  ;;  %v4934_v55 = vpop.f32.mrb[136].mxu1 }
 0x7cf   : > { %5561 = vst [vmem:[#allocation13 + $0x40] sm:$0xff] %v4934_v55  ;;  %v4936_v12 = vpop.f32.mrb[137].mxu1  ;;  %v11188_v27 = vadd.f32 %v5425_v52, %v4914_v30  ;;  %v5426_v59 = vmul.f32 %v9705_v11, %v5234_v63 }
 0x7d0   : > { %v5305_v16 = vmul.f32 1.442695, %v4936_v12  ;;  %5562 = vst [vmem:[#allocation13 + $0x48] sm:$0xff] %v4936_v12  ;;  %v4938_v29 = vpop.f32.mrb[138].mxu1 }
 0x7d1   : > { %5563 = vst [vmem:[#allocation13 + $0x50] sm:$0xff] %v4938_v29  ;;  %v4940_v60 = vpop.f32.mrb[139].mxu1  ;;  %5681 = vst [vmem:[#allocation12] sm:$0xff] %v11188_v27  ;;  %v11191_v42 = vadd.f32 %v5426_v59, %v4918_v21 }
 0x7d2   : > { %9710 = vpow2.f32 %v5305_v16  ;;  %v5307_v31 = vmul.f32 1.442695, %v4940_v60  ;;  %5564 = vst [vmem:[#allocation13 + $0x58] sm:$0xff] %v4940_v60 }
 0x7d3   : > { %5203 = vmatmul.mubr.bf16.gmra.mrb[244].mxu1 %v9953_v32  ;;  %5682 = vst [vmem:[#allocation12 + $0x8] sm:$0xff] %v11191_v42  ;;  %v5244_v32 = vld [vmem:[#allocation11 + $0x58] sm:$0xff] }
 0x7d4   : > { %v9707_v1 = vpop.eup %9706  ;;  %9712 = vpow2.f32 %v5307_v31  ;;  %5212 = vmatprep.mubr.bf16.mxu1 %v9954_v14  ;;  %v5243_v31 = vld [vmem:[#allocation11 + $0x50] sm:$0xff] }
 0x7d5   : > { %v5427_v2 = vmul.f32 %v9707_v1, %v5235_v13 }
 0x7d6   : > { %v9709_v62 = vpop.eup %9708  ;;  %v4944_v57 = vpop.f32.mrb[140].mxu1 }
 0x7d7   : > { %5565 = vst [vmem:[#allocation13 + $0x60] sm:$0xff] %v4944_v57  ;;  %v4946_v6 = vpop.f32.mrb[141].mxu1  ;;  %v11194_v4 = vadd.f32 %v5427_v2, %v4924_v22  ;;  %v5428_v34 = vmul.f32 %v9709_v62, %v5236_v10 }
 0x7d8   : > { %v5309_v33 = vmul.f32 1.442695, %v4946_v6  ;;  %5566 = vst [vmem:[#allocation13 + $0x68] sm:$0xff] %v4946_v6  ;;  %v4948_v48 = vpop.f32.mrb[142].mxu1 }
 0x7d9   : > { %5567 = vst [vmem:[#allocation13 + $0x70] sm:$0xff] %v4948_v48  ;;  %v4950_v35 = vpop.f32.mrb[143].mxu1  ;;  %5683 = vst [vmem:[#allocation12 + $0x10] sm:$0xff] %v11194_v4  ;;  %v11197_v15 = vadd.f32 %v5428_v34, %v4928_v50 }
 0x7da   : > { %9714 = vpow2.f32 %v5309_v33  ;;  %v5311_v37 = vmul.f32 1.442695, %v4950_v35  ;;  %5568 = vst [vmem:[#allocation13 + $0x78] sm:$0xff] %v4950_v35 }
 0x7db   : > { %5213 = vmatmul.mubr.bf16.gmra.mrb[248].mxu1 %v9955_v38  ;;  %5684 = vst [vmem:[#allocation12 + $0x18] sm:$0xff] %v11197_v15  ;;  %v5246_v38 = vld [vmem:[#allocation11 + $0x68] sm:$0xff] }
 0x7dc   : > { %v9711_v0 = vpop.eup %9710  ;;  %9716 = vpow2.f32 %v5311_v37  ;;  %5222 = vmatprep.mubr.bf16.mxu1 %v9956_v17  ;;  %v5245_v37 = vld [vmem:[#allocation11 + $0x60] sm:$0xff] }
 0x7dd   : > { %v5429_v53 = vmul.f32 %v9711_v0, %v5237_v51 }
 0x7de   : > { %v9713_v19 = vpop.eup %9712  ;;  %v4954_v18 = vpop.f32.mrb[144].mxu1 }
 0x7df   : > { %5569 = vst [vmem:[#allocation13 + $0x80] sm:$0xff] %v4954_v18  ;;  %v4956_v20 = vpop.f32.mrb[145].mxu1  ;;  %v11200_v39 = vadd.f32 %v5429_v53, %v4934_v55  ;;  %v5430_v5 = vmul.f32 %v9713_v19, %v5238_v3 }
 0x7e0   : > { %v5313_v41 = vmul.f32 1.442695, %v4956_v20  ;;  %5570 = vst [vmem:[#allocation13 + $0x88] sm:$0xff] %v4956_v20  ;;  %v4958_v56 = vpop.f32.mrb[146].mxu1 }
 0x7e1   : > { %5571 = vst [vmem:[#allocation13 + $0x90] sm:$0xff] %v4958_v56  ;;  %v4960_v43 = vpop.f32.mrb[147].mxu1  ;;  %5685 = vst [vmem:[#allocation12 + $0x20] sm:$0xff] %v11200_v39  ;;  %v11203_v58 = vadd.f32 %v5430_v5, %v4938_v29 }
 0x7e2   : > { %9718 = vpow2.f32 %v5313_v41  ;;  %v5315_v44 = vmul.f32 1.442695, %v4960_v43  ;;  %5572 = vst [vmem:[#allocation13 + $0x98] sm:$0xff] %v4960_v43 }
 0x7e3   : > { %5223 = vmatmul.mubr.bf16.gmra.mrb[252].mxu1 %v9957_v7  ;;  %5686 = vst [vmem:[#allocation12 + $0x28] sm:$0xff] %v11203_v58  ;;  %v5248_v7 = vld [vmem:[#allocation11 + $0x78] sm:$0xff] }
 0x7e4   : > { %v9715_v30 = vpop.eup %9714  ;;  %9720 = vpow2.f32 %v5315_v44  ;;  %v5247_v44 = vld [vmem:[#allocation11 + $0x70] sm:$0xff] }
 0x7e5   : > { %v5431_v40 = vmul.f32 %v9715_v30, %v5239_v28 }
 0x7e6   : > { %v9717_v21 = vpop.eup %9716  ;;  %v4964_v46 = vpop.f32.mrb[148].mxu1 }
 0x7e7   : > { %5573 = vst [vmem:[#allocation13 + $0xa0] sm:$0xff] %v4964_v46  ;;  %v4966_v45 = vpop.f32.mrb[149].mxu1  ;;  %v11206_v23 = vadd.f32 %v5431_v40, %v4944_v57  ;;  %v5432_v47 = vmul.f32 %v9717_v21, %v5240_v8 }
 0x7e8   : > { %v5317_v22 = vmul.f32 1.442695, %v4966_v45  ;;  %5574 = vst [vmem:[#allocation13 + $0xa8] sm:$0xff] %v4966_v45  ;;  %v4968_v49 = vpop.f32.mrb[150].mxu1 }
 0x7e9   : > { %5575 = vst [vmem:[#allocation13 + $0xb0] sm:$0xff] %v4968_v49  ;;  %v4970_v25 = vpop.f32.mrb[151].mxu1  ;;  %5687 = vst [vmem:[#allocation12 + $0x30] sm:$0xff] %v11206_v23  ;;  %v11209_v50 = vadd.f32 %v5432_v47, %v4948_v48 }
 0x7ea   : > { %9722 = vpow2.f32 %v5317_v22  ;;  %v5319_v54 = vmul.f32 1.442695, %v4970_v25  ;;  %5576 = vst [vmem:[#allocation13 + $0xb8] sm:$0xff] %v4970_v25 }
 0x7eb   : > { %5688 = vst [vmem:[#allocation12 + $0x38] sm:$0xff] %v11209_v50 }
 0x7ec   : > { %v9719_v61 = vpop.eup %9718  ;;  %9724 = vpow2.f32 %v5319_v54 }
 0x7ed   : > { %v5433_v9 = vmul.f32 %v9719_v61, %v5241_v26  ;;  %v5249_v26 = vld [vmem:[#allocation11 + $0x80] sm:$0xff] }
 0x7ee   : > { %v9721_v36 = vpop.eup %9720  ;;  %v4974_v63 = vpop.f32.mrb[152].mxu1 }
 0x7ef   : > { %5577 = vst [vmem:[#allocation13 + $0xc0] sm:$0xff] %v4974_v63  ;;  %v4976_v52 = vpop.f32.mrb[153].mxu1  ;;  %v11212_v11 = vadd.f32 %v5433_v9, %v4954_v18  ;;  %v5434_v55 = vmul.f32 %v9721_v36, %v5242_v24  ;;  %v5250_v24 = vld [vmem:[#allocation11 + $0x88] sm:$0xff] }
 0x7f0   : > { %v5321_v12 = vmul.f32 1.442695, %v4976_v52  ;;  %5578 = vst [vmem:[#allocation13 + $0xc8] sm:$0xff] %v4976_v52  ;;  %v4978_v59 = vpop.f32.mrb[154].mxu1 }
 0x7f1   : > { %5579 = vst [vmem:[#allocation13 + $0xd0] sm:$0xff] %v4978_v59  ;;  %v4980_v16 = vpop.f32.mrb[155].mxu1  ;;  %5689 = vst [vmem:[#allocation12 + $0x40] sm:$0xff] %v11212_v11  ;;  %v11215_v29 = vadd.f32 %v5434_v55, %v4958_v56 }
 0x7f2   : > { %9726 = vpow2.f32 %v5321_v12  ;;  %v5323_v60 = vmul.f32 1.442695, %v4980_v16  ;;  %5580 = vst [vmem:[#allocation13 + $0xd8] sm:$0xff] %v4980_v16 }
 0x7f3   : > { %5690 = vst [vmem:[#allocation12 + $0x48] sm:$0xff] %v11215_v29 }
 0x7f4   : > { %v9723_v13 = vpop.eup %9722  ;;  %9728 = vpow2.f32 %v5323_v60 }
 0x7f5   : > { %v5435_v1 = vmul.f32 %v9723_v13, %v5243_v31 }
 0x7f6   : > { %v9725_v14 = vpop.eup %9724  ;;  %v4984_v10 = vpop.f32.mrb[156].mxu1 }
 0x7f7   : > { %5581 = vst [vmem:[#allocation13 + $0xe0] sm:$0xff] %v4984_v10  ;;  %v4986_v2 = vpop.f32.mrb[157].mxu1  ;;  %v11218_v62 = vadd.f32 %v5435_v1, %v4964_v46  ;;  %v5436_v57 = vmul.f32 %v9725_v14, %v5244_v32  ;;  %v5251_v1 = vld [vmem:[#allocation11 + $0x90] sm:$0xff] }
 0x7f8   : > { %v5325_v6 = vmul.f32 1.442695, %v4986_v2  ;;  %5582 = vst [vmem:[#allocation13 + $0xe8] sm:$0xff] %v4986_v2  ;;  %v4988_v34 = vpop.f32.mrb[158].mxu1  ;;  %v5252_v2 = vld [vmem:[#allocation11 + $0x98] sm:$0xff] }
 0x7f9   : > { %5583 = vst [vmem:[#allocation13 + $0xf0] sm:$0xff] %v4988_v34  ;;  %v4990_v33 = vpop.f32.mrb[159].mxu1  ;;  %5691 = vst [vmem:[#allocation12 + $0x50] sm:$0xff] %v11218_v62  ;;  %v11221_v48 = vadd.f32 %v5436_v57, %v4968_v49 }
 0x7fa   : > { %9730 = vpow2.f32 %v5325_v6  ;;  %v5327_v35 = vmul.f32 1.442695, %v4990_v33  ;;  %5584 = vst [vmem:[#allocation13 + $0xf8] sm:$0xff] %v4990_v33 }
 0x7fb   : > { %5692 = vst [vmem:[#allocation12 + $0x58] sm:$0xff] %v11221_v48 }
 0x7fc   : > { %v9727_v51 = vpop.eup %9726  ;;  %9732 = vpow2.f32 %v5327_v35 }
 0x7fd   : > { %v5437_v0 = vmul.f32 %v9727_v51, %v5245_v37 }
 0x7fe   : > { %v9729_v17 = vpop.eup %9728  ;;  %v4994_v3 = vpop.f32.mrb[160].mxu1 }
 0x7ff   : > { %5585 = vst [vmem:[#allocation13 + $0x100] sm:$0xff] %v4994_v3  ;;  %v4996_v53 = vpop.f32.mrb[161].mxu1  ;;  %v11224_v19 = vadd.f32 %v5437_v0, %v4974_v63  ;;  %v5438_v18 = vmul.f32 %v9729_v17, %v5246_v38 }
 0x800   : > { %v5329_v20 = vmul.f32 1.442695, %v4996_v53  ;;  %5586 = vst [vmem:[#allocation13 + $0x108] sm:$0xff] %v4996_v53  ;;  %v4998_v5 = vpop.f32.mrb[162].mxu1 }
 0x801   : > { %5587 = vst [vmem:[#allocation13 + $0x110] sm:$0xff] %v4998_v5  ;;  %v5000_v41 = vpop.f32.mrb[163].mxu1  ;;  %5693 = vst [vmem:[#allocation12 + $0x60] sm:$0xff] %v11224_v19  ;;  %v11227_v56 = vadd.f32 %v5438_v18, %v4978_v59 }
 0x802   : > { %9734 = vpow2.f32 %v5329_v20  ;;  %v5331_v43 = vmul.f32 1.442695, %v5000_v41  ;;  %5588 = vst [vmem:[#allocation13 + $0x118] sm:$0xff] %v5000_v41  ;;  %v5254_v20 = vld [vmem:[#allocation11 + $0xa8] sm:$0xff] }
 0x803   : > { %5694 = vst [vmem:[#allocation12 + $0x68] sm:$0xff] %v11227_v56 }
 0x804   : > { %v9731_v28 = vpop.eup %9730  ;;  %9736 = vpow2.f32 %v5331_v43 }
 0x805   : > { %v5439_v30 = vmul.f32 %v9731_v28, %v5247_v44 }
 0x806   : > { %v9733_v8 = vpop.eup %9732  ;;  %v5004_v40 = vpop.f32.mrb[164].mxu1 }
 0x807   : > { %5589 = vst [vmem:[#allocation13 + $0x120] sm:$0xff] %v5004_v40  ;;  %v5006_v21 = vpop.f32.mrb[165].mxu1  ;;  %v11230_v46 = vadd.f32 %v5439_v30, %v4984_v10  ;;  %v5440_v45 = vmul.f32 %v9733_v8, %v5248_v7 }
 0x808   : > { %v5333_v47 = vmul.f32 1.442695, %v5006_v21  ;;  %5590 = vst [vmem:[#allocation13 + $0x128] sm:$0xff] %v5006_v21  ;;  %v5008_v22 = vpop.f32.mrb[166].mxu1 }
 0x809   : > { %5591 = vst [vmem:[#allocation13 + $0x130] sm:$0xff] %v5008_v22  ;;  %v5010_v49 = vpop.f32.mrb[167].mxu1  ;;  %5695 = vst [vmem:[#allocation12 + $0x70] sm:$0xff] %v11230_v46  ;;  %v11233_v25 = vadd.f32 %v5440_v45, %v4988_v34  ;;  %v5255_v45 = vld [vmem:[#allocation11 + $0xb0] sm:$0xff] }
 0x80a   : > { %9738 = vpow2.f32 %v5333_v47  ;;  %v5335_v54 = vmul.f32 1.442695, %v5010_v49  ;;  %5592 = vst [vmem:[#allocation13 + $0x138] sm:$0xff] %v5010_v49  ;;  %v5256_v49 = vld [vmem:[#allocation11 + $0xb8] sm:$0xff] }
 0x80b   : > { %5696 = vst [vmem:[#allocation12 + $0x78] sm:$0xff] %v11233_v25 }
 0x80c   : > { %v9735_v61 = vpop.eup %9734  ;;  %9740 = vpow2.f32 %v5335_v54 }
 0x80d   : > { %v5441_v9 = vmul.f32 %v9735_v61, %v5249_v26 }
 0x80e   : > { %v9737_v36 = vpop.eup %9736  ;;  %v5014_v63 = vpop.f32.mrb[168].mxu1 }
 0x80f   : > { %5593 = vst [vmem:[#allocation13 + $0x140] sm:$0xff] %v5014_v63  ;;  %v5016_v52 = vpop.f32.mrb[169].mxu1  ;;  %v5505_v55 = vadd.f32 %v5441_v9, %v4994_v3  ;;  %v5442_v12 = vmul.f32 %v9737_v36, %v5250_v24  ;;  %v5253_v3 = vld [vmem:[#allocation11 + $0xa0] sm:$0xff] }
 0x810   : > { %v5337_v59 = vmul.f32 1.442695, %v5016_v52  ;;  %5594 = vst [vmem:[#allocation13 + $0x148] sm:$0xff] %v5016_v52  ;;  %v5018_v16 = vpop.f32.mrb[170].mxu1 }
 0x811   : > { %5595 = vst [vmem:[#allocation13 + $0x150] sm:$0xff] %v5018_v16  ;;  %v5020_v60 = vpop.f32.mrb[171].mxu1  ;;  %v8950_v31 = vpack.i.bf16 %v5505_v55, %v11188_v27  ;;  %5697 = vst [vmem:[#allocation12 + $0x80] sm:$0xff] %v5505_v55  ;;  %v5506_v13 = vadd.f32 %v5442_v12, %v4998_v5 }
 0x812   : > { %9742 = vpow2.f32 %v5337_v59  ;;  %v5339_v32 = vmul.f32 1.442695, %v5020_v60  ;;  %5596 = vst [vmem:[#allocation13 + $0x158] sm:$0xff] %v5020_v60  ;;  %v5257_v59 = vld [vmem:[#allocation11 + $0xc0] sm:$0xff] }
 0x813   : > { %8951 = vxpose.xlu0.b32.start [1/16] %v8950_v31, 128  ;;  %v8952_v14 = vpack.i.bf16 %v5506_v13, %v11191_v42  ;;  %5698 = vst [vmem:[#allocation12 + $0x88] sm:$0xff] %v5506_v13  ;;  %v5258_v31 = vld [vmem:[#allocation11 + $0xc8] sm:$0xff] }
 0x814   : > { %v9739_v10 = vpop.eup %9738  ;;  %9744 = vpow2.f32 %v5339_v32 }
 0x815   : > { %v5443_v57 = vmul.f32 %v9739_v10, %v5251_v1 }
 0x816   : > { %v9741_v6 = vpop.eup %9740  ;;  %v5024_v34 = vpop.f32.mrb[172].mxu1 }
 0x817   : > { %5597 = vst [vmem:[#allocation13 + $0x160] sm:$0xff] %v5024_v34  ;;  %8953 = vxpose.xlu0.b32.cont [2/16] %v8952_v14, 128  ;;  %v5026_v33 = vpop.f32.mrb[173].mxu1  ;;  %v5507_v27 = vadd.f32 %v5443_v57, %v5004_v40  ;;  %v5444_v35 = vmul.f32 %v9741_v6, %v5252_v2 }
 0x818   : > { %v5341_v37 = vmul.f32 1.442695, %v5026_v33  ;;  %5598 = vst [vmem:[#allocation13 + $0x168] sm:$0xff] %v5026_v33  ;;  %v5028_v51 = vpop.f32.mrb[174].mxu1 }
 0x819   : > { %5599 = vst [vmem:[#allocation13 + $0x170] sm:$0xff] %v5028_v51  ;;  %v5030_v38 = vpop.f32.mrb[175].mxu1  ;;  %v8954_v0 = vpack.i.bf16 %v5507_v27, %v11194_v4  ;;  %5699 = vst [vmem:[#allocation12 + $0x90] sm:$0xff] %v5507_v27  ;;  %v5508_v42 = vadd.f32 %v5444_v35, %v5008_v22  ;;  %v5259_v27 = vld [vmem:[#allocation11 + $0xd0] sm:$0xff] }
 0x81a   : > { %9746 = vpow2.f32 %v5341_v37  ;;  %v5343_v17 = vmul.f32 1.442695, %v5030_v38  ;;  %5600 = vst [vmem:[#allocation13 + $0x178] sm:$0xff] %v5030_v38 }
 0x81b   : > { %8955 = vxpose.xlu0.b32.cont [3/16] %v8954_v0, 128  ;;  %v8956_v53 = vpack.i.bf16 %v5508_v42, %v11197_v15  ;;  %5700 = vst [vmem:[#allocation12 + $0x98] sm:$0xff] %v5508_v42 }
 0x81c   : > { %v9743_v18 = vpop.eup %9742  ;;  %9748 = vpow2.f32 %v5343_v17 }
 0x81d   : > { %v5445_v5 = vmul.f32 %v9743_v18, %v5253_v3 }
 0x81e   : > { %v9745_v41 = vpop.eup %9744  ;;  %v5034_v43 = vpop.f32.mrb[176].mxu1 }
 0x81f   : > { %5601 = vst [vmem:[#allocation13 + $0x180] sm:$0xff] %v5034_v43  ;;  %8957 = vxpose.xlu0.b32.cont [4/16] %v8956_v53, 128  ;;  %v5036_v44 = vpop.f32.mrb[177].mxu1  ;;  %v5509_v4 = vadd.f32 %v5445_v5, %v5014_v63  ;;  %v5446_v28 = vmul.f32 %v9745_v41, %v5254_v20 }
 0x820   : > { %v5345_v7 = vmul.f32 1.442695, %v5036_v44  ;;  %5602 = vst [vmem:[#allocation13 + $0x188] sm:$0xff] %v5036_v44  ;;  %v5038_v30 = vpop.f32.mrb[178].mxu1 }
 0x821   : > { %5603 = vst [vmem:[#allocation13 + $0x190] sm:$0xff] %v5038_v30  ;;  %v5040_v8 = vpop.f32.mrb[179].mxu1  ;;  %v8958_v40 = vpack.i.bf16 %v5509_v4, %v11200_v39  ;;  %5701 = vst [vmem:[#allocation12 + $0xa0] sm:$0xff] %v5509_v4  ;;  %v5510_v15 = vadd.f32 %v5446_v28, %v5018_v16  ;;  %v5262_v28 = vld [vmem:[#allocation11 + $0xe8] sm:$0xff] }
 0x822   : > { %9750 = vpow2.f32 %v5345_v7  ;;  %v5347_v21 = vmul.f32 1.442695, %v5040_v8  ;;  %5604 = vst [vmem:[#allocation13 + $0x198] sm:$0xff] %v5040_v8 }
 0x823   : > { %8959 = vxpose.xlu0.b32.cont [5/16] %v8958_v40, 128  ;;  %v8960_v47 = vpack.i.bf16 %v5510_v15, %v11203_v58  ;;  %5702 = vst [vmem:[#allocation12 + $0xa8] sm:$0xff] %v5510_v15 }
 0x824   : > { %v9747_v22 = vpop.eup %9746  ;;  %9752 = vpow2.f32 %v5347_v21 }
 0x825   : > { %v5447_v54 = vmul.f32 %v9747_v22, %v5255_v45 }
 0x826   : > { %v9749_v26 = vpop.eup %9748  ;;  %v5044_v61 = vpop.f32.mrb[180].mxu1 }
 0x827   : > { %5605 = vst [vmem:[#allocation13 + $0x1a0] sm:$0xff] %v5044_v61  ;;  %8961 = vxpose.xlu0.b32.cont [6/16] %v8960_v47, 128  ;;  %v5046_v24 = vpop.f32.mrb[181].mxu1  ;;  %v5511_v39 = vadd.f32 %v5447_v54, %v5024_v34  ;;  %v5448_v9 = vmul.f32 %v9749_v26, %v5256_v49  ;;  %v5263_v54 = vld [vmem:[#allocation11 + $0xf0] sm:$0xff] }
 0x828   : > { %v5349_v36 = vmul.f32 1.442695, %v5046_v24  ;;  %5606 = vst [vmem:[#allocation13 + $0x1a8] sm:$0xff] %v5046_v24  ;;  %v5048_v63 = vpop.f32.mrb[182].mxu1  ;;  %v5264_v24 = vld [vmem:[#allocation11 + $0xf8] sm:$0xff] }
 0x829   : > { %5607 = vst [vmem:[#allocation13 + $0x1b0] sm:$0xff] %v5048_v63  ;;  %v5050_v52 = vpop.f32.mrb[183].mxu1  ;;  %v8962_v55 = vpack.i.bf16 %v5511_v39, %v11206_v23  ;;  %5703 = vst [vmem:[#allocation12 + $0xb0] sm:$0xff] %v5511_v39  ;;  %v5512_v58 = vadd.f32 %v5448_v9, %v5028_v51  ;;  %v5260_v51 = vld [vmem:[#allocation11 + $0xd8] sm:$0xff] }
 0x82a   : > { %9754 = vpow2.f32 %v5349_v36  ;;  %v5351_v12 = vmul.f32 1.442695, %v5050_v52  ;;  %5608 = vst [vmem:[#allocation13 + $0x1b8] sm:$0xff] %v5050_v52 }
 0x82b   : > { %8963 = vxpose.xlu0.b32.cont [7/16] %v8962_v55, 128  ;;  %v8964_v16 = vpack.i.bf16 %v5512_v58, %v11209_v50  ;;  %5704 = vst [vmem:[#allocation12 + $0xb8] sm:$0xff] %v5512_v58 }
 0x82c   : > { %v9751_v60 = vpop.eup %9750  ;;  %9756 = vpow2.f32 %v5351_v12 }
 0x82d   : > { %v5449_v13 = vmul.f32 %v9751_v60, %v5257_v59  ;;  %v5265_v60 = vld [vmem:[#allocation11 + $0x100] sm:$0xff] }
 0x82e   : > { %v9753_v32 = vpop.eup %9752  ;;  %v5054_v1 = vpop.f32.mrb[184].mxu1 }
 0x82f   : > { %5609 = vst [vmem:[#allocation13 + $0x1c0] sm:$0xff] %v5054_v1  ;;  %8965 = vxpose.xlu0.b32.cont [8/16] %v8964_v16, 128  ;;  %v5056_v14 = vpop.f32.mrb[185].mxu1  ;;  %v5513_v23 = vadd.f32 %v5449_v13, %v5034_v43  ;;  %v5450_v10 = vmul.f32 %v9753_v32, %v5258_v31  ;;  %v5261_v43 = vld [vmem:[#allocation11 + $0xe0] sm:$0xff]  ;;  %v5266_v32 = vld [vmem:[#allocation11 + $0x108] sm:$0xff] }
 0x830   : > { %v5353_v2 = vmul.f32 1.442695, %v5056_v14  ;;  %5610 = vst [vmem:[#allocation13 + $0x1c8] sm:$0xff] %v5056_v14  ;;  %v5058_v57 = vpop.f32.mrb[186].mxu1 }
 0x831   : > { %5611 = vst [vmem:[#allocation13 + $0x1d0] sm:$0xff] %v5058_v57  ;;  %v5060_v6 = vpop.f32.mrb[187].mxu1  ;;  %v8966_v34 = vpack.i.bf16 %v5513_v23, %v11212_v11  ;;  %5705 = vst [vmem:[#allocation12 + $0xc0] sm:$0xff] %v5513_v23  ;;  %v5514_v50 = vadd.f32 %v5450_v10, %v5038_v30 }
 0x832   : > { %9758 = vpow2.f32 %v5353_v2  ;;  %v5355_v33 = vmul.f32 1.442695, %v5060_v6  ;;  %5612 = vst [vmem:[#allocation13 + $0x1d8] sm:$0xff] %v5060_v6 }
 0x833   : > { %8967 = vxpose.xlu0.b32.cont [9/16] %v8966_v34, 128  ;;  %v8968_v35 = vpack.i.bf16 %v5514_v50, %v11215_v29  ;;  %5706 = vst [vmem:[#allocation12 + $0xc8] sm:$0xff] %v5514_v50 }
 0x834   : > { %v9755_v37 = vpop.eup %9754  ;;  %9760 = vpow2.f32 %v5355_v33  ;;  %v5267_v33 = vld [vmem:[#allocation11 + $0x110] sm:$0xff] }
 0x835   : > { %v5451_v38 = vmul.f32 %v9755_v37, %v5259_v27 }
 0x836   : > { %v9757_v0 = vpop.eup %9756  ;;  %v5064_v42 = vpop.f32.mrb[188].mxu1 }
 0x837   : > { %5613 = vst [vmem:[#allocation13 + $0x1e0] sm:$0xff] %v5064_v42  ;;  %8969 = vxpose.xlu0.b32.cont [10/16] %v8968_v35, 128  ;;  %v5066_v17 = vpop.f32.mrb[189].mxu1  ;;  %v5515_v11 = vadd.f32 %v5451_v38, %v5044_v61  ;;  %v5452_v3 = vmul.f32 %v9757_v0, %v5260_v51  ;;  %v5268_v35 = vld [vmem:[#allocation11 + $0x118] sm:$0xff] }
 0x838   : > { %v5357_v53 = vmul.f32 1.442695, %v5066_v17  ;;  %5614 = vst [vmem:[#allocation13 + $0x1e8] sm:$0xff] %v5066_v17  ;;  %v5068_v18 = vpop.f32.mrb[190].mxu1 }
 0x839   : > { %5615 = vst [vmem:[#allocation13 + $0x1f0] sm:$0xff] %v5068_v18  ;;  %v5070_v20 = vpop.f32.mrb[191].mxu1  ;;  %v8970_v5 = vpack.i.bf16 %v5515_v11, %v11218_v62  ;;  %5707 = vst [vmem:[#allocation12 + $0xd0] sm:$0xff] %v5515_v11  ;;  %v5516_v29 = vadd.f32 %v5452_v3, %v5048_v63 }
 0x83a   : > { %9762 = vpow2.f32 %v5357_v53  ;;  %v5359_v41 = vmul.f32 1.442695, %v5070_v20  ;;  %5616 = vst [vmem:[#allocation13 + $0x1f8] sm:$0xff] %v5070_v20 }
 0x83b   : > { %8971 = vxpose.xlu0.b32.cont [11/16] %v8970_v5, 128  ;;  %v8972_v44 = vpack.i.bf16 %v5516_v29, %v11221_v48  ;;  %5708 = vst [vmem:[#allocation12 + $0xd8] sm:$0xff] %v5516_v29  ;;  %v5269_v5 = vld [vmem:[#allocation11 + $0x120] sm:$0xff] }
 0x83c   : > { %v9759_v4 = vpop.eup %9758  ;;  %9764 = vpow2.f32 %v5359_v41  ;;  %v5270_v41 = vld [vmem:[#allocation11 + $0x128] sm:$0xff] }
 0x83d   : > { %v5453_v7 = vmul.f32 %v9759_v4, %v5261_v43 }
 0x83e   : > { %v9761_v30 = vpop.eup %9760  ;;  %v5074_v8 = vpop.f32.mrb[192].mxu1 }
 0x83f   : > { %5617 = vst [vmem:[#allocation13 + $0x200] sm:$0xff] %v5074_v8  ;;  %8973 = vxpose.xlu0.b32.cont [12/16] %v8972_v44, 128  ;;  %v5076_v40 = vpop.f32.mrb[193].mxu1  ;;  %v5517_v62 = vadd.f32 %v5453_v7, %v5054_v1  ;;  %v5454_v15 = vmul.f32 %v9761_v30, %v5262_v28 }
 0x840   : > { %v5361_v21 = vmul.f32 1.442695, %v5076_v40  ;;  %5618 = vst [vmem:[#allocation13 + $0x208] sm:$0xff] %v5076_v40  ;;  %v5078_v45 = vpop.f32.mrb[194].mxu1 }
 0x841   : > { %5619 = vst [vmem:[#allocation13 + $0x210] sm:$0xff] %v5078_v45  ;;  %v5080_v47 = vpop.f32.mrb[195].mxu1  ;;  %v8974_v22 = vpack.i.bf16 %v5517_v62, %v11224_v19  ;;  %5709 = vst [vmem:[#allocation12 + $0xe0] sm:$0xff] %v5517_v62  ;;  %v5518_v48 = vadd.f32 %v5454_v15, %v5058_v57 }
 0x842   : > { %9766 = vpow2.f32 %v5361_v21  ;;  %v5363_v49 = vmul.f32 1.442695, %v5080_v47  ;;  %5620 = vst [vmem:[#allocation13 + $0x218] sm:$0xff] %v5080_v47 }
 0x843   : > { %8975 = vxpose.xlu0.b32.cont [13/16] %v8974_v22, 128  ;;  %v8976_v26 = vpack.i.bf16 %v5518_v48, %v11227_v56  ;;  %5710 = vst [vmem:[#allocation12 + $0xe8] sm:$0xff] %v5518_v48  ;;  %v5272_v22 = vld [vmem:[#allocation11 + $0x138] sm:$0xff] }
 0x844   : > { %v9763_v61 = vpop.eup %9762  ;;  %9768 = vpow2.f32 %v5363_v49 }
 0x845   : > { %v5455_v39 = vmul.f32 %v9763_v61, %v5263_v54 }
 0x846   : > { %v9765_v9 = vpop.eup %9764  ;;  %v5084_v36 = vpop.f32.mrb[196].mxu1 }
 0x847   : > { %5621 = vst [vmem:[#allocation13 + $0x220] sm:$0xff] %v5084_v36  ;;  %8977 = vxpose.xlu0.b32.cont [14/16] %v8976_v26, 128  ;;  %v5086_v63 = vpop.f32.mrb[197].mxu1  ;;  %v5519_v19 = vadd.f32 %v5455_v39, %v5064_v42  ;;  %v5456_v52 = vmul.f32 %v9765_v9, %v5264_v24 }
 0x848   : > { %v5365_v55 = vmul.f32 1.442695, %v5086_v63  ;;  %5622 = vst [vmem:[#allocation13 + $0x228] sm:$0xff] %v5086_v63  ;;  %v5088_v58 = vpop.f32.mrb[198].mxu1 }
 0x849   : > { %5623 = vst [vmem:[#allocation13 + $0x230] sm:$0xff] %v5088_v58  ;;  %v5090_v12 = vpop.f32.mrb[199].mxu1  ;;  %v8978_v59 = vpack.i.bf16 %v5519_v19, %v11230_v46  ;;  %5711 = vst [vmem:[#allocation12 + $0xf0] sm:$0xff] %v5519_v19  ;;  %v5520_v56 = vadd.f32 %v5456_v52, %v5068_v18  ;;  %v5273_v52 = vld [vmem:[#allocation11 + $0x140] sm:$0xff] }
 0x84a   : > { %9770 = vpow2.f32 %v5365_v55  ;;  %v5367_v16 = vmul.f32 1.442695, %v5090_v12  ;;  %5624 = vst [vmem:[#allocation13 + $0x238] sm:$0xff] %v5090_v12 }
 0x84b   : > { %8979 = vxpose.xlu0.b32.cont [15/16] %v8978_v59, 128  ;;  %v8980_v31 = vpack.i.bf16 %v5520_v56, %v11233_v25  ;;  %5712 = vst [vmem:[#allocation12 + $0xf8] sm:$0xff] %v5520_v56 }
 0x84c   : > { %v9767_v13 = vpop.eup %9766  ;;  %9772 = vpow2.f32 %v5367_v16 }
 0x84d   : > { %v5457_v1 = vmul.f32 %v9767_v13, %v5265_v60 }
 0x84e   : > { %v9769_v14 = vpop.eup %9768  ;;  %v5094_v23 = vpop.f32.mrb[200].mxu1 }
 0x84f   : > { %5625 = vst [vmem:[#allocation13 + $0x240] sm:$0xff] %v5094_v23  ;;  %8981 = vxpose.xlu0.b32.end [16/16] %v8980_v31, 128  ;;  %v5096_v10 = vpop.f32.mrb[201].mxu1  ;;  %v11252_v46 = vadd.f32 %v5457_v1, %v5074_v8  ;;  %v5458_v2 = vmul.f32 %v9769_v14, %v5266_v32 }
 0x850   : > { %v5369_v57 = vmul.f32 1.442695, %v5096_v10  ;;  %5626 = vst [vmem:[#allocation13 + $0x248] sm:$0xff] %v5096_v10  ;;  %v5098_v6 = vpop.f32.mrb[202].mxu1  ;;  %v5275_v10 = vld [vmem:[#allocation11 + $0x150] sm:$0xff] }
 0x851   : > { %5627 = vst [vmem:[#allocation13 + $0x250] sm:$0xff] %v5098_v6  ;;  %v5100_v34 = vpop.f32.mrb[203].mxu1  ;;  %5713 = vst [vmem:[#allocation12 + $0x100] sm:$0xff] %v11252_v46  ;;  %v11255_v25 = vadd.f32 %v5458_v2, %v5078_v45  ;;  %v5271_v45 = vld [vmem:[#allocation11 + $0x130] sm:$0xff] }
 0x852   : > { %9774 = vpow2.f32 %v5369_v57  ;;  %v5371_v50 = vmul.f32 1.442695, %v5100_v34  ;;  %5628 = vst [vmem:[#allocation13 + $0x258] sm:$0xff] %v5100_v34  ;;  %v5276_v57 = vld [vmem:[#allocation11 + $0x158] sm:$0xff] }
 0x853   : > { %5714 = vst [vmem:[#allocation12 + $0x108] sm:$0xff] %v11255_v25 }
 0x854   : > { %v9771_v27 = vpop.eup %9770  ;;  %9776 = vpow2.f32 %v5371_v50 }
 0x855   : > { %v5459_v37 = vmul.f32 %v9771_v27, %v5267_v33 }
 0x856   : > { %v9773_v51 = vpop.eup %9772  ;;  %v5104_v38 = vpop.f32.mrb[204].mxu1 }
 0x857   : > { %5629 = vst [vmem:[#allocation13 + $0x260] sm:$0xff] %v5104_v38  ;;  %v5106_v0 = vpop.f32.mrb[205].mxu1  ;;  %v11258_v42 = vadd.f32 %v5459_v37, %v5084_v36  ;;  %v5460_v17 = vmul.f32 %v9773_v51, %v5268_v35 }
 0x858   : > { %v5373_v11 = vmul.f32 1.442695, %v5106_v0  ;;  %5630 = vst [vmem:[#allocation13 + $0x268] sm:$0xff] %v5106_v0  ;;  %v5108_v3 = vpop.f32.mrb[206].mxu1 }
 0x859   : > { %5631 = vst [vmem:[#allocation13 + $0x270] sm:$0xff] %v5108_v3  ;;  %v5110_v53 = vpop.f32.mrb[207].mxu1  ;;  %5715 = vst [vmem:[#allocation12 + $0x110] sm:$0xff] %v11258_v42  ;;  %v11261_v18 = vadd.f32 %v5460_v17, %v5088_v58  ;;  %v5274_v58 = vld [vmem:[#allocation11 + $0x148] sm:$0xff] }
 0x85a   : > { %9778 = vpow2.f32 %v5373_v11  ;;  %v5375_v20 = vmul.f32 1.442695, %v5110_v53  ;;  %5632 = vst [vmem:[#allocation13 + $0x278] sm:$0xff] %v5110_v53  ;;  %v5277_v11 = vld [vmem:[#allocation11 + $0x160] sm:$0xff]  ;;  %v5278_v53 = vld [vmem:[#allocation11 + $0x168] sm:$0xff] }
 0x85b   : > { %5716 = vst [vmem:[#allocation12 + $0x118] sm:$0xff] %v11261_v18 }
 0x85c   : > { %v9775_v29 = vpop.eup %9774  ;;  %9780 = vpow2.f32 %v5375_v20 }
 0x85d   : > { %v5461_v43 = vmul.f32 %v9775_v29, %v5269_v5 }
 0x85e   : > { %v9777_v44 = vpop.eup %9776  ;;  %v5114_v4 = vpop.f32.mrb[208].mxu1 }
 0x85f   : > { %5633 = vst [vmem:[#allocation13 + $0x280] sm:$0xff] %v5114_v4  ;;  %v5116_v28 = vpop.f32.mrb[209].mxu1  ;;  %v11264_v7 = vadd.f32 %v5461_v43, %v5094_v23  ;;  %v5462_v30 = vmul.f32 %v9777_v44, %v5270_v41 }
 0x860   : > { %v5377_v8 = vmul.f32 1.442695, %v5116_v28  ;;  %5634 = vst [vmem:[#allocation13 + $0x288] sm:$0xff] %v5116_v28  ;;  %v5118_v40 = vpop.f32.mrb[210].mxu1 }
 0x861   : > { %5635 = vst [vmem:[#allocation13 + $0x290] sm:$0xff] %v5118_v40  ;;  %v5120_v62 = vpop.f32.mrb[211].mxu1  ;;  %5717 = vst [vmem:[#allocation12 + $0x120] sm:$0xff] %v11264_v7  ;;  %v11267_v15 = vadd.f32 %v5462_v30, %v5098_v6 }
 0x862   : > { %9782 = vpow2.f32 %v5377_v8  ;;  %v5379_v21 = vmul.f32 1.442695, %v5120_v62  ;;  %5636 = vst [vmem:[#allocation13 + $0x298] sm:$0xff] %v5120_v62  ;;  %v5279_v62 = vld [vmem:[#allocation11 + $0x170] sm:$0xff] }
 0x863   : > { %5718 = vst [vmem:[#allocation12 + $0x128] sm:$0xff] %v11267_v15 }
 0x864   : > { %v9779_v47 = vpop.eup %9778  ;;  %9784 = vpow2.f32 %v5379_v21 }
 0x865   : > { %v5463_v48 = vmul.f32 %v9779_v47, %v5271_v45  ;;  %v5280_v45 = vld [vmem:[#allocation11 + $0x178] sm:$0xff] }
 0x866   : > { %v9781_v49 = vpop.eup %9780  ;;  %v5124_v54 = vpop.f32.mrb[212].mxu1 }
 0x867   : > { %5637 = vst [vmem:[#allocation13 + $0x2a0] sm:$0xff] %v5124_v54  ;;  %v5126_v26 = vpop.f32.mrb[213].mxu1  ;;  %v11270_v61 = vadd.f32 %v5463_v48, %v5104_v38  ;;  %v5464_v24 = vmul.f32 %v9781_v49, %v5272_v22 }
 0x868   : > { %v5381_v39 = vmul.f32 1.442695, %v5126_v26  ;;  %5638 = vst [vmem:[#allocation13 + $0x2a8] sm:$0xff] %v5126_v26  ;;  %v5128_v9 = vpop.f32.mrb[214].mxu1 }
 0x869   : > { %5639 = vst [vmem:[#allocation13 + $0x2b0] sm:$0xff] %v5128_v9  ;;  %v5130_v36 = vpop.f32.mrb[215].mxu1  ;;  %5719 = vst [vmem:[#allocation12 + $0x130] sm:$0xff] %v11270_v61  ;;  %v11273_v63 = vadd.f32 %v5464_v24, %v5108_v3 }
 0x86a   : > { %9786 = vpow2.f32 %v5381_v39  ;;  %v5383_v19 = vmul.f32 1.442695, %v5130_v36  ;;  %5640 = vst [vmem:[#allocation13 + $0x2b8] sm:$0xff] %v5130_v36 }
 0x86b   : > { %5720 = vst [vmem:[#allocation12 + $0x138] sm:$0xff] %v11273_v63 }
 0x86c   : > { %v9783_v55 = vpop.eup %9782  ;;  %9788 = vpow2.f32 %v5383_v19 }
 0x86d   : > { %v5465_v12 = vmul.f32 %v9783_v55, %v5273_v52  ;;  %v5281_v52 = vld [vmem:[#allocation11 + $0x180] sm:$0xff] }
 0x86e   : > { %v9785_v59 = vpop.eup %9784  ;;  %v5134_v56 = vpop.f32.mrb[216].mxu1 }
 0x86f   : > { %5641 = vst [vmem:[#allocation13 + $0x2c0] sm:$0xff] %v5134_v56  ;;  %v5136_v16 = vpop.f32.mrb[217].mxu1  ;;  %v11276_v60 = vadd.f32 %v5465_v12, %v5114_v4  ;;  %v5466_v31 = vmul.f32 %v9785_v59, %v5274_v58  ;;  %v5282_v58 = vld [vmem:[#allocation11 + $0x188] sm:$0xff] }
 0x870   : > { %v5385_v13 = vmul.f32 1.442695, %v5136_v16  ;;  %5642 = vst [vmem:[#allocation13 + $0x2c8] sm:$0xff] %v5136_v16  ;;  %v5138_v32 = vpop.f32.mrb[218].mxu1 }
 0x871   : > { %5643 = vst [vmem:[#allocation13 + $0x2d0] sm:$0xff] %v5138_v32  ;;  %v5140_v1 = vpop.f32.mrb[219].mxu1  ;;  %5721 = vst [vmem:[#allocation12 + $0x140] sm:$0xff] %v11276_v60  ;;  %v11279_v14 = vadd.f32 %v5466_v31, %v5118_v40 }
 0x872   : > { %9790 = vpow2.f32 %v5385_v13  ;;  %v5387_v23 = vmul.f32 1.442695, %v5140_v1  ;;  %5644 = vst [vmem:[#allocation13 + $0x2d8] sm:$0xff] %v5140_v1 }
 0x873   : > { %5722 = vst [vmem:[#allocation12 + $0x148] sm:$0xff] %v11279_v14 }
 0x874   : > { %v9787_v2 = vpop.eup %9786  ;;  %9792 = vpow2.f32 %v5387_v23 }
 0x875   : > { %v5467_v6 = vmul.f32 %v9787_v2, %v5275_v10 }
 0x876   : > { %v9789_v34 = vpop.eup %9788  ;;  %v5144_v50 = vpop.f32.mrb[220].mxu1 }
 0x877   : > { %5645 = vst [vmem:[#allocation13 + $0x2e0] sm:$0xff] %v5144_v50  ;;  %v5146_v33 = vpop.f32.mrb[221].mxu1  ;;  %v11282_v27 = vadd.f32 %v5467_v6, %v5124_v54  ;;  %v5468_v35 = vmul.f32 %v9789_v34, %v5276_v57  ;;  %v5283_v6 = vld [vmem:[#allocation11 + $0x190] sm:$0xff] }
 0x878   : > { %v5389_v37 = vmul.f32 1.442695, %v5146_v33  ;;  %5646 = vst [vmem:[#allocation13 + $0x2e8] sm:$0xff] %v5146_v33  ;;  %v5148_v51 = vpop.f32.mrb[222].mxu1 }
 0x879   : > { %5647 = vst [vmem:[#allocation13 + $0x2f0] sm:$0xff] %v5148_v51  ;;  %v5150_v38 = vpop.f32.mrb[223].mxu1  ;;  %5723 = vst [vmem:[#allocation12 + $0x150] sm:$0xff] %v11282_v27  ;;  %v11285_v0 = vadd.f32 %v5468_v35, %v5128_v9  ;;  %v5284_v35 = vld [vmem:[#allocation11 + $0x198] sm:$0xff] }
 0x87a   : > { %9794 = vpow2.f32 %v5389_v37  ;;  %v5391_v17 = vmul.f32 1.442695, %v5150_v38  ;;  %5648 = vst [vmem:[#allocation13 + $0x2f8] sm:$0xff] %v5150_v38 }
 0x87b   : > { %5724 = vst [vmem:[#allocation12 + $0x158] sm:$0xff] %v11285_v0 }
 0x87c   : > { %v9791_v3 = vpop.eup %9790  ;;  %9796 = vpow2.f32 %v5391_v17 }
 0x87d   : > { %v5469_v20 = vmul.f32 %v9791_v3, %v5277_v11 }
 0x87e   : > { %v9793_v5 = vpop.eup %9792  ;;  %v5154_v29 = vpop.f32.mrb[224].mxu1 }
 0x87f   : > { %5649 = vst [vmem:[#allocation13 + $0x300] sm:$0xff] %v5154_v29  ;;  %v5156_v41 = vpop.f32.mrb[225].mxu1  ;;  %v11288_v43 = vadd.f32 %v5469_v20, %v5134_v56  ;;  %v5470_v44 = vmul.f32 %v9793_v5, %v5278_v53 }
 0x880   : > { %v5393_v4 = vmul.f32 1.442695, %v5156_v41  ;;  %5650 = vst [vmem:[#allocation13 + $0x308] sm:$0xff] %v5156_v41  ;;  %v5158_v28 = vpop.f32.mrb[226].mxu1 }
 0x881   : > { %5651 = vst [vmem:[#allocation13 + $0x310] sm:$0xff] %v5158_v28  ;;  %v5160_v30 = vpop.f32.mrb[227].mxu1  ;;  %5725 = vst [vmem:[#allocation12 + $0x160] sm:$0xff] %v11288_v43  ;;  %v11291_v8 = vadd.f32 %v5470_v44, %v5138_v32 }
 0x882   : > { %9798 = vpow2.f32 %v5393_v4  ;;  %v5395_v40 = vmul.f32 1.442695, %v5160_v30  ;;  %5652 = vst [vmem:[#allocation13 + $0x318] sm:$0xff] %v5160_v30 }
 0x883   : > { %5726 = vst [vmem:[#allocation12 + $0x168] sm:$0xff] %v11291_v8 }
 0x884   : > { %v9795_v21 = vpop.eup %9794  ;;  %9800 = vpow2.f32 %v5395_v40  ;;  %v5285_v40 = vld [vmem:[#allocation11 + $0x1a0] sm:$0xff] }
 0x885   : > { %v5471_v47 = vmul.f32 %v9795_v21, %v5279_v62 }
 0x886   : > { %v9797_v22 = vpop.eup %9796  ;;  %v5164_v48 = vpop.f32.mrb[228].mxu1 }
 0x887   : > { %5653 = vst [vmem:[#allocation13 + $0x320] sm:$0xff] %v5164_v48  ;;  %v5166_v49 = vpop.f32.mrb[229].mxu1  ;;  %v11294_v54 = vadd.f32 %v5471_v47, %v5144_v50  ;;  %v5472_v26 = vmul.f32 %v9797_v22, %v5280_v45 }
 0x888   : > { %v5397_v24 = vmul.f32 1.442695, %v5166_v49  ;;  %5654 = vst [vmem:[#allocation13 + $0x328] sm:$0xff] %v5166_v49  ;;  %v5168_v39 = vpop.f32.mrb[230].mxu1 }
 0x889   : > { %5655 = vst [vmem:[#allocation13 + $0x330] sm:$0xff] %v5168_v39  ;;  %v5170_v9 = vpop.f32.mrb[231].mxu1  ;;  %5727 = vst [vmem:[#allocation12 + $0x170] sm:$0xff] %v11294_v54  ;;  %v11297_v36 = vadd.f32 %v5472_v26, %v5148_v51 }
 0x88a   : > { %9802 = vpow2.f32 %v5397_v24  ;;  %v5399_v19 = vmul.f32 1.442695, %v5170_v9  ;;  %5656 = vst [vmem:[#allocation13 + $0x338] sm:$0xff] %v5170_v9 }
 0x88b   : > { %5728 = vst [vmem:[#allocation12 + $0x178] sm:$0xff] %v11297_v36 }
 0x88c   : > { %v9799_v55 = vpop.eup %9798  ;;  %9804 = vpow2.f32 %v5399_v19 }
 0x88d   : > { %v5473_v12 = vmul.f32 %v9799_v55, %v5281_v52 }
 0x88e   : > { %v9801_v59 = vpop.eup %9800  ;;  %v11300_v56 = vpop.f32.mrb[232].mxu1 }
 0x88f   : > { %5657 = vst [vmem:[#allocation13 + $0x340] sm:$0xff] %v11300_v56  ;;  %v5176_v16 = vpop.f32.mrb[233].mxu1  ;;  %v5537_v31 = vadd.f32 %v5473_v12, %v5154_v29  ;;  %v5474_v13 = vmul.f32 %v9801_v59, %v5282_v58 }
 0x890   : > { %v5401_v32 = vmul.f32 1.442695, %v5176_v16  ;;  %5658 = vst [vmem:[#allocation13 + $0x348] sm:$0xff] %v5176_v16  ;;  %v11303_v1 = vpop.f32.mrb[234].mxu1 }
 0x891   : > { %5659 = vst [vmem:[#allocation13 + $0x350] sm:$0xff] %v11303_v1  ;;  %v5180_v23 = vpop.f32.mrb[235].mxu1  ;;  %v9062_v10 = vpack.i.bf16 %v5537_v31, %v11252_v46  ;;  %5729 = vst [vmem:[#allocation12 + $0x180] sm:$0xff] %v5537_v31  ;;  %v5538_v2 = vadd.f32 %v5474_v13, %v5158_v28 }
 0x892   : > { %9806 = vpow2.f32 %v5401_v32  ;;  %v5403_v57 = vmul.f32 1.442695, %v5180_v23  ;;  %5660 = vst [vmem:[#allocation13 + $0x358] sm:$0xff] %v5180_v23 }
 0x893   : > { %9063 = vxpose.xlu1.b32.start [1/16] %v9062_v10, 128  ;;  %v9064_v34 = vpack.i.bf16 %v5538_v2, %v11255_v25  ;;  %5730 = vst [vmem:[#allocation12 + $0x188] sm:$0xff] %v5538_v2  ;;  %v8982_v50 = vpop.trf.xlu0 }
 0x894   : > { %v9803_v33 = vpop.eup %9802  ;;  %9808 = vpow2.f32 %v5403_v57  ;;  %v8986_v17 = vunpack.i.h.bf16 %v8982_v50  ;;  %v8983_v53 = vunpack.i.l.bf16 %v8982_v50 }
 0x895   : > { %v5475_v37 = vmul.f32 %v9803_v33, %v5283_v6 }
 0x896   : > { %v9805_v51 = vpop.eup %9804  ;;  %v11308_v38 = vpop.f32.mrb[236].mxu1 }
 0x897   : > { %5661 = vst [vmem:[#allocation13 + $0x360] sm:$0xff] %v11308_v38  ;;  %9065 = vxpose.xlu1.b32.cont [2/16] %v9064_v34, 128  ;;  %v5186_v46 = vpop.f32.mrb[237].mxu1  ;;  %v5539_v11 = vadd.f32 %v5475_v37, %v5164_v48  ;;  %v5476_v3 = vmul.f32 %v9805_v51, %v5284_v35  ;;  %v8987_v20 = vpop.trf.xlu0  ;;  %v5286_v48 = vld [vmem:[#allocation11 + $0x1a8] sm:$0xff]  ;;  %v5288_v34 = vld [vmem:[#allocation11 + $0x1b8] sm:$0xff] }
 0x898   : > { %v5405_v5 = vmul.f32 1.442695, %v5186_v46  ;;  %5662 = vst [vmem:[#allocation13 + $0x368] sm:$0xff] %v5186_v46  ;;  %v11311_v25 = vpop.f32.mrb[238].mxu1  ;;  %v8991_v29 = vunpack.i.h.bf16 %v8987_v20  ;;  %v8988_v28 = vunpack.i.l.bf16 %v8987_v20 }
 0x899   : > { %5663 = vst [vmem:[#allocation13 + $0x370] sm:$0xff] %v11311_v25  ;;  %v5190_v41 = vpop.f32.mrb[239].mxu1  ;;  %v9066_v44 = vpack.i.bf16 %v5539_v11, %v11258_v42  ;;  %5731 = vst [vmem:[#allocation12 + $0x190] sm:$0xff] %v5539_v11  ;;  %v5540_v4 = vadd.f32 %v5476_v3, %v5168_v39 }
 0x89a   : > { %9810 = vpow2.f32 %v5405_v5  ;;  %v5407_v30 = vmul.f32 1.442695, %v5190_v41  ;;  %5664 = vst [vmem:[#allocation13 + $0x378] sm:$0xff] %v5190_v41  ;;  %v5874_v62 = vpack.c.bf16 %v8991_v29, %v8986_v17  ;;  %v5873_v45 = vpack.c.bf16 %v8988_v28, %v8983_v53 }
 0x89b   : > { %9067 = vxpose.xlu1.b32.cont [3/16] %v9066_v44, 128  ;;  %v9068_v21 = vpack.i.bf16 %v5540_v4, %v11261_v18  ;;  %5732 = vst [vmem:[#allocation12 + $0x198] sm:$0xff] %v5540_v4  ;;  %v8992_v47 = vpop.trf.xlu0 }
 0x89c   : > { %v9807_v22 = vpop.eup %9806  ;;  %9812 = vpow2.f32 %v5407_v30  ;;  %5906 = vst [vmem:[#allocation2 + $0x8] sm:$0xff] %v5874_v62  ;;  %5905 = vst [vmem:[#allocation2] sm:$0xff] %v5873_v45  ;;  %v8996_v24 = vunpack.i.h.bf16 %v8992_v47  ;;  %v8993_v19 = vunpack.i.l.bf16 %v8992_v47  ;;  %v5290_v62 = vld [vmem:[#allocation11 + $0x1c8] sm:$0xff] }
 0x89d   : > { %v5477_v49 = vmul.f32 %v9807_v22, %v5285_v40 }
 0x89e   : > { %v9809_v42 = vpop.eup %9808  ;;  %v11316_v26 = vpop.f32.mrb[240].mxu1 }
 0x89f   : > { %5665 = vst [vmem:[#allocation13 + $0x380] sm:$0xff] %v11316_v26  ;;  %9069 = vxpose.xlu1.b32.cont [4/16] %v9068_v21, 128  ;;  %v5196_v39 = vpop.f32.mrb[241].mxu1  ;;  %v5541_v9 = vadd.f32 %v5477_v49, %v11300_v56  ;;  %v5478_v18 = vmul.f32 %v9809_v42, %v5286_v48  ;;  %v8997_v52 = vpop.trf.xlu0  ;;  %v5287_v56 = vld [vmem:[#allocation11 + $0x1b0] sm:$0xff] }
 0x8a0   : > { %v5409_v55 = vmul.f32 1.442695, %v5196_v39  ;;  %5666 = vst [vmem:[#allocation13 + $0x388] sm:$0xff] %v5196_v39  ;;  %v11320_v58 = vpop.f32.mrb[242].mxu1  ;;  %v9001_v12 = vunpack.i.h.bf16 %v8997_v52  ;;  %v8998_v13 = vunpack.i.l.bf16 %v8997_v52 }
 0x8a1   : > { %5667 = vst [vmem:[#allocation13 + $0x390] sm:$0xff] %v11320_v58  ;;  %v5200_v59 = vpop.f32.mrb[243].mxu1  ;;  %v9070_v16 = vpack.i.bf16 %v5541_v9, %v11264_v7  ;;  %5733 = vst [vmem:[#allocation12 + $0x1a0] sm:$0xff] %v5541_v9  ;;  %v5542_v31 = vadd.f32 %v5478_v18, %v11303_v1 }
 0x8a2   : > { %9814 = vpow2.f32 %v5409_v55  ;;  %v5411_v32 = vmul.f32 1.442695, %v5200_v59  ;;  %5668 = vst [vmem:[#allocation13 + $0x398] sm:$0xff] %v5200_v59  ;;  %v5878_v23 = vpack.c.bf16 %v9001_v12, %v8996_v24  ;;  %v5877_v2 = vpack.c.bf16 %v8998_v13, %v8993_v19 }
 0x8a3   : > { %9071 = vxpose.xlu1.b32.cont [5/16] %v9070_v16, 128  ;;  %v9072_v10 = vpack.i.bf16 %v5542_v31, %v11267_v15  ;;  %5734 = vst [vmem:[#allocation12 + $0x1a8] sm:$0xff] %v5542_v31  ;;  %v9002_v57 = vpop.trf.xlu0 }
 0x8a4   : > { %v9811_v6 = vpop.eup %9810  ;;  %9816 = vpow2.f32 %v5411_v32  ;;  %5910 = vst [vmem:[#allocation2 + $0x28] sm:$0xff] %v5878_v23  ;;  %5909 = vst [vmem:[#allocation2 + $0x20] sm:$0xff] %v5877_v2  ;;  %v9006_v33 = vunpack.i.h.bf16 %v9002_v57  ;;  %v9003_v51 = vunpack.i.l.bf16 %v9002_v57  ;;  %v5292_v32 = vld [vmem:[#allocation11 + $0x1d8] sm:$0xff] }
 0x8a5   : > { %v5479_v7 = vmul.f32 %v9811_v6, %v5287_v56 }
 0x8a6   : > { %v9813_v50 = vpop.eup %9812  ;;  %v11326_v1 = vpop.f32.mrb[244].mxu1 }
 0x8a7   : > { %5669 = vst [vmem:[#allocation13 + $0x3a0] sm:$0xff] %v11326_v1  ;;  %9073 = vxpose.xlu1.b32.cont [6/16] %v9072_v10, 128  ;;  %v5206_v35 = vpop.f32.mrb[245].mxu1  ;;  %v5543_v37 = vadd.f32 %v5479_v7, %v11308_v38  ;;  %v5480_v15 = vmul.f32 %v9813_v50, %v5288_v34  ;;  %v9007_v17 = vpop.trf.xlu0  ;;  %v5289_v38 = vld [vmem:[#allocation11 + $0x1c0] sm:$0xff] }
 0x8a8   : > { %v5413_v46 = vmul.f32 1.442695, %v5206_v35  ;;  %5670 = vst [vmem:[#allocation13 + $0x3a8] sm:$0xff] %v5206_v35  ;;  %v11330_v11 = vpop.f32.mrb[246].mxu1  ;;  %v9011_v3 = vunpack.i.h.bf16 %v9007_v17  ;;  %v9008_v29 = vunpack.i.l.bf16 %v9007_v17  ;;  %v5293_v17 = vld [vmem:[#allocation11 + $0x1e0] sm:$0xff] }
 0x8a9   : > { %5671 = vst [vmem:[#allocation13 + $0x3b0] sm:$0xff] %v11330_v11  ;;  %v5210_v53 = vpop.f32.mrb[247].mxu1  ;;  %v9074_v20 = vpack.i.bf16 %v5543_v37, %v11270_v61  ;;  %5735 = vst [vmem:[#allocation12 + $0x1b0] sm:$0xff] %v5543_v37  ;;  %v5544_v5 = vadd.f32 %v5480_v15, %v11311_v25 }
 0x8aa   : > { %9818 = vpow2.f32 %v5413_v46  ;;  %v5415_v41 = vmul.f32 1.442695, %v5210_v53  ;;  %5672 = vst [vmem:[#allocation13 + $0x3b8] sm:$0xff] %v5210_v53  ;;  %v5882_v44 = vpack.c.bf16 %v9011_v3, %v9006_v33  ;;  %v5881_v28 = vpack.c.bf16 %v9008_v29, %v9003_v51 }
 0x8ab   : > { %9075 = vxpose.xlu1.b32.cont [7/16] %v9074_v20, 128  ;;  %v9076_v4 = vpack.i.bf16 %v5544_v5, %v11273_v63  ;;  %5736 = vst [vmem:[#allocation12 + $0x1b8] sm:$0xff] %v5544_v5  ;;  %v9012_v30 = vpop.trf.xlu0  ;;  %v5294_v5 = vld [vmem:[#allocation11 + $0x1e8] sm:$0xff] }
 0x8ac   : > { %v9815_v40 = vpop.eup %9814  ;;  %9820 = vpow2.f32 %v5415_v41  ;;  %5914 = vst [vmem:[#allocation2 + $0x48] sm:$0xff] %v5882_v44  ;;  %5913 = vst [vmem:[#allocation2 + $0x40] sm:$0xff] %v5881_v28  ;;  %v9016_v45 = vunpack.i.h.bf16 %v9012_v30  ;;  %v9013_v48 = vunpack.i.l.bf16 %v9012_v30 }
 0x8ad   : > { %v5481_v61 = vmul.f32 %v9815_v40, %v5289_v38 }
 0x8ae   : > { %v9817_v21 = vpop.eup %9816  ;;  %v11336_v25 = vpop.f32.mrb[248].mxu1 }
 0x8af   : > { %5673 = vst [vmem:[#allocation13 + $0x3c0] sm:$0xff] %v11336_v25  ;;  %9077 = vxpose.xlu1.b32.cont [8/16] %v9076_v4, 128  ;;  %v5216_v47 = vpop.f32.mrb[249].mxu1  ;;  %v5545_v22 = vadd.f32 %v5481_v61, %v11316_v26  ;;  %v5482_v63 = vmul.f32 %v9817_v21, %v5290_v62  ;;  %v9017_v49 = vpop.trf.xlu0  ;;  %v5291_v26 = vld [vmem:[#allocation11 + $0x1d0] sm:$0xff] }
 0x8b0   : > { %v5417_v42 = vmul.f32 1.442695, %v5216_v47  ;;  %5674 = vst [vmem:[#allocation13 + $0x3c8] sm:$0xff] %v5216_v47  ;;  %v11340_v24 = vpop.f32.mrb[250].mxu1  ;;  %v9021_v39 = vunpack.i.h.bf16 %v9017_v49  ;;  %v9018_v52 = vunpack.i.l.bf16 %v9017_v49  ;;  %v5295_v62 = vld [vmem:[#allocation11 + $0x1f0] sm:$0xff] }
 0x8b1   : > { %5675 = vst [vmem:[#allocation13 + $0x3d0] sm:$0xff] %v11340_v24  ;;  %v5220_v9 = vpop.f32.mrb[251].mxu1  ;;  %v9078_v18 = vpack.i.bf16 %v5545_v22, %v11276_v60  ;;  %5737 = vst [vmem:[#allocation12 + $0x1c0] sm:$0xff] %v5545_v22  ;;  %v5546_v19 = vadd.f32 %v5482_v63, %v11320_v58  ;;  %v5296_v63 = vld [vmem:[#allocation11 + $0x1f8] sm:$0xff] }
 0x8b2   : > { %9822 = vpow2.f32 %v5417_v42  ;;  %v5419_v55 = vmul.f32 1.442695, %v5220_v9  ;;  %5676 = vst [vmem:[#allocation13 + $0x3d8] sm:$0xff] %v5220_v9  ;;  %v5886_v12 = vpack.c.bf16 %v9021_v39, %v9016_v45  ;;  %v5885_v16 = vpack.c.bf16 %v9018_v52, %v9013_v48 }
 0x8b3   : > { %9079 = vxpose.xlu1.b32.cont [9/16] %v9078_v18, 128  ;;  %v9080_v59 = vpack.i.bf16 %v5546_v19, %v11279_v14  ;;  %5738 = vst [vmem:[#allocation12 + $0x1c8] sm:$0xff] %v5546_v19  ;;  %v9022_v31 = vpop.trf.xlu0 }
 0x8b4   : > { %v9819_v13 = vpop.eup %9818  ;;  %9824 = vpow2.f32 %v5419_v55  ;;  %5918 = vst [vmem:[#allocation2 + $0x68] sm:$0xff] %v5886_v12  ;;  %5917 = vst [vmem:[#allocation2 + $0x60] sm:$0xff] %v5885_v16  ;;  %v9026_v23 = vunpack.i.h.bf16 %v9022_v31  ;;  %v9023_v57 = vunpack.i.l.bf16 %v9022_v31 }
 0x8b5   : > { %v5483_v60 = vmul.f32 %v9819_v13, %v5291_v26 }
 0x8b6   : > { %v9821_v56 = vpop.eup %9820  ;;  %v11346_v58 = vpop.f32.mrb[252].mxu1 }
 0x8b7   : > { %5677 = vst [vmem:[#allocation13 + $0x3e0] sm:$0xff] %v11346_v58  ;;  %9081 = vxpose.xlu1.b32.cont [10/16] %v9080_v59, 128  ;;  %v5226_v10 = vpop.f32.mrb[253].mxu1  ;;  %v5547_v2 = vadd.f32 %v5483_v60, %v11326_v1  ;;  %v5484_v14 = vmul.f32 %v9821_v56, %v5292_v32  ;;  %v9027_v6 = vpop.trf.xlu0 }
 0x8b8   : > { %v5421_v34 = vmul.f32 1.442695, %v5226_v10  ;;  %5678 = vst [vmem:[#allocation13 + $0x3e8] sm:$0xff] %v5226_v10  ;;  %v5228_v7 = vpop.f32.mrb[254].mxu1  ;;  %v9031_v50 = vunpack.i.h.bf16 %v9027_v6  ;;  %v9028_v15 = vunpack.i.l.bf16 %v9027_v6 }
 0x8b9   : > { %5679 = vst [vmem:[#allocation13 + $0x3f0] sm:$0xff] %v5228_v7  ;;  %v5230_v33 = vpop.f32.mrb[255].mxu1  ;;  %v9082_v35 = vpack.i.bf16 %v5547_v2, %v11282_v27  ;;  %5739 = vst [vmem:[#allocation12 + $0x1d0] sm:$0xff] %v5547_v2  ;;  %v5548_v37 = vadd.f32 %v5484_v14, %v11330_v11 }
 0x8ba   : > { %9826 = vpow2.f32 %v5421_v34  ;;  %v5423_v51 = vmul.f32 1.442695, %v5230_v33  ;;  %5680 = vst [vmem:[#allocation13 + $0x3f8] sm:$0xff] %v5230_v33  ;;  %v5890_v1 = vpack.c.bf16 %v9031_v50, %v9026_v23  ;;  %v5889_v3 = vpack.c.bf16 %v9028_v15, %v9023_v57 }
 0x8bb   : > { %9083 = vxpose.xlu1.b32.cont [11/16] %v9082_v35, 128  ;;  %v9084_v46 = vpack.i.bf16 %v5548_v37, %v11285_v0  ;;  %5740 = vst [vmem:[#allocation12 + $0x1d8] sm:$0xff] %v5548_v37  ;;  %v9032_v53 = vpop.trf.xlu0 }
 0x8bc   : > { %v9823_v20 = vpop.eup %9822  ;;  %9828 = vpow2.f32 %v5423_v51  ;;  %5922 = vst [vmem:[#allocation2 + $0x88] sm:$0xff] %v5890_v1  ;;  %5921 = vst [vmem:[#allocation2 + $0x80] sm:$0xff] %v5889_v3  ;;  %v9036_v11 = vunpack.i.h.bf16 %v9032_v53  ;;  %v9033_v41 = vunpack.i.l.bf16 %v9032_v53 }
 0x8bd   : > { %v5485_v27 = vmul.f32 %v9823_v20, %v5293_v17 }
 0x8be   : > { %v9825_v29 = vpop.eup %9824 }
 0x8bf   : > { %9085 = vxpose.xlu1.b32.cont [12/16] %v9084_v46, 128  ;;  %v5549_v38 = vadd.f32 %v5485_v27, %v11336_v25  ;;  %v5486_v44 = vmul.f32 %v9825_v29, %v5294_v5  ;;  %v9037_v4 = vpop.trf.xlu0 }
 0x8c0   : > { %v9041_v28 = vunpack.i.h.bf16 %v9037_v4  ;;  %v9038_v30 = vunpack.i.l.bf16 %v9037_v4 }
 0x8c1   : > { %v9086_v0 = vpack.i.bf16 %v5549_v38, %v11288_v43  ;;  %5741 = vst [vmem:[#allocation12 + $0x1e0] sm:$0xff] %v5549_v38  ;;  %v5550_v40 = vadd.f32 %v5486_v44, %v11340_v24 }
 0x8c2   : > { %v5893_v61 = vpack.c.bf16 %v9038_v30, %v9033_v41  ;;  %v5894_v21 = vpack.c.bf16 %v9041_v28, %v9036_v11 }
 0x8c3   : > { %9087 = vxpose.xlu1.b32.cont [13/16] %v9086_v0, 128  ;;  %v9088_v45 = vpack.i.bf16 %v5550_v40, %v11291_v8  ;;  %5742 = vst [vmem:[#allocation12 + $0x1e8] sm:$0xff] %v5550_v40  ;;  %v9042_v47 = vpop.trf.xlu0 }
 0x8c4   : > { %v9827_v22 = vpop.eup %9826  ;;  %5925 = vst [vmem:[#allocation2 + $0xa0] sm:$0xff] %v5893_v61  ;;  %5926 = vst [vmem:[#allocation2 + $0xa8] sm:$0xff] %v5894_v21  ;;  %v9046_v49 = vunpack.i.h.bf16 %v9042_v47  ;;  %v9043_v42 = vunpack.i.l.bf16 %v9042_v47 }
 0x8c5   : > { %v5487_v25 = vmul.f32 %v9827_v22, %v5295_v62 }
 0x8c6   : > { %v9829_v48 = vpop.eup %9828 }
 0x8c7   : > { %9089 = vxpose.xlu1.b32.cont [14/16] %v9088_v45, 128  ;;  %v5551_v43 = vadd.f32 %v5487_v25, %v11346_v58  ;;  %v5488_v24 = vmul.f32 %v9829_v48, %v5296_v63  ;;  %v9047_v39 = vpop.trf.xlu0 }
 0x8c8   : > { %v9051_v9 = vunpack.i.h.bf16 %v9047_v39  ;;  %v9048_v18 = vunpack.i.l.bf16 %v9047_v39 }
 0x8c9   : > { %v9090_v19 = vpack.i.bf16 %v5551_v43, %v11294_v54  ;;  %5743 = vst [vmem:[#allocation12 + $0x1f0] sm:$0xff] %v5551_v43  ;;  %v5552_v8 = vadd.f32 %v5488_v24, %v5228_v7 }
 0x8ca   : > { %v5897_v52 = vpack.c.bf16 %v9048_v18, %v9043_v42  ;;  %v5898_v55 = vpack.c.bf16 %v9051_v9, %v9046_v49 }
 0x8cb   : > { %9091 = vxpose.xlu1.b32.cont [15/16] %v9090_v19, 128  ;;  %v9092_v26 = vpack.i.bf16 %v5552_v8, %v11297_v36  ;;  %5744 = vst [vmem:[#allocation12 + $0x1f8] sm:$0xff] %v5552_v8  ;;  %v9052_v12 = vpop.trf.xlu0 }
 0x8cc   : > { %5929 = vst [vmem:[#allocation2 + $0xc0] sm:$0xff] %v5897_v52  ;;  %5930 = vst [vmem:[#allocation2 + $0xc8] sm:$0xff] %v5898_v55  ;;  %v9056_v59 = vunpack.i.h.bf16 %v9052_v12  ;;  %v9053_v16 = vunpack.i.l.bf16 %v9052_v12 }
 0x8cf   : > { %9093 = vxpose.xlu1.b32.end [16/16] %v9092_v26, 128  ;;  %v9057_v31 = vpop.trf.xlu0 }
 0x8d0   : > { %v9061_v13 = vunpack.i.h.bf16 %v9057_v31  ;;  %v9058_v32 = vunpack.i.l.bf16 %v9057_v31 }
 0x8d2   : > { %v5901_v60 = vpack.c.bf16 %v9058_v32, %v9053_v16  ;;  %v5902_v56 = vpack.c.bf16 %v9061_v13, %v9056_v59 }
 0x8d4   : > { %5933 = vst [vmem:[#allocation2 + $0xe0] sm:$0xff] %v5901_v60  ;;  %5934 = vst [vmem:[#allocation2 + $0xe8] sm:$0xff] %v5902_v56 }
 0x913   : > { %v9094_v54 = vpop.trf.xlu1 }
 0x914   : > { %v9098_v58 = vunpack.i.h.bf16 %v9094_v54  ;;  %v9095_v23 = vunpack.i.l.bf16 %v9094_v54 }
 0x917   : > { %v9099_v10 = vpop.trf.xlu1 }
 0x918   : > { %v9103_v2 = vunpack.i.h.bf16 %v9099_v10  ;;  %v9100_v36 = vunpack.i.l.bf16 %v9099_v10 }
 0x91a   : > { %v5875_v14 = vpack.c.bf16 %v9100_v36, %v9095_v23  ;;  %v5876_v57 = vpack.c.bf16 %v9103_v2, %v9098_v58 }
 0x91b   : > { %v9104_v6 = vpop.trf.xlu1 }
 0x91c   : > { %5907 = vst [vmem:[#allocation2 + $0x10] sm:$0xff] %v5875_v14  ;;  %5908 = vst [vmem:[#allocation2 + $0x18] sm:$0xff] %v5876_v57  ;;  %v9108_v34 = vunpack.i.h.bf16 %v9104_v6  ;;  %v9105_v7 = vunpack.i.l.bf16 %v9104_v6 }
 0x91f   : > { %v9109_v50 = vpop.trf.xlu1 }
 0x920   : > { %v9113_v33 = vunpack.i.h.bf16 %v9109_v50  ;;  %v9110_v35 = vunpack.i.l.bf16 %v9109_v50 }
 0x922   : > { %v5879_v37 = vpack.c.bf16 %v9110_v35, %v9105_v7  ;;  %v5880_v15 = vpack.c.bf16 %v9113_v33, %v9108_v34 }
 0x923   : > { %v9114_v51 = vpop.trf.xlu1 }
 0x924   : > { %5911 = vst [vmem:[#allocation2 + $0x30] sm:$0xff] %v5879_v37  ;;  %5912 = vst [vmem:[#allocation2 + $0x38] sm:$0xff] %v5880_v15  ;;  %v9118_v17 = vunpack.i.h.bf16 %v9114_v51  ;;  %v9115_v1 = vunpack.i.l.bf16 %v9114_v51 }
 0x927   : > { %v9119_v46 = vpop.trf.xlu1 }
 0x928   : > { %v9123_v3 = vunpack.i.h.bf16 %v9119_v46  ;;  %v9120_v53 = vunpack.i.l.bf16 %v9119_v46 }
 0x92a   : > { %v5883_v20 = vpack.c.bf16 %v9120_v53, %v9115_v1  ;;  %v5884_v5 = vpack.c.bf16 %v9123_v3, %v9118_v17 }
 0x92b   : > { %v9124_v27 = vpop.trf.xlu1 }
 0x92c   : > { %5915 = vst [vmem:[#allocation2 + $0x50] sm:$0xff] %v5883_v20  ;;  %5916 = vst [vmem:[#allocation2 + $0x58] sm:$0xff] %v5884_v5  ;;  %v9128_v29 = vunpack.i.h.bf16 %v9124_v27  ;;  %v9125_v11 = vunpack.i.l.bf16 %v9124_v27 }
 0x92f   : > { %v9129_v41 = vpop.trf.xlu1 }
 0x930   : > { %v9133_v38 = vunpack.i.h.bf16 %v9129_v41  ;;  %v9130_v44 = vunpack.i.l.bf16 %v9129_v41 }
 0x932   : > { %v5887_v4 = vpack.c.bf16 %v9130_v44, %v9125_v11  ;;  %v5888_v28 = vpack.c.bf16 %v9133_v38, %v9128_v29 }
 0x933   : > { %v9134_v30 = vpop.trf.xlu1 }
 0x934   : > { %5919 = vst [vmem:[#allocation2 + $0x70] sm:$0xff] %v5887_v4  ;;  %5920 = vst [vmem:[#allocation2 + $0x78] sm:$0xff] %v5888_v28  ;;  %v9138_v0 = vunpack.i.h.bf16 %v9134_v30  ;;  %v9135_v40 = vunpack.i.l.bf16 %v9134_v30 }
 0x937   : > { %v9139_v62 = vpop.trf.xlu1 }
 0x938   : > { %v9143_v61 = vunpack.i.h.bf16 %v9139_v62  ;;  %v9140_v21 = vunpack.i.l.bf16 %v9139_v62 }
 0x93a   : > { %v5891_v45 = vpack.c.bf16 %v9140_v21, %v9135_v40  ;;  %v5892_v47 = vpack.c.bf16 %v9143_v61, %v9138_v0 }
 0x93b   : > { %v9144_v22 = vpop.trf.xlu1 }
 0x93c   : > { %5923 = vst [vmem:[#allocation2 + $0x90] sm:$0xff] %v5891_v45  ;;  %5924 = vst [vmem:[#allocation2 + $0x98] sm:$0xff] %v5892_v47  ;;  %v9148_v63 = vunpack.i.h.bf16 %v9144_v22  ;;  %v9145_v25 = vunpack.i.l.bf16 %v9144_v22 }
 0x93f   : > { %v9149_v48 = vpop.trf.xlu1 }
 0x940   : > { %v9153_v49 = vunpack.i.h.bf16 %v9149_v48  ;;  %v9150_v42 = vunpack.i.l.bf16 %v9149_v48 }
 0x942   : > { %v5895_v43 = vpack.c.bf16 %v9150_v42, %v9145_v25  ;;  %v5896_v24 = vpack.c.bf16 %v9153_v49, %v9148_v63 }
 0x943   : > { %v9154_v39 = vpop.trf.xlu1 }
 0x944   : > { %5927 = vst [vmem:[#allocation2 + $0xb0] sm:$0xff] %v5895_v43  ;;  %5928 = vst [vmem:[#allocation2 + $0xb8] sm:$0xff] %v5896_v24  ;;  %v9158_v9 = vunpack.i.h.bf16 %v9154_v39  ;;  %v9155_v18 = vunpack.i.l.bf16 %v9154_v39 }
 0x947   : > { %v9159_v19 = vpop.trf.xlu1 }
 0x948   : > { %v9163_v8 = vunpack.i.h.bf16 %v9159_v19  ;;  %v9160_v52 = vunpack.i.l.bf16 %v9159_v19 }
 0x94a   : > { %v5899_v55 = vpack.c.bf16 %v9160_v52, %v9155_v18  ;;  %v5900_v26 = vpack.c.bf16 %v9163_v8, %v9158_v9 }
 0x94b   : > { %v9164_v12 = vpop.trf.xlu1 }
 0x94c   : > { %5931 = vst [vmem:[#allocation2 + $0xd0] sm:$0xff] %v5899_v55  ;;  %5932 = vst [vmem:[#allocation2 + $0xd8] sm:$0xff] %v5900_v26  ;;  %v9168_v59 = vunpack.i.h.bf16 %v9164_v12  ;;  %v9165_v16 = vunpack.i.l.bf16 %v9164_v12 }
 0x94f   : > { %v9169_v31 = vpop.trf.xlu1 }
 0x950   : > { %v9173_v13 = vunpack.i.h.bf16 %v9169_v31  ;;  %v9170_v32 = vunpack.i.l.bf16 %v9169_v31 }
 0x952   : > { %v5903_v60 = vpack.c.bf16 %v9170_v32, %v9165_v16  ;;  %v5904_v56 = vpack.c.bf16 %v9173_v13, %v9168_v59 }
 0x954   : > { %5935 = vst [vmem:[#allocation2 + $0xf0] sm:$0xff] %v5903_v60  ;;  %5936 = vst [vmem:[#allocation2 + $0xf8] sm:$0xff] %v5904_v56 }
 0x955 PF: > { %v5988_v54 = vld [vmem:[#allocation2 + $0x8] sm:$0xff]  ;;  %v5990_v58 = vld [vmem:[#allocation2 + $0x18] sm:$0xff]  ;;  %v5987_v23 = vld [vmem:[#allocation2] sm:$0xff]  ;;  %v10755_v7 = vmov 0   ;;  %s8152_s8 = sshll.u32 %s10822_s28, 8  ;;  %s10756_s23 = smov [#allocation12]  }
 0x956   : > { %6019 = vmatprep.subr.bf16.mxu0 %v5988_v54  ;;  %6212 = vmatprep.subr.bf16.mxu1 %v5990_v58  ;;  %v5989_v10 = vld [vmem:[#allocation2 + $0x10] sm:$0xff]  ;;  %v5992_v2 = vld [vmem:[#allocation2 + $0x28] sm:$0xff]  ;;  %v5994_v36 = vld [vmem:[#allocation2 + $0x38] sm:$0xff]  ;;  %s11363_s19 = scalar_lea.vmem [#allocation12], %s8152_s8  ;;  %s7632_s29 = sshll.u32 %s10756_s23, 4  ;;  %s11735_s29 = int_to_ptr.vmem [resolvable:$true] %s7632_s29 }
 0x957   : > { %6020 = vmatpush1.bf16.msra.mxu0 %v5987_v23  ;;  %6213 = vmatpush1.bf16.msra.mxu1 %v5989_v10  ;;  %v5991_v14 = vld [vmem:[#allocation2 + $0x20] sm:$0xff]  ;;  %v5993_v57 = vld [vmem:[#allocation2 + $0x30] sm:$0xff]  ;;  %v5996_v6 = vld [vmem:[#allocation2 + $0x48] sm:$0xff]  ;;  %s10757_s10 = smov [#allocation13]   ;;  %s10610_s20 = scalar_lea.vmem %s11735_s29, 8192 }
 0x958   : > { %6021 = vmatprep.subr.bf16.mxu0 %v5992_v2  ;;  %6214 = vmatprep.subr.bf16.mxu1 %v5994_v36  ;;  %v5998_v34 = vld [vmem:[#allocation2 + $0x58] sm:$0xff]  ;;  %v5995_v50 = vld [vmem:[#allocation2 + $0x40] sm:$0xff]  ;;  %v5997_v33 = vld [vmem:[#allocation2 + $0x50] sm:$0xff]  ;;  %s7645_s30 = sshll.u32 %s10757_s10, 4  ;;  %p10611_p0 = scmp.ne.s32.totalorder %s11735_s29, %s10610_s20  ;;  %s7646_s30 = int_to_ptr.vmem [resolvable:$true] %s7645_s30 }
 0x959   : > { %6051 = vmatprep.mubr.bf16.mxu0 %v10755_v7  ;;  %6244 = vmatprep.mubr.bf16.mxu1 %v10755_v7  ;;  %v6000_v35 = vld [vmem:[#allocation2 + $0x68] sm:$0xff]  ;;  %v6002_v37 = vld [vmem:[#allocation2 + $0x78] sm:$0xff]  ;;  %v5999_v15 = vld [vmem:[#allocation2 + $0x60] sm:$0xff]  ;;  %p12016_p3 = scmp.eq.s32.totalorder %s10822_s28, 1  ;;  %p10617_p8 = scmp.lt.s32.totalorder %s11735_s29, %s11735_s29 }
 0x95a   : > { %v6001_v51 = vld [vmem:[#allocation2 + $0x70] sm:$0xff]  ;;  %v6004_v17 = vld [vmem:[#allocation2 + $0x88] sm:$0xff]  ;;  %v6006_v1 = vld [vmem:[#allocation2 + $0x98] sm:$0xff]  ;;  %p10618_p12 = scmp.lt.s32.totalorder %s10610_s20, %s10610_s20 }
 0x95b   : > { %6022 = vmatpush1.bf16.msra.mxu0 %v5991_v14  ;;  %6215 = vmatpush1.bf16.msra.mxu1 %v5993_v57  ;;  %v6003_v46 = vld [vmem:[#allocation2 + $0x80] sm:$0xff]  ;;  %v6005_v3 = vld [vmem:[#allocation2 + $0x90] sm:$0xff]  ;;  %v6008_v53 = vld [vmem:[#allocation2 + $0xa8] sm:$0xff]  ;;  %p10612_p4 = pnand %p10611_p0, %p12016_p3 }
 0x95c   : > { %6023 = vmatprep.subr.bf16.mxu0 %v5996_v6  ;;  %6216 = vmatprep.subr.bf16.mxu1 %v5998_v34  ;;  %v6010_v20 = vld [vmem:[#allocation2 + $0xb8] sm:$0xff]  ;;  %v6007_v5 = vld [vmem:[#allocation2 + $0xa0] sm:$0xff]  ;;  %v6009_v27 = vld [vmem:[#allocation2 + $0xb0] sm:$0xff]  ;;  %p10619_p2 = por %p10618_p12, %p10617_p8 }
 0x95d   : > { %v6012_v29 = vld [vmem:[#allocation2 + $0xc8] sm:$0xff]  ;;  %v6014_v11 = vld [vmem:[#allocation2 + $0xd8] sm:$0xff]  ;;  %v6011_v41 = vld [vmem:[#allocation2 + $0xc0] sm:$0xff]  ;;  %p10613_p7 = pneg %p10612_p4 }
 0x95e   : > { %v6013_v38 = vld [vmem:[#allocation2 + $0xd0] sm:$0xff]  ;;  %v6016_v44 = vld [vmem:[#allocation2 + $0xe8] sm:$0xff]  ;;  %v6018_v4 = vld [vmem:[#allocation2 + $0xf8] sm:$0xff] }
 0x95f   : > { %6024 = vmatpush1.bf16.msra.mxu0 %v5995_v50  ;;  %6217 = vmatpush1.bf16.msra.mxu1 %v5997_v33  ;;  %v5939_v28 = vld [vmem:[%s11363_s19] sm:$0xff]  ;;  %v5940_v30 = vld [vmem:[%s11363_s19 + $0x8] sm:$0xff]  ;;  %v6017_v40 = vld [vmem:[#allocation2 + $0xf0] sm:$0xff]  ;;  %p10620_p1 = pnand %p10619_p2, %p10613_p7 }
 0x960   : > { %6025 = vmatprep.subr.bf16.mxu0 %v6000_v35  ;;  %6218 = vmatprep.subr.bf16.mxu1 %v6002_v37  ;;  %v6015_v0 = vld [vmem:[#allocation2 + $0xe0] sm:$0xff]  ;;  %v5971_v62 = vpack.c.bf16 %v5940_v30, %v5939_v28  ;;  %v5941_v61 = vld [vmem:[%s11363_s19 + $0x10] sm:$0xff]  ;;  %v5942_v21 = vld [vmem:[%s11363_s19 + $0x18] sm:$0xff] }
 0x961   : > { %v5972_v45 = vpack.c.bf16 %v5942_v21, %v5941_v61  ;;  %v5943_v47 = vld [vmem:[%s11363_s19 + $0x20] sm:$0xff]  ;;  %v5944_v22 = vld [vmem:[%s11363_s19 + $0x28] sm:$0xff]  ;;  %v5945_v25 = vld [vmem:[%s11363_s19 + $0x30] sm:$0xff] }
 0x962   : > { %v5973_v63 = vpack.c.bf16 %v5944_v22, %v5943_v47  ;;  %v5946_v48 = vld [vmem:[%s11363_s19 + $0x38] sm:$0xff]  ;;  %v5947_v42 = vld [vmem:[%s11363_s19 + $0x40] sm:$0xff]  ;;  %v5948_v43 = vld [vmem:[%s11363_s19 + $0x48] sm:$0xff] }
 0x963   : > { %6026 = vmatpush1.bf16.msra.mxu0 %v5999_v15  ;;  %6219 = vmatpush1.bf16.msra.mxu1 %v6001_v51  ;;  %v5974_v49 = vpack.c.bf16 %v5946_v48, %v5945_v25  ;;  %v5975_v24 = vpack.c.bf16 %v5948_v43, %v5947_v42  ;;  %v5949_v39 = vld [vmem:[%s11363_s19 + $0x50] sm:$0xff]  ;;  %v5950_v9 = vld [vmem:[%s11363_s19 + $0x58] sm:$0xff]  ;;  %v5951_v19 = vld [vmem:[%s11363_s19 + $0x60] sm:$0xff] }
 0x964   : > { %6027 = vmatprep.subr.bf16.mxu0 %v6004_v17  ;;  %6220 = vmatprep.subr.bf16.mxu1 %v6006_v1  ;;  %v5976_v18 = vpack.c.bf16 %v5950_v9, %v5949_v39  ;;  %v5952_v8 = vld [vmem:[%s11363_s19 + $0x68] sm:$0xff]  ;;  %v5953_v55 = vld [vmem:[%s11363_s19 + $0x70] sm:$0xff]  ;;  %v5954_v26 = vld [vmem:[%s11363_s19 + $0x78] sm:$0xff] }
 0x965   : > { %v5977_v52 = vpack.c.bf16 %v5952_v8, %v5951_v19  ;;  %v5978_v12 = vpack.c.bf16 %v5954_v26, %v5953_v55  ;;  %v5955_v59 = vld [vmem:[%s11363_s19 + $0x80] sm:$0xff]  ;;  %v5956_v16 = vld [vmem:[%s11363_s19 + $0x88] sm:$0xff]  ;;  %v5957_v13 = vld [vmem:[%s11363_s19 + $0x90] sm:$0xff] }
 0x966   : > { %v5979_v31 = vpack.c.bf16 %v5956_v16, %v5955_v59  ;;  %v5958_v32 = vld [vmem:[%s11363_s19 + $0x98] sm:$0xff]  ;;  %v5959_v56 = vld [vmem:[%s11363_s19 + $0xa0] sm:$0xff]  ;;  %v5960_v54 = vld [vmem:[%s11363_s19 + $0xa8] sm:$0xff] }
 0x967   : > { %6028 = vmatpush1.bf16.msra.mxu0 %v6003_v46  ;;  %6221 = vmatpush1.bf16.msra.mxu1 %v6005_v3  ;;  %v5980_v60 = vpack.c.bf16 %v5958_v32, %v5957_v13  ;;  %v5981_v58 = vpack.c.bf16 %v5960_v54, %v5959_v56  ;;  %v5961_v23 = vld [vmem:[%s11363_s19 + $0xb0] sm:$0xff]  ;;  %v5962_v10 = vld [vmem:[%s11363_s19 + $0xb8] sm:$0xff]  ;;  %v5963_v36 = vld [vmem:[%s11363_s19 + $0xc0] sm:$0xff] }
 0x968   : > { %6029 = vmatprep.subr.bf16.mxu0 %v6008_v53  ;;  %6222 = vmatprep.subr.bf16.mxu1 %v6010_v20  ;;  %v5982_v2 = vpack.c.bf16 %v5962_v10, %v5961_v23  ;;  %v5964_v14 = vld [vmem:[%s11363_s19 + $0xc8] sm:$0xff]  ;;  %v5965_v6 = vld [vmem:[%s11363_s19 + $0xd0] sm:$0xff]  ;;  %v5966_v34 = vld [vmem:[%s11363_s19 + $0xd8] sm:$0xff] }
 0x969   : > { %v5983_v57 = vpack.c.bf16 %v5964_v14, %v5963_v36  ;;  %v5984_v50 = vpack.c.bf16 %v5966_v34, %v5965_v6  ;;  %v5967_v33 = vld [vmem:[%s11363_s19 + $0xe0] sm:$0xff]  ;;  %v5968_v35 = vld [vmem:[%s11363_s19 + $0xe8] sm:$0xff]  ;;  %v5969_v15 = vld [vmem:[%s11363_s19 + $0xf0] sm:$0xff] }
 0x96a   : > { %v5985_v37 = vpack.c.bf16 %v5968_v35, %v5967_v33  ;;  %v5970_v51 = vld [vmem:[%s11363_s19 + $0xf8] sm:$0xff] }
 0x96b   : > { %6030 = vmatpush1.bf16.msra.mxu0 %v6007_v5  ;;  %6223 = vmatpush1.bf16.msra.mxu1 %v6009_v27  ;;  %v5986_v17 = vpack.c.bf16 %v5970_v51, %v5969_v15 }
 0x96c   : > { %6031 = vmatprep.subr.bf16.mxu0 %v6012_v29  ;;  %6224 = vmatprep.subr.bf16.mxu1 %v6014_v11 }
 0x96f   : > { %6032 = vmatpush1.bf16.msra.mxu0 %v6011_v41  ;;  %6225 = vmatpush1.bf16.msra.mxu1 %v6013_v38 }
 0x970   : > { %6033 = vmatprep.subr.bf16.mxu0 %v6016_v44  ;;  %6226 = vmatprep.subr.bf16.mxu1 %v6018_v4 }
 0x973   : > { %6034 = vmatpush1.bf16.msra.mxu0 %v6015_v0  ;;  %6227 = vmatpush1.bf16.msra.mxu1 %v6017_v40 }
 0x976   : > { %6052 = vmatmul.mubr.bf16.vlgmr.msra.gmra.mrb[0].mxu0 %v5971_v62  ;;  %6245 = vmatmul.mubr.bf16.vlgmr.msra.gmra.mrb[0].mxu1 %v5971_v62 }
 0x977   : > { %6061 = vmatprep.mubr.bf16.mxu0 %v10755_v7  ;;  %6254 = vmatprep.mubr.bf16.mxu1 %v10755_v7 }
 0x97e   : > { %6062 = vmatmul.mubr.bf16.gmra.mrb[4].mxu0 %v5972_v45  ;;  %6255 = vmatmul.mubr.bf16.gmra.mrb[4].mxu1 %v5972_v45 }
 0x97f   : > { %6071 = vmatprep.mubr.bf16.mxu0 %v10755_v7  ;;  %6264 = vmatprep.mubr.bf16.mxu1 %v10755_v7 }
 0x986   : > { %6072 = vmatmul.mubr.bf16.gmra.mrb[8].mxu0 %v5973_v63  ;;  %6265 = vmatmul.mubr.bf16.gmra.mrb[8].mxu1 %v5973_v63 }
 0x987   : > { %6081 = vmatprep.mubr.bf16.mxu0 %v10755_v7  ;;  %6274 = vmatprep.mubr.bf16.mxu1 %v10755_v7 }
 0x98e   : > { %6082 = vmatmul.mubr.bf16.gmra.mrb[12].mxu0 %v5974_v49  ;;  %6275 = vmatmul.mubr.bf16.gmra.mrb[12].mxu1 %v5974_v49 }
 0x98f   : > { %6091 = vmatprep.mubr.bf16.mxu0 %v10755_v7  ;;  %6284 = vmatprep.mubr.bf16.mxu1 %v10755_v7 }
 0x996   : > { %6092 = vmatmul.mubr.bf16.gmra.mrb[16].mxu0 %v5975_v24  ;;  %6285 = vmatmul.mubr.bf16.gmra.mrb[16].mxu1 %v5975_v24 }
 0x997   : > { %6101 = vmatprep.mubr.bf16.mxu0 %v10755_v7  ;;  %6294 = vmatprep.mubr.bf16.mxu1 %v10755_v7 }
 0x99e   : > { %6102 = vmatmul.mubr.bf16.gmra.mrb[20].mxu0 %v5976_v18  ;;  %6295 = vmatmul.mubr.bf16.gmra.mrb[20].mxu1 %v5976_v18 }
 0x99f   : > { %6111 = vmatprep.mubr.bf16.mxu0 %v10755_v7  ;;  %6304 = vmatprep.mubr.bf16.mxu1 %v10755_v7 }
 0x9a6   : > { %6112 = vmatmul.mubr.bf16.gmra.mrb[24].mxu0 %v5977_v52  ;;  %6305 = vmatmul.mubr.bf16.gmra.mrb[24].mxu1 %v5977_v52 }
 0x9a7   : > { %6121 = vmatprep.mubr.bf16.mxu0 %v10755_v7  ;;  %6314 = vmatprep.mubr.bf16.mxu1 %v10755_v7 }
 0x9ae   : > { %6122 = vmatmul.mubr.bf16.gmra.mrb[28].mxu0 %v5978_v12  ;;  %6315 = vmatmul.mubr.bf16.gmra.mrb[28].mxu1 %v5978_v12 }
 0x9af   : > { %6131 = vmatprep.mubr.bf16.mxu0 %v10755_v7  ;;  %6324 = vmatprep.mubr.bf16.mxu1 %v10755_v7 }
 0x9b6   : > { %6132 = vmatmul.mubr.bf16.gmra.mrb[32].mxu0 %v5979_v31  ;;  %6325 = vmatmul.mubr.bf16.gmra.mrb[32].mxu1 %v5979_v31 }
 0x9b7   : > { %6141 = vmatprep.mubr.bf16.mxu0 %v10755_v7  ;;  %6334 = vmatprep.mubr.bf16.mxu1 %v10755_v7 }
 0x9be   : > { %6142 = vmatmul.mubr.bf16.gmra.mrb[36].mxu0 %v5980_v60  ;;  %6335 = vmatmul.mubr.bf16.gmra.mrb[36].mxu1 %v5980_v60 }
 0x9bf   : > { %6151 = vmatprep.mubr.bf16.mxu0 %v10755_v7  ;;  %6344 = vmatprep.mubr.bf16.mxu1 %v10755_v7 }
 0x9c6   : > { %6152 = vmatmul.mubr.bf16.gmra.mrb[40].mxu0 %v5981_v58  ;;  %6345 = vmatmul.mubr.bf16.gmra.mrb[40].mxu1 %v5981_v58 }
 0x9c7   : > { %6161 = vmatprep.mubr.bf16.mxu0 %v10755_v7  ;;  %6354 = vmatprep.mubr.bf16.mxu1 %v10755_v7 }
 0x9ce   : > { %6162 = vmatmul.mubr.bf16.gmra.mrb[44].mxu0 %v5982_v2  ;;  %6355 = vmatmul.mubr.bf16.gmra.mrb[44].mxu1 %v5982_v2 }
 0x9cf   : > { %6171 = vmatprep.mubr.bf16.mxu0 %v10755_v7  ;;  %6364 = vmatprep.mubr.bf16.mxu1 %v10755_v7 }
 0x9d6   : > { %6172 = vmatmul.mubr.bf16.gmra.mrb[48].mxu0 %v5983_v57  ;;  %6365 = vmatmul.mubr.bf16.gmra.mrb[48].mxu1 %v5983_v57 }
 0x9d7   : > { %6181 = vmatprep.mubr.bf16.mxu0 %v10755_v7  ;;  %6374 = vmatprep.mubr.bf16.mxu1 %v10755_v7 }
 0x9de   : > { %6182 = vmatmul.mubr.bf16.gmra.mrb[52].mxu0 %v5984_v50  ;;  %6375 = vmatmul.mubr.bf16.gmra.mrb[52].mxu1 %v5984_v50 }
 0x9df   : > { %6191 = vmatprep.mubr.bf16.mxu0 %v10755_v7  ;;  %6384 = vmatprep.mubr.bf16.mxu1 %v10755_v7 }
 0x9e6   : > { %6192 = vmatmul.mubr.bf16.gmra.mrb[56].mxu0 %v5985_v37  ;;  %6385 = vmatmul.mubr.bf16.gmra.mrb[56].mxu1 %v5985_v37 }
 0x9e7   : > { %6201 = vmatprep.mubr.bf16.mxu0 %v10755_v7  ;;  %6394 = vmatprep.mubr.bf16.mxu1 %v10755_v7 }
 0x9ee   : > { %6202 = vmatmul.mubr.bf16.gmra.mrb[60].mxu0 %v5986_v17  ;;  %6395 = vmatmul.mubr.bf16.gmra.mrb[60].mxu1 %v5986_v17 }
 0xa49   : > { %v6053_v1 = vpop.f32.mrb[0].mxu0  ;;  %v6246_v46 = vpop.f32.mrb[0].mxu1 }
 0xa4a   : > { %v8153_v3 = vmul.f32 -1.442695, %v6053_v1  ;;  %v8155_v53 = vmul.f32 -1.442695, %v6246_v46  ;;  %v6055_v20 = vpop.f32.mrb[1].mxu0  ;;  %v6248_v5 = vpop.f32.mrb[1].mxu1 }
 0xa4b   : > { %v8154_v27 = vmul.f32 -1.442695, %v6055_v20  ;;  %v8156_v29 = vmul.f32 -1.442695, %v6248_v5  ;;  %v6057_v11 = vpop.f32.mrb[2].mxu0  ;;  %v6250_v41 = vpop.f32.mrb[2].mxu1 }
 0xa4c   : > { %9958 = vpow2.f32 %v8153_v3  ;;  %v8157_v38 = vmul.f32 -1.442695, %v6057_v11  ;;  %v6059_v44 = vpop.f32.mrb[3].mxu0  ;;  %v6252_v4 = vpop.f32.mrb[3].mxu1  ;;  %v8159_v7 = vmul.f32 -1.442695, %v6250_v41 }
 0xa4d   : > { %9960 = vpow2.f32 %v8155_v53  ;;  %v8158_v28 = vmul.f32 -1.442695, %v6059_v44  ;;  %v8160_v30 = vmul.f32 -1.442695, %v6252_v4 }
 0xa4e   : > { %9962 = vpow2.f32 %v8154_v27 }
 0xa4f   : > { %9964 = vpow2.f32 %v8156_v29 }
 0xa50   : > { %9966 = vpow2.f32 %v8157_v38 }
 0xa51   : > { %9968 = vpow2.f32 %v8159_v7  ;;  %v6063_v0 = vpop.f32.mrb[4].mxu0  ;;  %v6256_v40 = vpop.f32.mrb[4].mxu1 }
 0xa52   : > { %9970 = vpow2.f32 %v8158_v28  ;;  %v8161_v62 = vmul.f32 -1.442695, %v6063_v0  ;;  %v8163_v61 = vmul.f32 -1.442695, %v6256_v40  ;;  %v6065_v21 = vpop.f32.mrb[5].mxu0  ;;  %v6258_v45 = vpop.f32.mrb[5].mxu1 }
 0xa53   : > { %9972 = vpow2.f32 %v8160_v30  ;;  %v8162_v47 = vmul.f32 -1.442695, %v6065_v21  ;;  %v8164_v22 = vmul.f32 -1.442695, %v6258_v45  ;;  %v6067_v63 = vpop.f32.mrb[6].mxu0  ;;  %v6260_v25 = vpop.f32.mrb[6].mxu1 }
 0xa54   : > { %9974 = vpow2.f32 %v8161_v62  ;;  %v8165_v48 = vmul.f32 -1.442695, %v6067_v63  ;;  %v6069_v49 = vpop.f32.mrb[7].mxu0  ;;  %v6262_v42 = vpop.f32.mrb[7].mxu1  ;;  %v8167_v1 = vmul.f32 -1.442695, %v6260_v25 }
 0xa55   : > { %9976 = vpow2.f32 %v8163_v61  ;;  %v8166_v20 = vmul.f32 -1.442695, %v6069_v49  ;;  %v8168_v11 = vmul.f32 -1.442695, %v6262_v42 }
 0xa56   : > { %v9959_v43 = vpop.eup %9958  ;;  %9978 = vpow2.f32 %v8162_v47 }
 0xa57   : > { %v9961_v24 = vpop.eup %9960  ;;  %v6789_v39 = vadd.f32 1.0, %v9959_v43  ;;  %9980 = vpow2.f32 %v8164_v22 }
 0xa58   : > { %v9963_v9 = vpop.eup %9962  ;;  %v6791_v18 = vadd.f32 1.0, %v9961_v24  ;;  %9982 = vpow2.f32 %v8165_v48 }
 0xa59   : > { %v9965_v19 = vpop.eup %9964  ;;  %9984 = vrcp.f32 %v6789_v39  ;;  %v6790_v8 = vadd.f32 1.0, %v9963_v9  ;;  %v6073_v52 = vpop.f32.mrb[8].mxu0 }
 0xa5a   : > { %v6266_v55 = vpop.f32.mrb[8].mxu1  ;;  %v9967_v26 = vpop.eup %9966  ;;  %9986 = vrcp.f32 %v6791_v18  ;;  %v6792_v12 = vadd.f32 1.0, %v9965_v19  ;;  %v8169_v4 = vmul.f32 -1.442695, %v6073_v52 }
 0xa5b   : > { %v6075_v59 = vpop.f32.mrb[9].mxu0  ;;  %v9969_v16 = vpop.eup %9968  ;;  %9988 = vrcp.f32 %v6790_v8  ;;  %v6793_v31 = vadd.f32 1.0, %v9967_v26  ;;  %v8171_v0 = vmul.f32 -1.442695, %v6266_v55 }
 0xa5c   : > { %v6268_v13 = vpop.f32.mrb[9].mxu1  ;;  %v6077_v32 = vpop.f32.mrb[10].mxu0  ;;  %9990 = vrcp.f32 %v6792_v12  ;;  %v6795_v56 = vadd.f32 1.0, %v9969_v16  ;;  %v8170_v61 = vmul.f32 -1.442695, %v6075_v59 }
 0xa5d   : > { %v9971_v60 = vpop.eup %9970  ;;  %v6270_v54 = vpop.f32.mrb[10].mxu1  ;;  %9992 = vrcp.f32 %v6793_v31  ;;  %v8172_v45 = vmul.f32 -1.442695, %v6268_v13  ;;  %v8173_v22 = vmul.f32 -1.442695, %v6077_v32 }
 0xa5e   : > { %v9973_v58 = vpop.eup %9972  ;;  %v6794_v23 = vadd.f32 1.0, %v9971_v60  ;;  %v6079_v10 = vpop.f32.mrb[11].mxu0  ;;  %9994 = vrcp.f32 %v6795_v56  ;;  %v8175_v42 = vmul.f32 -1.442695, %v6270_v54 }
 0xa5f   : > { %v11427_v2 = vpop.f32.mrb[11].mxu1  ;;  %v9975_v36 = vpop.eup %9974  ;;  %v6796_v14 = vadd.f32 1.0, %v9973_v58  ;;  %v8174_v18 = vmul.f32 -1.442695, %v6079_v10 }
 0xa60   : > { %v9977_v57 = vpop.eup %9976  ;;  %9996 = vrcp.f32 %v6794_v23  ;;  %v6797_v6 = vadd.f32 1.0, %v9975_v36  ;;  %v8176_v55 = vmul.f32 -1.442695, %v11427_v2 }
 0xa61   : > { %v9979_v34 = vpop.eup %9978  ;;  %9998 = vrcp.f32 %v6796_v14  ;;  %v6799_v50 = vadd.f32 1.0, %v9977_v57  ;;  %v6083_v37 = vpop.f32.mrb[12].mxu0 }
 0xa62   : > { %v9981_v33 = vpop.eup %9980  ;;  %10000 = vrcp.f32 %v6797_v6  ;;  %v6798_v35 = vadd.f32 1.0, %v9979_v34  ;;  %v11429_v15 = vpop.f32.mrb[12].mxu1  ;;  %v8177_v16 = vmul.f32 -1.442695, %v6083_v37 }
 0xa63   : > { %v9983_v51 = vpop.eup %9982  ;;  %10002 = vrcp.f32 %v6799_v50  ;;  %v6800_v17 = vadd.f32 1.0, %v9981_v33  ;;  %v11431_v46 = vpop.f32.mrb[13].mxu0  ;;  %v8179_v32 = vmul.f32 -1.442695, %v11429_v15 }
 0xa64   : > { %v9985_v3 = vpop.eup %9984  ;;  %10004 = vrcp.f32 %v6798_v35  ;;  %v6801_v53 = vadd.f32 1.0, %v9983_v51  ;;  %v11433_v5 = vpop.f32.mrb[13].mxu1 }
 0xa65   : > { %v11435_v27 = vpop.f32.mrb[14].mxu0  ;;  %v9987_v29 = vpop.eup %9986  ;;  %10006 = vrcp.f32 %v6800_v17 }
 0xa66   : > { %v11437_v41 = vpop.f32.mrb[14].mxu1  ;;  %v11439_v38 = vpop.f32.mrb[15].mxu0  ;;  %10008 = vrcp.f32 %v6801_v53 }
 0xa67   : > { %v9989_v44 = vpop.eup %9988  ;;  %v11441_v7 = vpop.f32.mrb[15].mxu1  ;;  %10010 = vpow2.f32 %v8167_v1 }
 0xa68   : > { %v9991_v28 = vpop.eup %9990  ;;  %v8355_v30 = vpack.c.bf16 %v9989_v44, %v9985_v3  ;;  %10012 = vpow2.f32 %v8166_v20 }
 0xa69   : > { %v9993_v40 = vpop.eup %9992  ;;  %v8356_v62 = vpack.c.bf16 %v9991_v28, %v9987_v29  ;;  %10014 = vpow2.f32 %v8168_v11  ;;  %v11445_v63 = vpop.f32.mrb[16].mxu0 }
 0xa6a   : > { %v9995_v21 = vpop.eup %9994  ;;  %7557 = vst [vmem:[%s10992_s24] sm:$0xff] %v8355_v30  ;;  %10016 = vpow2.f32 %v8169_v4  ;;  %v11447_v25 = vpop.f32.mrb[16].mxu1 }
 0xa6b   : > { %v9997_v47 = vpop.eup %9996  ;;  %7558 = vst [vmem:[%s10992_s24 + $0x8] sm:$0xff] %v8356_v62  ;;  %10018 = vpow2.f32 %v8171_v0  ;;  %v11449_v43 = vpop.f32.mrb[17].mxu0 }
 0xa6c   : > { %v9999_v48 = vpop.eup %9998  ;;  %v8357_v49 = vpack.c.bf16 %v9997_v47, %v9993_v40  ;;  %v11451_v24 = vpop.f32.mrb[17].mxu1  ;;  %10020 = vpow2.f32 %v8170_v61 }
 0xa6d   : > { %v10001_v39 = vpop.eup %10000  ;;  %v8358_v9 = vpack.c.bf16 %v9999_v48, %v9995_v21  ;;  %v11453_v19 = vpop.f32.mrb[18].mxu0  ;;  %10022 = vpow2.f32 %v8172_v45 }
 0xa6e   : > { %v11455_v8 = vpop.f32.mrb[18].mxu1  ;;  %v10003_v52 = vpop.eup %10002  ;;  %7559 = vst [vmem:[%s10992_s24 + $0x10] sm:$0xff] %v8357_v49  ;;  %10024 = vpow2.f32 %v8173_v22 }
 0xa6f   : > { %v11459_v26 = vpop.f32.mrb[19].mxu0  ;;  %v11461_v12 = vpop.f32.mrb[19].mxu1  ;;  %7560 = vst [vmem:[%s10992_s24 + $0x18] sm:$0xff] %v8358_v9  ;;  %10026 = vpow2.f32 %v8175_v42 }
 0xa70   : > { %v10005_v59 = vpop.eup %10004  ;;  %10028 = vpow2.f32 %v8174_v18 }
 0xa71   : > { %v10007_v31 = vpop.eup %10006  ;;  %v8359_v13 = vpack.c.bf16 %v10005_v59, %v10001_v39  ;;  %10030 = vpow2.f32 %v8176_v55  ;;  %v11469_v10 = vpop.f32.mrb[20].mxu0  ;;  %v8178_v39 = vmul.f32 -1.442695, %v11431_v46  ;;  %v8180_v55 = vmul.f32 -1.442695, %v11433_v5 }
 0xa72   : > { %v11465_v60 = vpop.eup %10008  ;;  %v8360_v56 = vpack.c.bf16 %v10007_v31, %v10003_v52  ;;  %10032 = vpow2.f32 %v8177_v16  ;;  %v11471_v2 = vpop.f32.mrb[20].mxu1  ;;  %v8182_v5 = vmul.f32 -1.442695, %v11439_v38 }
 0xa73   : > { %v10011_v54 = vpop.eup %10010  ;;  %7561 = vst [vmem:[%s10992_s24 + $0x20] sm:$0xff] %v8359_v13  ;;  %10034 = vpow2.f32 %v8179_v32  ;;  %v11473_v57 = vpop.f32.mrb[21].mxu0  ;;  %v8181_v13 = vmul.f32 -1.442695, %v11435_v27 }
 0xa74   : > { %v10013_v58 = vpop.eup %10012  ;;  %7562 = vst [vmem:[%s10992_s24 + $0x28] sm:$0xff] %v8360_v56  ;;  %v6803_v23 = vadd.f32 1.0, %v10011_v54  ;;  %v11475_v50 = vpop.f32.mrb[21].mxu1  ;;  %v8183_v56 = vmul.f32 -1.442695, %v11437_v41 }
 0xa75   : > { %v10015_v36 = vpop.eup %10014  ;;  %v6802_v14 = vadd.f32 1.0, %v10013_v58  ;;  %v11477_v33 = vpop.f32.mrb[22].mxu0 }
 0xa76   : > { %v10017_v6 = vpop.eup %10016  ;;  %10036 = vrcp.f32 %v6803_v23  ;;  %v6804_v34 = vadd.f32 1.0, %v10015_v36  ;;  %v11479_v15 = vpop.f32.mrb[22].mxu1  ;;  %v8184_v36 = vmul.f32 -1.442695, %v11441_v7  ;;  %v8187_v7 = vmul.f32 -1.442695, %v11447_v25 }
 0xa77   : > { %v10019_v35 = vpop.eup %10018  ;;  %10038 = vrcp.f32 %v6802_v14  ;;  %v6805_v37 = vadd.f32 1.0, %v10017_v6  ;;  %v11481_v1 = vpop.f32.mrb[23].mxu0 }
 0xa78   : > { %v10021_v51 = vpop.eup %10020  ;;  %10040 = vrcp.f32 %v6804_v34  ;;  %v6807_v17 = vadd.f32 1.0, %v10019_v35  ;;  %v11483_v3 = vpop.f32.mrb[23].mxu1 }
 0xa79   : > { %v10023_v53 = vpop.eup %10022  ;;  %10042 = vrcp.f32 %v6805_v37  ;;  %v6806_v20 = vadd.f32 1.0, %v10021_v51  ;;  %v11485_v0 = vpop.f32.mrb[24].mxu0 }
 0xa7a   : > { %v10025_v29 = vpop.eup %10024  ;;  %10044 = vrcp.f32 %v6807_v17  ;;  %v6808_v11 = vadd.f32 1.0, %v10023_v53  ;;  %v11487_v40 = vpop.f32.mrb[24].mxu1 }
 0xa7b   : > { %v10027_v44 = vpop.eup %10026  ;;  %10046 = vrcp.f32 %v6806_v20  ;;  %v6809_v4 = vadd.f32 1.0, %v10025_v29  ;;  %v11489_v21 = vpop.f32.mrb[25].mxu0 }
 0xa7c   : > { %v10029_v28 = vpop.eup %10028  ;;  %10048 = vrcp.f32 %v6808_v11  ;;  %v6811_v30 = vadd.f32 1.0, %v10027_v44  ;;  %v11491_v22 = vpop.f32.mrb[25].mxu1  ;;  %v8188_v44 = vmul.f32 -1.442695, %v11451_v24 }
 0xa7d   : > { %v10031_v62 = vpop.eup %10030  ;;  %10050 = vrcp.f32 %v6809_v4  ;;  %v6810_v61 = vadd.f32 1.0, %v10029_v28  ;;  %v11493_v48 = vpop.f32.mrb[26].mxu0  ;;  %v8189_v4 = vmul.f32 -1.442695, %v11453_v19 }
 0xa7e   : > { %v10033_v45 = vpop.eup %10032  ;;  %10052 = vrcp.f32 %v6811_v30  ;;  %v6812_v47 = vadd.f32 1.0, %v10031_v62  ;;  %v11496_v9 = vpop.f32.mrb[26].mxu1 }
 0xa7f   : > { %v10035_v49 = vpop.eup %10034  ;;  %10054 = vrcp.f32 %v6810_v61  ;;  %v6813_v42 = vadd.f32 1.0, %v10033_v45  ;;  %v11499_v59 = vpop.f32.mrb[27].mxu0  ;;  %v8190_v45 = vmul.f32 -1.442695, %v11459_v26 }
 0xa80   : > { %v10037_v18 = vpop.eup %10036  ;;  %10056 = vrcp.f32 %v6812_v47  ;;  %v6815_v52 = vadd.f32 1.0, %v10035_v49  ;;  %v11501_v16 = vpop.f32.mrb[27].mxu1 }
 0xa81   : > { %v10039_v31 = vpop.eup %10038  ;;  %10058 = vrcp.f32 %v6813_v42  ;;  %v11509_v14 = vpop.f32.mrb[28].mxu0 }
 0xa82   : > { %v10041_v32 = vpop.eup %10040  ;;  %v8361_v46 = vpack.c.bf16 %v10039_v31, %v11465_v60  ;;  %10060 = vrcp.f32 %v6815_v52  ;;  %v11511_v27 = vpop.f32.mrb[28].mxu1  ;;  %v8185_v60 = vmul.f32 -1.442695, %v11445_v63  ;;  %v8186_v63 = vmul.f32 -1.442695, %v11449_v43 }
 0xa83   : > { %v10043_v54 = vpop.eup %10042  ;;  %v8362_v58 = vpack.c.bf16 %v10041_v32, %v10037_v18  ;;  %10062 = vpow2.f32 %v8178_v39  ;;  %v11515_v41 = vpop.f32.mrb[29].mxu0  ;;  %v8191_v43 = vmul.f32 -1.442695, %v11455_v8 }
 0xa84   : > { %v10045_v23 = vpop.eup %10044  ;;  %7563 = vst [vmem:[%s10992_s24 + $0x30] sm:$0xff] %v8361_v46  ;;  %10064 = vpow2.f32 %v8180_v55  ;;  %v11517_v34 = vpop.f32.mrb[29].mxu1 }
 0xa85   : > { %v10047_v6 = vpop.eup %10046  ;;  %7564 = vst [vmem:[%s10992_s24 + $0x38] sm:$0xff] %v8362_v58  ;;  %10066 = vpow2.f32 %v8181_v13  ;;  %v11520_v37 = vpop.f32.mrb[30].mxu0 }
 0xa86   : > { %v10049_v38 = vpop.eup %10048  ;;  %v8363_v35 = vpack.c.bf16 %v10047_v6, %v10043_v54  ;;  %10068 = vpow2.f32 %v8183_v56  ;;  %v11522_v51 = vpop.f32.mrb[30].mxu1 }
 0xa87   : > { %v10051_v17 = vpop.eup %10050  ;;  %v8364_v53 = vpack.c.bf16 %v10049_v38, %v10045_v23  ;;  %10070 = vpow2.f32 %v8182_v5  ;;  %v11525_v20 = vpop.f32.mrb[31].mxu0 }
 0xa88   : > { %v11527_v29 = vpop.f32.mrb[31].mxu1  ;;  %v10053_v11 = vpop.eup %10052  ;;  %7565 = vst [vmem:[%s10992_s24 + $0x40] sm:$0xff] %v8363_v35  ;;  %10072 = vpow2.f32 %v8184_v36 }
 0xa89   : > { %v10055_v25 = vpop.eup %10054  ;;  %7566 = vst [vmem:[%s10992_s24 + $0x48] sm:$0xff] %v8364_v53  ;;  %10074 = vpow2.f32 %v8185_v60  ;;  %v11540_v24 = vpop.f32.mrb[32].mxu0 }
 0xa8a   : > { %v10057_v28 = vpop.eup %10056  ;;  %v8365_v30 = vpack.c.bf16 %v10055_v25, %v10051_v17  ;;  %10076 = vpow2.f32 %v8187_v7  ;;  %v11542_v49 = vpop.f32.mrb[32].mxu1 }
 0xa8b   : > { %v11534_v62 = vpop.eup %10058  ;;  %v8366_v61 = vpack.c.bf16 %v10057_v28, %v10053_v11  ;;  %10078 = vpow2.f32 %v8186_v63  ;;  %v11545_v42 = vpop.f32.mrb[33].mxu0 }
 0xa8c   : > { %v11537_v47 = vpop.eup %10060  ;;  %7567 = vst [vmem:[%s10992_s24 + $0x50] sm:$0xff] %v8365_v30  ;;  %10080 = vpow2.f32 %v8188_v44  ;;  %v11547_v8 = vpop.f32.mrb[33].mxu1 }
 0xa8d   : > { %v10063_v19 = vpop.eup %10062  ;;  %7568 = vst [vmem:[%s10992_s24 + $0x58] sm:$0xff] %v8366_v61  ;;  %10082 = vpow2.f32 %v8189_v4  ;;  %v11549_v52 = vpop.f32.mrb[34].mxu0 }
 0xa8e   : > { %v10065_v39 = vpop.eup %10064  ;;  %v6814_v18 = vadd.f32 1.0, %v10063_v19  ;;  %10084 = vpow2.f32 %v8191_v43  ;;  %v11551_v31 = vpop.f32.mrb[34].mxu1 }
 0xa8f   : > { %v10067_v26 = vpop.eup %10066  ;;  %v6816_v55 = vadd.f32 1.0, %v10065_v39  ;;  %10086 = vpow2.f32 %v8190_v45  ;;  %v11553_v13 = vpop.f32.mrb[35].mxu0 }
 0xa90   : > { %v10069_v32 = vpop.eup %10068  ;;  %10088 = vrcp.f32 %v6814_v18  ;;  %v6817_v46 = vadd.f32 1.0, %v10067_v26  ;;  %v11555_v56 = vpop.f32.mrb[35].mxu1 }
 0xa91   : > { %v10071_v54 = vpop.eup %10070  ;;  %10090 = vrcp.f32 %v6816_v55  ;;  %v6819_v58 = vadd.f32 1.0, %v10069_v32  ;;  %v11557_v35 = vpop.f32.mrb[36].mxu0  ;;  %v8192_v55 = vmul.f32 -1.442695, %v11461_v12 }
 0xa92   : > { %v10073_v5 = vpop.eup %10072  ;;  %10092 = vrcp.f32 %v6817_v46  ;;  %v6818_v23 = vadd.f32 1.0, %v10071_v54  ;;  %v11559_v7 = vpop.f32.mrb[36].mxu1  ;;  %v8193_v54 = vmul.f32 -1.442695, %v11469_v10  ;;  %v8196_v10 = vmul.f32 -1.442695, %v11475_v50 }
 0xa93   : > { %v10075_v36 = vpop.eup %10074  ;;  %10094 = vrcp.f32 %v6819_v58  ;;  %v6820_v6 = vadd.f32 1.0, %v10073_v5  ;;  %v11561_v63 = vpop.f32.mrb[37].mxu0  ;;  %v8199_v50 = vmul.f32 -1.442695, %v11479_v15  ;;  %v8201_v15 = vmul.f32 -1.442695, %v11485_v0 }
 0xa94   : > { %v10077_v60 = vpop.eup %10076  ;;  %10096 = vrcp.f32 %v6818_v23  ;;  %v6821_v38 = vadd.f32 1.0, %v10075_v36  ;;  %v11563_v25 = vpop.f32.mrb[37].mxu1  ;;  %v8195_v23 = vmul.f32 -1.442695, %v11471_v2  ;;  %v8204_v0 = vmul.f32 -1.442695, %v11491_v22 }
 0xa95   : > { %v10079_v17 = vpop.eup %10078  ;;  %10098 = vrcp.f32 %v6820_v6  ;;  %v6823_v53 = vadd.f32 1.0, %v10077_v60  ;;  %v11565_v4 = vpop.f32.mrb[38].mxu0  ;;  %v8194_v60 = vmul.f32 -1.442695, %v11473_v57 }
 0xa96   : > { %v10081_v11 = vpop.eup %10080  ;;  %10100 = vrcp.f32 %v6821_v38  ;;  %v6822_v44 = vadd.f32 1.0, %v10079_v17  ;;  %v11567_v43 = vpop.f32.mrb[38].mxu1 }
 0xa97   : > { %v10083_v28 = vpop.eup %10082  ;;  %10102 = vrcp.f32 %v6823_v53  ;;  %v6824_v30 = vadd.f32 1.0, %v10081_v11  ;;  %v11569_v19 = vpop.f32.mrb[39].mxu0 }
 0xa98   : > { %v10085_v61 = vpop.eup %10084  ;;  %10104 = vrcp.f32 %v6822_v44  ;;  %v6825_v45 = vadd.f32 1.0, %v10083_v28  ;;  %v11571_v39 = vpop.f32.mrb[39].mxu1 }
 0xa99   : > { %v10087_v18 = vpop.eup %10086  ;;  %10106 = vrcp.f32 %v6824_v30  ;;  %v6827_v26 = vadd.f32 1.0, %v10085_v61  ;;  %v11579_v12 = vpop.f32.mrb[40].mxu0 }
 0xa9a   : > { %v10089_v32 = vpop.eup %10088  ;;  %10108 = vrcp.f32 %v6825_v45  ;;  %v6826_v46 = vadd.f32 1.0, %v10087_v18  ;;  %v11581_v38 = vpop.f32.mrb[40].mxu1 }
 0xa9b   : > { %v10091_v58 = vpop.eup %10090  ;;  %v8367_v5 = vpack.c.bf16 %v10089_v32, %v11534_v62  ;;  %10110 = vrcp.f32 %v6827_v26  ;;  %v11585_v62 = vpop.f32.mrb[41].mxu0  ;;  %v8198_v26 = vmul.f32 -1.442695, %v11481_v1  ;;  %v8202_v1 = vmul.f32 -1.442695, %v11489_v21 }
 0xa9c   : > { %v10093_v36 = vpop.eup %10092  ;;  %v8368_v6 = vpack.c.bf16 %v10091_v58, %v11537_v47  ;;  %10112 = vrcp.f32 %v6826_v46  ;;  %v11587_v53 = vpop.f32.mrb[41].mxu1  ;;  %v8197_v47 = vmul.f32 -1.442695, %v11477_v33  ;;  %v8203_v58 = vmul.f32 -1.442695, %v11487_v40 }
 0xa9d   : > { %v10095_v17 = vpop.eup %10094  ;;  %7569 = vst [vmem:[%s10992_s24 + $0x60] sm:$0xff] %v8367_v5  ;;  %10114 = vpow2.f32 %v8192_v55  ;;  %v11591_v57 = vpop.f32.mrb[42].mxu0  ;;  %v8200_v55 = vmul.f32 -1.442695, %v11483_v3 }
 0xa9e   : > { %v10097_v2 = vpop.eup %10096  ;;  %7570 = vst [vmem:[%s10992_s24 + $0x68] sm:$0xff] %v8368_v6  ;;  %10116 = vpow2.f32 %v8193_v54  ;;  %v11593_v11 = vpop.f32.mrb[42].mxu1 }
 0xa9f   : > { %v10099_v44 = vpop.eup %10098  ;;  %v8369_v28 = vpack.c.bf16 %v10097_v2, %v10093_v36  ;;  %10118 = vpow2.f32 %v8195_v23  ;;  %v11596_v30 = vpop.f32.mrb[43].mxu0 }
 0xaa0   : > { %v11598_v61 = vpop.f32.mrb[43].mxu1  ;;  %v10101_v45 = vpop.eup %10100  ;;  %v8370_v18 = vpack.c.bf16 %v10099_v44, %v10095_v17  ;;  %10120 = vpow2.f32 %v8194_v60 }
 0xaa1   : > { %v10103_v33 = vpop.eup %10102  ;;  %7571 = vst [vmem:[%s10992_s24 + $0x70] sm:$0xff] %v8369_v28  ;;  %10122 = vpow2.f32 %v8196_v10  ;;  %v11607_v36 = vpop.f32.mrb[44].mxu0 }
 0xaa2   : > { %v10105_v32 = vpop.eup %10104  ;;  %7572 = vst [vmem:[%s10992_s24 + $0x78] sm:$0xff] %v8370_v18  ;;  %10124 = vpow2.f32 %v8197_v47  ;;  %v11609_v3 = vpop.f32.mrb[44].mxu1 }
 0xaa3   : > { %v10107_v46 = vpop.eup %10106  ;;  %v8371_v54 = vpack.c.bf16 %v10105_v32, %v10101_v45  ;;  %10126 = vpow2.f32 %v8199_v50  ;;  %v11615_v60 = vpop.f32.mrb[45].mxu0 }
 0xaa4   : > { %v10109_v5 = vpop.eup %10108  ;;  %v8372_v23 = vpack.c.bf16 %v10107_v46, %v10103_v33  ;;  %10128 = vpow2.f32 %v8198_v26  ;;  %v11617_v17 = vpop.f32.mrb[45].mxu1 }
 0xaa5   : > { %v11611_v6 = vpop.eup %10110  ;;  %7573 = vst [vmem:[%s10992_s24 + $0x80] sm:$0xff] %v8371_v54  ;;  %10130 = vpow2.f32 %v8200_v55  ;;  %v11620_v10 = vpop.f32.mrb[46].mxu0 }
 0xaa6   : > { %v10113_v40 = vpop.eup %10112  ;;  %7574 = vst [vmem:[%s10992_s24 + $0x88] sm:$0xff] %v8372_v23  ;;  %10132 = vpow2.f32 %v8201_v15  ;;  %v11622_v21 = vpop.f32.mrb[46].mxu1 }
 0xaa7   : > { %v10115_v2 = vpop.eup %10114  ;;  %v8373_v47 = vpack.c.bf16 %v10113_v40, %v10109_v5  ;;  %10134 = vpow2.f32 %v8203_v58  ;;  %v11624_v44 = vpop.f32.mrb[47].mxu0 }
 0xaa8   : > { %v11626_v28 = vpop.f32.mrb[47].mxu1  ;;  %v10117_v22 = vpop.eup %10116  ;;  %v6828_v50 = vadd.f32 1.0, %v10115_v2  ;;  %10136 = vpow2.f32 %v8202_v1 }
 0xaa9   : > { %v10119_v45 = vpop.eup %10118  ;;  %7575 = vst [vmem:[%s10992_s24 + $0x90] sm:$0xff] %v8373_v47  ;;  %v6829_v18 = vadd.f32 1.0, %v10117_v22  ;;  %10138 = vpow2.f32 %v8204_v0  ;;  %v11629_v54 = vpop.f32.mrb[48].mxu0 }
 0xaaa   : > { %v10121_v26 = vpop.eup %10120  ;;  %10140 = vrcp.f32 %v6828_v50  ;;  %v6831_v33 = vadd.f32 1.0, %v10119_v45  ;;  %v11631_v58 = vpop.f32.mrb[48].mxu1 }
 0xaab   : > { %v10123_v55 = vpop.eup %10122  ;;  %10142 = vrcp.f32 %v6829_v18  ;;  %v6830_v32 = vadd.f32 1.0, %v10121_v26  ;;  %v11633_v1 = vpop.f32.mrb[49].mxu0 }
 0xaac   : > { %v10125_v15 = vpop.eup %10124  ;;  %10144 = vrcp.f32 %v6831_v33  ;;  %v6832_v46 = vadd.f32 1.0, %v10123_v55  ;;  %v11635_v2 = vpop.f32.mrb[49].mxu1 }
 0xaad   : > { %v10127_v5 = vpop.eup %10126  ;;  %10146 = vrcp.f32 %v6830_v32  ;;  %v6833_v23 = vadd.f32 1.0, %v10125_v15  ;;  %12001 = vst [vmem:[#allocation43_spill] sm:$0xff] %v11635_v2  ;;  %v11637_v47 = vpop.f32.mrb[50].mxu0 }
 0xaae   : > { %v10129_v40 = vpop.eup %10128  ;;  %10148 = vrcp.f32 %v6832_v46  ;;  %v6835_v0 = vadd.f32 1.0, %v10127_v5  ;;  %12002 = vst [vmem:[#allocation44_spill] sm:$0xff] %v11637_v47  ;;  %v11639_v45 = vpop.f32.mrb[50].mxu1 }
 0xaaf   : > { %v10131_v22 = vpop.eup %10130  ;;  %10150 = vrcp.f32 %v6833_v23  ;;  %v6834_v50 = vadd.f32 1.0, %v10129_v40  ;;  %12003 = vst [vmem:[#allocation45_spill] sm:$0xff] %v11639_v45  ;;  %v11641_v33 = vpop.f32.mrb[51].mxu0  ;;  %v8205_v23 = vmul.f32 -1.442695, %v11493_v48 }
 0xab0   : > { %v10133_v18 = vpop.eup %10132  ;;  %10152 = vrcp.f32 %v6835_v0  ;;  %v6836_v26 = vadd.f32 1.0, %v10131_v22  ;;  %v11643_v55 = vpop.f32.mrb[51].mxu1  ;;  %v8207_v0 = vmul.f32 -1.442695, %v11496_v9 }
 0xab1   : > { %12004 = vst [vmem:[#allocation46_spill] sm:$0xff] %v11643_v55  ;;  %v10135_v32 = vpop.eup %10134  ;;  %10154 = vrcp.f32 %v6834_v50  ;;  %v6837_v15 = vadd.f32 1.0, %v10133_v18  ;;  %v11647_v22 = vpop.f32.mrb[52].mxu0 }
 0xab2   : > { %v10137_v46 = vpop.eup %10136  ;;  %10156 = vrcp.f32 %v6836_v26  ;;  %v6839_v5 = vadd.f32 1.0, %v10135_v32  ;;  %v11649_v55 = vpop.f32.mrb[52].mxu1  ;;  %v8206_v26 = vmul.f32 -1.442695, %v11499_v59 }
 0xab3   : > { %v10139_v2 = vpop.eup %10138  ;;  %10158 = vrcp.f32 %v6837_v15  ;;  %v6838_v47 = vadd.f32 1.0, %v10137_v46  ;;  %v11653_v32 = vpop.f32.mrb[53].mxu0 }
 0xab4   : > { %v10141_v40 = vpop.eup %10140  ;;  %10160 = vrcp.f32 %v6839_v5  ;;  %v6840_v45 = vadd.f32 1.0, %v10139_v2  ;;  %12005 = vst [vmem:[#allocation47_spill] sm:$0xff] %v11653_v32  ;;  %v11655_v15 = vpop.f32.mrb[53].mxu1  ;;  %v8208_v2 = vmul.f32 -1.442695, %v11501_v16 }
 0xab5   : > { %v10143_v50 = vpop.eup %10142  ;;  %v8374_v18 = vpack.c.bf16 %v10141_v40, %v11611_v6  ;;  %10162 = vrcp.f32 %v6838_v47  ;;  %12006 = vst [vmem:[#allocation48_spill] sm:$0xff] %v11655_v15  ;;  %v11658_v46 = vpop.f32.mrb[54].mxu0  ;;  %v8209_v6 = vmul.f32 -1.442695, %v11509_v14  ;;  %v8211_v16 = vmul.f32 -1.442695, %v11511_v27 }
 0xab6   : > { %v10145_v48 = vpop.eup %10144  ;;  %10164 = vrcp.f32 %v6840_v45  ;;  %12007 = vst [vmem:[#allocation49_spill] sm:$0xff] %v11658_v46  ;;  %v11660_v9 = vpop.f32.mrb[54].mxu1  ;;  %v8212_v14 = vmul.f32 -1.442695, %v11517_v34  ;;  %v8215_v27 = vmul.f32 -1.442695, %v11522_v51 }
 0xab7   : > { %12008 = vst [vmem:[#allocation50_spill] sm:$0xff] %v11660_v9  ;;  %v10147_v5 = vpop.eup %10146  ;;  %7576 = vst [vmem:[%s10992_s24 + $0x98] sm:$0xff] %v8374_v18  ;;  %10166 = vpow2.f32 %v8205_v23  ;;  %v11664_v59 = vpop.f32.mrb[55].mxu0  ;;  %v8210_v9 = vmul.f32 -1.442695, %v11515_v41 }
 0xab8   : > { %v11666_v47 = vpop.f32.mrb[55].mxu1  ;;  %v10149_v40 = vpop.eup %10148  ;;  %v8375_v15 = vpack.c.bf16 %v10147_v5, %v10143_v50  ;;  %10168 = vpow2.f32 %v8207_v0  ;;  %v8213_v18 = vmul.f32 -1.442695, %v11520_v37  ;;  %v8214_v34 = vmul.f32 -1.442695, %v11525_v20 }
 0xab9   : > { %v10151_v45 = vpop.eup %10150  ;;  %v8376_v46 = vpack.c.bf16 %v10149_v40, %v10145_v48  ;;  %10170 = vpow2.f32 %v8206_v26  ;;  %v11675_v26 = vpop.f32.mrb[56].mxu0  ;;  %v8216_v5 = vmul.f32 -1.442695, %v11527_v29  ;;  %v8217_v20 = vmul.f32 -1.442695, %v11540_v24 }
 0xaba   : > { %v10153_v32 = vpop.eup %10152  ;;  %7577 = vst [vmem:[%s10992_s24 + $0xa0] sm:$0xff] %v8375_v15  ;;  %10172 = vpow2.f32 %v8208_v2  ;;  %v11677_v41 = vpop.f32.mrb[56].mxu1 }
 0xabb   : > { %v10155_v23 = vpop.eup %10154  ;;  %7578 = vst [vmem:[%s10992_s24 + $0xa8] sm:$0xff] %v8376_v46  ;;  %10174 = vpow2.f32 %v8209_v6  ;;  %v11680_v2 = vpop.f32.mrb[57].mxu0 }
 0xabc   : > { %v10157_v50 = vpop.eup %10156  ;;  %v8377_v0 = vpack.c.bf16 %v10155_v23, %v10151_v45  ;;  %10176 = vpow2.f32 %v8211_v16  ;;  %v11682_v46 = vpop.f32.mrb[57].mxu1 }
 0xabd   : > { %v10159_v15 = vpop.eup %10158  ;;  %v8378_v48 = vpack.c.bf16 %v10157_v50, %v10153_v32  ;;  %10178 = vpow2.f32 %v8210_v9  ;;  %v11686_v51 = vpop.f32.mrb[58].mxu0 }
 0xabe   : > { %v10161_v37 = vpop.eup %10160  ;;  %7579 = vst [vmem:[%s10992_s24 + $0xb0] sm:$0xff] %v8377_v0  ;;  %10180 = vpow2.f32 %v8212_v14  ;;  %v11688_v6 = vpop.f32.mrb[58].mxu1 }
 0xabf   : > { %v10163_v40 = vpop.eup %10162  ;;  %7580 = vst [vmem:[%s10992_s24 + $0xb8] sm:$0xff] %v8378_v48  ;;  %10182 = vpow2.f32 %v8213_v18  ;;  %v11692_v32 = vpop.f32.mrb[59].mxu0 }
 0xac0   : > { %12009 = vst [vmem:[#allocation51_spill] sm:$0xff] %v11692_v32  ;;  %v11694_v9 = vpop.f32.mrb[59].mxu1  ;;  %v10165_v16 = vpop.eup %10164  ;;  %v8379_v45 = vpack.c.bf16 %v10163_v40, %v10159_v15  ;;  %10184 = vpow2.f32 %v8215_v27 }
 0xac1   : > { %12010 = vst [vmem:[#allocation52_spill] sm:$0xff] %v11694_v9  ;;  %v10167_v14 = vpop.eup %10166  ;;  %v8380_v29 = vpack.c.bf16 %v10165_v16, %v10161_v37  ;;  %10186 = vpow2.f32 %v8214_v34  ;;  %v11698_v32 = vpop.f32.mrb[60].mxu0 }
 0xac2   : > { %v10169_v23 = vpop.eup %10168  ;;  %7581 = vst [vmem:[%s10992_s24 + $0xc0] sm:$0xff] %v8379_v45  ;;  %v6841_v50 = vadd.f32 1.0, %v10167_v14  ;;  %10188 = vpow2.f32 %v8216_v5  ;;  %v11700_v9 = vpop.f32.mrb[60].mxu1 }
 0xac3   : > { %v10171_v0 = vpop.eup %10170  ;;  %7582 = vst [vmem:[%s10992_s24 + $0xc8] sm:$0xff] %v8380_v29  ;;  %v6843_v48 = vadd.f32 1.0, %v10169_v23  ;;  %10190 = vpow2.f32 %v8217_v20  ;;  %v11702_v37 = vpop.f32.mrb[61].mxu0 }
 0xac4   : > { %v10173_v18 = vpop.eup %10172  ;;  %10192 = vrcp.f32 %v6841_v50  ;;  %v6842_v24 = vadd.f32 1.0, %v10171_v0  ;;  %v11704_v5 = vpop.f32.mrb[61].mxu1 }
 0xac5   : > { %v10175_v15 = vpop.eup %10174  ;;  %10194 = vrcp.f32 %v6843_v48  ;;  %v6844_v27 = vadd.f32 1.0, %v10173_v18  ;;  %12011 = vst [vmem:[#allocation53_spill] sm:$0xff] %v11704_v5  ;;  %v11706_v16 = vpop.f32.mrb[62].mxu0 }
 0xac6   : > { %v10177_v34 = vpop.eup %10176  ;;  %10196 = vrcp.f32 %v6842_v24  ;;  %v6845_v40 = vadd.f32 1.0, %v10175_v15  ;;  %12012 = vst [vmem:[#allocation54_spill] sm:$0xff] %v11706_v16  ;;  %v11708_v14 = vpop.f32.mrb[62].mxu1 }
 0xac7   : > { %v10179_v20 = vpop.eup %10178  ;;  %10198 = vrcp.f32 %v6844_v27  ;;  %v6847_v45 = vadd.f32 1.0, %v10177_v34  ;;  %12013 = vst [vmem:[#allocation55_spill] sm:$0xff] %v11708_v14  ;;  %v11710_v50 = vpop.f32.mrb[63].mxu0 }
 0xac8   : > { %v10181_v29 = vpop.eup %10180  ;;  %10200 = vrcp.f32 %v6845_v40  ;;  %v6846_v23 = vadd.f32 1.0, %v10179_v20  ;;  %12014 = vst [vmem:[#allocation56_spill] sm:$0xff] %v11710_v50  ;;  %v11712_v0 = vpop.f32.mrb[63].mxu1  ;;  %v8219_v20 = vmul.f32 -1.442695, %v11542_v49 }
 0xac9   : > { %12015 = vst [vmem:[#allocation57_spill] sm:$0xff] %v11712_v0  ;;  %v10183_v48 = vpop.eup %10182  ;;  %10202 = vrcp.f32 %v6847_v45  ;;  %v6848_v18 = vadd.f32 1.0, %v10181_v29  ;;  %v8218_v45 = vmul.f32 -1.442695, %v11545_v42  ;;  %v8223_v49 = vmul.f32 -1.442695, %v11551_v31 }
 0xaca   : > { %v10185_v24 = vpop.eup %10184  ;;  %10204 = vrcp.f32 %v6846_v23  ;;  %v6849_v15 = vadd.f32 1.0, %v10183_v48  ;;  %v8220_v23 = vmul.f32 -1.442695, %v11547_v8  ;;  %v8222_v42 = vmul.f32 -1.442695, %v11553_v13 }
 0xacb   : > { %v10187_v5 = vpop.eup %10186  ;;  %10206 = vrcp.f32 %v6848_v18  ;;  %v6851_v16 = vadd.f32 1.0, %v10185_v24  ;;  %v8224_v8 = vmul.f32 -1.442695, %v11555_v56  ;;  %v8227_v31 = vmul.f32 -1.442695, %v11559_v7 }
 0xacc   : > { %v10189_v27 = vpop.eup %10188  ;;  %10208 = vrcp.f32 %v6849_v15  ;;  %v6850_v34 = vadd.f32 1.0, %v10187_v5  ;;  %v8221_v5 = vmul.f32 -1.442695, %v11549_v52  ;;  %v8225_v52 = vmul.f32 -1.442695, %v11557_v35 }
 0xacd   : > { %v10191_v14 = vpop.eup %10190  ;;  %10210 = vrcp.f32 %v6851_v16  ;;  %v6852_v40 = vadd.f32 1.0, %v10189_v27  ;;  %v8226_v13 = vmul.f32 -1.442695, %v11561_v63  ;;  %v8228_v56 = vmul.f32 -1.442695, %v11563_v25 }
 0xace   : > { %v10193_v50 = vpop.eup %10192  ;;  %10212 = vrcp.f32 %v6850_v34  ;;  %v6853_v0 = vadd.f32 1.0, %v10191_v14  ;;  %v8229_v35 = vmul.f32 -1.442695, %v11565_v4  ;;  %v8231_v7 = vmul.f32 -1.442695, %v11567_v43 }
 0xacf   : > { %v10195_v29 = vpop.eup %10194  ;;  %10214 = vrcp.f32 %v6852_v40 }
 0xad0   : > { %v10197_v48 = vpop.eup %10196  ;;  %10216 = vrcp.f32 %v6853_v0 }
 0xad1   : > { %v10199_v18 = vpop.eup %10198  ;;  %v8381_v16 = vpack.c.bf16 %v10197_v48, %v10193_v50  ;;  %10218 = vpow2.f32 %v8219_v20 }
 0xad2   : > { %v10201_v24 = vpop.eup %10200  ;;  %v8382_v15 = vpack.c.bf16 %v10199_v18, %v10195_v29  ;;  %10220 = vpow2.f32 %v8218_v45 }
 0xad3   : > { %v10203_v14 = vpop.eup %10202  ;;  %7583 = vst [vmem:[%s10992_s24 + $0xd0] sm:$0xff] %v8381_v16  ;;  %10222 = vpow2.f32 %v8220_v23 }
 0xad4   : > { %v10205_v27 = vpop.eup %10204  ;;  %7584 = vst [vmem:[%s10992_s24 + $0xd8] sm:$0xff] %v8382_v15  ;;  %10224 = vpow2.f32 %v8221_v5 }
 0xad5   : > { %v10207_v50 = vpop.eup %10206  ;;  %v8383_v0 = vpack.c.bf16 %v10205_v27, %v10201_v24  ;;  %10226 = vpow2.f32 %v8223_v49 }
 0xad6   : > { %v10209_v34 = vpop.eup %10208  ;;  %v8384_v40 = vpack.c.bf16 %v10207_v50, %v10203_v14  ;;  %10228 = vpow2.f32 %v8222_v42 }
 0xad7   : > { %v10211_v20 = vpop.eup %10210  ;;  %7585 = vst [vmem:[%s10992_s24 + $0xe0] sm:$0xff] %v8383_v0  ;;  %10230 = vpow2.f32 %v8224_v8 }
 0xad8   : > { %v10213_v45 = vpop.eup %10212  ;;  %7586 = vst [vmem:[%s10992_s24 + $0xe8] sm:$0xff] %v8384_v40  ;;  %10232 = vpow2.f32 %v8225_v52 }
 0xad9   : > { %v10215_v29 = vpop.eup %10214  ;;  %v8385_v23 = vpack.c.bf16 %v10213_v45, %v10209_v34  ;;  %10234 = vpow2.f32 %v8227_v31 }
 0xada   : > { %v11731_v48 = vpop.eup %10216  ;;  %v8386_v63 = vpack.c.bf16 %v10215_v29, %v10211_v20  ;;  %10236 = vpow2.f32 %v8226_v13 }
 0xadb   : > { %v10219_v5 = vpop.eup %10218  ;;  %7587 = vst [vmem:[%s10992_s24 + $0xf0] sm:$0xff] %v8385_v23  ;;  %10238 = vpow2.f32 %v8228_v56 }
 0xadc   : > { %v10221_v25 = vpop.eup %10220  ;;  %7588 = vst [vmem:[%s10992_s24 + $0xf8] sm:$0xff] %v8386_v63  ;;  %v6855_v18 = vadd.f32 1.0, %v10219_v5  ;;  %10240 = vpow2.f32 %v8229_v35 }
 0xadd   : > { %v10223_v4 = vpop.eup %10222  ;;  %v6854_v43 = vadd.f32 1.0, %v10221_v25  ;;  %10242 = vpow2.f32 %v8231_v7 }
 0xade   : > { %v10225_v16 = vpop.eup %10224  ;;  %10244 = vrcp.f32 %v6855_v18  ;;  %v6856_v49 = vadd.f32 1.0, %v10223_v4 }
 0xadf   : > { %10623 = shalt.err (!%p10620_p1)
}
 0xae0   : > { %s10624_s14 = scalar_lea.hbm %s11932_s5, 8192  ;;  %p12017_p6 = pmov %p12016_p3 }
 0xae1   : > { %p10625_p5 = scmp.ne.s32.totalorder %s11932_s5, %s10624_s14  ;;  %p10630_p13 = scmp.lt.u32.totalorder %s10624_s14, %s11932_s5 }
 0xae3   : > { %p10626_p9 = pnand %p10625_p5, %p12017_p6 }
 0xae5   : > { %p10627_p10 = pneg %p10626_p9 }
 0xae7   : > { %p10632_p11 = pnand %p10630_p13, %p10627_p10 }
 0xae9   : > { %10635 = shalt.err (!%p10632_p11)
}
 0xaea   : > { %s10758_s17 = smov 128   ;;  %s10759_s13 = smov 8   ;;  %v10227_v24 = vpop.eup %10226  ;;  %10246 = vrcp.f32 %v6854_v43  ;;  %v6857_v15 = vadd.f32 1.0, %v10225_v16 }
 0xaeb   : > { %p12018_p0 = pmov %p12016_p3  ;;  %v10229_v42 = vpop.eup %10228  ;;  %10248 = vrcp.f32 %v6856_v49  ;;  %v6859_v14 = vadd.f32 1.0, %v10227_v24  ;;  %s10636_s19 = scalar_lea.vmem %s7646_s30, 16384 }
 0xaec   : > { %v10231_v8 = vpop.eup %10230  ;;  %10250 = vrcp.f32 %v6857_v15  ;;  %v6858_v27 = vadd.f32 1.0, %v10229_v42  ;;  %p10637_p3 = scmp.ne.s32.totalorder %s7646_s30, %s10636_s19  ;;  %p10643_p12 = scmp.lt.s32.totalorder %s7646_s30, %s7646_s30 }
 0xaed   : > { %8858 = dma.vmem_to_hbm [thread:$0]  (%p12018_p0), %s11735_s29, 8192, %s11932_s5, [#allocation5], %s10758_s17, %s10758_s17, %s10759_s13  }
 0xaee   : > { %p12019_p4 = pmov %p12018_p0  ;;  %p10644_p2 = scmp.lt.s32.totalorder %s10636_s19, %s10636_s19 }
 0xaf0   : > { %p10638_p7 = pnand %p10637_p3, %p12019_p4  ;;  %p10645_p1 = por %p10644_p2, %p10643_p12 }
 0xaf2   : > { %p10639_p8 = pneg %p10638_p7 }
 0xaf4   : > { %p10646_p5 = pnand %p10645_p1, %p10639_p8 }
 0xaf6   : > { %10649 = shalt.err (!%p10646_p5)
}
 0xaf7   : > { %s10650_s10 = scalar_lea.hbm %s11933_s6, 16384  ;;  %p12020_p9 = pmov %p12018_p0 }
 0xaf8   : > { %p10651_p6 = scmp.ne.s32.totalorder %s11933_s6, %s10650_s10  ;;  %p10656_p11 = scmp.lt.u32.totalorder %s10650_s10, %s11933_s6 }
 0xafa   : > { %p10652_p10 = pnand %p10651_p6, %p12020_p9 }
 0xafc   : > { %p10653_p13 = pneg %p10652_p10 }
 0xafe   : > { %p10658_p0 = pnand %p10656_p11, %p10653_p13 }
 0xb00   : > { %10661 = shalt.err (!%p10658_p0)
}
 0xb01   : > { %s10760_s15 = smov 256   ;;  %s10761_s26 = smov 16   ;;  %v10233_v52 = vpop.eup %10232  ;;  %10252 = vrcp.f32 %v6859_v14  ;;  %v6860_v50 = vadd.f32 1.0, %v10231_v8  ;;  %v8230_v23 = vmul.f32 -1.442695, %v11569_v19 }
 0xb02   : > { %p12021_p3 = pmov %p12019_p4  ;;  %v10235_v0 = vpop.eup %10234  ;;  %10254 = vrcp.f32 %v6858_v27  ;;  %v6861_v31 = vadd.f32 1.0, %v10233_v52  ;;  %v8232_v5 = vmul.f32 -1.442695, %v11571_v39  ;;  %v8233_v18 = vmul.f32 -1.442695, %v11579_v12  ;;  %s8420_s17 = sshll.u32 %s10822_s28, 13 }
 0xb03   : > { %v10237_v34 = vpop.eup %10236  ;;  %10256 = vrcp.f32 %v6860_v50  ;;  %v6863_v40 = vadd.f32 1.0, %v10235_v0  ;;  %v8235_v16 = vmul.f32 -1.442695, %v11581_v38  ;;  %v8234_v19 = vmul.f32 -1.442695, %v11585_v62  ;;  %s7662_s13 = sshll.u32 %s10992_s24, 4  ;;  %s11868_s19 = scalar_lea.hbm %s11934_s7, %s8420_s17  ;;  %s11870_s13 = int_to_ptr.vmem [resolvable:$true] %s7662_s13 }
 0xb04   : > { %8860 = dma.vmem_to_hbm [thread:$0]  (%p12021_p3), %s7646_s30, 16384, %s11933_s6, [#allocation14], %s10760_s15, %s10760_s15, %s10761_s26   ;;  %v10239_v13 = vpop.eup %10238  ;;  %10258 = vrcp.f32 %v6861_v31  ;;  %v6862_v20 = vadd.f32 1.0, %v10237_v34  ;;  %v8236_v39 = vmul.f32 -1.442695, %v11587_v53 }
 0xb05   : > { %v10241_v56 = vpop.eup %10240  ;;  %10260 = vrcp.f32 %v6863_v40  ;;  %v6864_v45 = vadd.f32 1.0, %v10239_v13  ;;  %v8237_v12 = vmul.f32 -1.442695, %v11591_v57  ;;  %v8239_v38 = vmul.f32 -1.442695, %v11593_v11  ;;  %s7621_s30 = sand.u32 1, %s10822_s28  }
 0xb06   : > { %v10243_v35 = vpop.eup %10242  ;;  %10262 = vrcp.f32 %v6862_v20  ;;  %v6865_v29 = vadd.f32 1.0, %v10241_v56  ;;  %v8238_v62 = vmul.f32 -1.442695, %v11596_v30  ;;  %v8240_v53 = vmul.f32 -1.442695, %v11598_v61  ;;  %s11874_s23 = scalar_lea.sflag [#allocation5], %s7621_s30 }
 0xb07   : > { %v10245_v7 = vpop.eup %10244  ;;  %10264 = vrcp.f32 %v6864_v45  ;;  %v6867_v63 = vadd.f32 1.0, %v10243_v35  ;;  %v8241_v57 = vmul.f32 -1.442695, %v11607_v36  ;;  %v8243_v11 = vmul.f32 -1.442695, %v11609_v3  ;;  %s10662_s29 = scalar_lea.vmem %s11870_s13, 8192 }
 0xb08   : > { %v10247_v25 = vpop.eup %10246  ;;  %10266 = vrcp.f32 %v6865_v29  ;;  %v8242_v30 = vmul.f32 -1.442695, %v11615_v60  ;;  %p10663_p4 = scmp.ne.s32.totalorder %s11870_s13, %s10662_s29  ;;  %p12037_p7 = scmp.ne.s32.totalorder %s11950_s11, 0 }
 0xb09   : > { %v10249_v4 = vpop.eup %10248  ;;  %v8387_v43 = vpack.c.bf16 %v10247_v25, %v11731_v48  ;;  %10268 = vrcp.f32 %v6867_v63  ;;  %s10762_s10 = smov [#allocation15]  }
 0xb0a   : > { %v10251_v49 = vpop.eup %10250  ;;  %v8388_v24 = vpack.c.bf16 %v10249_v4, %v10245_v7  ;;  %10270 = vpow2.f32 %v8230_v23  ;;  %p10664_p8 = pnand %p10663_p4, %p12037_p7  ;;  %s10666_s20 = sshll.u32 %s10762_s10, 4  ;;  %s10667_s20 = int_to_ptr.vmem [resolvable:$false] %s10666_s20 }
 0xb0b   : > { %v10253_v15 = vpop.eup %10252  ;;  %7589 = vst [vmem:[%s10992_s24 + $0x100] sm:$0xff] %v8387_v43  ;;  %10272 = vpow2.f32 %v8232_v5  ;;  %s10668_s22 = scalar_lea.vmem %s10667_s20, 16384  ;;  %p10669_p2 = scmp.lt.s32.totalorder %s11870_s13, %s10667_s20 }
 0xb0c   : > { %v10255_v42 = vpop.eup %10254  ;;  %7590 = vst [vmem:[%s10992_s24 + $0x108] sm:$0xff] %v8388_v24  ;;  %10274 = vpow2.f32 %v8233_v18  ;;  %p10665_p12 = pneg %p10664_p8  ;;  %p10670_p1 = scmp.lt.s32.totalorder %s10668_s22, %s10662_s29 }
 0xb0d   : > { %v10257_v48 = vpop.eup %10256  ;;  %v8389_v14 = vpack.c.bf16 %v10255_v42, %v10251_v49  ;;  %10276 = vpow2.f32 %v8235_v16 }
 0xb0e   : > { %v10259_v8 = vpop.eup %10258  ;;  %v8390_v27 = vpack.c.bf16 %v10257_v48, %v10253_v15  ;;  %10278 = vpow2.f32 %v8234_v19  ;;  %v8244_v48 = vmul.f32 -1.442695, %v11617_v17  ;;  %v8248_v17 = vmul.f32 -1.442695, %v11626_v28  ;;  %v12022_v28 = vld [vmem:[#allocation43_spill] sm:$0xff]  ;;  %p10671_p5 = por %p10670_p1, %p10669_p2 }
 0xb0f   : > { %v10261_v52 = vpop.eup %10260  ;;  %7591 = vst [vmem:[%s10992_s24 + $0x110] sm:$0xff] %v8389_v14  ;;  %10280 = vpow2.f32 %v8236_v39 }
 0xb10   : > { %v10263_v50 = vpop.eup %10262  ;;  %7592 = vst [vmem:[%s10992_s24 + $0x118] sm:$0xff] %v8390_v27  ;;  %10282 = vpow2.f32 %v8237_v12  ;;  %p10672_p6 = pnand %p10671_p5, %p10665_p12 }
 0xb11   : > { %v10265_v0 = vpop.eup %10264  ;;  %v8391_v31 = vpack.c.bf16 %v10263_v50, %v10259_v8  ;;  %10284 = vpow2.f32 %v8239_v38  ;;  %v8245_v8 = vmul.f32 -1.442695, %v11620_v10  ;;  %v8249_v10 = vmul.f32 -1.442695, %v11629_v54  ;;  %v12023_v54 = vld [vmem:[#allocation44_spill] sm:$0xff] }
 0xb12   : > { %v10267_v34 = vpop.eup %10266  ;;  %v8392_v40 = vpack.c.bf16 %v10265_v0, %v10261_v52  ;;  %10286 = vpow2.f32 %v8238_v62  ;;  %v8247_v52 = vmul.f32 -1.442695, %v11622_v21  ;;  %v8251_v21 = vmul.f32 -1.442695, %v11631_v58  ;;  %v12024_v58 = vld [vmem:[#allocation45_spill] sm:$0xff] }
 0xb13   : > { %v10269_v13 = vpop.eup %10268  ;;  %7593 = vst [vmem:[%s10992_s24 + $0x120] sm:$0xff] %v8391_v31  ;;  %10288 = vpow2.f32 %v8240_v53 }
 0xb14   : > { %v10271_v61 = vpop.eup %10270  ;;  %7594 = vst [vmem:[%s10992_s24 + $0x128] sm:$0xff] %v8392_v40  ;;  %10290 = vpow2.f32 %v8241_v57  ;;  %v8246_v57 = vmul.f32 -1.442695, %v11624_v44  ;;  %v8250_v44 = vmul.f32 -1.442695, %v11633_v1 }
 0xb15   : > { %v10273_v20 = vpop.eup %10272  ;;  %v6866_v56 = vadd.f32 1.0, %v10271_v61  ;;  %10292 = vpow2.f32 %v8243_v11  ;;  %v8252_v61 = vmul.f32 -1.442695, %v12022_v28  ;;  %v8254_v1 = vmul.f32 -1.442695, %v11641_v33  ;;  %v12027_v28 = vld [vmem:[#allocation48_spill] sm:$0xff] }
 0xb16   : > { %v10275_v36 = vpop.eup %10274  ;;  %v6868_v45 = vadd.f32 1.0, %v10273_v20  ;;  %10294 = vpow2.f32 %v8242_v30 }
 0xb17   : > { %v10277_v35 = vpop.eup %10276  ;;  %10296 = vrcp.f32 %v6866_v56  ;;  %v6869_v3 = vadd.f32 1.0, %v10275_v36  ;;  %v8253_v56 = vmul.f32 -1.442695, %v12023_v54 }
 0xb18   : > { %v10279_v29 = vpop.eup %10278  ;;  %10298 = vrcp.f32 %v6868_v45  ;;  %v6871_v23 = vadd.f32 1.0, %v10277_v35  ;;  %v8255_v35 = vmul.f32 -1.442695, %v12024_v58 }
 0xb19   : > { %v10281_v7 = vpop.eup %10280  ;;  %10300 = vrcp.f32 %v6869_v3  ;;  %v6870_v60 = vadd.f32 1.0, %v10279_v29 }
 0xb1a   : > { %v10283_v63 = vpop.eup %10282  ;;  %10302 = vrcp.f32 %v6871_v23  ;;  %v6872_v5 = vadd.f32 1.0, %v10281_v7  ;;  %v12025_v7 = vld [vmem:[#allocation46_spill] sm:$0xff] }
 0xb1b   : > { %v10285_v25 = vpop.eup %10284  ;;  %10304 = vrcp.f32 %v6870_v60  ;;  %v6873_v18 = vadd.f32 1.0, %v10283_v63  ;;  %v8256_v60 = vmul.f32 -1.442695, %v12025_v7  ;;  %v8265_v7 = vmul.f32 -1.442695, %v11675_v26 }
 0xb1c   : > { %v10287_v4 = vpop.eup %10286  ;;  %10306 = vrcp.f32 %v6872_v5  ;;  %v6875_v43 = vadd.f32 1.0, %v10285_v25  ;;  %v8269_v26 = vmul.f32 -1.442695, %v11686_v51 }
 0xb1d   : > { %v10289_v16 = vpop.eup %10288  ;;  %10308 = vrcp.f32 %v6873_v18  ;;  %v6874_v49 = vadd.f32 1.0, %v10287_v4 }
 0xb1e   : > { %v10291_v24 = vpop.eup %10290  ;;  %10310 = vrcp.f32 %v6875_v43  ;;  %v6876_v19 = vadd.f32 1.0, %v10289_v16 }
 0xb1f   : > { %v10293_v15 = vpop.eup %10292  ;;  %10312 = vrcp.f32 %v6874_v49  ;;  %v6877_v39 = vadd.f32 1.0, %v10291_v24 }
 0xb20   : > { %v10295_v42 = vpop.eup %10294  ;;  %10314 = vrcp.f32 %v6876_v19  ;;  %v6879_v12 = vadd.f32 1.0, %v10293_v15 }
 0xb21   : > { %v10297_v14 = vpop.eup %10296  ;;  %10316 = vrcp.f32 %v6877_v39  ;;  %v6878_v38 = vadd.f32 1.0, %v10295_v42 }
 0xb22   : > { %v10299_v27 = vpop.eup %10298  ;;  %v8393_v62 = vpack.c.bf16 %v10297_v14, %v10267_v34  ;;  %10318 = vrcp.f32 %v6879_v12 }
 0xb23   : > { %v10301_v53 = vpop.eup %10300  ;;  %v8394_v50 = vpack.c.bf16 %v10299_v27, %v10269_v13  ;;  %10320 = vrcp.f32 %v6878_v38 }
 0xb24   : > { %v10303_v0 = vpop.eup %10302  ;;  %7595 = vst [vmem:[%s10992_s24 + $0x130] sm:$0xff] %v8393_v62  ;;  %10322 = vpow2.f32 %v8244_v48 }
 0xb25   : > { %v10305_v31 = vpop.eup %10304  ;;  %7596 = vst [vmem:[%s10992_s24 + $0x138] sm:$0xff] %v8394_v50  ;;  %10324 = vpow2.f32 %v8245_v8 }
 0xb26   : > { %v10307_v11 = vpop.eup %10306  ;;  %v8395_v34 = vpack.c.bf16 %v10305_v31, %v10301_v53  ;;  %10326 = vpow2.f32 %v8247_v52  ;;  %v8257_v31 = vmul.f32 -1.442695, %v11647_v22  ;;  %v12028_v22 = vld [vmem:[#allocation49_spill] sm:$0xff] }
 0xb27   : > { %v10309_v40 = vpop.eup %10308  ;;  %v8396_v30 = vpack.c.bf16 %v10307_v11, %v10303_v0  ;;  %10328 = vpow2.f32 %v8246_v57  ;;  %v8261_v54 = vmul.f32 -1.442695, %v12028_v22 }
 0xb28   : > { %v10311_v13 = vpop.eup %10310  ;;  %7597 = vst [vmem:[%s10992_s24 + $0x140] sm:$0xff] %v8395_v34  ;;  %10330 = vpow2.f32 %v8248_v17  ;;  %v8259_v34 = vmul.f32 -1.442695, %v11649_v55  ;;  %v12029_v55 = vld [vmem:[#allocation50_spill] sm:$0xff] }
 0xb29   : > { %v10313_v20 = vpop.eup %10312  ;;  %7598 = vst [vmem:[%s10992_s24 + $0x148] sm:$0xff] %v8396_v30  ;;  %10332 = vpow2.f32 %v8249_v10  ;;  %v12026_v30 = vld [vmem:[#allocation47_spill] sm:$0xff] }
 0xb2a   : > { %v10315_v36 = vpop.eup %10314  ;;  %v8397_v45 = vpack.c.bf16 %v10313_v20, %v10309_v40  ;;  %10334 = vpow2.f32 %v8251_v21 }
 0xb2b   : > { %v10317_v3 = vpop.eup %10316  ;;  %v8398_v29 = vpack.c.bf16 %v10315_v36, %v10311_v13  ;;  %10336 = vpow2.f32 %v8250_v44  ;;  %v8258_v44 = vmul.f32 -1.442695, %v12026_v30 }
 0xb2c   : > { %v10319_v23 = vpop.eup %10318  ;;  %7599 = vst [vmem:[%s10992_s24 + $0x150] sm:$0xff] %v8397_v45  ;;  %10338 = vpow2.f32 %v8252_v61  ;;  %v8260_v61 = vmul.f32 -1.442695, %v12027_v28  ;;  %v8263_v45 = vmul.f32 -1.442695, %v12029_v55 }
 0xb2d   : > { %v10321_v63 = vpop.eup %10320  ;;  %7600 = vst [vmem:[%s10992_s24 + $0x158] sm:$0xff] %v8398_v29  ;;  %10340 = vpow2.f32 %v8253_v56  ;;  %v8274_v55 = vmul.f32 -1.442695, %v11702_v37  ;;  %v12035_v37 = vld [vmem:[#allocation56_spill] sm:$0xff] }
 0xb2e   : > { %v10323_v5 = vpop.eup %10322  ;;  %v8399_v25 = vpack.c.bf16 %v10321_v63, %v10317_v3  ;;  %10342 = vpow2.f32 %v8255_v35  ;;  %v8262_v3 = vmul.f32 -1.442695, %v11664_v59  ;;  %v8266_v59 = vmul.f32 -1.442695, %v11680_v2 }
 0xb2f   : > { %v10325_v18 = vpop.eup %10324  ;;  %v6880_v4 = vadd.f32 1.0, %v10323_v5  ;;  %10344 = vpow2.f32 %v8254_v1  ;;  %v8264_v1 = vmul.f32 -1.442695, %v11666_v47  ;;  %v8267_v5 = vmul.f32 -1.442695, %v11677_v41 }
 0xb30   : > { %v10327_v43 = vpop.eup %10326  ;;  %7601 = vst [vmem:[%s10992_s24 + $0x160] sm:$0xff] %v8399_v25  ;;  %v6881_v16 = vadd.f32 1.0, %v10325_v18  ;;  %10346 = vpow2.f32 %v8256_v60  ;;  %v8268_v47 = vmul.f32 -1.442695, %v11682_v46 }
 0xb31   : > { %v10329_v49 = vpop.eup %10328  ;;  %10348 = vrcp.f32 %v6880_v4  ;;  %v6883_v33 = vadd.f32 1.0, %v10327_v43 }
 0xb32   : > { %v10331_v24 = vpop.eup %10330  ;;  %10350 = vrcp.f32 %v6881_v16  ;;  %v6882_v19 = vadd.f32 1.0, %v10329_v49 }
 0xb33   : > { %v10333_v15 = vpop.eup %10332  ;;  %10352 = vrcp.f32 %v6883_v33  ;;  %v6884_v39 = vadd.f32 1.0, %v10331_v24 }
 0xb34   : > { %v10335_v42 = vpop.eup %10334  ;;  %10354 = vrcp.f32 %v6882_v19  ;;  %v6885_v12 = vadd.f32 1.0, %v10333_v15 }
 0xb35   : > { %v10337_v48 = vpop.eup %10336  ;;  %10356 = vrcp.f32 %v6884_v39  ;;  %v6887_v14 = vadd.f32 1.0, %v10335_v42 }
 0xb36   : > { %v10339_v38 = vpop.eup %10338  ;;  %10358 = vrcp.f32 %v6885_v12  ;;  %v6886_v8 = vadd.f32 1.0, %v10337_v48 }
 0xb37   : > { %v10341_v27 = vpop.eup %10340  ;;  %10360 = vrcp.f32 %v6887_v14  ;;  %v6888_v62 = vadd.f32 1.0, %v10339_v38 }
 0xb38   : > { %v10343_v52 = vpop.eup %10342  ;;  %10362 = vrcp.f32 %v6886_v8  ;;  %v6889_v53 = vadd.f32 1.0, %v10341_v27 }
 0xb39   : > { %v10345_v50 = vpop.eup %10344  ;;  %10364 = vrcp.f32 %v6888_v62  ;;  %v6891_v57 = vadd.f32 1.0, %v10343_v52 }
 0xb3a   : > { %v10347_v0 = vpop.eup %10346  ;;  %10366 = vrcp.f32 %v6889_v53  ;;  %v6890_v17 = vadd.f32 1.0, %v10345_v50 }
 0xb3b   : > { %v10349_v10 = vpop.eup %10348  ;;  %10368 = vrcp.f32 %v6891_v57  ;;  %v6892_v11 = vadd.f32 1.0, %v10347_v0 }
 0xb3c   : > { %v10351_v21 = vpop.eup %10350  ;;  %v8400_v40 = vpack.c.bf16 %v10349_v10, %v10319_v23  ;;  %10370 = vrcp.f32 %v6890_v17 }
 0xb3d   : > { %v10353_v13 = vpop.eup %10352  ;;  %10372 = vrcp.f32 %v6892_v11 }
 0xb3e   : > { %v10355_v20 = vpop.eup %10354  ;;  %7602 = vst [vmem:[%s10992_s24 + $0x168] sm:$0xff] %v8400_v40  ;;  %10374 = vpow2.f32 %v8257_v31  ;;  %v12030_v40 = vld [vmem:[#allocation51_spill] sm:$0xff] }
 0xb3f   : > { %v10357_v56 = vpop.eup %10356  ;;  %v8401_v36 = vpack.c.bf16 %v10355_v20, %v10351_v21  ;;  %10376 = vpow2.f32 %v8259_v34  ;;  %v8271_v34 = vmul.f32 -1.442695, %v11688_v6  ;;  %v8270_v30 = vmul.f32 -1.442695, %v12030_v40 }
 0xb40   : > { %v10359_v58 = vpop.eup %10358  ;;  %v8402_v35 = vpack.c.bf16 %v10357_v56, %v10353_v13  ;;  %10378 = vpow2.f32 %v8258_v44  ;;  %v12031_v13 = vld [vmem:[#allocation52_spill] sm:$0xff]  ;;  %v8273_v20 = vmul.f32 -1.442695, %v11698_v32  ;;  %v8275_v56 = vmul.f32 -1.442695, %v11700_v9  ;;  %v12033_v32 = vld [vmem:[#allocation54_spill] sm:$0xff] }
 0xb41   : > { %v10361_v29 = vpop.eup %10360  ;;  %7603 = vst [vmem:[%s10992_s24 + $0x170] sm:$0xff] %v8401_v36  ;;  %10380 = vpow2.f32 %v8260_v61  ;;  %v8272_v28 = vmul.f32 -1.442695, %v12031_v13  ;;  %v12034_v9 = vld [vmem:[#allocation55_spill] sm:$0xff] }
 0xb42   : > { %v10363_v23 = vpop.eup %10362  ;;  %7604 = vst [vmem:[%s10992_s24 + $0x178] sm:$0xff] %v8402_v35  ;;  %10382 = vpow2.f32 %v8261_v54 }
 0xb43   : > { %v10365_v60 = vpop.eup %10364  ;;  %v8403_v63 = vpack.c.bf16 %v10363_v23, %v10359_v58  ;;  %10384 = vpow2.f32 %v8263_v45  ;;  %v12032_v58 = vld [vmem:[#allocation53_spill] sm:$0xff] }
 0xb44   : > { %v10367_v25 = vpop.eup %10366  ;;  %v8404_v18 = vpack.c.bf16 %v10365_v60, %v10361_v29  ;;  %10386 = vpow2.f32 %v8262_v3  ;;  %v8276_v35 = vmul.f32 -1.442695, %v12032_v58  ;;  %v8277_v29 = vmul.f32 -1.442695, %v12033_v32 }
 0xb45   : > { %v10369_v4 = vpop.eup %10368  ;;  %7605 = vst [vmem:[%s10992_s24 + $0x180] sm:$0xff] %v8403_v63  ;;  %10388 = vpow2.f32 %v8264_v1 }
 0xb46   : > { %v10371_v43 = vpop.eup %10370  ;;  %7606 = vst [vmem:[%s10992_s24 + $0x188] sm:$0xff] %v8404_v18  ;;  %10390 = vpow2.f32 %v8265_v7  ;;  %v8279_v7 = vmul.f32 -1.442695, %v12034_v9  ;;  %v12036_v18 = vld [vmem:[#allocation57_spill] sm:$0xff] }
 0xb47   : > { %v10373_v16 = vpop.eup %10372  ;;  %v8405_v49 = vpack.c.bf16 %v10371_v43, %v10367_v25  ;;  %10392 = vpow2.f32 %v8267_v5  ;;  %v8278_v5 = vmul.f32 -1.442695, %v12035_v37 }
 0xb48   : > { %v10375_v41 = vpop.eup %10374  ;;  %v8406_v33 = vpack.c.bf16 %v10373_v16, %v10369_v4  ;;  %10394 = vpow2.f32 %v8266_v59  ;;  %v8280_v59 = vmul.f32 -1.442695, %v12036_v18 }
 0xb49   : > { %v10377_v24 = vpop.eup %10376  ;;  %7607 = vst [vmem:[%s10992_s24 + $0x190] sm:$0xff] %v8405_v49  ;;  %v6893_v2 = vadd.f32 1.0, %v10375_v41  ;;  %10396 = vpow2.f32 %v8268_v47 }
 0xb4a   : > { %v10379_v19 = vpop.eup %10378  ;;  %7608 = vst [vmem:[%s10992_s24 + $0x198] sm:$0xff] %v8406_v33  ;;  %v6895_v15 = vadd.f32 1.0, %v10377_v24  ;;  %10398 = vpow2.f32 %v8269_v26 }
 0xb4b   : > { %v10381_v46 = vpop.eup %10380  ;;  %10400 = vrcp.f32 %v6893_v2  ;;  %v6894_v39 = vadd.f32 1.0, %v10379_v19 }
 0xb4c   : > { %v10383_v42 = vpop.eup %10382  ;;  %10402 = vrcp.f32 %v6895_v15  ;;  %v6896_v51 = vadd.f32 1.0, %v10381_v46 }
 0xb4d   : > { %v10385_v12 = vpop.eup %10384  ;;  %10404 = vrcp.f32 %v6894_v39  ;;  %v6897_v48 = vadd.f32 1.0, %v10383_v42 }
 0xb4e   : > { %v10387_v14 = vpop.eup %10386  ;;  %10406 = vrcp.f32 %v6896_v51  ;;  %v6899_v38 = vadd.f32 1.0, %v10385_v12 }
 0xb4f   : > { %v10389_v8 = vpop.eup %10388  ;;  %10408 = vrcp.f32 %v6897_v48  ;;  %v6898_v27 = vadd.f32 1.0, %v10387_v14 }
 0xb50   : > { %v10391_v62 = vpop.eup %10390  ;;  %10410 = vrcp.f32 %v6899_v38  ;;  %v6900_v52 = vadd.f32 1.0, %v10389_v8 }
 0xb51   : > { %v10393_v53 = vpop.eup %10392  ;;  %10412 = vrcp.f32 %v6898_v27  ;;  %v6901_v50 = vadd.f32 1.0, %v10391_v62 }
 0xb52   : > { %v10395_v57 = vpop.eup %10394  ;;  %10414 = vrcp.f32 %v6900_v52  ;;  %v6903_v0 = vadd.f32 1.0, %v10393_v53 }
 0xb53   : > { %v10397_v17 = vpop.eup %10396  ;;  %10416 = vrcp.f32 %v6901_v50  ;;  %v6902_v31 = vadd.f32 1.0, %v10395_v57 }
 0xb54   : > { %v10399_v10 = vpop.eup %10398  ;;  %10418 = vrcp.f32 %v6903_v0  ;;  %v6904_v11 = vadd.f32 1.0, %v10397_v17 }
 0xb55   : > { %v10401_v21 = vpop.eup %10400  ;;  %10420 = vrcp.f32 %v6902_v31  ;;  %v6905_v26 = vadd.f32 1.0, %v10399_v10 }
 0xb56   : > { %v10403_v44 = vpop.eup %10402  ;;  %10422 = vrcp.f32 %v6904_v11 }
 0xb57   : > { %v10405_v61 = vpop.eup %10404  ;;  %10424 = vpow2.f32 %v8271_v34 }
 0xb58   : > { %v10407_v22 = vpop.eup %10406  ;;  %v8407_v54 = vpack.c.bf16 %v10405_v61, %v10401_v21  ;;  %10426 = vpow2.f32 %v8270_v30 }
 0xb59   : > { %v10409_v36 = vpop.eup %10408  ;;  %v8408_v6 = vpack.c.bf16 %v10407_v22, %v10403_v44  ;;  %10428 = vpow2.f32 %v8272_v28 }
 0xb5a   : > { %v10411_v45 = vpop.eup %10410  ;;  %7609 = vst [vmem:[%s10992_s24 + $0x1a0] sm:$0xff] %v8407_v54  ;;  %10430 = vpow2.f32 %v8273_v20 }
 0xb5b   : > { %v10413_v3 = vpop.eup %10412  ;;  %7610 = vst [vmem:[%s10992_s24 + $0x1a8] sm:$0xff] %v8408_v6  ;;  %10432 = vpow2.f32 %v8275_v56 }
 0xb5c   : > { %v10415_v1 = vpop.eup %10414  ;;  %v8409_v23 = vpack.c.bf16 %v10413_v3, %v10409_v36  ;;  %10434 = vpow2.f32 %v8274_v55 }
 0xb5d   : > { %v10417_v60 = vpop.eup %10416  ;;  %v8410_v63 = vpack.c.bf16 %v10415_v1, %v10411_v45  ;;  %10436 = vpow2.f32 %v8276_v35 }
 0xb5e   : > { %v10419_v25 = vpop.eup %10418  ;;  %7611 = vst [vmem:[%s10992_s24 + $0x1b0] sm:$0xff] %v8409_v23  ;;  %10438 = vpow2.f32 %v8277_v29 }
 0xb5f   : > { %v10421_v4 = vpop.eup %10420  ;;  %7612 = vst [vmem:[%s10992_s24 + $0x1b8] sm:$0xff] %v8410_v63  ;;  %10440 = vpow2.f32 %v8279_v7 }
 0xb60   : > { %v10423_v47 = vpop.eup %10422  ;;  %v8411_v43 = vpack.c.bf16 %v10421_v4, %v10417_v60  ;;  %10442 = vpow2.f32 %v8278_v5 }
 0xb61   : > { %v8412_v16 = vpack.c.bf16 %v10423_v47, %v10419_v25  ;;  %v10425_v49 = vpop.eup %10424  ;;  %10444 = vpow2.f32 %v8280_v59 }
 0xb62   : > { %7613 = vst [vmem:[%s10992_s24 + $0x1c0] sm:$0xff] %v8411_v43  ;;  %v10427_v41 = vpop.eup %10426  ;;  %v6907_v33 = vadd.f32 1.0, %v10425_v49  ;;  %10446 = vrcp.f32 %v6905_v26 }
 0xb63   : > { %7614 = vst [vmem:[%s10992_s24 + $0x1c8] sm:$0xff] %v8412_v16  ;;  %v10429_v24 = vpop.eup %10428  ;;  %v6906_v2 = vadd.f32 1.0, %v10427_v41 }
 0xb64   : > { %v10431_v19 = vpop.eup %10430  ;;  %10448 = vrcp.f32 %v6907_v33  ;;  %v6908_v15 = vadd.f32 1.0, %v10429_v24 }
 0xb65   : > { %v10433_v46 = vpop.eup %10432  ;;  %10450 = vrcp.f32 %v6906_v2  ;;  %v6909_v39 = vadd.f32 1.0, %v10431_v19 }
 0xb66   : > { %v10435_v42 = vpop.eup %10434  ;;  %10452 = vrcp.f32 %v6908_v15  ;;  %v6911_v51 = vadd.f32 1.0, %v10433_v46 }
 0xb67   : > { %v10437_v12 = vpop.eup %10436  ;;  %10454 = vrcp.f32 %v6909_v39  ;;  %v6910_v48 = vadd.f32 1.0, %v10435_v42 }
 0xb68   : > { %v10439_v14 = vpop.eup %10438  ;;  %10456 = vrcp.f32 %v6911_v51  ;;  %v6912_v38 = vadd.f32 1.0, %v10437_v12 }
 0xb69   : > { %v10441_v8 = vpop.eup %10440  ;;  %10458 = vrcp.f32 %v6910_v48  ;;  %v6913_v27 = vadd.f32 1.0, %v10439_v14 }
 0xb6a   : > { %v10443_v62 = vpop.eup %10442  ;;  %10460 = vrcp.f32 %v6912_v38  ;;  %v6915_v52 = vadd.f32 1.0, %v10441_v8 }
 0xb6b   : > { %v10445_v53 = vpop.eup %10444  ;;  %10462 = vrcp.f32 %v6913_v27  ;;  %v6914_v50 = vadd.f32 1.0, %v10443_v62 }
 0xb6c   : > { %10464 = vrcp.f32 %v6915_v52  ;;  %v6916_v57 = vadd.f32 1.0, %v10445_v53  ;;  %v10447_v0 = vpop.eup %10446 }
 0xb6d   : > { %10466 = vrcp.f32 %v6914_v50 }
 0xb6e   : > { %v10449_v17 = vpop.eup %10448  ;;  %10468 = vrcp.f32 %v6916_v57 }
 0xb6f   : > { %v10451_v31 = vpop.eup %10450 }
 0xb70   : > { %v10453_v10 = vpop.eup %10452  ;;  %v8413_v11 = vpack.c.bf16 %v10451_v31, %v10447_v0 }
 0xb71   : > { %v10455_v34 = vpop.eup %10454  ;;  %v8414_v21 = vpack.c.bf16 %v10453_v10, %v10449_v17 }
 0xb72   : > { %v10457_v40 = vpop.eup %10456  ;;  %7615 = vst [vmem:[%s10992_s24 + $0x1d0] sm:$0xff] %v8413_v11 }
 0xb73   : > { %v10459_v30 = vpop.eup %10458  ;;  %7616 = vst [vmem:[%s10992_s24 + $0x1d8] sm:$0xff] %v8414_v21 }
 0xb74   : > { %v10461_v44 = vpop.eup %10460  ;;  %v8415_v13 = vpack.c.bf16 %v10459_v30, %v10455_v34 }
 0xb75   : > { %v10463_v28 = vpop.eup %10462  ;;  %v8416_v61 = vpack.c.bf16 %v10461_v44, %v10457_v40 }
 0xb76   : > { %v10465_v20 = vpop.eup %10464  ;;  %7617 = vst [vmem:[%s10992_s24 + $0x1e0] sm:$0xff] %v8415_v13 }
 0xb77   : > { %v10467_v22 = vpop.eup %10466  ;;  %7618 = vst [vmem:[%s10992_s24 + $0x1e8] sm:$0xff] %v8416_v61 }
 0xb78   : > { %v10469_v54 = vpop.eup %10468  ;;  %v8417_v56 = vpack.c.bf16 %v10467_v22, %v10463_v28 }
 0xb79   : > { %v8418_v36 = vpack.c.bf16 %v10469_v54, %v10465_v20 }
 0xb7a   : > { %7619 = vst [vmem:[%s10992_s24 + $0x1f0] sm:$0xff] %v8417_v56 }
 0xb7b   : > { %7620 = vst [vmem:[%s10992_s24 + $0x1f8] sm:$0xff] %v8418_v36 }
 0xb7c   : > { %10675 = shalt.err (!%p10672_p6)
}
 0xb7d   : > { %s10676_s24 = scalar_lea.hbm %s11868_s19, 8192  ;;  %s10680_s18 = scalar_lea.hbm %s11934_s7, 16384 }
 0xb7e   : > { %p10677_p9 = scmp.ne.s32.totalorder %s11868_s19, %s10676_s24  ;;  %p10681_p11 = scmp.lt.u32.totalorder %s11868_s19, %s11934_s7 }
 0xb7f   : > { %p10682_p0 = scmp.lt.u32.totalorder %s10680_s18, %s10676_s24  ;;  %p10684_p4 = scmp.lt.u32.totalorder %s10676_s24, %s11868_s19 }
 0xb80   : > { %p10678_p10 = pnand %p10677_p9, %p12037_p7 }
 0xb81   : > { %p10683_p3 = por %p10682_p0, %p10681_p11 }
 0xb82   : > { %p10679_p13 = pneg %p10678_p10 }
 0xb83   : > { %p10685_p8 = por %p10684_p4, %p10683_p3 }
 0xb85   : > { %p10686_p12 = pnand %p10685_p8, %p10679_p13 }
 0xb87   : > { %10689 = shalt.err (!%p10686_p12)
}
 0xb88   : > { %8861 = dma.vmem_to_hbm [thread:$0]  (%p12037_p7), %s11870_s13, 8192, %s11868_s19, %s11874_s23, %s10760_s15, %s10760_s15, %s10761_s26  }
 0xb89   : > { %p12038_p2 = scmp.eq.s32.totalorder %s10822_s28, 1 }
 0xb8b   : > { %10719 = dma.done.wait (%p12038_p2), [#allocation5], 8192   ;;  %p12039_p1 = pmov %p12038_p2 }
 0xb8d   : > { %10721 = vsyncadd (%p12039_p1), [#allocation5], 4294959104  ;;  %p12040_p5 = pmov %p12039_p1 }
 0xb8e   : > { %p12041_p6 = pmov %p12039_p1 }
 0xb8f   : > { %10723 = dma.done.wait (%p12040_p5), [#allocation14], 16384  }
 0xb90   : > { %10725 = vsyncadd (%p12041_p6), [#allocation14], 4294950912 }
 0xb91 PF: > { %p8901_p9 = scmp.ge.s32.totalorder %s10744_s27, 2  ;;  %s12042_s11 = sadd.s32 4294967294, %s10744_s27  }
 0xb92   : > { %s7685_s17 = sand.u32 1, %s12042_s11   ;;  %p12043_p10 = scmp.ne.s32.totalorder %s11951_s12, 0 }
 0xb93   : > { %s7686_s15 = scalar_lea.sflag [#allocation5], %s7685_s17 }
 0xb94   : > { %p8884_p7 = pnand %p8901_p9, %p12043_p10 }
 0xb96   : > { %10727 = dma.done.wait (!%p8884_p7), %s7686_s15, 8192  }
 0xb97   : > { %10729 = vsyncadd (!%p8884_p7), %s7686_s15, 4294959104  ;;  %s12044_s27 = sld [smem:[#allocation23_spill]]  ;;  %s12045_s26 = sld [smem:[#allocation22_spill]] }
 0xb98   : > { %s12046_s13 = sld [smem:[#allocation24_spill]]  ;;  %s12047_s24 = smov %s10736_s25 }
 0xb9d   : > { %p20_p13 = scmp.ge.s32.totalorder %s12044_s27, 4   ;;  %s12048_s25 = smov %s12045_s26 }
 0xb9e   : > { %s12049_s26 = smov %s12046_s13 }
 0xb9f   :  { %22 = sbr.rel (!%p20_p13) target bundleno = 6 (0x6), region = 113 }
 0xba6   :  { %7691 = vsyncpa [#allocation4], 1 }
 0xba7   :  { %7693 = vsyncpa [#allocation4 + $0x1], 1 }
 0xba8   :  { %7694 = vsyncpa [#allocation7], 1 }
 0xba9   :  { %7695 = vsyncpa [#allocation10], 1 }
 0xbaa   :  { %7696 = vsyncpa [#allocation5], 1 }
 0xbab   :  { %7698 = vsyncpa [#allocation5 + $0x1], 1 }
 0xbac   :  { %7699 = vsyncpa [#allocation14], 1 }

</bundles_post_ra>
